<compile_context>
chip_gen: v7x
topology: tpu7x:2x2x1
jax: 0.10.0
libtpu: 0.0.40
codegen_flags: <defaults>
</compile_context>

<pallas_src>
import jax
import jax.numpy as jnp
from jax import lax
from jax.experimental import pallas as pl
from jax.experimental.pallas import tpu as pltpu

INPUT_FEATURES = 3     # input_features in the PyTorch module
FEAT_PAD = 8           # x lane padding (only 3 lanes used)
HIDDEN = 100           # hidden_size
HIDDEN_PAD = 128       # lane-padded hidden size
PROJ = 1               # proj_size (kernel hard-wired to proj_size == 1)
GATE_ORDER = (0, 1, 3, 2)   # slot -> PyTorch gate index; lane packing is [i | f | o | g]


def lstm_kernel(x_ref,                      # (T*Bp, FEAT_PAD)   time-major padded inputs
                wih0_ref, b0_ref,           # (FEAT_PAD, 4Hp), (1, 4Hp)   i/f/o pre-scaled 0.5
                m0_ref, m01_ref, m11_ref,   # (Hp, 4Hp) rank-1 folded recurrent mats (pre-scaled)
                b1_ref,                     # (1, 4Hp)  pre-scaled
                whr1_ref,                   # (1, Hp)
                wlin_ref, blin_ref,         # (T, OUTp), (1, OUTp)
                out_ref,                    # (Bp, OUTp)
                pre0_ref):                  # scratch: (T*Bp, 4Hp)
    TB = x_ref.shape[0]
    T = wlin_ref.shape[0]
    Bp = TB // T
    Hp = whr1_ref.shape[1]
    G4 = 4 * Hp
    OUTp = wlin_ref.shape[1]
    f32 = jnp.float32

    # ---- hoisted layer-0 input projection for ALL timesteps (3 broadcast FMAs, K=3) ----
    pre0_ref[...] = (b0_ref[...]
                     + x_ref[:, 0:1] * wih0_ref[0:1, :]
                     + x_ref[:, 1:2] * wih0_ref[1:2, :]
                     + x_ref[:, 2:3] * wih0_ref[2:3, :])

    # tanh-only activation fixup vectors (loop-invariant, hoisted):
    #   i/f/o lanes: sigmoid(z) = 0.5*tanh(z/2)+0.5 (the /2 is folded into the weights)
    #   g lanes:     tanh(z)
    lane = lax.broadcasted_iota(jnp.int32, (1, G4), 1)
    is_ifo = lane < 3 * Hp
    act_scale = jnp.where(is_ifo, 0.5, 1.0).astype(f32)
    act_offset = jnp.where(is_ifo, 0.5, 0.0).astype(f32)

    def act(gates):
        a = jnp.tanh(gates) * act_scale + act_offset      # one EUP pass over (Bp, 4Hp)
        return a[:, :Hp], a[:, Hp:2 * Hp], a[:, 2 * Hp:3 * Hp], a[:, 3 * Hp:]

    def step(t, carry):
        p1, c1, p2, c2, acc = carry                       # p = o*tanh(c)  (h = p @ whr)

        row = pl.multiple_of(t * Bp, Bp)
        pre0_t = pre0_ref[pl.ds(row, Bp), :]              # (Bp, 4Hp)

        # ---- layer 0: recurrent term h1_{t-1}*W_hh0 == p1 @ M0 (rank-1, on the MXU) ----
        gates0 = pre0_t + jnp.dot(p1, m0_ref[...], preferred_element_type=f32)
        i0, f0, o0, g0 = act(gates0)
        c1 = f0 * c1 + i0 * g0
        p1 = o0 * jnp.tanh(c1)

        # ---- layer 1: h1_t*W_ih1 + h2_{t-1}*W_hh1 == p1@M01 + p2@M11 ----
        gates1 = (jnp.dot(p1, m01_ref[...], preferred_element_type=f32)
                  + jnp.dot(p2, m11_ref[...], preferred_element_type=f32)
                  + b1_ref[...])
        i1, f1, o1, g1 = act(gates1)
        c2 = f1 * c2 + i1 * g1
        p2 = o1 * jnp.tanh(c2)

        # ---- fused final Linear (XLU reduce is off the recurrence critical chain) ----
        h2 = jnp.sum(p2 * whr1_ref[...], axis=1, keepdims=True)   # (Bp, 1)
        acc = acc + h2 * wlin_ref[pl.ds(t, 1), :]                 # (Bp, OUTp)
        return p1, c1, p2, c2, acc

    z = jnp.zeros((Bp, Hp), f32)
    init = (z, z, z, z, jnp.zeros((Bp, OUTp), f32))
    unroll = T if T <= 32 else 8
    _, _, _, _, acc = lax.fori_loop(0, T, step, init, unroll=unroll)

    out_ref[...] = jax.nn.sigmoid(acc + blin_ref[...])


def _round_up(n, m):
    return ((n + m - 1) // m) * m


def init_params(key, input_length, out_length):
    """Deterministic params matching the PyTorch module's shapes/default-init ranges."""
    H, F, P = HIDDEN, INPUT_FEATURES, PROJ
    ks = jax.random.split(key, 12)
    s_lstm = 1.0 / jnp.sqrt(H)
    s_lin = 1.0 / jnp.sqrt(input_length)

    def u(k, shape, bound):
        return jax.random.uniform(k, shape, jnp.float32, -bound, bound)

    return {
        # layer 0 (input_size = F, proj_size = P)
        "w_ih0": u(ks[0], (4 * H, F), s_lstm),
        "w_hh0": u(ks[1], (4 * H, P), s_lstm),
        "b_ih0": u(ks[2], (4 * H,), s_lstm),
        "b_hh0": u(ks[3], (4 * H,), s_lstm),
        "w_hr0": u(ks[4], (P, H), s_lstm),
        # layer 1 (input_size = proj_size = P)
        "w_ih1": u(ks[5], (4 * H, P), s_lstm),
        "w_hh1": u(ks[6], (4 * H, P), s_lstm),
        "b_ih1": u(ks[7], (4 * H,), s_lstm),
        "b_hh1": u(ks[8], (4 * H,), s_lstm),
        "w_hr1": u(ks[9], (P, H), s_lstm),
        # final linear: in_features = input_length (T), out_features = out_length
        "w_lin": u(ks[10], (out_length, input_length), s_lin),
        "b_lin": u(ks[11], (out_length,), s_lin),
    }


def lstm_forward(x, params):
    """x: (B, 3, input_length) float32 -> (B, out_length) float32."""
    B, C, T = x.shape
    assert C == INPUT_FEATURES
    assert PROJ == 1
    H, Hp = HIDDEN, HIDDEN_PAD
    G4 = 4 * Hp
    OUT = params["b_lin"].shape[0]
    Bp = max(8, _round_up(B, 8))
    OUTp = max(128, _round_up(OUT, 128))
    f32 = jnp.float32

    # 0.5 pre-scale of the i/f/o lane blocks (tanh-only activation trick).
    gate_scale = jnp.concatenate(
        [jnp.full((1, 3 * Hp), 0.5, f32), jnp.ones((1, Hp), f32)], axis=1)

    def pack_gate_vec(v):
        # (4H,) -> (1, 4*Hp) with [i | f | o | g] lane packing, zero padded.
        v4 = v.reshape(4, H)
        out = jnp.zeros((1, G4), f32)
        for s, g in enumerate(GATE_ORDER):
            out = out.at[0, s * Hp:s * Hp + H].set(v4[g])
        return out

    def pack_gate_mat(w, in_dim, rows):
        # (4H, in_dim) -> (rows, 4*Hp) transposed + lane-packed, zero padded.
        w4 = w.reshape(4, H, in_dim)
        out = jnp.zeros((rows, G4), f32)
        for s, g in enumerate(GATE_ORDER):
            out = out.at[:in_dim, s * Hp:s * Hp + H].set(jnp.transpose(w4[g]))
        return out

    def pad_row(v, width):
        return jnp.zeros((1, width), f32).at[0, :v.shape[0]].set(v)

    wih0_p = pack_gate_mat(params["w_ih0"], INPUT_FEATURES, FEAT_PAD) * gate_scale
    b0_p = pack_gate_vec(params["b_ih0"] + params["b_hh0"]) * gate_scale
    b1_p = pack_gate_vec(params["b_ih1"] + params["b_hh1"]) * gate_scale

    whh0_row = pack_gate_vec(params["w_hh0"][:, 0])
    wih1_row = pack_gate_vec(params["w_ih1"][:, 0])
    whh1_row = pack_gate_vec(params["w_hh1"][:, 0])
    whr0_col = jnp.zeros((Hp, 1), f32).at[:H, 0].set(params["w_hr0"][0])
    whr1_col = jnp.zeros((Hp, 1), f32).at[:H, 0].set(params["w_hr1"][0])
    whr1_row = pad_row(params["w_hr1"][0], Hp)

    # Rank-1 folds:  h_prev * W_row == (o*tanh(c)) @ (whr^T ⊗ W_row)  -> one MXU matmul/step.
    m0_p = (whr0_col @ whh0_row) * gate_scale
    m01_p = (whr0_col @ wih1_row) * gate_scale
    m11_p = (whr1_col @ whh1_row) * gate_scale

    wlin_p = jnp.zeros((T, OUTp), f32).at[:, :OUT].set(jnp.transpose(params["w_lin"]))
    blin_p = pad_row(params["b_lin"], OUTp)

    # x.permute(0,2,1) -> (B, T, 3); time-major, batch/feature zero-padded, flattened so
    # timestep t occupies sublane-aligned rows [t*Bp, (t+1)*Bp).
    x_tm = jnp.transpose(x.astype(f32), (2, 0, 1))                    # (T, B, 3)
    x_pad = jnp.zeros((T, Bp, FEAT_PAD), f32).at[:, :B, :C].set(x_tm)
    x_flat = x_pad.reshape(T * Bp, FEAT_PAD)

    args = (x_flat, wih0_p, b0_p, m0_p, m01_p, m11_p, b1_p, whr1_row, wlin_p, blin_p)

    out = pl.pallas_call(
        lstm_kernel,
        out_shape=jax.ShapeDtypeStruct((Bp, OUTp), f32),
        in_specs=[pl.BlockSpec(memory_space=pltpu.MemorySpace.VMEM)] * len(args),
        out_specs=pl.BlockSpec(memory_space=pltpu.MemorySpace.VMEM),
        scratch_shapes=[pltpu.VMEM((T * Bp, G4), f32)],
        compiler_params=pltpu.CompilerParams(vmem_limit_bytes=32 * 1024 * 1024),
    )(*args)
    return out[:B, :OUT]


def lstm_reference(x, params):
    """Pure-JAX forward matching the PyTorch module (eval mode, features_only=False)."""
    B, _, T = x.shape
    xt = jnp.transpose(x, (0, 2, 1)).astype(jnp.float32)   # (B, T, 3)

    def cell(inp, h, c, w_ih, w_hh, b_ih, b_hh, w_hr):
        z = inp @ w_ih.T + b_ih + h @ w_hh.T + b_hh         # (B, 4H), PyTorch order [i,f,g,o]
        i, f, g, o = jnp.split(z, 4, axis=1)
        i, f, o = jax.nn.sigmoid(i), jax.nn.sigmoid(f), jax.nn.sigmoid(o)
        g = jnp.tanh(g)
        c = f * c + i * g
        h = (o * jnp.tanh(c)) @ w_hr.T                      # proj_size projection
        return h, c

    h1 = jnp.zeros((B, PROJ)); c1 = jnp.zeros((B, HIDDEN))
    h2 = jnp.zeros((B, PROJ)); c2 = jnp.zeros((B, HIDDEN))
    ys = []
    for t in range(T):
        h1, c1 = cell(xt[:, t], h1, c1, params["w_ih0"], params["w_hh0"],
                      params["b_ih0"], params["b_hh0"], params["w_hr0"])
        h2, c2 = cell(h1, h2, c2, params["w_ih1"], params["w_hh1"],
                      params["b_ih1"], params["b_hh1"], params["w_hr1"])
        ys.append(h2[:, 0])
    y = jnp.stack(ys, axis=1)                               # (B, T) == squeeze(lstm_out, 2)
    return jax.nn.sigmoid(y @ params["w_lin"].T + params["b_lin"])


if __name__ == "__main__":
    # Small, self-consistent shapes: batch=2, channels=3 (fixed by module),
    # input_length (seq) = 16, out_length = 8.
    B, T, OUT = 2, 16, 8
    key = jax.random.PRNGKey(0)
    kx, kp = jax.random.split(key)

    x = jax.random.normal(kx, (B, INPUT_FEATURES, T), dtype=jnp.float32)
    params = init_params(kp, input_length=T, out_length=OUT)

    out = jax.block_until_ready(jax.jit(lstm_forward)(x, params))
    ref = lstm_reference(x, params)

    assert out.shape == (B, OUT)
    assert bool(jnp.all(jnp.isfinite(out)))
    assert bool(jnp.all((out > 0.0) & (out < 1.0)))          # sigmoid range
    # Loose tolerance covers MXU f32 multi-pass precision; structural bugs would be >>1e-1.
    assert bool(jnp.max(jnp.abs(out - ref)) < 2e-2), float(jnp.max(jnp.abs(out - ref)))
    # TODO(synk): self.dropout is defined but unused in the reference forward; not applied.
    print("KERNEL_OK")
</pallas_src>

<mosaic_0001>
module attributes {stable_mosaic.version = 11 : i64} {
  func.func @lstm_kernel(%arg0: memref<128x8xf32, #tpu.memory_space<vmem>>, %arg1: memref<8x512xf32, #tpu.memory_space<vmem>>, %arg2: memref<1x512xf32, #tpu.memory_space<vmem>>, %arg3: memref<128x512xf32, #tpu.memory_space<vmem>>, %arg4: memref<128x512xf32, #tpu.memory_space<vmem>>, %arg5: memref<128x512xf32, #tpu.memory_space<vmem>>, %arg6: memref<1x512xf32, #tpu.memory_space<vmem>>, %arg7: memref<1x128xf32, #tpu.memory_space<vmem>>, %arg8: memref<16x128xf32, #tpu.memory_space<vmem>>, %arg9: memref<1x128xf32, #tpu.memory_space<vmem>>, %arg10: memref<8x128xf32, #tpu.memory_space<vmem>>, %arg11: memref<128x512xf32, #tpu.memory_space<vmem>>) attributes {dimension_semantics = [], scalar_prefetch = 0 : i64, scratch_operands = 1 : i64, tpu.core_type = #tpu.core_type<tc>} {
    %c0 = arith.constant 0 : index
    %c0_0 = arith.constant 0 : index
    %0 = vector.load %arg2[%c0, %c0_0] : memref<1x512xf32, #tpu.memory_space<vmem>>, vector<1x512xf32>
    %c0_1 = arith.constant 0 : index
    %c0_2 = arith.constant 0 : index
    %1 = vector.load %arg0[%c0_1, %c0_2] : memref<128x8xf32, #tpu.memory_space<vmem>>, vector<128x1xf32>
    %c0_3 = arith.constant 0 : index
    %c0_4 = arith.constant 0 : index
    %2 = vector.load %arg1[%c0_3, %c0_4] : memref<8x512xf32, #tpu.memory_space<vmem>>, vector<1x512xf32>
    %3 = vector.broadcast %1 : vector<128x1xf32> to vector<128x512xf32>
    %4 = vector.broadcast %2 : vector<1x512xf32> to vector<128x512xf32>
    %5 = arith.mulf %3, %4 : vector<128x512xf32>
    %6 = vector.broadcast %0 : vector<1x512xf32> to vector<128x512xf32>
    %7 = arith.addf %6, %5 : vector<128x512xf32>
    %c0_5 = arith.constant 0 : index
    %c1 = arith.constant 1 : index
    %8 = vector.load %arg0[%c0_5, %c1] : memref<128x8xf32, #tpu.memory_space<vmem>>, vector<128x1xf32>
    %c1_6 = arith.constant 1 : index
    %c0_7 = arith.constant 0 : index
    %9 = vector.load %arg1[%c1_6, %c0_7] : memref<8x512xf32, #tpu.memory_space<vmem>>, vector<1x512xf32>
    %10 = vector.broadcast %8 : vector<128x1xf32> to vector<128x512xf32>
    %11 = vector.broadcast %9 : vector<1x512xf32> to vector<128x512xf32>
    %12 = arith.mulf %10, %11 : vector<128x512xf32>
    %13 = arith.addf %7, %12 : vector<128x512xf32>
    %c0_8 = arith.constant 0 : index
    %c2 = arith.constant 2 : index
    %14 = vector.load %arg0[%c0_8, %c2] : memref<128x8xf32, #tpu.memory_space<vmem>>, vector<128x1xf32>
    %c2_9 = arith.constant 2 : index
    %c0_10 = arith.constant 0 : index
    %15 = vector.load %arg1[%c2_9, %c0_10] : memref<8x512xf32, #tpu.memory_space<vmem>>, vector<1x512xf32>
    %16 = vector.broadcast %14 : vector<128x1xf32> to vector<128x512xf32>
    %17 = vector.broadcast %15 : vector<1x512xf32> to vector<128x512xf32>
    %18 = arith.mulf %16, %17 : vector<128x512xf32>
    %19 = arith.addf %13, %18 : vector<128x512xf32>
    %c0_11 = arith.constant 0 : index
    %c0_12 = arith.constant 0 : index
    %20 = vector.load %arg11[%c0_11, %c0_12] : memref<128x512xf32, #tpu.memory_space<vmem>>, vector<128x512xf32>
    tpu.vector_store %arg11[%c0_11, %c0_12], %19 {strides = array<i32>} : memref<128x512xf32, #tpu.memory_space<vmem>>, vector<128x512xf32>,
    %21 = tpu.iota {dimensions = array<i32: 1>} : vector<1x512xi32>
    %c384_i32 = arith.constant 384 : i32
    %22 = vector.broadcast %c384_i32 : i32 to vector<1x512xi32>
    %23 = arith.cmpi slt, %21, %22 : vector<1x512xi32>
    %cst = arith.constant 5.000000e-01 : f32
    %cst_13 = arith.constant 1.000000e+00 : f32
    %24 = vector.broadcast %cst : f32 to vector<1x512xf32>
    %25 = vector.broadcast %cst_13 : f32 to vector<1x512xf32>
    %26 = arith.select %23, %24, %25 : vector<1x512xi1>, vector<1x512xf32>
    %cst_14 = arith.constant 5.000000e-01 : f32
    %cst_15 = arith.constant 0.000000e+00 : f32
    %27 = vector.broadcast %cst_14 : f32 to vector<1x512xf32>
    %28 = vector.broadcast %cst_15 : f32 to vector<1x512xf32>
    %29 = arith.select %23, %27, %28 : vector<1x512xi1>, vector<1x512xf32>
    %cst_16 = arith.constant 0.000000e+00 : f32
    %30 = vector.broadcast %cst_16 : f32 to vector<8x128xf32>
    %cst_17 = arith.constant 0.000000e+00 : f32
    %31 = vector.broadcast %cst_17 : f32 to vector<8x128xf32>
    %c0_i32 = arith.constant 0 : i32
    %c8_i32 = arith.constant 8 : i32
    %32 = arith.muli %c0_i32, %c8_i32 : i32
    %33 = tpu.assume_multiple %32, 8 : i32
    %34 = arith.index_cast %33 : i32 to index
    %c0_18 = arith.constant 0 : index
    %35 = vector.load %arg11[%34, %c0_18] : memref<128x512xf32, #tpu.memory_space<vmem>>, vector<8x512xf32>
    %c0_19 = arith.constant 0 : index
    %c0_20 = arith.constant 0 : index
    %36 = vector.load %arg3[%c0_19, %c0_20] : memref<128x512xf32, #tpu.memory_space<vmem>>, vector<128x512xf32>
    %cst_21 = arith.constant dense<0.000000e+00> : vector<8x512xf32>
    %37 = tpu.matmul %30, %36, %cst_21 {dimension_numbers = #tpu.dot_dimension_numbers<[1], [0], [0], [1], [0, 0, 1, 1], [], []>} : vector<8x128xf32>, vector<128x512xf32>, vector<8x512xf32> -> vector<8x512xf32>
    %38 = arith.addf %35, %37 : vector<8x512xf32>
    %39 = math.tanh %38 : vector<8x512xf32>
    %40 = vector.broadcast %26 : vector<1x512xf32> to vector<8x512xf32>
    %41 = arith.mulf %39, %40 : vector<8x512xf32>
    %42 = vector.broadcast %29 : vector<1x512xf32> to vector<8x512xf32>
    %43 = arith.addf %41, %42 : vector<8x512xf32>
    %44 = vector.extract_strided_slice %43 {offsets = [0, 0], sizes = [8, 128], strides = [1, 1]} : vector<8x512xf32> to vector<8x128xf32>
    %45 = vector.extract_strided_slice %43 {offsets = [0, 128], sizes = [8, 128], strides = [1, 1]} : vector<8x512xf32> to vector<8x128xf32>
    %46 = vector.extract_strided_slice %43 {offsets = [0, 256], sizes = [8, 128], strides = [1, 1]} : vector<8x512xf32> to vector<8x128xf32>
    %47 = vector.extract_strided_slice %43 {offsets = [0, 384], sizes = [8, 128], strides = [1, 1]} : vector<8x512xf32> to vector<8x128xf32>
    %48 = arith.mulf %45, %30 : vector<8x128xf32>
    %49 = arith.mulf %44, %47 : vector<8x128xf32>
    %50 = arith.addf %48, %49 : vector<8x128xf32>
    %51 = math.tanh %50 : vector<8x128xf32>
    %52 = arith.mulf %46, %51 : vector<8x128xf32>
    %c0_22 = arith.constant 0 : index
    %c0_23 = arith.constant 0 : index
    %53 = vector.load %arg4[%c0_22, %c0_23] : memref<128x512xf32, #tpu.memory_space<vmem>>, vector<128x512xf32>
    %cst_24 = arith.constant dense<0.000000e+00> : vector<8x512xf32>
    %54 = tpu.matmul %52, %53, %cst_24 {dimension_numbers = #tpu.dot_dimension_numbers<[1], [0], [0], [1], [0, 0, 1, 1], [], []>} : vector<8x128xf32>, vector<128x512xf32>, vector<8x512xf32> -> vector<8x512xf32>
    %c0_25 = arith.constant 0 : index
    %c0_26 = arith.constant 0 : index
    %55 = vector.load %arg5[%c0_25, %c0_26] : memref<128x512xf32, #tpu.memory_space<vmem>>, vector<128x512xf32>
    %cst_27 = arith.constant dense<0.000000e+00> : vector<8x512xf32>
    %56 = tpu.matmul %30, %55, %cst_27 {dimension_numbers = #tpu.dot_dimension_numbers<[1], [0], [0], [1], [0, 0, 1, 1], [], []>} : vector<8x128xf32>, vector<128x512xf32>, vector<8x512xf32> -> vector<8x512xf32>
    %57 = arith.addf %54, %56 : vector<8x512xf32>
    %c0_28 = arith.constant 0 : index
    %c0_29 = arith.constant 0 : index
    %58 = vector.load %arg6[%c0_28, %c0_29] : memref<1x512xf32, #tpu.memory_space<vmem>>, vector<1x512xf32>
    %59 = vector.broadcast %58 : vector<1x512xf32> to vector<8x512xf32>
    %60 = arith.addf %57, %59 : vector<8x512xf32>
    %61 = math.tanh %60 : vector<8x512xf32>
    %62 = vector.broadcast %26 : vector<1x512xf32> to vector<8x512xf32>
    %63 = arith.mulf %61, %62 : vector<8x512xf32>
    %64 = vector.broadcast %29 : vector<1x512xf32> to vector<8x512xf32>
    %65 = arith.addf %63, %64 : vector<8x512xf32>
    %66 = vector.extract_strided_slice %65 {offsets = [0, 0], sizes = [8, 128], strides = [1, 1]} : vector<8x512xf32> to vector<8x128xf32>
    %67 = vector.extract_strided_slice %65 {offsets = [0, 128], sizes = [8, 128], strides = [1, 1]} : vector<8x512xf32> to vector<8x128xf32>
    %68 = vector.extract_strided_slice %65 {offsets = [0, 256], sizes = [8, 128], strides = [1, 1]} : vector<8x512xf32> to vector<8x128xf32>
    %69 = vector.extract_strided_slice %65 {offsets = [0, 384], sizes = [8, 128], strides = [1, 1]} : vector<8x512xf32> to vector<8x128xf32>
    %70 = arith.mulf %67, %30 : vector<8x128xf32>
    %71 = arith.mulf %66, %69 : vector<8x128xf32>
    %72 = arith.addf %70, %71 : vector<8x128xf32>
    %73 = math.tanh %72 : vector<8x128xf32>
    %74 = arith.mulf %68, %73 : vector<8x128xf32>
    %c0_30 = arith.constant 0 : index
    %c0_31 = arith.constant 0 : index
    %75 = vector.load %arg7[%c0_30, %c0_31] : memref<1x128xf32, #tpu.memory_space<vmem>>, vector<1x128xf32>
    %76 = vector.broadcast %75 : vector<1x128xf32> to vector<8x128xf32>
    %77 = arith.mulf %74, %76 : vector<8x128xf32>
    %cst_32 = arith.constant dense<0.000000e+00> : vector<8xf32>
    %78 = vector.multi_reduction <add>, %77, %cst_32 [1] : vector<8x128xf32> to vector<8xf32>
    %79 = vector.shape_cast %78 : vector<8xf32> to vector<8x1xf32>
    %80 = arith.index_cast %c0_i32 : i32 to index
    %c0_33 = arith.constant 0 : index
    %81 = vector.load %arg8[%80, %c0_33] : memref<16x128xf32, #tpu.memory_space<vmem>>, vector<1x128xf32>
    %82 = vector.broadcast %79 : vector<8x1xf32> to vector<8x128xf32>
    %83 = vector.broadcast %81 : vector<1x128xf32> to vector<8x128xf32>
    %84 = arith.mulf %82, %83 : vector<8x128xf32>
    %85 = arith.addf %31, %84 : vector<8x128xf32>
    %c1_i32 = arith.constant 1 : i32
    %c8_i32_34 = arith.constant 8 : i32
    %86 = arith.muli %c1_i32, %c8_i32_34 : i32
    %87 = tpu.assume_multiple %86, 8 : i32
    %88 = arith.index_cast %87 : i32 to index
    %c0_35 = arith.constant 0 : index
    %89 = vector.load %arg11[%88, %c0_35] : memref<128x512xf32, #tpu.memory_space<vmem>>, vector<8x512xf32>
    %c0_36 = arith.constant 0 : index
    %c0_37 = arith.constant 0 : index
    %90 = vector.load %arg3[%c0_36, %c0_37] : memref<128x512xf32, #tpu.memory_space<vmem>>, vector<128x512xf32>
    %cst_38 = arith.constant dense<0.000000e+00> : vector<8x512xf32>
    %91 = tpu.matmul %52, %90, %cst_38 {dimension_numbers = #tpu.dot_dimension_numbers<[1], [0], [0], [1], [0, 0, 1, 1], [], []>} : vector<8x128xf32>, vector<128x512xf32>, vector<8x512xf32> -> vector<8x512xf32>
    %92 = arith.addf %89, %91 : vector<8x512xf32>
    %93 = math.tanh %92 : vector<8x512xf32>
    %94 = vector.broadcast %26 : vector<1x512xf32> to vector<8x512xf32>
    %95 = arith.mulf %93, %94 : vector<8x512xf32>
    %96 = vector.broadcast %29 : vector<1x512xf32> to vector<8x512xf32>
    %97 = arith.addf %95, %96 : vector<8x512xf32>
    %98 = vector.extract_strided_slice %97 {offsets = [0, 0], sizes = [8, 128], strides = [1, 1]} : vector<8x512xf32> to vector<8x128xf32>
    %99 = vector.extract_strided_slice %97 {offsets = [0, 128], sizes = [8, 128], strides = [1, 1]} : vector<8x512xf32> to vector<8x128xf32>
    %100 = vector.extract_strided_slice %97 {offsets = [0, 256], sizes = [8, 128], strides = [1, 1]} : vector<8x512xf32> to vector<8x128xf32>
    %101 = vector.extract_strided_slice %97 {offsets = [0, 384], sizes = [8, 128], strides = [1, 1]} : vector<8x512xf32> to vector<8x128xf32>
    %102 = arith.mulf %99, %50 : vector<8x128xf32>
    %103 = arith.mulf %98, %101 : vector<8x128xf32>
    %104 = arith.addf %102, %103 : vector<8x128xf32>
    %105 = math.tanh %104 : vector<8x128xf32>
    %106 = arith.mulf %100, %105 : vector<8x128xf32>
    %c0_39 = arith.constant 0 : index
    %c0_40 = arith.constant 0 : index
    %107 = vector.load %arg4[%c0_39, %c0_40] : memref<128x512xf32, #tpu.memory_space<vmem>>, vector<128x512xf32>
    %cst_41 = arith.constant dense<0.000000e+00> : vector<8x512xf32>
    %108 = tpu.matmul %106, %107, %cst_41 {dimension_numbers = #tpu.dot_dimension_numbers<[1], [0], [0], [1], [0, 0, 1, 1], [], []>} : vector<8x128xf32>, vector<128x512xf32>, vector<8x512xf32> -> vector<8x512xf32>
    %c0_42 = arith.constant 0 : index
    %c0_43 = arith.constant 0 : index
    %109 = vector.load %arg5[%c0_42, %c0_43] : memref<128x512xf32, #tpu.memory_space<vmem>>, vector<128x512xf32>
    %cst_44 = arith.constant dense<0.000000e+00> : vector<8x512xf32>
    %110 = tpu.matmul %74, %109, %cst_44 {dimension_numbers = #tpu.dot_dimension_numbers<[1], [0], [0], [1], [0, 0, 1, 1], [], []>} : vector<8x128xf32>, vector<128x512xf32>, vector<8x512xf32> -> vector<8x512xf32>
    %111 = arith.addf %108, %110 : vector<8x512xf32>
    %c0_45 = arith.constant 0 : index
    %c0_46 = arith.constant 0 : index
    %112 = vector.load %arg6[%c0_45, %c0_46] : memref<1x512xf32, #tpu.memory_space<vmem>>, vector<1x512xf32>
    %113 = vector.broadcast %112 : vector<1x512xf32> to vector<8x512xf32>
    %114 = arith.addf %111, %113 : vector<8x512xf32>
    %115 = math.tanh %114 : vector<8x512xf32>
    %116 = vector.broadcast %26 : vector<1x512xf32> to vector<8x512xf32>
    %117 = arith.mulf %115, %116 : vector<8x512xf32>
    %118 = vector.broadcast %29 : vector<1x512xf32> to vector<8x512xf32>
    %119 = arith.addf %117, %118 : vector<8x512xf32>
    %120 = vector.extract_strided_slice %119 {offsets = [0, 0], sizes = [8, 128], strides = [1, 1]} : vector<8x512xf32> to vector<8x128xf32>
    %121 = vector.extract_strided_slice %119 {offsets = [0, 128], sizes = [8, 128], strides = [1, 1]} : vector<8x512xf32> to vector<8x128xf32>
    %122 = vector.extract_strided_slice %119 {offsets = [0, 256], sizes = [8, 128], strides = [1, 1]} : vector<8x512xf32> to vector<8x128xf32>
    %123 = vector.extract_strided_slice %119 {offsets = [0, 384], sizes = [8, 128], strides = [1, 1]} : vector<8x512xf32> to vector<8x128xf32>
    %124 = arith.mulf %121, %72 : vector<8x128xf32>
    %125 = arith.mulf %120, %123 : vector<8x128xf32>
    %126 = arith.addf %124, %125 : vector<8x128xf32>
    %127 = math.tanh %126 : vector<8x128xf32>
    %128 = arith.mulf %122, %127 : vector<8x128xf32>
    %c0_47 = arith.constant 0 : index
    %c0_48 = arith.constant 0 : index
    %129 = vector.load %arg7[%c0_47, %c0_48] : memref<1x128xf32, #tpu.memory_space<vmem>>, vector<1x128xf32>
    %130 = vector.broadcast %129 : vector<1x128xf32> to vector<8x128xf32>
    %131 = arith.mulf %128, %130 : vector<8x128xf32>
    %cst_49 = arith.constant dense<0.000000e+00> : vector<8xf32>
    %132 = vector.multi_reduction <add>, %131, %cst_49 [1] : vector<8x128xf32> to vector<8xf32>
    %133 = vector.shape_cast %132 : vector<8xf32> to vector<8x1xf32>
    %134 = arith.index_cast %c1_i32 : i32 to index
    %c0_50 = arith.constant 0 : index
    %135 = vector.load %arg8[%134, %c0_50] : memref<16x128xf32, #tpu.memory_space<vmem>>, vector<1x128xf32>
    %136 = vector.broadcast %133 : vector<8x1xf32> to vector<8x128xf32>
    %137 = vector.broadcast %135 : vector<1x128xf32> to vector<8x128xf32>
    %138 = arith.mulf %136, %137 : vector<8x128xf32>
    %139 = arith.addf %85, %138 : vector<8x128xf32>
    %c2_i32 = arith.constant 2 : i32
    %c8_i32_51 = arith.constant 8 : i32
    %140 = arith.muli %c2_i32, %c8_i32_51 : i32
    %141 = tpu.assume_multiple %140, 8 : i32
    %142 = arith.index_cast %141 : i32 to index
    %c0_52 = arith.constant 0 : index
    %143 = vector.load %arg11[%142, %c0_52] : memref<128x512xf32, #tpu.memory_space<vmem>>, vector<8x512xf32>
    %c0_53 = arith.constant 0 : index
    %c0_54 = arith.constant 0 : index
    %144 = vector.load %arg3[%c0_53, %c0_54] : memref<128x512xf32, #tpu.memory_space<vmem>>, vector<128x512xf32>
    %cst_55 = arith.constant dense<0.000000e+00> : vector<8x512xf32>
    %145 = tpu.matmul %106, %144, %cst_55 {dimension_numbers = #tpu.dot_dimension_numbers<[1], [0], [0], [1], [0, 0, 1, 1], [], []>} : vector<8x128xf32>, vector<128x512xf32>, vector<8x512xf32> -> vector<8x512xf32>
    %146 = arith.addf %143, %145 : vector<8x512xf32>
    %147 = math.tanh %146 : vector<8x512xf32>
    %148 = vector.broadcast %26 : vector<1x512xf32> to vector<8x512xf32>
    %149 = arith.mulf %147, %148 : vector<8x512xf32>
    %150 = vector.broadcast %29 : vector<1x512xf32> to vector<8x512xf32>
    %151 = arith.addf %149, %150 : vector<8x512xf32>
    %152 = vector.extract_strided_slice %151 {offsets = [0, 0], sizes = [8, 128], strides = [1, 1]} : vector<8x512xf32> to vector<8x128xf32>
    %153 = vector.extract_strided_slice %151 {offsets = [0, 128], sizes = [8, 128], strides = [1, 1]} : vector<8x512xf32> to vector<8x128xf32>
    %154 = vector.extract_strided_slice %151 {offsets = [0, 256], sizes = [8, 128], strides = [1, 1]} : vector<8x512xf32> to vector<8x128xf32>
    %155 = vector.extract_strided_slice %151 {offsets = [0, 384], sizes = [8, 128], strides = [1, 1]} : vector<8x512xf32> to vector<8x128xf32>
    %156 = arith.mulf %153, %104 : vector<8x128xf32>
    %157 = arith.mulf %152, %155 : vector<8x128xf32>
    %158 = arith.addf %156, %157 : vector<8x128xf32>
    %159 = math.tanh %158 : vector<8x128xf32>
    %160 = arith.mulf %154, %159 : vector<8x128xf32>
    %c0_56 = arith.constant 0 : index
    %c0_57 = arith.constant 0 : index
    %161 = vector.load %arg4[%c0_56, %c0_57] : memref<128x512xf32, #tpu.memory_space<vmem>>, vector<128x512xf32>
    %cst_58 = arith.constant dense<0.000000e+00> : vector<8x512xf32>
    %162 = tpu.matmul %160, %161, %cst_58 {dimension_numbers = #tpu.dot_dimension_numbers<[1], [0], [0], [1], [0, 0, 1, 1], [], []>} : vector<8x128xf32>, vector<128x512xf32>, vector<8x512xf32> -> vector<8x512xf32>
    %c0_59 = arith.constant 0 : index
    %c0_60 = arith.constant 0 : index
    %163 = vector.load %arg5[%c0_59, %c0_60] : memref<128x512xf32, #tpu.memory_space<vmem>>, vector<128x512xf32>
    %cst_61 = arith.constant dense<0.000000e+00> : vector<8x512xf32>
    %164 = tpu.matmul %128, %163, %cst_61 {dimension_numbers = #tpu.dot_dimension_numbers<[1], [0], [0], [1], [0, 0, 1, 1], [], []>} : vector<8x128xf32>, vector<128x512xf32>, vector<8x512xf32> -> vector<8x512xf32>
    %165 = arith.addf %162, %164 : vector<8x512xf32>
    %c0_62 = arith.constant 0 : index
    %c0_63 = arith.constant 0 : index
    %166 = vector.load %arg6[%c0_62, %c0_63] : memref<1x512xf32, #tpu.memory_space<vmem>>, vector<1x512xf32>
    %167 = vector.broadcast %166 : vector<1x512xf32> to vector<8x512xf32>
    %168 = arith.addf %165, %167 : vector<8x512xf32>
    %169 = math.tanh %168 : vector<8x512xf32>
    %170 = vector.broadcast %26 : vector<1x512xf32> to vector<8x512xf32>
    %171 = arith.mulf %169, %170 : vector<8x512xf32>
    %172 = vector.broadcast %29 : vector<1x512xf32> to vector<8x512xf32>
    %173 = arith.addf %171, %172 : vector<8x512xf32>
    %174 = vector.extract_strided_slice %173 {offsets = [0, 0], sizes = [8, 128], strides = [1, 1]} : vector<8x512xf32> to vector<8x128xf32>
    %175 = vector.extract_strided_slice %173 {offsets = [0, 128], sizes = [8, 128], strides = [1, 1]} : vector<8x512xf32> to vector<8x128xf32>
    %176 = vector.extract_strided_slice %173 {offsets = [0, 256], sizes = [8, 128], strides = [1, 1]} : vector<8x512xf32> to vector<8x128xf32>
    %177 = vector.extract_strided_slice %173 {offsets = [0, 384], sizes = [8, 128], strides = [1, 1]} : vector<8x512xf32> to vector<8x128xf32>
    %178 = arith.mulf %175, %126 : vector<8x128xf32>
    %179 = arith.mulf %174, %177 : vector<8x128xf32>
    %180 = arith.addf %178, %179 : vector<8x128xf32>
    %181 = math.tanh %180 : vector<8x128xf32>
    %182 = arith.mulf %176, %181 : vector<8x128xf32>
    %c0_64 = arith.constant 0 : index
    %c0_65 = arith.constant 0 : index
    %183 = vector.load %arg7[%c0_64, %c0_65] : memref<1x128xf32, #tpu.memory_space<vmem>>, vector<1x128xf32>
    %184 = vector.broadcast %183 : vector<1x128xf32> to vector<8x128xf32>
    %185 = arith.mulf %182, %184 : vector<8x128xf32>
    %cst_66 = arith.constant dense<0.000000e+00> : vector<8xf32>
    %186 = vector.multi_reduction <add>, %185, %cst_66 [1] : vector<8x128xf32> to vector<8xf32>
    %187 = vector.shape_cast %186 : vector<8xf32> to vector<8x1xf32>
    %188 = arith.index_cast %c2_i32 : i32 to index
    %c0_67 = arith.constant 0 : index
    %189 = vector.load %arg8[%188, %c0_67] : memref<16x128xf32, #tpu.memory_space<vmem>>, vector<1x128xf32>
    %190 = vector.broadcast %187 : vector<8x1xf32> to vector<8x128xf32>
    %191 = vector.broadcast %189 : vector<1x128xf32> to vector<8x128xf32>
    %192 = arith.mulf %190, %191 : vector<8x128xf32>
    %193 = arith.addf %139, %192 : vector<8x128xf32>
    %c3_i32 = arith.constant 3 : i32
    %c8_i32_68 = arith.constant 8 : i32
    %194 = arith.muli %c3_i32, %c8_i32_68 : i32
    %195 = tpu.assume_multiple %194, 8 : i32
    %196 = arith.index_cast %195 : i32 to index
    %c0_69 = arith.constant 0 : index
    %197 = vector.load %arg11[%196, %c0_69] : memref<128x512xf32, #tpu.memory_space<vmem>>, vector<8x512xf32>
    %c0_70 = arith.constant 0 : index
    %c0_71 = arith.constant 0 : index
    %198 = vector.load %arg3[%c0_70, %c0_71] : memref<128x512xf32, #tpu.memory_space<vmem>>, vector<128x512xf32>
    %cst_72 = arith.constant dense<0.000000e+00> : vector<8x512xf32>
    %199 = tpu.matmul %160, %198, %cst_72 {dimension_numbers = #tpu.dot_dimension_numbers<[1], [0], [0], [1], [0, 0, 1, 1], [], []>} : vector<8x128xf32>, vector<128x512xf32>, vector<8x512xf32> -> vector<8x512xf32>
    %200 = arith.addf %197, %199 : vector<8x512xf32>
    %201 = math.tanh %200 : vector<8x512xf32>
    %202 = vector.broadcast %26 : vector<1x512xf32> to vector<8x512xf32>
    %203 = arith.mulf %201, %202 : vector<8x512xf32>
    %204 = vector.broadcast %29 : vector<1x512xf32> to vector<8x512xf32>
    %205 = arith.addf %203, %204 : vector<8x512xf32>
    %206 = vector.extract_strided_slice %205 {offsets = [0, 0], sizes = [8, 128], strides = [1, 1]} : vector<8x512xf32> to vector<8x128xf32>
    %207 = vector.extract_strided_slice %205 {offsets = [0, 128], sizes = [8, 128], strides = [1, 1]} : vector<8x512xf32> to vector<8x128xf32>
    %208 = vector.extract_strided_slice %205 {offsets = [0, 256], sizes = [8, 128], strides = [1, 1]} : vector<8x512xf32> to vector<8x128xf32>
    %209 = vector.extract_strided_slice %205 {offsets = [0, 384], sizes = [8, 128], strides = [1, 1]} : vector<8x512xf32> to vector<8x128xf32>
    %210 = arith.mulf %207, %158 : vector<8x128xf32>
    %211 = arith.mulf %206, %209 : vector<8x128xf32>
    %212 = arith.addf %210, %211 : vector<8x128xf32>
    %213 = math.tanh %212 : vector<8x128xf32>
    %214 = arith.mulf %208, %213 : vector<8x128xf32>
    %c0_73 = arith.constant 0 : index
    %c0_74 = arith.constant 0 : index
    %215 = vector.load %arg4[%c0_73, %c0_74] : memref<128x512xf32, #tpu.memory_space<vmem>>, vector<128x512xf32>
    %cst_75 = arith.constant dense<0.000000e+00> : vector<8x512xf32>
    %216 = tpu.matmul %214, %215, %cst_75 {dimension_numbers = #tpu.dot_dimension_numbers<[1], [0], [0], [1], [0, 0, 1, 1], [], []>} : vector<8x128xf32>, vector<128x512xf32>, vector<8x512xf32> -> vector<8x512xf32>
    %c0_76 = arith.constant 0 : index
    %c0_77 = arith.constant 0 : index
    %217 = vector.load %arg5[%c0_76, %c0_77] : memref<128x512xf32, #tpu.memory_space<vmem>>, vector<128x512xf32>
    %cst_78 = arith.constant dense<0.000000e+00> : vector<8x512xf32>
    %218 = tpu.matmul %182, %217, %cst_78 {dimension_numbers = #tpu.dot_dimension_numbers<[1], [0], [0], [1], [0, 0, 1, 1], [], []>} : vector<8x128xf32>, vector<128x512xf32>, vector<8x512xf32> -> vector<8x512xf32>
    %219 = arith.addf %216, %218 : vector<8x512xf32>
    %c0_79 = arith.constant 0 : index
    %c0_80 = arith.constant 0 : index
    %220 = vector.load %arg6[%c0_79, %c0_80] : memref<1x512xf32, #tpu.memory_space<vmem>>, vector<1x512xf32>
    %221 = vector.broadcast %220 : vector<1x512xf32> to vector<8x512xf32>
    %222 = arith.addf %219, %221 : vector<8x512xf32>
    %223 = math.tanh %222 : vector<8x512xf32>
    %224 = vector.broadcast %26 : vector<1x512xf32> to vector<8x512xf32>
    %225 = arith.mulf %223, %224 : vector<8x512xf32>
    %226 = vector.broadcast %29 : vector<1x512xf32> to vector<8x512xf32>
    %227 = arith.addf %225, %226 : vector<8x512xf32>
    %228 = vector.extract_strided_slice %227 {offsets = [0, 0], sizes = [8, 128], strides = [1, 1]} : vector<8x512xf32> to vector<8x128xf32>
    %229 = vector.extract_strided_slice %227 {offsets = [0, 128], sizes = [8, 128], strides = [1, 1]} : vector<8x512xf32> to vector<8x128xf32>
    %230 = vector.extract_strided_slice %227 {offsets = [0, 256], sizes = [8, 128], strides = [1, 1]} : vector<8x512xf32> to vector<8x128xf32>
    %231 = vector.extract_strided_slice %227 {offsets = [0, 384], sizes = [8, 128], strides = [1, 1]} : vector<8x512xf32> to vector<8x128xf32>
    %232 = arith.mulf %229, %180 : vector<8x128xf32>
    %233 = arith.mulf %228, %231 : vector<8x128xf32>
    %234 = arith.addf %232, %233 : vector<8x128xf32>
    %235 = math.tanh %234 : vector<8x128xf32>
    %236 = arith.mulf %230, %235 : vector<8x128xf32>
    %c0_81 = arith.constant 0 : index
    %c0_82 = arith.constant 0 : index
    %237 = vector.load %arg7[%c0_81, %c0_82] : memref<1x128xf32, #tpu.memory_space<vmem>>, vector<1x128xf32>
    %238 = vector.broadcast %237 : vector<1x128xf32> to vector<8x128xf32>
    %239 = arith.mulf %236, %238 : vector<8x128xf32>
    %cst_83 = arith.constant dense<0.000000e+00> : vector<8xf32>
    %240 = vector.multi_reduction <add>, %239, %cst_83 [1] : vector<8x128xf32> to vector<8xf32>
    %241 = vector.shape_cast %240 : vector<8xf32> to vector<8x1xf32>
    %242 = arith.index_cast %c3_i32 : i32 to index
    %c0_84 = arith.constant 0 : index
    %243 = vector.load %arg8[%242, %c0_84] : memref<16x128xf32, #tpu.memory_space<vmem>>, vector<1x128xf32>
    %244 = vector.broadcast %241 : vector<8x1xf32> to vector<8x128xf32>
    %245 = vector.broadcast %243 : vector<1x128xf32> to vector<8x128xf32>
    %246 = arith.mulf %244, %245 : vector<8x128xf32>
    %247 = arith.addf %193, %246 : vector<8x128xf32>
    %c4_i32 = arith.constant 4 : i32
    %c8_i32_85 = arith.constant 8 : i32
    %248 = arith.muli %c4_i32, %c8_i32_85 : i32
    %249 = tpu.assume_multiple %248, 8 : i32
    %250 = arith.index_cast %249 : i32 to index
    %c0_86 = arith.constant 0 : index
    %251 = vector.load %arg11[%250, %c0_86] : memref<128x512xf32, #tpu.memory_space<vmem>>, vector<8x512xf32>
    %c0_87 = arith.constant 0 : index
    %c0_88 = arith.constant 0 : index
    %252 = vector.load %arg3[%c0_87, %c0_88] : memref<128x512xf32, #tpu.memory_space<vmem>>, vector<128x512xf32>
    %cst_89 = arith.constant dense<0.000000e+00> : vector<8x512xf32>
    %253 = tpu.matmul %214, %252, %cst_89 {dimension_numbers = #tpu.dot_dimension_numbers<[1], [0], [0], [1], [0, 0, 1, 1], [], []>} : vector<8x128xf32>, vector<128x512xf32>, vector<8x512xf32> -> vector<8x512xf32>
    %254 = arith.addf %251, %253 : vector<8x512xf32>
    %255 = math.tanh %254 : vector<8x512xf32>
    %256 = vector.broadcast %26 : vector<1x512xf32> to vector<8x512xf32>
    %257 = arith.mulf %255, %256 : vector<8x512xf32>
    %258 = vector.broadcast %29 : vector<1x512xf32> to vector<8x512xf32>
    %259 = arith.addf %257, %258 : vector<8x512xf32>
    %260 = vector.extract_strided_slice %259 {offsets = [0, 0], sizes = [8, 128], strides = [1, 1]} : vector<8x512xf32> to vector<8x128xf32>
    %261 = vector.extract_strided_slice %259 {offsets = [0, 128], sizes = [8, 128], strides = [1, 1]} : vector<8x512xf32> to vector<8x128xf32>
    %262 = vector.extract_strided_slice %259 {offsets = [0, 256], sizes = [8, 128], strides = [1, 1]} : vector<8x512xf32> to vector<8x128xf32>
    %263 = vector.extract_strided_slice %259 {offsets = [0, 384], sizes = [8, 128], strides = [1, 1]} : vector<8x512xf32> to vector<8x128xf32>
    %264 = arith.mulf %261, %212 : vector<8x128xf32>
    %265 = arith.mulf %260, %263 : vector<8x128xf32>
    %266 = arith.addf %264, %265 : vector<8x128xf32>
    %267 = math.tanh %266 : vector<8x128xf32>
    %268 = arith.mulf %262, %267 : vector<8x128xf32>
    %c0_90 = arith.constant 0 : index
    %c0_91 = arith.constant 0 : index
    %269 = vector.load %arg4[%c0_90, %c0_91] : memref<128x512xf32, #tpu.memory_space<vmem>>, vector<128x512xf32>
    %cst_92 = arith.constant dense<0.000000e+00> : vector<8x512xf32>
    %270 = tpu.matmul %268, %269, %cst_92 {dimension_numbers = #tpu.dot_dimension_numbers<[1], [0], [0], [1], [0, 0, 1, 1], [], []>} : vector<8x128xf32>, vector<128x512xf32>, vector<8x512xf32> -> vector<8x512xf32>
    %c0_93 = arith.constant 0 : index
    %c0_94 = arith.constant 0 : index
    %271 = vector.load %arg5[%c0_93, %c0_94] : memref<128x512xf32, #tpu.memory_space<vmem>>, vector<128x512xf32>
    %cst_95 = arith.constant dense<0.000000e+00> : vector<8x512xf32>
    %272 = tpu.matmul %236, %271, %cst_95 {dimension_numbers = #tpu.dot_dimension_numbers<[1], [0], [0], [1], [0, 0, 1, 1], [], []>} : vector<8x128xf32>, vector<128x512xf32>, vector<8x512xf32> -> vector<8x512xf32>
    %273 = arith.addf %270, %272 : vector<8x512xf32>
    %c0_96 = arith.constant 0 : index
    %c0_97 = arith.constant 0 : index
    %274 = vector.load %arg6[%c0_96, %c0_97] : memref<1x512xf32, #tpu.memory_space<vmem>>, vector<1x512xf32>
    %275 = vector.broadcast %274 : vector<1x512xf32> to vector<8x512xf32>
    %276 = arith.addf %273, %275 : vector<8x512xf32>
    %277 = math.tanh %276 : vector<8x512xf32>
    %278 = vector.broadcast %26 : vector<1x512xf32> to vector<8x512xf32>
    %279 = arith.mulf %277, %278 : vector<8x512xf32>
    %280 = vector.broadcast %29 : vector<1x512xf32> to vector<8x512xf32>
    %281 = arith.addf %279, %280 : vector<8x512xf32>
    %282 = vector.extract_strided_slice %281 {offsets = [0, 0], sizes = [8, 128], strides = [1, 1]} : vector<8x512xf32> to vector<8x128xf32>
    %283 = vector.extract_strided_slice %281 {offsets = [0, 128], sizes = [8, 128], strides = [1, 1]} : vector<8x512xf32> to vector<8x128xf32>
    %284 = vector.extract_strided_slice %281 {offsets = [0, 256], sizes = [8, 128], strides = [1, 1]} : vector<8x512xf32> to vector<8x128xf32>
    %285 = vector.extract_strided_slice %281 {offsets = [0, 384], sizes = [8, 128], strides = [1, 1]} : vector<8x512xf32> to vector<8x128xf32>
    %286 = arith.mulf %283, %234 : vector<8x128xf32>
    %287 = arith.mulf %282, %285 : vector<8x128xf32>
    %288 = arith.addf %286, %287 : vector<8x128xf32>
    %289 = math.tanh %288 : vector<8x128xf32>
    %290 = arith.mulf %284, %289 : vector<8x128xf32>
    %c0_98 = arith.constant 0 : index
    %c0_99 = arith.constant 0 : index
    %291 = vector.load %arg7[%c0_98, %c0_99] : memref<1x128xf32, #tpu.memory_space<vmem>>, vector<1x128xf32>
    %292 = vector.broadcast %291 : vector<1x128xf32> to vector<8x128xf32>
    %293 = arith.mulf %290, %292 : vector<8x128xf32>
    %cst_100 = arith.constant dense<0.000000e+00> : vector<8xf32>
    %294 = vector.multi_reduction <add>, %293, %cst_100 [1] : vector<8x128xf32> to vector<8xf32>
    %295 = vector.shape_cast %294 : vector<8xf32> to vector<8x1xf32>
    %296 = arith.index_cast %c4_i32 : i32 to index
    %c0_101 = arith.constant 0 : index
    %297 = vector.load %arg8[%296, %c0_101] : memref<16x128xf32, #tpu.memory_space<vmem>>, vector<1x128xf32>
    %298 = vector.broadcast %295 : vector<8x1xf32> to vector<8x128xf32>
    %299 = vector.broadcast %297 : vector<1x128xf32> to vector<8x128xf32>
    %300 = arith.mulf %298, %299 : vector<8x128xf32>
    %301 = arith.addf %247, %300 : vector<8x128xf32>
    %c5_i32 = arith.constant 5 : i32
    %c8_i32_102 = arith.constant 8 : i32
    %302 = arith.muli %c5_i32, %c8_i32_102 : i32
    %303 = tpu.assume_multiple %302, 8 : i32
    %304 = arith.index_cast %303 : i32 to index
    %c0_103 = arith.constant 0 : index
    %305 = vector.load %arg11[%304, %c0_103] : memref<128x512xf32, #tpu.memory_space<vmem>>, vector<8x512xf32>
    %c0_104 = arith.constant 0 : index
    %c0_105 = arith.constant 0 : index
    %306 = vector.load %arg3[%c0_104, %c0_105] : memref<128x512xf32, #tpu.memory_space<vmem>>, vector<128x512xf32>
    %cst_106 = arith.constant dense<0.000000e+00> : vector<8x512xf32>
    %307 = tpu.matmul %268, %306, %cst_106 {dimension_numbers = #tpu.dot_dimension_numbers<[1], [0], [0], [1], [0, 0, 1, 1], [], []>} : vector<8x128xf32>, vector<128x512xf32>, vector<8x512xf32> -> vector<8x512xf32>
    %308 = arith.addf %305, %307 : vector<8x512xf32>
    %309 = math.tanh %308 : vector<8x512xf32>
    %310 = vector.broadcast %26 : vector<1x512xf32> to vector<8x512xf32>
    %311 = arith.mulf %309, %310 : vector<8x512xf32>
    %312 = vector.broadcast %29 : vector<1x512xf32> to vector<8x512xf32>
    %313 = arith.addf %311, %312 : vector<8x512xf32>
    %314 = vector.extract_strided_slice %313 {offsets = [0, 0], sizes = [8, 128], strides = [1, 1]} : vector<8x512xf32> to vector<8x128xf32>
    %315 = vector.extract_strided_slice %313 {offsets = [0, 128], sizes = [8, 128], strides = [1, 1]} : vector<8x512xf32> to vector<8x128xf32>
    %316 = vector.extract_strided_slice %313 {offsets = [0, 256], sizes = [8, 128], strides = [1, 1]} : vector<8x512xf32> to vector<8x128xf32>
    %317 = vector.extract_strided_slice %313 {offsets = [0, 384], sizes = [8, 128], strides = [1, 1]} : vector<8x512xf32> to vector<8x128xf32>
    %318 = arith.mulf %315, %266 : vector<8x128xf32>
    %319 = arith.mulf %314, %317 : vector<8x128xf32>
    %320 = arith.addf %318, %319 : vector<8x128xf32>
    %321 = math.tanh %320 : vector<8x128xf32>
    %322 = arith.mulf %316, %321 : vector<8x128xf32>
    %c0_107 = arith.constant 0 : index
    %c0_108 = arith.constant 0 : index
    %323 = vector.load %arg4[%c0_107, %c0_108] : memref<128x512xf32, #tpu.memory_space<vmem>>, vector<128x512xf32>
    %cst_109 = arith.constant dense<0.000000e+00> : vector<8x512xf32>
    %324 = tpu.matmul %322, %323, %cst_109 {dimension_numbers = #tpu.dot_dimension_numbers<[1], [0], [0], [1], [0, 0, 1, 1], [], []>} : vector<8x128xf32>, vector<128x512xf32>, vector<8x512xf32> -> vector<8x512xf32>
    %c0_110 = arith.constant 0 : index
    %c0_111 = arith.constant 0 : index
    %325 = vector.load %arg5[%c0_110, %c0_111] : memref<128x512xf32, #tpu.memory_space<vmem>>, vector<128x512xf32>
    %cst_112 = arith.constant dense<0.000000e+00> : vector<8x512xf32>
    %326 = tpu.matmul %290, %325, %cst_112 {dimension_numbers = #tpu.dot_dimension_numbers<[1], [0], [0], [1], [0, 0, 1, 1], [], []>} : vector<8x128xf32>, vector<128x512xf32>, vector<8x512xf32> -> vector<8x512xf32>
    %327 = arith.addf %324, %326 : vector<8x512xf32>
    %c0_113 = arith.constant 0 : index
    %c0_114 = arith.constant 0 : index
    %328 = vector.load %arg6[%c0_113, %c0_114] : memref<1x512xf32, #tpu.memory_space<vmem>>, vector<1x512xf32>
    %329 = vector.broadcast %328 : vector<1x512xf32> to vector<8x512xf32>
    %330 = arith.addf %327, %329 : vector<8x512xf32>
    %331 = math.tanh %330 : vector<8x512xf32>
    %332 = vector.broadcast %26 : vector<1x512xf32> to vector<8x512xf32>
    %333 = arith.mulf %331, %332 : vector<8x512xf32>
    %334 = vector.broadcast %29 : vector<1x512xf32> to vector<8x512xf32>
    %335 = arith.addf %333, %334 : vector<8x512xf32>
    %336 = vector.extract_strided_slice %335 {offsets = [0, 0], sizes = [8, 128], strides = [1, 1]} : vector<8x512xf32> to vector<8x128xf32>
    %337 = vector.extract_strided_slice %335 {offsets = [0, 128], sizes = [8, 128], strides = [1, 1]} : vector<8x512xf32> to vector<8x128xf32>
    %338 = vector.extract_strided_slice %335 {offsets = [0, 256], sizes = [8, 128], strides = [1, 1]} : vector<8x512xf32> to vector<8x128xf32>
    %339 = vector.extract_strided_slice %335 {offsets = [0, 384], sizes = [8, 128], strides = [1, 1]} : vector<8x512xf32> to vector<8x128xf32>
    %340 = arith.mulf %337, %288 : vector<8x128xf32>
    %341 = arith.mulf %336, %339 : vector<8x128xf32>
    %342 = arith.addf %340, %341 : vector<8x128xf32>
    %343 = math.tanh %342 : vector<8x128xf32>
    %344 = arith.mulf %338, %343 : vector<8x128xf32>
    %c0_115 = arith.constant 0 : index
    %c0_116 = arith.constant 0 : index
    %345 = vector.load %arg7[%c0_115, %c0_116] : memref<1x128xf32, #tpu.memory_space<vmem>>, vector<1x128xf32>
    %346 = vector.broadcast %345 : vector<1x128xf32> to vector<8x128xf32>
    %347 = arith.mulf %344, %346 : vector<8x128xf32>
    %cst_117 = arith.constant dense<0.000000e+00> : vector<8xf32>
    %348 = vector.multi_reduction <add>, %347, %cst_117 [1] : vector<8x128xf32> to vector<8xf32>
    %349 = vector.shape_cast %348 : vector<8xf32> to vector<8x1xf32>
    %350 = arith.index_cast %c5_i32 : i32 to index
    %c0_118 = arith.constant 0 : index
    %351 = vector.load %arg8[%350, %c0_118] : memref<16x128xf32, #tpu.memory_space<vmem>>, vector<1x128xf32>
    %352 = vector.broadcast %349 : vector<8x1xf32> to vector<8x128xf32>
    %353 = vector.broadcast %351 : vector<1x128xf32> to vector<8x128xf32>
    %354 = arith.mulf %352, %353 : vector<8x128xf32>
    %355 = arith.addf %301, %354 : vector<8x128xf32>
    %c6_i32 = arith.constant 6 : i32
    %c8_i32_119 = arith.constant 8 : i32
    %356 = arith.muli %c6_i32, %c8_i32_119 : i32
    %357 = tpu.assume_multiple %356, 8 : i32
    %358 = arith.index_cast %357 : i32 to index
    %c0_120 = arith.constant 0 : index
    %359 = vector.load %arg11[%358, %c0_120] : memref<128x512xf32, #tpu.memory_space<vmem>>, vector<8x512xf32>
    %c0_121 = arith.constant 0 : index
    %c0_122 = arith.constant 0 : index
    %360 = vector.load %arg3[%c0_121, %c0_122] : memref<128x512xf32, #tpu.memory_space<vmem>>, vector<128x512xf32>
    %cst_123 = arith.constant dense<0.000000e+00> : vector<8x512xf32>
    %361 = tpu.matmul %322, %360, %cst_123 {dimension_numbers = #tpu.dot_dimension_numbers<[1], [0], [0], [1], [0, 0, 1, 1], [], []>} : vector<8x128xf32>, vector<128x512xf32>, vector<8x512xf32> -> vector<8x512xf32>
    %362 = arith.addf %359, %361 : vector<8x512xf32>
    %363 = math.tanh %362 : vector<8x512xf32>
    %364 = vector.broadcast %26 : vector<1x512xf32> to vector<8x512xf32>
    %365 = arith.mulf %363, %364 : vector<8x512xf32>
    %366 = vector.broadcast %29 : vector<1x512xf32> to vector<8x512xf32>
    %367 = arith.addf %365, %366 : vector<8x512xf32>
    %368 = vector.extract_strided_slice %367 {offsets = [0, 0], sizes = [8, 128], strides = [1, 1]} : vector<8x512xf32> to vector<8x128xf32>
    %369 = vector.extract_strided_slice %367 {offsets = [0, 128], sizes = [8, 128], strides = [1, 1]} : vector<8x512xf32> to vector<8x128xf32>
    %370 = vector.extract_strided_slice %367 {offsets = [0, 256], sizes = [8, 128], strides = [1, 1]} : vector<8x512xf32> to vector<8x128xf32>
    %371 = vector.extract_strided_slice %367 {offsets = [0, 384], sizes = [8, 128], strides = [1, 1]} : vector<8x512xf32> to vector<8x128xf32>
    %372 = arith.mulf %369, %320 : vector<8x128xf32>
    %373 = arith.mulf %368, %371 : vector<8x128xf32>
    %374 = arith.addf %372, %373 : vector<8x128xf32>
    %375 = math.tanh %374 : vector<8x128xf32>
    %376 = arith.mulf %370, %375 : vector<8x128xf32>
    %c0_124 = arith.constant 0 : index
    %c0_125 = arith.constant 0 : index
    %377 = vector.load %arg4[%c0_124, %c0_125] : memref<128x512xf32, #tpu.memory_space<vmem>>, vector<128x512xf32>
    %cst_126 = arith.constant dense<0.000000e+00> : vector<8x512xf32>
    %378 = tpu.matmul %376, %377, %cst_126 {dimension_numbers = #tpu.dot_dimension_numbers<[1], [0], [0], [1], [0, 0, 1, 1], [], []>} : vector<8x128xf32>, vector<128x512xf32>, vector<8x512xf32> -> vector<8x512xf32>
    %c0_127 = arith.constant 0 : index
    %c0_128 = arith.constant 0 : index
    %379 = vector.load %arg5[%c0_127, %c0_128] : memref<128x512xf32, #tpu.memory_space<vmem>>, vector<128x512xf32>
    %cst_129 = arith.constant dense<0.000000e+00> : vector<8x512xf32>
    %380 = tpu.matmul %344, %379, %cst_129 {dimension_numbers = #tpu.dot_dimension_numbers<[1], [0], [0], [1], [0, 0, 1, 1], [], []>} : vector<8x128xf32>, vector<128x512xf32>, vector<8x512xf32> -> vector<8x512xf32>
    %381 = arith.addf %378, %380 : vector<8x512xf32>
    %c0_130 = arith.constant 0 : index
    %c0_131 = arith.constant 0 : index
    %382 = vector.load %arg6[%c0_130, %c0_131] : memref<1x512xf32, #tpu.memory_space<vmem>>, vector<1x512xf32>
    %383 = vector.broadcast %382 : vector<1x512xf32> to vector<8x512xf32>
    %384 = arith.addf %381, %383 : vector<8x512xf32>
    %385 = math.tanh %384 : vector<8x512xf32>
    %386 = vector.broadcast %26 : vector<1x512xf32> to vector<8x512xf32>
    %387 = arith.mulf %385, %386 : vector<8x512xf32>
    %388 = vector.broadcast %29 : vector<1x512xf32> to vector<8x512xf32>
    %389 = arith.addf %387, %388 : vector<8x512xf32>
    %390 = vector.extract_strided_slice %389 {offsets = [0, 0], sizes = [8, 128], strides = [1, 1]} : vector<8x512xf32> to vector<8x128xf32>
    %391 = vector.extract_strided_slice %389 {offsets = [0, 128], sizes = [8, 128], strides = [1, 1]} : vector<8x512xf32> to vector<8x128xf32>
    %392 = vector.extract_strided_slice %389 {offsets = [0, 256], sizes = [8, 128], strides = [1, 1]} : vector<8x512xf32> to vector<8x128xf32>
    %393 = vector.extract_strided_slice %389 {offsets = [0, 384], sizes = [8, 128], strides = [1, 1]} : vector<8x512xf32> to vector<8x128xf32>
    %394 = arith.mulf %391, %342 : vector<8x128xf32>
    %395 = arith.mulf %390, %393 : vector<8x128xf32>
    %396 = arith.addf %394, %395 : vector<8x128xf32>
    %397 = math.tanh %396 : vector<8x128xf32>
    %398 = arith.mulf %392, %397 : vector<8x128xf32>
    %c0_132 = arith.constant 0 : index
    %c0_133 = arith.constant 0 : index
    %399 = vector.load %arg7[%c0_132, %c0_133] : memref<1x128xf32, #tpu.memory_space<vmem>>, vector<1x128xf32>
    %400 = vector.broadcast %399 : vector<1x128xf32> to vector<8x128xf32>
    %401 = arith.mulf %398, %400 : vector<8x128xf32>
    %cst_134 = arith.constant dense<0.000000e+00> : vector<8xf32>
    %402 = vector.multi_reduction <add>, %401, %cst_134 [1] : vector<8x128xf32> to vector<8xf32>
    %403 = vector.shape_cast %402 : vector<8xf32> to vector<8x1xf32>
    %404 = arith.index_cast %c6_i32 : i32 to index
    %c0_135 = arith.constant 0 : index
    %405 = vector.load %arg8[%404, %c0_135] : memref<16x128xf32, #tpu.memory_space<vmem>>, vector<1x128xf32>
    %406 = vector.broadcast %403 : vector<8x1xf32> to vector<8x128xf32>
    %407 = vector.broadcast %405 : vector<1x128xf32> to vector<8x128xf32>
    %408 = arith.mulf %406, %407 : vector<8x128xf32>
    %409 = arith.addf %355, %408 : vector<8x128xf32>
    %c7_i32 = arith.constant 7 : i32
    %c8_i32_136 = arith.constant 8 : i32
    %410 = arith.muli %c7_i32, %c8_i32_136 : i32
    %411 = tpu.assume_multiple %410, 8 : i32
    %412 = arith.index_cast %411 : i32 to index
    %c0_137 = arith.constant 0 : index
    %413 = vector.load %arg11[%412, %c0_137] : memref<128x512xf32, #tpu.memory_space<vmem>>, vector<8x512xf32>
    %c0_138 = arith.constant 0 : index
    %c0_139 = arith.constant 0 : index
    %414 = vector.load %arg3[%c0_138, %c0_139] : memref<128x512xf32, #tpu.memory_space<vmem>>, vector<128x512xf32>
    %cst_140 = arith.constant dense<0.000000e+00> : vector<8x512xf32>
    %415 = tpu.matmul %376, %414, %cst_140 {dimension_numbers = #tpu.dot_dimension_numbers<[1], [0], [0], [1], [0, 0, 1, 1], [], []>} : vector<8x128xf32>, vector<128x512xf32>, vector<8x512xf32> -> vector<8x512xf32>
    %416 = arith.addf %413, %415 : vector<8x512xf32>
    %417 = math.tanh %416 : vector<8x512xf32>
    %418 = vector.broadcast %26 : vector<1x512xf32> to vector<8x512xf32>
    %419 = arith.mulf %417, %418 : vector<8x512xf32>
    %420 = vector.broadcast %29 : vector<1x512xf32> to vector<8x512xf32>
    %421 = arith.addf %419, %420 : vector<8x512xf32>
    %422 = vector.extract_strided_slice %421 {offsets = [0, 0], sizes = [8, 128], strides = [1, 1]} : vector<8x512xf32> to vector<8x128xf32>
    %423 = vector.extract_strided_slice %421 {offsets = [0, 128], sizes = [8, 128], strides = [1, 1]} : vector<8x512xf32> to vector<8x128xf32>
    %424 = vector.extract_strided_slice %421 {offsets = [0, 256], sizes = [8, 128], strides = [1, 1]} : vector<8x512xf32> to vector<8x128xf32>
    %425 = vector.extract_strided_slice %421 {offsets = [0, 384], sizes = [8, 128], strides = [1, 1]} : vector<8x512xf32> to vector<8x128xf32>
    %426 = arith.mulf %423, %374 : vector<8x128xf32>
    %427 = arith.mulf %422, %425 : vector<8x128xf32>
    %428 = arith.addf %426, %427 : vector<8x128xf32>
    %429 = math.tanh %428 : vector<8x128xf32>
    %430 = arith.mulf %424, %429 : vector<8x128xf32>
    %c0_141 = arith.constant 0 : index
    %c0_142 = arith.constant 0 : index
    %431 = vector.load %arg4[%c0_141, %c0_142] : memref<128x512xf32, #tpu.memory_space<vmem>>, vector<128x512xf32>
    %cst_143 = arith.constant dense<0.000000e+00> : vector<8x512xf32>
    %432 = tpu.matmul %430, %431, %cst_143 {dimension_numbers = #tpu.dot_dimension_numbers<[1], [0], [0], [1], [0, 0, 1, 1], [], []>} : vector<8x128xf32>, vector<128x512xf32>, vector<8x512xf32> -> vector<8x512xf32>
    %c0_144 = arith.constant 0 : index
    %c0_145 = arith.constant 0 : index
    %433 = vector.load %arg5[%c0_144, %c0_145] : memref<128x512xf32, #tpu.memory_space<vmem>>, vector<128x512xf32>
    %cst_146 = arith.constant dense<0.000000e+00> : vector<8x512xf32>
    %434 = tpu.matmul %398, %433, %cst_146 {dimension_numbers = #tpu.dot_dimension_numbers<[1], [0], [0], [1], [0, 0, 1, 1], [], []>} : vector<8x128xf32>, vector<128x512xf32>, vector<8x512xf32> -> vector<8x512xf32>
    %435 = arith.addf %432, %434 : vector<8x512xf32>
    %c0_147 = arith.constant 0 : index
    %c0_148 = arith.constant 0 : index
    %436 = vector.load %arg6[%c0_147, %c0_148] : memref<1x512xf32, #tpu.memory_space<vmem>>, vector<1x512xf32>
    %437 = vector.broadcast %436 : vector<1x512xf32> to vector<8x512xf32>
    %438 = arith.addf %435, %437 : vector<8x512xf32>
    %439 = math.tanh %438 : vector<8x512xf32>
    %440 = vector.broadcast %26 : vector<1x512xf32> to vector<8x512xf32>
    %441 = arith.mulf %439, %440 : vector<8x512xf32>
    %442 = vector.broadcast %29 : vector<1x512xf32> to vector<8x512xf32>
    %443 = arith.addf %441, %442 : vector<8x512xf32>
    %444 = vector.extract_strided_slice %443 {offsets = [0, 0], sizes = [8, 128], strides = [1, 1]} : vector<8x512xf32> to vector<8x128xf32>
    %445 = vector.extract_strided_slice %443 {offsets = [0, 128], sizes = [8, 128], strides = [1, 1]} : vector<8x512xf32> to vector<8x128xf32>
    %446 = vector.extract_strided_slice %443 {offsets = [0, 256], sizes = [8, 128], strides = [1, 1]} : vector<8x512xf32> to vector<8x128xf32>
    %447 = vector.extract_strided_slice %443 {offsets = [0, 384], sizes = [8, 128], strides = [1, 1]} : vector<8x512xf32> to vector<8x128xf32>
    %448 = arith.mulf %445, %396 : vector<8x128xf32>
    %449 = arith.mulf %444, %447 : vector<8x128xf32>
    %450 = arith.addf %448, %449 : vector<8x128xf32>
    %451 = math.tanh %450 : vector<8x128xf32>
    %452 = arith.mulf %446, %451 : vector<8x128xf32>
    %c0_149 = arith.constant 0 : index
    %c0_150 = arith.constant 0 : index
    %453 = vector.load %arg7[%c0_149, %c0_150] : memref<1x128xf32, #tpu.memory_space<vmem>>, vector<1x128xf32>
    %454 = vector.broadcast %453 : vector<1x128xf32> to vector<8x128xf32>
    %455 = arith.mulf %452, %454 : vector<8x128xf32>
    %cst_151 = arith.constant dense<0.000000e+00> : vector<8xf32>
    %456 = vector.multi_reduction <add>, %455, %cst_151 [1] : vector<8x128xf32> to vector<8xf32>
    %457 = vector.shape_cast %456 : vector<8xf32> to vector<8x1xf32>
    %458 = arith.index_cast %c7_i32 : i32 to index
    %c0_152 = arith.constant 0 : index
    %459 = vector.load %arg8[%458, %c0_152] : memref<16x128xf32, #tpu.memory_space<vmem>>, vector<1x128xf32>
    %460 = vector.broadcast %457 : vector<8x1xf32> to vector<8x128xf32>
    %461 = vector.broadcast %459 : vector<1x128xf32> to vector<8x128xf32>
    %462 = arith.mulf %460, %461 : vector<8x128xf32>
    %463 = arith.addf %409, %462 : vector<8x128xf32>
    %c8_i32_153 = arith.constant 8 : i32
    %c8_i32_154 = arith.constant 8 : i32
    %464 = arith.muli %c8_i32_153, %c8_i32_154 : i32
    %465 = tpu.assume_multiple %464, 8 : i32
    %466 = arith.index_cast %465 : i32 to index
    %c0_155 = arith.constant 0 : index
    %467 = vector.load %arg11[%466, %c0_155] : memref<128x512xf32, #tpu.memory_space<vmem>>, vector<8x512xf32>
    %c0_156 = arith.constant 0 : index
    %c0_157 = arith.constant 0 : index
    %468 = vector.load %arg3[%c0_156, %c0_157] : memref<128x512xf32, #tpu.memory_space<vmem>>, vector<128x512xf32>
    %cst_158 = arith.constant dense<0.000000e+00> : vector<8x512xf32>
    %469 = tpu.matmul %430, %468, %cst_158 {dimension_numbers = #tpu.dot_dimension_numbers<[1], [0], [0], [1], [0, 0, 1, 1], [], []>} : vector<8x128xf32>, vector<128x512xf32>, vector<8x512xf32> -> vector<8x512xf32>
    %470 = arith.addf %467, %469 : vector<8x512xf32>
    %471 = math.tanh %470 : vector<8x512xf32>
    %472 = vector.broadcast %26 : vector<1x512xf32> to vector<8x512xf32>
    %473 = arith.mulf %471, %472 : vector<8x512xf32>
    %474 = vector.broadcast %29 : vector<1x512xf32> to vector<8x512xf32>
    %475 = arith.addf %473, %474 : vector<8x512xf32>
    %476 = vector.extract_strided_slice %475 {offsets = [0, 0], sizes = [8, 128], strides = [1, 1]} : vector<8x512xf32> to vector<8x128xf32>
    %477 = vector.extract_strided_slice %475 {offsets = [0, 128], sizes = [8, 128], strides = [1, 1]} : vector<8x512xf32> to vector<8x128xf32>
    %478 = vector.extract_strided_slice %475 {offsets = [0, 256], sizes = [8, 128], strides = [1, 1]} : vector<8x512xf32> to vector<8x128xf32>
    %479 = vector.extract_strided_slice %475 {offsets = [0, 384], sizes = [8, 128], strides = [1, 1]} : vector<8x512xf32> to vector<8x128xf32>
    %480 = arith.mulf %477, %428 : vector<8x128xf32>
    %481 = arith.mulf %476, %479 : vector<8x128xf32>
    %482 = arith.addf %480, %481 : vector<8x128xf32>
    %483 = math.tanh %482 : vector<8x128xf32>
    %484 = arith.mulf %478, %483 : vector<8x128xf32>
    %c0_159 = arith.constant 0 : index
    %c0_160 = arith.constant 0 : index
    %485 = vector.load %arg4[%c0_159, %c0_160] : memref<128x512xf32, #tpu.memory_space<vmem>>, vector<128x512xf32>
    %cst_161 = arith.constant dense<0.000000e+00> : vector<8x512xf32>
    %486 = tpu.matmul %484, %485, %cst_161 {dimension_numbers = #tpu.dot_dimension_numbers<[1], [0], [0], [1], [0, 0, 1, 1], [], []>} : vector<8x128xf32>, vector<128x512xf32>, vector<8x512xf32> -> vector<8x512xf32>
    %c0_162 = arith.constant 0 : index
    %c0_163 = arith.constant 0 : index
    %487 = vector.load %arg5[%c0_162, %c0_163] : memref<128x512xf32, #tpu.memory_space<vmem>>, vector<128x512xf32>
    %cst_164 = arith.constant dense<0.000000e+00> : vector<8x512xf32>
    %488 = tpu.matmul %452, %487, %cst_164 {dimension_numbers = #tpu.dot_dimension_numbers<[1], [0], [0], [1], [0, 0, 1, 1], [], []>} : vector<8x128xf32>, vector<128x512xf32>, vector<8x512xf32> -> vector<8x512xf32>
    %489 = arith.addf %486, %488 : vector<8x512xf32>
    %c0_165 = arith.constant 0 : index
    %c0_166 = arith.constant 0 : index
    %490 = vector.load %arg6[%c0_165, %c0_166] : memref<1x512xf32, #tpu.memory_space<vmem>>, vector<1x512xf32>
    %491 = vector.broadcast %490 : vector<1x512xf32> to vector<8x512xf32>
    %492 = arith.addf %489, %491 : vector<8x512xf32>
    %493 = math.tanh %492 : vector<8x512xf32>
    %494 = vector.broadcast %26 : vector<1x512xf32> to vector<8x512xf32>
    %495 = arith.mulf %493, %494 : vector<8x512xf32>
    %496 = vector.broadcast %29 : vector<1x512xf32> to vector<8x512xf32>
    %497 = arith.addf %495, %496 : vector<8x512xf32>
    %498 = vector.extract_strided_slice %497 {offsets = [0, 0], sizes = [8, 128], strides = [1, 1]} : vector<8x512xf32> to vector<8x128xf32>
    %499 = vector.extract_strided_slice %497 {offsets = [0, 128], sizes = [8, 128], strides = [1, 1]} : vector<8x512xf32> to vector<8x128xf32>
    %500 = vector.extract_strided_slice %497 {offsets = [0, 256], sizes = [8, 128], strides = [1, 1]} : vector<8x512xf32> to vector<8x128xf32>
    %501 = vector.extract_strided_slice %497 {offsets = [0, 384], sizes = [8, 128], strides = [1, 1]} : vector<8x512xf32> to vector<8x128xf32>
    %502 = arith.mulf %499, %450 : vector<8x128xf32>
    %503 = arith.mulf %498, %501 : vector<8x128xf32>
    %504 = arith.addf %502, %503 : vector<8x128xf32>
    %505 = math.tanh %504 : vector<8x128xf32>
    %506 = arith.mulf %500, %505 : vector<8x128xf32>
    %c0_167 = arith.constant 0 : index
    %c0_168 = arith.constant 0 : index
    %507 = vector.load %arg7[%c0_167, %c0_168] : memref<1x128xf32, #tpu.memory_space<vmem>>, vector<1x128xf32>
    %508 = vector.broadcast %507 : vector<1x128xf32> to vector<8x128xf32>
    %509 = arith.mulf %506, %508 : vector<8x128xf32>
    %cst_169 = arith.constant dense<0.000000e+00> : vector<8xf32>
    %510 = vector.multi_reduction <add>, %509, %cst_169 [1] : vector<8x128xf32> to vector<8xf32>
    %511 = vector.shape_cast %510 : vector<8xf32> to vector<8x1xf32>
    %512 = arith.index_cast %c8_i32_153 : i32 to index
    %c0_170 = arith.constant 0 : index
    %513 = vector.load %arg8[%512, %c0_170] : memref<16x128xf32, #tpu.memory_space<vmem>>, vector<1x128xf32>
    %514 = vector.broadcast %511 : vector<8x1xf32> to vector<8x128xf32>
    %515 = vector.broadcast %513 : vector<1x128xf32> to vector<8x128xf32>
    %516 = arith.mulf %514, %515 : vector<8x128xf32>
    %517 = arith.addf %463, %516 : vector<8x128xf32>
    %c9_i32 = arith.constant 9 : i32
    %c8_i32_171 = arith.constant 8 : i32
    %518 = arith.muli %c9_i32, %c8_i32_171 : i32
    %519 = tpu.assume_multiple %518, 8 : i32
    %520 = arith.index_cast %519 : i32 to index
    %c0_172 = arith.constant 0 : index
    %521 = vector.load %arg11[%520, %c0_172] : memref<128x512xf32, #tpu.memory_space<vmem>>, vector<8x512xf32>
    %c0_173 = arith.constant 0 : index
    %c0_174 = arith.constant 0 : index
    %522 = vector.load %arg3[%c0_173, %c0_174] : memref<128x512xf32, #tpu.memory_space<vmem>>, vector<128x512xf32>
    %cst_175 = arith.constant dense<0.000000e+00> : vector<8x512xf32>
    %523 = tpu.matmul %484, %522, %cst_175 {dimension_numbers = #tpu.dot_dimension_numbers<[1], [0], [0], [1], [0, 0, 1, 1], [], []>} : vector<8x128xf32>, vector<128x512xf32>, vector<8x512xf32> -> vector<8x512xf32>
    %524 = arith.addf %521, %523 : vector<8x512xf32>
    %525 = math.tanh %524 : vector<8x512xf32>
    %526 = vector.broadcast %26 : vector<1x512xf32> to vector<8x512xf32>
    %527 = arith.mulf %525, %526 : vector<8x512xf32>
    %528 = vector.broadcast %29 : vector<1x512xf32> to vector<8x512xf32>
    %529 = arith.addf %527, %528 : vector<8x512xf32>
    %530 = vector.extract_strided_slice %529 {offsets = [0, 0], sizes = [8, 128], strides = [1, 1]} : vector<8x512xf32> to vector<8x128xf32>
    %531 = vector.extract_strided_slice %529 {offsets = [0, 128], sizes = [8, 128], strides = [1, 1]} : vector<8x512xf32> to vector<8x128xf32>
    %532 = vector.extract_strided_slice %529 {offsets = [0, 256], sizes = [8, 128], strides = [1, 1]} : vector<8x512xf32> to vector<8x128xf32>
    %533 = vector.extract_strided_slice %529 {offsets = [0, 384], sizes = [8, 128], strides = [1, 1]} : vector<8x512xf32> to vector<8x128xf32>
    %534 = arith.mulf %531, %482 : vector<8x128xf32>
    %535 = arith.mulf %530, %533 : vector<8x128xf32>
    %536 = arith.addf %534, %535 : vector<8x128xf32>
    %537 = math.tanh %536 : vector<8x128xf32>
    %538 = arith.mulf %532, %537 : vector<8x128xf32>
    %c0_176 = arith.constant 0 : index
    %c0_177 = arith.constant 0 : index
    %539 = vector.load %arg4[%c0_176, %c0_177] : memref<128x512xf32, #tpu.memory_space<vmem>>, vector<128x512xf32>
    %cst_178 = arith.constant dense<0.000000e+00> : vector<8x512xf32>
    %540 = tpu.matmul %538, %539, %cst_178 {dimension_numbers = #tpu.dot_dimension_numbers<[1], [0], [0], [1], [0, 0, 1, 1], [], []>} : vector<8x128xf32>, vector<128x512xf32>, vector<8x512xf32> -> vector<8x512xf32>
    %c0_179 = arith.constant 0 : index
    %c0_180 = arith.constant 0 : index
    %541 = vector.load %arg5[%c0_179, %c0_180] : memref<128x512xf32, #tpu.memory_space<vmem>>, vector<128x512xf32>
    %cst_181 = arith.constant dense<0.000000e+00> : vector<8x512xf32>
    %542 = tpu.matmul %506, %541, %cst_181 {dimension_numbers = #tpu.dot_dimension_numbers<[1], [0], [0], [1], [0, 0, 1, 1], [], []>} : vector<8x128xf32>, vector<128x512xf32>, vector<8x512xf32> -> vector<8x512xf32>
    %543 = arith.addf %540, %542 : vector<8x512xf32>
    %c0_182 = arith.constant 0 : index
    %c0_183 = arith.constant 0 : index
    %544 = vector.load %arg6[%c0_182, %c0_183] : memref<1x512xf32, #tpu.memory_space<vmem>>, vector<1x512xf32>
    %545 = vector.broadcast %544 : vector<1x512xf32> to vector<8x512xf32>
    %546 = arith.addf %543, %545 : vector<8x512xf32>
    %547 = math.tanh %546 : vector<8x512xf32>
    %548 = vector.broadcast %26 : vector<1x512xf32> to vector<8x512xf32>
    %549 = arith.mulf %547, %548 : vector<8x512xf32>
    %550 = vector.broadcast %29 : vector<1x512xf32> to vector<8x512xf32>
    %551 = arith.addf %549, %550 : vector<8x512xf32>
    %552 = vector.extract_strided_slice %551 {offsets = [0, 0], sizes = [8, 128], strides = [1, 1]} : vector<8x512xf32> to vector<8x128xf32>
    %553 = vector.extract_strided_slice %551 {offsets = [0, 128], sizes = [8, 128], strides = [1, 1]} : vector<8x512xf32> to vector<8x128xf32>
    %554 = vector.extract_strided_slice %551 {offsets = [0, 256], sizes = [8, 128], strides = [1, 1]} : vector<8x512xf32> to vector<8x128xf32>
    %555 = vector.extract_strided_slice %551 {offsets = [0, 384], sizes = [8, 128], strides = [1, 1]} : vector<8x512xf32> to vector<8x128xf32>
    %556 = arith.mulf %553, %504 : vector<8x128xf32>
    %557 = arith.mulf %552, %555 : vector<8x128xf32>
    %558 = arith.addf %556, %557 : vector<8x128xf32>
    %559 = math.tanh %558 : vector<8x128xf32>
    %560 = arith.mulf %554, %559 : vector<8x128xf32>
    %c0_184 = arith.constant 0 : index
    %c0_185 = arith.constant 0 : index
    %561 = vector.load %arg7[%c0_184, %c0_185] : memref<1x128xf32, #tpu.memory_space<vmem>>, vector<1x128xf32>
    %562 = vector.broadcast %561 : vector<1x128xf32> to vector<8x128xf32>
    %563 = arith.mulf %560, %562 : vector<8x128xf32>
    %cst_186 = arith.constant dense<0.000000e+00> : vector<8xf32>
    %564 = vector.multi_reduction <add>, %563, %cst_186 [1] : vector<8x128xf32> to vector<8xf32>
    %565 = vector.shape_cast %564 : vector<8xf32> to vector<8x1xf32>
    %566 = arith.index_cast %c9_i32 : i32 to index
    %c0_187 = arith.constant 0 : index
    %567 = vector.load %arg8[%566, %c0_187] : memref<16x128xf32, #tpu.memory_space<vmem>>, vector<1x128xf32>
    %568 = vector.broadcast %565 : vector<8x1xf32> to vector<8x128xf32>
    %569 = vector.broadcast %567 : vector<1x128xf32> to vector<8x128xf32>
    %570 = arith.mulf %568, %569 : vector<8x128xf32>
    %571 = arith.addf %517, %570 : vector<8x128xf32>
    %c10_i32 = arith.constant 10 : i32
    %c8_i32_188 = arith.constant 8 : i32
    %572 = arith.muli %c10_i32, %c8_i32_188 : i32
    %573 = tpu.assume_multiple %572, 8 : i32
    %574 = arith.index_cast %573 : i32 to index
    %c0_189 = arith.constant 0 : index
    %575 = vector.load %arg11[%574, %c0_189] : memref<128x512xf32, #tpu.memory_space<vmem>>, vector<8x512xf32>
    %c0_190 = arith.constant 0 : index
    %c0_191 = arith.constant 0 : index
    %576 = vector.load %arg3[%c0_190, %c0_191] : memref<128x512xf32, #tpu.memory_space<vmem>>, vector<128x512xf32>
    %cst_192 = arith.constant dense<0.000000e+00> : vector<8x512xf32>
    %577 = tpu.matmul %538, %576, %cst_192 {dimension_numbers = #tpu.dot_dimension_numbers<[1], [0], [0], [1], [0, 0, 1, 1], [], []>} : vector<8x128xf32>, vector<128x512xf32>, vector<8x512xf32> -> vector<8x512xf32>
    %578 = arith.addf %575, %577 : vector<8x512xf32>
    %579 = math.tanh %578 : vector<8x512xf32>
    %580 = vector.broadcast %26 : vector<1x512xf32> to vector<8x512xf32>
    %581 = arith.mulf %579, %580 : vector<8x512xf32>
    %582 = vector.broadcast %29 : vector<1x512xf32> to vector<8x512xf32>
    %583 = arith.addf %581, %582 : vector<8x512xf32>
    %584 = vector.extract_strided_slice %583 {offsets = [0, 0], sizes = [8, 128], strides = [1, 1]} : vector<8x512xf32> to vector<8x128xf32>
    %585 = vector.extract_strided_slice %583 {offsets = [0, 128], sizes = [8, 128], strides = [1, 1]} : vector<8x512xf32> to vector<8x128xf32>
    %586 = vector.extract_strided_slice %583 {offsets = [0, 256], sizes = [8, 128], strides = [1, 1]} : vector<8x512xf32> to vector<8x128xf32>
    %587 = vector.extract_strided_slice %583 {offsets = [0, 384], sizes = [8, 128], strides = [1, 1]} : vector<8x512xf32> to vector<8x128xf32>
    %588 = arith.mulf %585, %536 : vector<8x128xf32>
    %589 = arith.mulf %584, %587 : vector<8x128xf32>
    %590 = arith.addf %588, %589 : vector<8x128xf32>
    %591 = math.tanh %590 : vector<8x128xf32>
    %592 = arith.mulf %586, %591 : vector<8x128xf32>
    %c0_193 = arith.constant 0 : index
    %c0_194 = arith.constant 0 : index
    %593 = vector.load %arg4[%c0_193, %c0_194] : memref<128x512xf32, #tpu.memory_space<vmem>>, vector<128x512xf32>
    %cst_195 = arith.constant dense<0.000000e+00> : vector<8x512xf32>
    %594 = tpu.matmul %592, %593, %cst_195 {dimension_numbers = #tpu.dot_dimension_numbers<[1], [0], [0], [1], [0, 0, 1, 1], [], []>} : vector<8x128xf32>, vector<128x512xf32>, vector<8x512xf32> -> vector<8x512xf32>
    %c0_196 = arith.constant 0 : index
    %c0_197 = arith.constant 0 : index
    %595 = vector.load %arg5[%c0_196, %c0_197] : memref<128x512xf32, #tpu.memory_space<vmem>>, vector<128x512xf32>
    %cst_198 = arith.constant dense<0.000000e+00> : vector<8x512xf32>
    %596 = tpu.matmul %560, %595, %cst_198 {dimension_numbers = #tpu.dot_dimension_numbers<[1], [0], [0], [1], [0, 0, 1, 1], [], []>} : vector<8x128xf32>, vector<128x512xf32>, vector<8x512xf32> -> vector<8x512xf32>
    %597 = arith.addf %594, %596 : vector<8x512xf32>
    %c0_199 = arith.constant 0 : index
    %c0_200 = arith.constant 0 : index
    %598 = vector.load %arg6[%c0_199, %c0_200] : memref<1x512xf32, #tpu.memory_space<vmem>>, vector<1x512xf32>
    %599 = vector.broadcast %598 : vector<1x512xf32> to vector<8x512xf32>
    %600 = arith.addf %597, %599 : vector<8x512xf32>
    %601 = math.tanh %600 : vector<8x512xf32>
    %602 = vector.broadcast %26 : vector<1x512xf32> to vector<8x512xf32>
    %603 = arith.mulf %601, %602 : vector<8x512xf32>
    %604 = vector.broadcast %29 : vector<1x512xf32> to vector<8x512xf32>
    %605 = arith.addf %603, %604 : vector<8x512xf32>
    %606 = vector.extract_strided_slice %605 {offsets = [0, 0], sizes = [8, 128], strides = [1, 1]} : vector<8x512xf32> to vector<8x128xf32>
    %607 = vector.extract_strided_slice %605 {offsets = [0, 128], sizes = [8, 128], strides = [1, 1]} : vector<8x512xf32> to vector<8x128xf32>
    %608 = vector.extract_strided_slice %605 {offsets = [0, 256], sizes = [8, 128], strides = [1, 1]} : vector<8x512xf32> to vector<8x128xf32>
    %609 = vector.extract_strided_slice %605 {offsets = [0, 384], sizes = [8, 128], strides = [1, 1]} : vector<8x512xf32> to vector<8x128xf32>
    %610 = arith.mulf %607, %558 : vector<8x128xf32>
    %611 = arith.mulf %606, %609 : vector<8x128xf32>
    %612 = arith.addf %610, %611 : vector<8x128xf32>
    %613 = math.tanh %612 : vector<8x128xf32>
    %614 = arith.mulf %608, %613 : vector<8x128xf32>
    %c0_201 = arith.constant 0 : index
    %c0_202 = arith.constant 0 : index
    %615 = vector.load %arg7[%c0_201, %c0_202] : memref<1x128xf32, #tpu.memory_space<vmem>>, vector<1x128xf32>
    %616 = vector.broadcast %615 : vector<1x128xf32> to vector<8x128xf32>
    %617 = arith.mulf %614, %616 : vector<8x128xf32>
    %cst_203 = arith.constant dense<0.000000e+00> : vector<8xf32>
    %618 = vector.multi_reduction <add>, %617, %cst_203 [1] : vector<8x128xf32> to vector<8xf32>
    %619 = vector.shape_cast %618 : vector<8xf32> to vector<8x1xf32>
    %620 = arith.index_cast %c10_i32 : i32 to index
    %c0_204 = arith.constant 0 : index
    %621 = vector.load %arg8[%620, %c0_204] : memref<16x128xf32, #tpu.memory_space<vmem>>, vector<1x128xf32>
    %622 = vector.broadcast %619 : vector<8x1xf32> to vector<8x128xf32>
    %623 = vector.broadcast %621 : vector<1x128xf32> to vector<8x128xf32>
    %624 = arith.mulf %622, %623 : vector<8x128xf32>
    %625 = arith.addf %571, %624 : vector<8x128xf32>
    %c11_i32 = arith.constant 11 : i32
    %c8_i32_205 = arith.constant 8 : i32
    %626 = arith.muli %c11_i32, %c8_i32_205 : i32
    %627 = tpu.assume_multiple %626, 8 : i32
    %628 = arith.index_cast %627 : i32 to index
    %c0_206 = arith.constant 0 : index
    %629 = vector.load %arg11[%628, %c0_206] : memref<128x512xf32, #tpu.memory_space<vmem>>, vector<8x512xf32>
    %c0_207 = arith.constant 0 : index
    %c0_208 = arith.constant 0 : index
    %630 = vector.load %arg3[%c0_207, %c0_208] : memref<128x512xf32, #tpu.memory_space<vmem>>, vector<128x512xf32>
    %cst_209 = arith.constant dense<0.000000e+00> : vector<8x512xf32>
    %631 = tpu.matmul %592, %630, %cst_209 {dimension_numbers = #tpu.dot_dimension_numbers<[1], [0], [0], [1], [0, 0, 1, 1], [], []>} : vector<8x128xf32>, vector<128x512xf32>, vector<8x512xf32> -> vector<8x512xf32>
    %632 = arith.addf %629, %631 : vector<8x512xf32>
    %633 = math.tanh %632 : vector<8x512xf32>
    %634 = vector.broadcast %26 : vector<1x512xf32> to vector<8x512xf32>
    %635 = arith.mulf %633, %634 : vector<8x512xf32>
    %636 = vector.broadcast %29 : vector<1x512xf32> to vector<8x512xf32>
    %637 = arith.addf %635, %636 : vector<8x512xf32>
    %638 = vector.extract_strided_slice %637 {offsets = [0, 0], sizes = [8, 128], strides = [1, 1]} : vector<8x512xf32> to vector<8x128xf32>
    %639 = vector.extract_strided_slice %637 {offsets = [0, 128], sizes = [8, 128], strides = [1, 1]} : vector<8x512xf32> to vector<8x128xf32>
    %640 = vector.extract_strided_slice %637 {offsets = [0, 256], sizes = [8, 128], strides = [1, 1]} : vector<8x512xf32> to vector<8x128xf32>
    %641 = vector.extract_strided_slice %637 {offsets = [0, 384], sizes = [8, 128], strides = [1, 1]} : vector<8x512xf32> to vector<8x128xf32>
    %642 = arith.mulf %639, %590 : vector<8x128xf32>
    %643 = arith.mulf %638, %641 : vector<8x128xf32>
    %644 = arith.addf %642, %643 : vector<8x128xf32>
    %645 = math.tanh %644 : vector<8x128xf32>
    %646 = arith.mulf %640, %645 : vector<8x128xf32>
    %c0_210 = arith.constant 0 : index
    %c0_211 = arith.constant 0 : index
    %647 = vector.load %arg4[%c0_210, %c0_211] : memref<128x512xf32, #tpu.memory_space<vmem>>, vector<128x512xf32>
    %cst_212 = arith.constant dense<0.000000e+00> : vector<8x512xf32>
    %648 = tpu.matmul %646, %647, %cst_212 {dimension_numbers = #tpu.dot_dimension_numbers<[1], [0], [0], [1], [0, 0, 1, 1], [], []>} : vector<8x128xf32>, vector<128x512xf32>, vector<8x512xf32> -> vector<8x512xf32>
    %c0_213 = arith.constant 0 : index
    %c0_214 = arith.constant 0 : index
    %649 = vector.load %arg5[%c0_213, %c0_214] : memref<128x512xf32, #tpu.memory_space<vmem>>, vector<128x512xf32>
    %cst_215 = arith.constant dense<0.000000e+00> : vector<8x512xf32>
    %650 = tpu.matmul %614, %649, %cst_215 {dimension_numbers = #tpu.dot_dimension_numbers<[1], [0], [0], [1], [0, 0, 1, 1], [], []>} : vector<8x128xf32>, vector<128x512xf32>, vector<8x512xf32> -> vector<8x512xf32>
    %651 = arith.addf %648, %650 : vector<8x512xf32>
    %c0_216 = arith.constant 0 : index
    %c0_217 = arith.constant 0 : index
    %652 = vector.load %arg6[%c0_216, %c0_217] : memref<1x512xf32, #tpu.memory_space<vmem>>, vector<1x512xf32>
    %653 = vector.broadcast %652 : vector<1x512xf32> to vector<8x512xf32>
    %654 = arith.addf %651, %653 : vector<8x512xf32>
    %655 = math.tanh %654 : vector<8x512xf32>
    %656 = vector.broadcast %26 : vector<1x512xf32> to vector<8x512xf32>
    %657 = arith.mulf %655, %656 : vector<8x512xf32>
    %658 = vector.broadcast %29 : vector<1x512xf32> to vector<8x512xf32>
    %659 = arith.addf %657, %658 : vector<8x512xf32>
    %660 = vector.extract_strided_slice %659 {offsets = [0, 0], sizes = [8, 128], strides = [1, 1]} : vector<8x512xf32> to vector<8x128xf32>
    %661 = vector.extract_strided_slice %659 {offsets = [0, 128], sizes = [8, 128], strides = [1, 1]} : vector<8x512xf32> to vector<8x128xf32>
    %662 = vector.extract_strided_slice %659 {offsets = [0, 256], sizes = [8, 128], strides = [1, 1]} : vector<8x512xf32> to vector<8x128xf32>
    %663 = vector.extract_strided_slice %659 {offsets = [0, 384], sizes = [8, 128], strides = [1, 1]} : vector<8x512xf32> to vector<8x128xf32>
    %664 = arith.mulf %661, %612 : vector<8x128xf32>
    %665 = arith.mulf %660, %663 : vector<8x128xf32>
    %666 = arith.addf %664, %665 : vector<8x128xf32>
    %667 = math.tanh %666 : vector<8x128xf32>
    %668 = arith.mulf %662, %667 : vector<8x128xf32>
    %c0_218 = arith.constant 0 : index
    %c0_219 = arith.constant 0 : index
    %669 = vector.load %arg7[%c0_218, %c0_219] : memref<1x128xf32, #tpu.memory_space<vmem>>, vector<1x128xf32>
    %670 = vector.broadcast %669 : vector<1x128xf32> to vector<8x128xf32>
    %671 = arith.mulf %668, %670 : vector<8x128xf32>
    %cst_220 = arith.constant dense<0.000000e+00> : vector<8xf32>
    %672 = vector.multi_reduction <add>, %671, %cst_220 [1] : vector<8x128xf32> to vector<8xf32>
    %673 = vector.shape_cast %672 : vector<8xf32> to vector<8x1xf32>
    %674 = arith.index_cast %c11_i32 : i32 to index
    %c0_221 = arith.constant 0 : index
    %675 = vector.load %arg8[%674, %c0_221] : memref<16x128xf32, #tpu.memory_space<vmem>>, vector<1x128xf32>
    %676 = vector.broadcast %673 : vector<8x1xf32> to vector<8x128xf32>
    %677 = vector.broadcast %675 : vector<1x128xf32> to vector<8x128xf32>
    %678 = arith.mulf %676, %677 : vector<8x128xf32>
    %679 = arith.addf %625, %678 : vector<8x128xf32>
    %c12_i32 = arith.constant 12 : i32
    %c8_i32_222 = arith.constant 8 : i32
    %680 = arith.muli %c12_i32, %c8_i32_222 : i32
    %681 = tpu.assume_multiple %680, 8 : i32
    %682 = arith.index_cast %681 : i32 to index
    %c0_223 = arith.constant 0 : index
    %683 = vector.load %arg11[%682, %c0_223] : memref<128x512xf32, #tpu.memory_space<vmem>>, vector<8x512xf32>
    %c0_224 = arith.constant 0 : index
    %c0_225 = arith.constant 0 : index
    %684 = vector.load %arg3[%c0_224, %c0_225] : memref<128x512xf32, #tpu.memory_space<vmem>>, vector<128x512xf32>
    %cst_226 = arith.constant dense<0.000000e+00> : vector<8x512xf32>
    %685 = tpu.matmul %646, %684, %cst_226 {dimension_numbers = #tpu.dot_dimension_numbers<[1], [0], [0], [1], [0, 0, 1, 1], [], []>} : vector<8x128xf32>, vector<128x512xf32>, vector<8x512xf32> -> vector<8x512xf32>
    %686 = arith.addf %683, %685 : vector<8x512xf32>
    %687 = math.tanh %686 : vector<8x512xf32>
    %688 = vector.broadcast %26 : vector<1x512xf32> to vector<8x512xf32>
    %689 = arith.mulf %687, %688 : vector<8x512xf32>
    %690 = vector.broadcast %29 : vector<1x512xf32> to vector<8x512xf32>
    %691 = arith.addf %689, %690 : vector<8x512xf32>
    %692 = vector.extract_strided_slice %691 {offsets = [0, 0], sizes = [8, 128], strides = [1, 1]} : vector<8x512xf32> to vector<8x128xf32>
    %693 = vector.extract_strided_slice %691 {offsets = [0, 128], sizes = [8, 128], strides = [1, 1]} : vector<8x512xf32> to vector<8x128xf32>
    %694 = vector.extract_strided_slice %691 {offsets = [0, 256], sizes = [8, 128], strides = [1, 1]} : vector<8x512xf32> to vector<8x128xf32>
    %695 = vector.extract_strided_slice %691 {offsets = [0, 384], sizes = [8, 128], strides = [1, 1]} : vector<8x512xf32> to vector<8x128xf32>
    %696 = arith.mulf %693, %644 : vector<8x128xf32>
    %697 = arith.mulf %692, %695 : vector<8x128xf32>
    %698 = arith.addf %696, %697 : vector<8x128xf32>
    %699 = math.tanh %698 : vector<8x128xf32>
    %700 = arith.mulf %694, %699 : vector<8x128xf32>
    %c0_227 = arith.constant 0 : index
    %c0_228 = arith.constant 0 : index
    %701 = vector.load %arg4[%c0_227, %c0_228] : memref<128x512xf32, #tpu.memory_space<vmem>>, vector<128x512xf32>
    %cst_229 = arith.constant dense<0.000000e+00> : vector<8x512xf32>
    %702 = tpu.matmul %700, %701, %cst_229 {dimension_numbers = #tpu.dot_dimension_numbers<[1], [0], [0], [1], [0, 0, 1, 1], [], []>} : vector<8x128xf32>, vector<128x512xf32>, vector<8x512xf32> -> vector<8x512xf32>
    %c0_230 = arith.constant 0 : index
    %c0_231 = arith.constant 0 : index
    %703 = vector.load %arg5[%c0_230, %c0_231] : memref<128x512xf32, #tpu.memory_space<vmem>>, vector<128x512xf32>
    %cst_232 = arith.constant dense<0.000000e+00> : vector<8x512xf32>
    %704 = tpu.matmul %668, %703, %cst_232 {dimension_numbers = #tpu.dot_dimension_numbers<[1], [0], [0], [1], [0, 0, 1, 1], [], []>} : vector<8x128xf32>, vector<128x512xf32>, vector<8x512xf32> -> vector<8x512xf32>
    %705 = arith.addf %702, %704 : vector<8x512xf32>
    %c0_233 = arith.constant 0 : index
    %c0_234 = arith.constant 0 : index
    %706 = vector.load %arg6[%c0_233, %c0_234] : memref<1x512xf32, #tpu.memory_space<vmem>>, vector<1x512xf32>
    %707 = vector.broadcast %706 : vector<1x512xf32> to vector<8x512xf32>
    %708 = arith.addf %705, %707 : vector<8x512xf32>
    %709 = math.tanh %708 : vector<8x512xf32>
    %710 = vector.broadcast %26 : vector<1x512xf32> to vector<8x512xf32>
    %711 = arith.mulf %709, %710 : vector<8x512xf32>
    %712 = vector.broadcast %29 : vector<1x512xf32> to vector<8x512xf32>
    %713 = arith.addf %711, %712 : vector<8x512xf32>
    %714 = vector.extract_strided_slice %713 {offsets = [0, 0], sizes = [8, 128], strides = [1, 1]} : vector<8x512xf32> to vector<8x128xf32>
    %715 = vector.extract_strided_slice %713 {offsets = [0, 128], sizes = [8, 128], strides = [1, 1]} : vector<8x512xf32> to vector<8x128xf32>
    %716 = vector.extract_strided_slice %713 {offsets = [0, 256], sizes = [8, 128], strides = [1, 1]} : vector<8x512xf32> to vector<8x128xf32>
    %717 = vector.extract_strided_slice %713 {offsets = [0, 384], sizes = [8, 128], strides = [1, 1]} : vector<8x512xf32> to vector<8x128xf32>
    %718 = arith.mulf %715, %666 : vector<8x128xf32>
    %719 = arith.mulf %714, %717 : vector<8x128xf32>
    %720 = arith.addf %718, %719 : vector<8x128xf32>
    %721 = math.tanh %720 : vector<8x128xf32>
    %722 = arith.mulf %716, %721 : vector<8x128xf32>
    %c0_235 = arith.constant 0 : index
    %c0_236 = arith.constant 0 : index
    %723 = vector.load %arg7[%c0_235, %c0_236] : memref<1x128xf32, #tpu.memory_space<vmem>>, vector<1x128xf32>
    %724 = vector.broadcast %723 : vector<1x128xf32> to vector<8x128xf32>
    %725 = arith.mulf %722, %724 : vector<8x128xf32>
    %cst_237 = arith.constant dense<0.000000e+00> : vector<8xf32>
    %726 = vector.multi_reduction <add>, %725, %cst_237 [1] : vector<8x128xf32> to vector<8xf32>
    %727 = vector.shape_cast %726 : vector<8xf32> to vector<8x1xf32>
    %728 = arith.index_cast %c12_i32 : i32 to index
    %c0_238 = arith.constant 0 : index
    %729 = vector.load %arg8[%728, %c0_238] : memref<16x128xf32, #tpu.memory_space<vmem>>, vector<1x128xf32>
    %730 = vector.broadcast %727 : vector<8x1xf32> to vector<8x128xf32>
    %731 = vector.broadcast %729 : vector<1x128xf32> to vector<8x128xf32>
    %732 = arith.mulf %730, %731 : vector<8x128xf32>
    %733 = arith.addf %679, %732 : vector<8x128xf32>
    %c13_i32 = arith.constant 13 : i32
    %c8_i32_239 = arith.constant 8 : i32
    %734 = arith.muli %c13_i32, %c8_i32_239 : i32
    %735 = tpu.assume_multiple %734, 8 : i32
    %736 = arith.index_cast %735 : i32 to index
    %c0_240 = arith.constant 0 : index
    %737 = vector.load %arg11[%736, %c0_240] : memref<128x512xf32, #tpu.memory_space<vmem>>, vector<8x512xf32>
    %c0_241 = arith.constant 0 : index
    %c0_242 = arith.constant 0 : index
    %738 = vector.load %arg3[%c0_241, %c0_242] : memref<128x512xf32, #tpu.memory_space<vmem>>, vector<128x512xf32>
    %cst_243 = arith.constant dense<0.000000e+00> : vector<8x512xf32>
    %739 = tpu.matmul %700, %738, %cst_243 {dimension_numbers = #tpu.dot_dimension_numbers<[1], [0], [0], [1], [0, 0, 1, 1], [], []>} : vector<8x128xf32>, vector<128x512xf32>, vector<8x512xf32> -> vector<8x512xf32>
    %740 = arith.addf %737, %739 : vector<8x512xf32>
    %741 = math.tanh %740 : vector<8x512xf32>
    %742 = vector.broadcast %26 : vector<1x512xf32> to vector<8x512xf32>
    %743 = arith.mulf %741, %742 : vector<8x512xf32>
    %744 = vector.broadcast %29 : vector<1x512xf32> to vector<8x512xf32>
    %745 = arith.addf %743, %744 : vector<8x512xf32>
    %746 = vector.extract_strided_slice %745 {offsets = [0, 0], sizes = [8, 128], strides = [1, 1]} : vector<8x512xf32> to vector<8x128xf32>
    %747 = vector.extract_strided_slice %745 {offsets = [0, 128], sizes = [8, 128], strides = [1, 1]} : vector<8x512xf32> to vector<8x128xf32>
    %748 = vector.extract_strided_slice %745 {offsets = [0, 256], sizes = [8, 128], strides = [1, 1]} : vector<8x512xf32> to vector<8x128xf32>
    %749 = vector.extract_strided_slice %745 {offsets = [0, 384], sizes = [8, 128], strides = [1, 1]} : vector<8x512xf32> to vector<8x128xf32>
    %750 = arith.mulf %747, %698 : vector<8x128xf32>
    %751 = arith.mulf %746, %749 : vector<8x128xf32>
    %752 = arith.addf %750, %751 : vector<8x128xf32>
    %753 = math.tanh %752 : vector<8x128xf32>
    %754 = arith.mulf %748, %753 : vector<8x128xf32>
    %c0_244 = arith.constant 0 : index
    %c0_245 = arith.constant 0 : index
    %755 = vector.load %arg4[%c0_244, %c0_245] : memref<128x512xf32, #tpu.memory_space<vmem>>, vector<128x512xf32>
    %cst_246 = arith.constant dense<0.000000e+00> : vector<8x512xf32>
    %756 = tpu.matmul %754, %755, %cst_246 {dimension_numbers = #tpu.dot_dimension_numbers<[1], [0], [0], [1], [0, 0, 1, 1], [], []>} : vector<8x128xf32>, vector<128x512xf32>, vector<8x512xf32> -> vector<8x512xf32>
    %c0_247 = arith.constant 0 : index
    %c0_248 = arith.constant 0 : index
    %757 = vector.load %arg5[%c0_247, %c0_248] : memref<128x512xf32, #tpu.memory_space<vmem>>, vector<128x512xf32>
    %cst_249 = arith.constant dense<0.000000e+00> : vector<8x512xf32>
    %758 = tpu.matmul %722, %757, %cst_249 {dimension_numbers = #tpu.dot_dimension_numbers<[1], [0], [0], [1], [0, 0, 1, 1], [], []>} : vector<8x128xf32>, vector<128x512xf32>, vector<8x512xf32> -> vector<8x512xf32>
    %759 = arith.addf %756, %758 : vector<8x512xf32>
    %c0_250 = arith.constant 0 : index
    %c0_251 = arith.constant 0 : index
    %760 = vector.load %arg6[%c0_250, %c0_251] : memref<1x512xf32, #tpu.memory_space<vmem>>, vector<1x512xf32>
    %761 = vector.broadcast %760 : vector<1x512xf32> to vector<8x512xf32>
    %762 = arith.addf %759, %761 : vector<8x512xf32>
    %763 = math.tanh %762 : vector<8x512xf32>
    %764 = vector.broadcast %26 : vector<1x512xf32> to vector<8x512xf32>
    %765 = arith.mulf %763, %764 : vector<8x512xf32>
    %766 = vector.broadcast %29 : vector<1x512xf32> to vector<8x512xf32>
    %767 = arith.addf %765, %766 : vector<8x512xf32>
    %768 = vector.extract_strided_slice %767 {offsets = [0, 0], sizes = [8, 128], strides = [1, 1]} : vector<8x512xf32> to vector<8x128xf32>
    %769 = vector.extract_strided_slice %767 {offsets = [0, 128], sizes = [8, 128], strides = [1, 1]} : vector<8x512xf32> to vector<8x128xf32>
    %770 = vector.extract_strided_slice %767 {offsets = [0, 256], sizes = [8, 128], strides = [1, 1]} : vector<8x512xf32> to vector<8x128xf32>
    %771 = vector.extract_strided_slice %767 {offsets = [0, 384], sizes = [8, 128], strides = [1, 1]} : vector<8x512xf32> to vector<8x128xf32>
    %772 = arith.mulf %769, %720 : vector<8x128xf32>
    %773 = arith.mulf %768, %771 : vector<8x128xf32>
    %774 = arith.addf %772, %773 : vector<8x128xf32>
    %775 = math.tanh %774 : vector<8x128xf32>
    %776 = arith.mulf %770, %775 : vector<8x128xf32>
    %c0_252 = arith.constant 0 : index
    %c0_253 = arith.constant 0 : index
    %777 = vector.load %arg7[%c0_252, %c0_253] : memref<1x128xf32, #tpu.memory_space<vmem>>, vector<1x128xf32>
    %778 = vector.broadcast %777 : vector<1x128xf32> to vector<8x128xf32>
    %779 = arith.mulf %776, %778 : vector<8x128xf32>
    %cst_254 = arith.constant dense<0.000000e+00> : vector<8xf32>
    %780 = vector.multi_reduction <add>, %779, %cst_254 [1] : vector<8x128xf32> to vector<8xf32>
    %781 = vector.shape_cast %780 : vector<8xf32> to vector<8x1xf32>
    %782 = arith.index_cast %c13_i32 : i32 to index
    %c0_255 = arith.constant 0 : index
    %783 = vector.load %arg8[%782, %c0_255] : memref<16x128xf32, #tpu.memory_space<vmem>>, vector<1x128xf32>
    %784 = vector.broadcast %781 : vector<8x1xf32> to vector<8x128xf32>
    %785 = vector.broadcast %783 : vector<1x128xf32> to vector<8x128xf32>
    %786 = arith.mulf %784, %785 : vector<8x128xf32>
    %787 = arith.addf %733, %786 : vector<8x128xf32>
    %c14_i32 = arith.constant 14 : i32
    %c8_i32_256 = arith.constant 8 : i32
    %788 = arith.muli %c14_i32, %c8_i32_256 : i32
    %789 = tpu.assume_multiple %788, 8 : i32
    %790 = arith.index_cast %789 : i32 to index
    %c0_257 = arith.constant 0 : index
    %791 = vector.load %arg11[%790, %c0_257] : memref<128x512xf32, #tpu.memory_space<vmem>>, vector<8x512xf32>
    %c0_258 = arith.constant 0 : index
    %c0_259 = arith.constant 0 : index
    %792 = vector.load %arg3[%c0_258, %c0_259] : memref<128x512xf32, #tpu.memory_space<vmem>>, vector<128x512xf32>
    %cst_260 = arith.constant dense<0.000000e+00> : vector<8x512xf32>
    %793 = tpu.matmul %754, %792, %cst_260 {dimension_numbers = #tpu.dot_dimension_numbers<[1], [0], [0], [1], [0, 0, 1, 1], [], []>} : vector<8x128xf32>, vector<128x512xf32>, vector<8x512xf32> -> vector<8x512xf32>
    %794 = arith.addf %791, %793 : vector<8x512xf32>
    %795 = math.tanh %794 : vector<8x512xf32>
    %796 = vector.broadcast %26 : vector<1x512xf32> to vector<8x512xf32>
    %797 = arith.mulf %795, %796 : vector<8x512xf32>
    %798 = vector.broadcast %29 : vector<1x512xf32> to vector<8x512xf32>
    %799 = arith.addf %797, %798 : vector<8x512xf32>
    %800 = vector.extract_strided_slice %799 {offsets = [0, 0], sizes = [8, 128], strides = [1, 1]} : vector<8x512xf32> to vector<8x128xf32>
    %801 = vector.extract_strided_slice %799 {offsets = [0, 128], sizes = [8, 128], strides = [1, 1]} : vector<8x512xf32> to vector<8x128xf32>
    %802 = vector.extract_strided_slice %799 {offsets = [0, 256], sizes = [8, 128], strides = [1, 1]} : vector<8x512xf32> to vector<8x128xf32>
    %803 = vector.extract_strided_slice %799 {offsets = [0, 384], sizes = [8, 128], strides = [1, 1]} : vector<8x512xf32> to vector<8x128xf32>
    %804 = arith.mulf %801, %752 : vector<8x128xf32>
    %805 = arith.mulf %800, %803 : vector<8x128xf32>
    %806 = arith.addf %804, %805 : vector<8x128xf32>
    %807 = math.tanh %806 : vector<8x128xf32>
    %808 = arith.mulf %802, %807 : vector<8x128xf32>
    %c0_261 = arith.constant 0 : index
    %c0_262 = arith.constant 0 : index
    %809 = vector.load %arg4[%c0_261, %c0_262] : memref<128x512xf32, #tpu.memory_space<vmem>>, vector<128x512xf32>
    %cst_263 = arith.constant dense<0.000000e+00> : vector<8x512xf32>
    %810 = tpu.matmul %808, %809, %cst_263 {dimension_numbers = #tpu.dot_dimension_numbers<[1], [0], [0], [1], [0, 0, 1, 1], [], []>} : vector<8x128xf32>, vector<128x512xf32>, vector<8x512xf32> -> vector<8x512xf32>
    %c0_264 = arith.constant 0 : index
    %c0_265 = arith.constant 0 : index
    %811 = vector.load %arg5[%c0_264, %c0_265] : memref<128x512xf32, #tpu.memory_space<vmem>>, vector<128x512xf32>
    %cst_266 = arith.constant dense<0.000000e+00> : vector<8x512xf32>
    %812 = tpu.matmul %776, %811, %cst_266 {dimension_numbers = #tpu.dot_dimension_numbers<[1], [0], [0], [1], [0, 0, 1, 1], [], []>} : vector<8x128xf32>, vector<128x512xf32>, vector<8x512xf32> -> vector<8x512xf32>
    %813 = arith.addf %810, %812 : vector<8x512xf32>
    %c0_267 = arith.constant 0 : index
    %c0_268 = arith.constant 0 : index
    %814 = vector.load %arg6[%c0_267, %c0_268] : memref<1x512xf32, #tpu.memory_space<vmem>>, vector<1x512xf32>
    %815 = vector.broadcast %814 : vector<1x512xf32> to vector<8x512xf32>
    %816 = arith.addf %813, %815 : vector<8x512xf32>
    %817 = math.tanh %816 : vector<8x512xf32>
    %818 = vector.broadcast %26 : vector<1x512xf32> to vector<8x512xf32>
    %819 = arith.mulf %817, %818 : vector<8x512xf32>
    %820 = vector.broadcast %29 : vector<1x512xf32> to vector<8x512xf32>
    %821 = arith.addf %819, %820 : vector<8x512xf32>
    %822 = vector.extract_strided_slice %821 {offsets = [0, 0], sizes = [8, 128], strides = [1, 1]} : vector<8x512xf32> to vector<8x128xf32>
    %823 = vector.extract_strided_slice %821 {offsets = [0, 128], sizes = [8, 128], strides = [1, 1]} : vector<8x512xf32> to vector<8x128xf32>
    %824 = vector.extract_strided_slice %821 {offsets = [0, 256], sizes = [8, 128], strides = [1, 1]} : vector<8x512xf32> to vector<8x128xf32>
    %825 = vector.extract_strided_slice %821 {offsets = [0, 384], sizes = [8, 128], strides = [1, 1]} : vector<8x512xf32> to vector<8x128xf32>
    %826 = arith.mulf %823, %774 : vector<8x128xf32>
    %827 = arith.mulf %822, %825 : vector<8x128xf32>
    %828 = arith.addf %826, %827 : vector<8x128xf32>
    %829 = math.tanh %828 : vector<8x128xf32>
    %830 = arith.mulf %824, %829 : vector<8x128xf32>
    %c0_269 = arith.constant 0 : index
    %c0_270 = arith.constant 0 : index
    %831 = vector.load %arg7[%c0_269, %c0_270] : memref<1x128xf32, #tpu.memory_space<vmem>>, vector<1x128xf32>
    %832 = vector.broadcast %831 : vector<1x128xf32> to vector<8x128xf32>
    %833 = arith.mulf %830, %832 : vector<8x128xf32>
    %cst_271 = arith.constant dense<0.000000e+00> : vector<8xf32>
    %834 = vector.multi_reduction <add>, %833, %cst_271 [1] : vector<8x128xf32> to vector<8xf32>
    %835 = vector.shape_cast %834 : vector<8xf32> to vector<8x1xf32>
    %836 = arith.index_cast %c14_i32 : i32 to index
    %c0_272 = arith.constant 0 : index
    %837 = vector.load %arg8[%836, %c0_272] : memref<16x128xf32, #tpu.memory_space<vmem>>, vector<1x128xf32>
    %838 = vector.broadcast %835 : vector<8x1xf32> to vector<8x128xf32>
    %839 = vector.broadcast %837 : vector<1x128xf32> to vector<8x128xf32>
    %840 = arith.mulf %838, %839 : vector<8x128xf32>
    %841 = arith.addf %787, %840 : vector<8x128xf32>
    %c15_i32 = arith.constant 15 : i32
    %c8_i32_273 = arith.constant 8 : i32
    %842 = arith.muli %c15_i32, %c8_i32_273 : i32
    %843 = tpu.assume_multiple %842, 8 : i32
    %844 = arith.index_cast %843 : i32 to index
    %c0_274 = arith.constant 0 : index
    %845 = vector.load %arg11[%844, %c0_274] : memref<128x512xf32, #tpu.memory_space<vmem>>, vector<8x512xf32>
    %c0_275 = arith.constant 0 : index
    %c0_276 = arith.constant 0 : index
    %846 = vector.load %arg3[%c0_275, %c0_276] : memref<128x512xf32, #tpu.memory_space<vmem>>, vector<128x512xf32>
    %cst_277 = arith.constant dense<0.000000e+00> : vector<8x512xf32>
    %847 = tpu.matmul %808, %846, %cst_277 {dimension_numbers = #tpu.dot_dimension_numbers<[1], [0], [0], [1], [0, 0, 1, 1], [], []>} : vector<8x128xf32>, vector<128x512xf32>, vector<8x512xf32> -> vector<8x512xf32>
    %848 = arith.addf %845, %847 : vector<8x512xf32>
    %849 = math.tanh %848 : vector<8x512xf32>
    %850 = vector.broadcast %26 : vector<1x512xf32> to vector<8x512xf32>
    %851 = arith.mulf %849, %850 : vector<8x512xf32>
    %852 = vector.broadcast %29 : vector<1x512xf32> to vector<8x512xf32>
    %853 = arith.addf %851, %852 : vector<8x512xf32>
    %854 = vector.extract_strided_slice %853 {offsets = [0, 0], sizes = [8, 128], strides = [1, 1]} : vector<8x512xf32> to vector<8x128xf32>
    %855 = vector.extract_strided_slice %853 {offsets = [0, 128], sizes = [8, 128], strides = [1, 1]} : vector<8x512xf32> to vector<8x128xf32>
    %856 = vector.extract_strided_slice %853 {offsets = [0, 256], sizes = [8, 128], strides = [1, 1]} : vector<8x512xf32> to vector<8x128xf32>
    %857 = vector.extract_strided_slice %853 {offsets = [0, 384], sizes = [8, 128], strides = [1, 1]} : vector<8x512xf32> to vector<8x128xf32>
    %858 = arith.mulf %855, %806 : vector<8x128xf32>
    %859 = arith.mulf %854, %857 : vector<8x128xf32>
    %860 = arith.addf %858, %859 : vector<8x128xf32>
    %861 = math.tanh %860 : vector<8x128xf32>
    %862 = arith.mulf %856, %861 : vector<8x128xf32>
    %c0_278 = arith.constant 0 : index
    %c0_279 = arith.constant 0 : index
    %863 = vector.load %arg4[%c0_278, %c0_279] : memref<128x512xf32, #tpu.memory_space<vmem>>, vector<128x512xf32>
    %cst_280 = arith.constant dense<0.000000e+00> : vector<8x512xf32>
    %864 = tpu.matmul %862, %863, %cst_280 {dimension_numbers = #tpu.dot_dimension_numbers<[1], [0], [0], [1], [0, 0, 1, 1], [], []>} : vector<8x128xf32>, vector<128x512xf32>, vector<8x512xf32> -> vector<8x512xf32>
    %c0_281 = arith.constant 0 : index
    %c0_282 = arith.constant 0 : index
    %865 = vector.load %arg5[%c0_281, %c0_282] : memref<128x512xf32, #tpu.memory_space<vmem>>, vector<128x512xf32>
    %cst_283 = arith.constant dense<0.000000e+00> : vector<8x512xf32>
    %866 = tpu.matmul %830, %865, %cst_283 {dimension_numbers = #tpu.dot_dimension_numbers<[1], [0], [0], [1], [0, 0, 1, 1], [], []>} : vector<8x128xf32>, vector<128x512xf32>, vector<8x512xf32> -> vector<8x512xf32>
    %867 = arith.addf %864, %866 : vector<8x512xf32>
    %c0_284 = arith.constant 0 : index
    %c0_285 = arith.constant 0 : index
    %868 = vector.load %arg6[%c0_284, %c0_285] : memref<1x512xf32, #tpu.memory_space<vmem>>, vector<1x512xf32>
    %869 = vector.broadcast %868 : vector<1x512xf32> to vector<8x512xf32>
    %870 = arith.addf %867, %869 : vector<8x512xf32>
    %871 = math.tanh %870 : vector<8x512xf32>
    %872 = vector.broadcast %26 : vector<1x512xf32> to vector<8x512xf32>
    %873 = arith.mulf %871, %872 : vector<8x512xf32>
    %874 = vector.broadcast %29 : vector<1x512xf32> to vector<8x512xf32>
    %875 = arith.addf %873, %874 : vector<8x512xf32>
    %876 = vector.extract_strided_slice %875 {offsets = [0, 0], sizes = [8, 128], strides = [1, 1]} : vector<8x512xf32> to vector<8x128xf32>
    %877 = vector.extract_strided_slice %875 {offsets = [0, 128], sizes = [8, 128], strides = [1, 1]} : vector<8x512xf32> to vector<8x128xf32>
    %878 = vector.extract_strided_slice %875 {offsets = [0, 256], sizes = [8, 128], strides = [1, 1]} : vector<8x512xf32> to vector<8x128xf32>
    %879 = vector.extract_strided_slice %875 {offsets = [0, 384], sizes = [8, 128], strides = [1, 1]} : vector<8x512xf32> to vector<8x128xf32>
    %880 = arith.mulf %877, %828 : vector<8x128xf32>
    %881 = arith.mulf %876, %879 : vector<8x128xf32>
    %882 = arith.addf %880, %881 : vector<8x128xf32>
    %883 = math.tanh %882 : vector<8x128xf32>
    %884 = arith.mulf %878, %883 : vector<8x128xf32>
    %c0_286 = arith.constant 0 : index
    %c0_287 = arith.constant 0 : index
    %885 = vector.load %arg7[%c0_286, %c0_287] : memref<1x128xf32, #tpu.memory_space<vmem>>, vector<1x128xf32>
    %886 = vector.broadcast %885 : vector<1x128xf32> to vector<8x128xf32>
    %887 = arith.mulf %884, %886 : vector<8x128xf32>
    %cst_288 = arith.constant dense<0.000000e+00> : vector<8xf32>
    %888 = vector.multi_reduction <add>, %887, %cst_288 [1] : vector<8x128xf32> to vector<8xf32>
    %889 = vector.shape_cast %888 : vector<8xf32> to vector<8x1xf32>
    %890 = arith.index_cast %c15_i32 : i32 to index
    %c0_289 = arith.constant 0 : index
    %891 = vector.load %arg8[%890, %c0_289] : memref<16x128xf32, #tpu.memory_space<vmem>>, vector<1x128xf32>
    %892 = vector.broadcast %889 : vector<8x1xf32> to vector<8x128xf32>
    %893 = vector.broadcast %891 : vector<1x128xf32> to vector<8x128xf32>
    %894 = arith.mulf %892, %893 : vector<8x128xf32>
    %895 = arith.addf %841, %894 : vector<8x128xf32>
    %c16_i32 = arith.constant 16 : i32
    %c0_290 = arith.constant 0 : index
    %c0_291 = arith.constant 0 : index
    %896 = vector.load %arg9[%c0_290, %c0_291] : memref<1x128xf32, #tpu.memory_space<vmem>>, vector<1x128xf32>
    %897 = vector.broadcast %896 : vector<1x128xf32> to vector<8x128xf32>
    %898 = arith.addf %895, %897 : vector<8x128xf32>
    %899 = arith.negf %898 : vector<8x128xf32>
    %900 = math.exp %899 : vector<8x128xf32>
    %cst_292 = arith.constant 1.000000e+00 : f32
    %901 = vector.broadcast %cst_292 : f32 to vector<8x128xf32>
    %902 = arith.addf %901, %900 : vector<8x128xf32>
    %903 = arith.divf %901, %902 : vector<8x128xf32>
    %c0_293 = arith.constant 0 : index
    %c0_294 = arith.constant 0 : index
    %904 = vector.load %arg10[%c0_293, %c0_294] : memref<8x128xf32, #tpu.memory_space<vmem>>, vector<8x128xf32>
    tpu.vector_store %arg10[%c0_293, %c0_294], %903 {strides = array<i32>} : memref<8x128xf32, #tpu.memory_space<vmem>>, vector<8x128xf32>,
    return
  }
}

</mosaic_0001>

<bundles_post_ra>
// kernel: lstm_forward.1
= control target key start
LH: loop header
LB: loop body
LE: loop exit
PB: predicated region body
PF: predicated region fallthrough
CT: control target
= control target key end

     0   :  { %v15581_v3 = vmov 0.0   ;;  %v15577_v8 = vmov 0   ;;  %v15575_v9 = vmov 2   ;;  %s15564_s3 = inlined_call_operand.vmem [shape: f32[128,512], index: 3, kind: input, shape index: {}]   ;;  %s15565_s0 = inlined_call_operand.vmem [shape: f32[128,8], index: 0, kind: input, shape index: {}]   ;;  %s15566_s5 = inlined_call_operand.vmem [shape: f32[128,512], index: 5, kind: input, shape index: {}]   ;;  %s15567_s4 = inlined_call_operand.vmem [shape: f32[128,512], index: 4, kind: input, shape index: {}]   ;;  %s15568_s1 = inlined_call_operand.vmem [shape: f32[8,512], index: 1, kind: input, shape index: {}]   ;;  %s15569_s2 = inlined_call_operand.vmem [shape: f32[1,512], index: 2, kind: input, shape index: {}]   ;;  %s15570_s6 = inlined_call_operand.vmem [shape: f32[1,512], index: 6, kind: input, shape index: {}]   ;;  %s15571_s7 = inlined_call_operand.vmem [shape: f32[1,128], index: 7, kind: input, shape index: {}]   ;;  %s15572_s8 = inlined_call_operand.vmem [shape: f32[16,128], index: 8, kind: input, shape index: {}]   ;;  %s15573_s9 = inlined_call_operand.vmem [shape: f32[1,128], index: 9, kind: input, shape index: {}]   ;;  %s15574_s10 = inlined_call_operand.vmem [shape: f32[8,128], index: 10, kind: output, shape index: {}]  }
   0x1   :  { %v822_v0 = vld [vmem:[%s15564_s3 + $0x8] sm:$0xff]  ;;  %v824_v2 = vld [vmem:[%s15564_s3 + $0x18] sm:$0xff]  ;;  %949 = vmatprep.mubr.f32.mxu0 %v15581_v3  ;;  %1020 = vmatprep.mubr.f32.mxu1 %v15581_v3  ;;  %v821_v6 = vld [vmem:[%s15564_s3] sm:$0xff] }
   0x2   :  { %v826_v1 = vld [vmem:[%s15564_s3 + $0x28] sm:$0xff]  ;;  %v828_v5 = vld [vmem:[%s15564_s3 + $0x38] sm:$0xff]  ;;  %v825_v7 = vld [vmem:[%s15564_s3 + $0x20] sm:$0xff]  ;;  %11990 = vset.pattern.permute.xlu0 %v15577_v8  ;;  %11992 = vset.pattern.permute.xlu1 %v15575_v9 }
   0x3   :  { %v12429_v4 = vpack.c.bf16 %v826_v1, %v822_v0  ;;  %v12442_v10 = vpack.c.bf16 %v828_v5, %v824_v2  ;;  %v12444_v11 = vpack.c.bf16 %v825_v7, %v821_v6  ;;  %v823_v12 = vld [vmem:[%s15564_s3 + $0x10] sm:$0xff]  ;;  %v830_v14 = vld [vmem:[%s15564_s3 + $0x48] sm:$0xff]  ;;  %v832_v17 = vld [vmem:[%s15564_s3 + $0x58] sm:$0xff] }
   0x4   :  { %v827_v13 = vld [vmem:[%s15564_s3 + $0x30] sm:$0xff]  ;;  %v834_v16 = vld [vmem:[%s15564_s3 + $0x68] sm:$0xff]  ;;  %v836_v18 = vld [vmem:[%s15564_s3 + $0x78] sm:$0xff] }
   0x5   :  { %15842 = vst [vmem:[#allocation3_spill] sm:$0xff] %v12429_v4  ;;  %15843 = vst [vmem:[#allocation4_spill] sm:$0xff] %v12442_v10  ;;  %8851 = vmatprep.subr.bf16.mxu0 %v12429_v4  ;;  %v12456_v15 = vpack.c.bf16 %v827_v13, %v823_v12  ;;  %8883 = vmatprep.subr.bf16.mxu1 %v12442_v10  ;;  %v12469_v19 = vpack.c.bf16 %v834_v16, %v830_v14  ;;  %v829_v21 = vld [vmem:[%s15564_s3 + $0x40] sm:$0xff]  ;;  %v831_v23 = vld [vmem:[%s15564_s3 + $0x50] sm:$0xff] }
   0x6   :  { %15844 = vst [vmem:[#allocation5_spill] sm:$0xff] %v12444_v11  ;;  %8853 = vmatpush1.bf16.msra.mxu0 %v12444_v11  ;;  %v12471_v20 = vpack.c.bf16 %v836_v18, %v832_v17  ;;  %v833_v22 = vld [vmem:[%s15564_s3 + $0x60] sm:$0xff]  ;;  %v835_v25 = vld [vmem:[%s15564_s3 + $0x70] sm:$0xff]  ;;  %v838_v26 = vld [vmem:[%s15564_s3 + $0x88] sm:$0xff] }
   0x7   :  { %15845 = vst [vmem:[#allocation6_spill] sm:$0xff] %v12456_v15  ;;  %15846 = vst [vmem:[#allocation7_spill] sm:$0xff] %v12469_v19  ;;  %8885 = vmatpush1.bf16.msra.mxu1 %v12456_v15  ;;  %v12483_v24 = vpack.c.bf16 %v833_v22, %v829_v21  ;;  %v842_v27 = vld [vmem:[%s15564_s3 + $0xa8] sm:$0xff]  ;;  %8855 = vmatprep.subr.bf16.mxu0 %v12469_v19  ;;  %v12496_v28 = vpack.c.bf16 %v835_v25, %v831_v23  ;;  %v840_v30 = vld [vmem:[%s15564_s3 + $0x98] sm:$0xff] }
   0x8   :  { %15847 = vst [vmem:[#allocation8_spill] sm:$0xff] %v12471_v20  ;;  %8887 = vmatprep.subr.bf16.mxu1 %v12471_v20  ;;  %v12498_v29 = vpack.c.bf16 %v842_v27, %v838_v26  ;;  %v844_v31 = vld [vmem:[%s15564_s3 + $0xb8] sm:$0xff]  ;;  %v837_v32 = vld [vmem:[%s15564_s3 + $0x80] sm:$0xff]  ;;  %v839_v35 = vld [vmem:[%s15564_s3 + $0x90] sm:$0xff] }
   0x9   :  { %15848 = vst [vmem:[#allocation9_spill] sm:$0xff] %v12483_v24  ;;  %15849 = vst [vmem:[#allocation10_spill] sm:$0xff] %v12496_v28  ;;  %v12509_v33 = vpack.c.bf16 %v844_v31, %v840_v30  ;;  %v841_v34 = vld [vmem:[%s15564_s3 + $0xa0] sm:$0xff]  ;;  %v843_v36 = vld [vmem:[%s15564_s3 + $0xb0] sm:$0xff] }
   0xa   :  { %15850 = vst [vmem:[#allocation11_spill] sm:$0xff] %v12498_v29  ;;  %8857 = vmatpush1.bf16.msra.mxu0 %v12483_v24  ;;  %v12521_v37 = vpack.c.bf16 %v841_v34, %v837_v32  ;;  %v846_v38 = vld [vmem:[%s15564_s3 + $0xc8] sm:$0xff]  ;;  %v848_v40 = vld [vmem:[%s15564_s3 + $0xd8] sm:$0xff]  ;;  %v12534_v41 = vpack.c.bf16 %v843_v36, %v839_v35  ;;  %v845_v44 = vld [vmem:[%s15564_s3 + $0xc0] sm:$0xff] }
   0xb   :  { %15851 = vst [vmem:[#allocation12_spill] sm:$0xff] %v12509_v33  ;;  %v850_v39 = vld [vmem:[%s15564_s3 + $0xe8] sm:$0xff]  ;;  %8889 = vmatpush1.bf16.msra.mxu1 %v12496_v28  ;;  %8859 = vmatprep.subr.bf16.mxu0 %v12498_v29  ;;  %v852_v43 = vld [vmem:[%s15564_s3 + $0xf8] sm:$0xff]  ;;  %v849_v45 = vld [vmem:[%s15564_s3 + $0xe0] sm:$0xff] }
   0xc   :  { %15852 = vst [vmem:[#allocation13_spill] sm:$0xff] %v12521_v37  ;;  %15853 = vst [vmem:[#allocation14_spill] sm:$0xff] %v12534_v41  ;;  %v12536_v42 = vpack.c.bf16 %v850_v39, %v846_v38  ;;  %8891 = vmatprep.subr.bf16.mxu1 %v12509_v33  ;;  %v12548_v46 = vpack.c.bf16 %v852_v43, %v848_v40  ;;  %v847_v47 = vld [vmem:[%s15564_s3 + $0xd0] sm:$0xff]  ;;  %v854_v49 = vld [vmem:[%s15564_s3 + $0x108] sm:$0xff]  ;;  %v12569_v53 = vpack.c.bf16 %v849_v45, %v845_v44 }
   0xd   :  { %v851_v48 = vld [vmem:[%s15564_s3 + $0xf0] sm:$0xff]  ;;  %v858_v50 = vld [vmem:[%s15564_s3 + $0x128] sm:$0xff]  ;;  %v856_v51 = vld [vmem:[%s15564_s3 + $0x118] sm:$0xff] }
   0xe   :  { %15854 = vst [vmem:[#allocation15_spill] sm:$0xff] %v12536_v42  ;;  %15855 = vst [vmem:[#allocation16_spill] sm:$0xff] %v12548_v46  ;;  %v860_v52 = vld [vmem:[%s15564_s3 + $0x138] sm:$0xff]  ;;  %8861 = vmatpush1.bf16.msra.mxu0 %v12521_v37  ;;  %v12573_v54 = vpack.c.bf16 %v851_v48, %v847_v47  ;;  %v12575_v55 = vpack.c.bf16 %v858_v50, %v854_v49  ;;  %v853_v56 = vld [vmem:[%s15564_s3 + $0x100] sm:$0xff] }
   0xf   :  { %15856 = vst [vmem:[#allocation17_spill] sm:$0xff] %v12569_v53  ;;  %8893 = vmatpush1.bf16.msra.mxu1 %v12534_v41  ;;  %8863 = vmatprep.subr.bf16.mxu0 %v12536_v42  ;;  %v857_v57 = vld [vmem:[%s15564_s3 + $0x120] sm:$0xff]  ;;  %v855_v58 = vld [vmem:[%s15564_s3 + $0x110] sm:$0xff]  ;;  %v12587_v59 = vpack.c.bf16 %v860_v52, %v856_v51  ;;  %v862_v61 = vld [vmem:[%s15564_s3 + $0x148] sm:$0xff]  ;;  %v15579_v51 = vmov 1  }
  0x10   :  { %15857 = vst [vmem:[#allocation18_spill] sm:$0xff] %v12573_v54  ;;  %15858 = vst [vmem:[#allocation19_spill] sm:$0xff] %v12575_v55  ;;  %8895 = vmatprep.subr.bf16.mxu1 %v12548_v46  ;;  %v859_v60 = vld [vmem:[%s15564_s3 + $0x130] sm:$0xff]  ;;  %v866_v62 = vld [vmem:[%s15564_s3 + $0x168] sm:$0xff]  ;;  %v12605_v1 = vpack.c.bf16 %v857_v57, %v853_v56 }
  0x11   :  { %15859 = vst [vmem:[#allocation20_spill] sm:$0xff] %v12587_v59  ;;  %v864_v63 = vld [vmem:[%s15564_s3 + $0x158] sm:$0xff]  ;;  %v12609_v2 = vpack.c.bf16 %v859_v60, %v855_v58  ;;  %v12611_v5 = vpack.c.bf16 %v866_v62, %v862_v61  ;;  %v861_v6 = vld [vmem:[%s15564_s3 + $0x140] sm:$0xff]  ;;  %v863_v12 = vld [vmem:[%s15564_s3 + $0x150] sm:$0xff] }
  0x12   :  { %v868_v0 = vld [vmem:[%s15564_s3 + $0x178] sm:$0xff]  ;;  %8865 = vmatpush1.bf16.msra.mxu0 %v12569_v53  ;;  %15860 = vst [vmem:[#allocation21_spill] sm:$0xff] %v12605_v1  ;;  %v865_v7 = vld [vmem:[%s15564_s3 + $0x160] sm:$0xff]  ;;  %v867_v14 = vld [vmem:[%s15564_s3 + $0x170] sm:$0xff] }
  0x13   :  { %8897 = vmatpush1.bf16.msra.mxu1 %v12573_v54  ;;  %8867 = vmatprep.subr.bf16.mxu0 %v12575_v55  ;;  %15861 = vst [vmem:[#allocation22_spill] sm:$0xff] %v12609_v2  ;;  %15862 = vst [vmem:[#allocation23_spill] sm:$0xff] %v12611_v5  ;;  %v12623_v13 = vpack.c.bf16 %v868_v0, %v864_v63  ;;  %v870_v16 = vld [vmem:[%s15564_s3 + $0x188] sm:$0xff]  ;;  %v872_v18 = vld [vmem:[%s15564_s3 + $0x198] sm:$0xff]  ;;  %v12641_v22 = vpack.c.bf16 %v865_v7, %v861_v6 }
  0x14   :  { %8899 = vmatprep.subr.bf16.mxu1 %v12587_v59  ;;  %v874_v17 = vld [vmem:[%s15564_s3 + $0x1a8] sm:$0xff]  ;;  %v876_v21 = vld [vmem:[%s15564_s3 + $0x1b8] sm:$0xff]  ;;  %v869_v23 = vld [vmem:[%s15564_s3 + $0x180] sm:$0xff]  ;;  %v12648_v25 = vpack.c.bf16 %v867_v14, %v863_v12 }
  0x15   :  { %15863 = vst [vmem:[#allocation24_spill] sm:$0xff] %v12623_v13  ;;  %15864 = vst [vmem:[#allocation25_spill] sm:$0xff] %v12641_v22  ;;  %v12650_v26 = vpack.c.bf16 %v874_v17, %v870_v16  ;;  %v873_v27 = vld [vmem:[%s15564_s3 + $0x1a0] sm:$0xff]  ;;  %v871_v30 = vld [vmem:[%s15564_s3 + $0x190] sm:$0xff]  ;;  %v12662_v32 = vpack.c.bf16 %v876_v21, %v872_v18 }
  0x16   :  { %8869 = vmatpush1.bf16.msra.mxu0 %v12605_v1  ;;  %15865 = vst [vmem:[#allocation26_spill] sm:$0xff] %v12648_v25  ;;  %v36_v31 = vld [vmem:[%s15565_s0] sm:$0xff]  ;;  %v875_v34 = vld [vmem:[%s15564_s3 + $0x1b0] sm:$0xff]  ;;  %v878_v35 = vld [vmem:[%s15564_s3 + $0x1c8] sm:$0xff]  ;;  %v12680_v40 = vpack.c.bf16 %v873_v27, %v869_v23 }
  0x17   :  { %8901 = vmatpush1.bf16.msra.mxu1 %v12609_v2  ;;  %8871 = vmatprep.subr.bf16.mxu0 %v12611_v5  ;;  %15866 = vst [vmem:[#allocation27_spill] sm:$0xff] %v12650_v26  ;;  %15867 = vst [vmem:[#allocation28_spill] sm:$0xff] %v12662_v32  ;;  %v882_v36 = vld [vmem:[%s15564_s3 + $0x1e8] sm:$0xff]  ;;  %v880_v38 = vld [vmem:[%s15564_s3 + $0x1d8] sm:$0xff]  ;;  %v12684_v43 = vpack.c.bf16 %v875_v34, %v871_v30 }
  0x18   :  { %8903 = vmatprep.subr.bf16.mxu1 %v12623_v13  ;;  %55 = vperm.xlu0 %11990, %v36_v31   ;;  %v884_v39 = vld [vmem:[%s15564_s3 + $0x1f8] sm:$0xff]  ;;  %15868 = vst [vmem:[#allocation29_spill] sm:$0xff] %v12680_v40  ;;  %v12686_v44 = vpack.c.bf16 %v882_v36, %v878_v35  ;;  %v877_v45 = vld [vmem:[%s15564_s3 + $0x1c0] sm:$0xff]  ;;  %v879_v48 = vld [vmem:[%s15564_s3 + $0x1d0] sm:$0xff] }
  0x19   :  { %521 = vperm.xlu1 %11992, %v36_v31   ;;  %15869 = vst [vmem:[#allocation30_spill] sm:$0xff] %v12684_v43  ;;  %v881_v47 = vld [vmem:[%s15564_s3 + $0x1e0] sm:$0xff]  ;;  %v12698_v49 = vpack.c.bf16 %v884_v39, %v880_v38  ;;  %v883_v50 = vld [vmem:[%s15564_s3 + $0x1f0] sm:$0xff]  ;;  %v1113_v52 = vld [vmem:[%s15566_s5 + $0x8] sm:$0xff] }
  0x1a   :  { %8873 = vmatpush1.bf16.msra.mxu0 %v12641_v22  ;;  %15870 = vst [vmem:[#allocation31_spill] sm:$0xff] %v12686_v44  ;;  %v1117_v56 = vld [vmem:[%s15566_s5 + $0x28] sm:$0xff]  ;;  %v1115_v57 = vld [vmem:[%s15566_s5 + $0x18] sm:$0xff]  ;;  %v12718_v60 = vpack.c.bf16 %v881_v47, %v877_v45  ;;  %v12722_v61 = vpack.c.bf16 %v883_v50, %v879_v48  ;;  %v1112_v63 = vld [vmem:[%s15566_s5] sm:$0xff] }
  0x1b   :  { %8905 = vmatpush1.bf16.msra.mxu1 %v12648_v25  ;;  %8875 = vmatprep.subr.bf16.mxu0 %v12650_v26  ;;  %15871 = vst [vmem:[#allocation32_spill] sm:$0xff] %v12698_v49  ;;  %v1119_v58 = vld [vmem:[%s15566_s5 + $0x38] sm:$0xff]  ;;  %v12724_v62 = vpack.c.bf16 %v1117_v56, %v1113_v52  ;;  %v1116_v0 = vld [vmem:[%s15566_s5 + $0x20] sm:$0xff]  ;;  %v1114_v6 = vld [vmem:[%s15566_s5 + $0x10] sm:$0xff] }
  0x1c   :  { %8907 = vmatprep.subr.bf16.mxu1 %v12662_v32  ;;  %11991 = vset.pattern.permute.xlu0 %v15579_v51  ;;  %15872 = vst [vmem:[#allocation33_spill] sm:$0xff] %v12718_v60  ;;  %15873 = vst [vmem:[#allocation34_spill] sm:$0xff] %v12722_v61  ;;  %v12736_v7 = vpack.c.bf16 %v1119_v58, %v1115_v57  ;;  %v1118_v12 = vld [vmem:[%s15566_s5 + $0x30] sm:$0xff]  ;;  %v1121_v14 = vld [vmem:[%s15566_s5 + $0x48] sm:$0xff]  ;;  %v12755_v21 = vpack.c.bf16 %v1116_v0, %v1112_v63 }
  0x1d   :  { %306 = vperm.xlu0 %11991, %v36_v31   ;;  %11993 = vset.pattern.permute.xlu1 %v15577_v8  ;;  %15874 = vst [vmem:[#allocation35_spill] sm:$0xff] %v12724_v62  ;;  %v1125_v16 = vld [vmem:[%s15566_s5 + $0x68] sm:$0xff]  ;;  %v1123_v17 = vld [vmem:[%s15566_s5 + $0x58] sm:$0xff]  ;;  %v12759_v23 = vpack.c.bf16 %v1118_v12, %v1114_v6  ;;  %v1120_v30 = vld [vmem:[%s15566_s5 + $0x40] sm:$0xff] }
  0x1e   :  { %8877 = vmatpush1.bf16.msra.mxu0 %v12680_v40  ;;  %15875 = vst [vmem:[#allocation36_spill] sm:$0xff] %v12736_v7  ;;  %v1127_v18 = vld [vmem:[%s15566_s5 + $0x78] sm:$0xff]  ;;  %15876 = vst [vmem:[#allocation37_spill] sm:$0xff] %v12755_v21  ;;  %v12761_v27 = vpack.c.bf16 %v1125_v16, %v1121_v14  ;;  %v1124_v31 = vld [vmem:[%s15566_s5 + $0x60] sm:$0xff] }
  0x1f   :  { %8909 = vmatpush1.bf16.msra.mxu1 %v12684_v43  ;;  %8879 = vmatprep.subr.bf16.mxu0 %v12686_v44  ;;  %15877 = vst [vmem:[#allocation38_spill] sm:$0xff] %v12759_v23  ;;  %v1122_v34 = vld [vmem:[%s15566_s5 + $0x50] sm:$0xff]  ;;  %v12773_v35 = vpack.c.bf16 %v1127_v18, %v1123_v17  ;;  %v1129_v38 = vld [vmem:[%s15566_s5 + $0x88] sm:$0xff]  ;;  %v1131_v45 = vld [vmem:[%s15566_s5 + $0x98] sm:$0xff]  ;;  %v12793_v48 = vpack.c.bf16 %v1124_v31, %v1120_v30 }
  0x20   :  { %8911 = vmatprep.subr.bf16.mxu1 %v12698_v49  ;;  %15878 = vst [vmem:[#allocation39_spill] sm:$0xff] %v12761_v27  ;;  %v1126_v36 = vld [vmem:[%s15566_s5 + $0x70] sm:$0xff]  ;;  %v1133_v39 = vld [vmem:[%s15566_s5 + $0xa8] sm:$0xff]  ;;  %v1135_v47 = vld [vmem:[%s15566_s5 + $0xb8] sm:$0xff] }
  0x21   :  { %11995 = vset.pattern.permute.xlu0 %v15575_v9  ;;  %15879 = vst [vmem:[#allocation40_spill] sm:$0xff] %v12773_v35  ;;  %15880 = vst [vmem:[#allocation41_spill] sm:$0xff] %v12793_v48  ;;  %v12797_v50 = vpack.c.bf16 %v1126_v36, %v1122_v34  ;;  %v12799_v52 = vpack.c.bf16 %v1133_v39, %v1129_v38  ;;  %v1128_v56 = vld [vmem:[%s15566_s5 + $0x80] sm:$0xff]  ;;  %v1130_v58 = vld [vmem:[%s15566_s5 + $0x90] sm:$0xff]  ;;  %v12811_v63 = vpack.c.bf16 %v1135_v47, %v1131_v45 }
  0x22   :  { %8881 = vmatpush1.bf16.msra.mxu0 %v12718_v60  ;;  %v1132_v57 = vld [vmem:[%s15566_s5 + $0xa0] sm:$0xff]  ;;  %v1134_v0 = vld [vmem:[%s15566_s5 + $0xb0] sm:$0xff]  ;;  %v1137_v6 = vld [vmem:[%s15566_s5 + $0xc8] sm:$0xff] }
  0x23   :  { %8913 = vmatpush1.bf16.msra.mxu1 %v12722_v61  ;;  %8915 = vmatprep.subr.bf16.mxu0 %v12724_v62  ;;  %15881 = vst [vmem:[#allocation42_spill] sm:$0xff] %v12797_v50  ;;  %15882 = vst [vmem:[#allocation43_spill] sm:$0xff] %v12799_v52  ;;  %v1141_v12 = vld [vmem:[%s15566_s5 + $0xe8] sm:$0xff]  ;;  %v1139_v14 = vld [vmem:[%s15566_s5 + $0xd8] sm:$0xff]  ;;  %v12831_v17 = vpack.c.bf16 %v1132_v57, %v1128_v56  ;;  %v12835_v18 = vpack.c.bf16 %v1134_v0, %v1130_v58 }
  0x24   :  { %8947 = vmatprep.subr.bf16.mxu1 %v12736_v7  ;;  %15883 = vst [vmem:[#allocation44_spill] sm:$0xff] %v12811_v63  ;;  %v1143_v16 = vld [vmem:[%s15566_s5 + $0xf8] sm:$0xff]  ;;  %v12837_v30 = vpack.c.bf16 %v1141_v12, %v1137_v6  ;;  %v1136_v31 = vld [vmem:[%s15566_s5 + $0xc0] sm:$0xff]  ;;  %v1138_v36 = vld [vmem:[%s15566_s5 + $0xd0] sm:$0xff] }
  0x25   :  { %950 = vmatmul.mubr.f32.vlgmr.msra.gmra.mrb[0].mxu0 %v15581_v3  ;;  %15884 = vst [vmem:[#allocation45_spill] sm:$0xff] %v12831_v17  ;;  %15885 = vst [vmem:[#allocation46_spill] sm:$0xff] %v12835_v18  ;;  %v1140_v34 = vld [vmem:[%s15566_s5 + $0xe0] sm:$0xff]  ;;  %v12849_v38 = vpack.c.bf16 %v1143_v16, %v1139_v14  ;;  %v1142_v39 = vld [vmem:[%s15566_s5 + $0xf0] sm:$0xff] }
  0x26   :  { %1021 = vmatmul.mubr.f32.vlgmr.msra.gmra.mrb[0].mxu1 %v15581_v3  ;;  %8917 = vmatpush1.bf16.msra.mxu0 %v12755_v21  ;;  %15886 = vst [vmem:[#allocation47_spill] sm:$0xff] %v12837_v30  ;;  %v1145_v45 = vld [vmem:[%s15566_s5 + $0x108] sm:$0xff]  ;;  %v1147_v56 = vld [vmem:[%s15566_s5 + $0x118] sm:$0xff]  ;;  %v12867_v58 = vpack.c.bf16 %v1140_v34, %v1136_v31  ;;  %v12871_v0 = vpack.c.bf16 %v1142_v39, %v1138_v36  ;;  %v1144_v12 = vld [vmem:[%s15566_s5 + $0x100] sm:$0xff] }
  0x27   :  { %8949 = vmatpush1.bf16.msra.mxu1 %v12759_v23  ;;  %8919 = vmatprep.subr.bf16.mxu0 %v12761_v27  ;;  %15887 = vst [vmem:[#allocation48_spill] sm:$0xff] %v12849_v38  ;;  %v1149_v47 = vld [vmem:[%s15566_s5 + $0x128] sm:$0xff]  ;;  %v1151_v57 = vld [vmem:[%s15566_s5 + $0x138] sm:$0xff]  ;;  %v1148_v14 = vld [vmem:[%s15566_s5 + $0x120] sm:$0xff] }
  0x28   :  { %8951 = vmatprep.subr.bf16.mxu1 %v12773_v35  ;;  %1240 = vmatprep.mubr.f32.mxu0 %v15581_v3  ;;  %15888 = vst [vmem:[#allocation49_spill] sm:$0xff] %v12867_v58  ;;  %15889 = vst [vmem:[#allocation50_spill] sm:$0xff] %v12871_v0  ;;  %v12873_v6 = vpack.c.bf16 %v1149_v47, %v1145_v45  ;;  %v1146_v16 = vld [vmem:[%s15566_s5 + $0x110] sm:$0xff]  ;;  %v12885_v31 = vpack.c.bf16 %v1151_v57, %v1147_v56  ;;  %v1153_v36 = vld [vmem:[%s15566_s5 + $0x148] sm:$0xff] }
  0x29   :  { %1311 = vmatprep.mubr.f32.mxu1 %v15581_v3  ;;  %v1150_v34 = vld [vmem:[%s15566_s5 + $0x130] sm:$0xff]  ;;  %v1157_v39 = vld [vmem:[%s15566_s5 + $0x168] sm:$0xff]  ;;  %v1155_v45 = vld [vmem:[%s15566_s5 + $0x158] sm:$0xff]  ;;  %v12903_v56 = vpack.c.bf16 %v1148_v14, %v1144_v12 }
  0x2a   :  { %8921 = vmatpush1.bf16.msra.mxu0 %v12793_v48  ;;  %15890 = vst [vmem:[#allocation51_spill] sm:$0xff] %v12873_v6  ;;  %15891 = vst [vmem:[#allocation52_spill] sm:$0xff] %v12885_v31  ;;  %v1159_v47 = vld [vmem:[%s15566_s5 + $0x178] sm:$0xff]  ;;  %v12907_v57 = vpack.c.bf16 %v1150_v34, %v1146_v16  ;;  %v12909_v9 = vpack.c.bf16 %v1157_v39, %v1153_v36  ;;  %v1152_v8 = vld [vmem:[%s15566_s5 + $0x140] sm:$0xff] }
  0x2b   :  { %8953 = vmatpush1.bf16.msra.mxu1 %v12797_v50  ;;  %8923 = vmatprep.subr.bf16.mxu0 %v12799_v52  ;;  %15892 = vst [vmem:[#allocation53_spill] sm:$0xff] %v12903_v56  ;;  %v1156_v51 = vld [vmem:[%s15566_s5 + $0x160] sm:$0xff]  ;;  %v1154_v12 = vld [vmem:[%s15566_s5 + $0x150] sm:$0xff]  ;;  %v12921_v14 = vpack.c.bf16 %v1159_v47, %v1155_v45  ;;  %v1161_v34 = vld [vmem:[%s15566_s5 + $0x188] sm:$0xff] }
  0x2c   :  { %8955 = vmatprep.subr.bf16.mxu1 %v12811_v63  ;;  %15893 = vst [vmem:[#allocation54_spill] sm:$0xff] %v12907_v57  ;;  %15894 = vst [vmem:[#allocation55_spill] sm:$0xff] %v12909_v9  ;;  %v1158_v16 = vld [vmem:[%s15566_s5 + $0x170] sm:$0xff]  ;;  %v1165_v36 = vld [vmem:[%s15566_s5 + $0x1a8] sm:$0xff]  ;;  %v12939_v47 = vpack.c.bf16 %v1156_v51, %v1152_v8 }
  0x2d   :  { %15895 = vst [vmem:[#allocation56_spill] sm:$0xff] %v12921_v14  ;;  %v1163_v39 = vld [vmem:[%s15566_s5 + $0x198] sm:$0xff]  ;;  %v12943_v3 = vpack.c.bf16 %v1158_v16, %v1154_v12  ;;  %v1162_v8 = vld [vmem:[%s15566_s5 + $0x190] sm:$0xff]  ;;  %v1169_v16 = vld [vmem:[%s15566_s5 + $0x1c8] sm:$0xff] }
  0x2e   :  { %8925 = vmatpush1.bf16.msra.mxu0 %v12831_v17  ;;  %v1167_v45 = vld [vmem:[%s15566_s5 + $0x1b8] sm:$0xff]  ;;  %15896 = vst [vmem:[#allocation57_spill] sm:$0xff] %v12939_v47  ;;  %v1166_v12 = vld [vmem:[%s15566_s5 + $0x1b0] sm:$0xff] }
  0x2f   :  { %8957 = vmatpush1.bf16.msra.mxu1 %v12835_v18  ;;  %8927 = vmatprep.subr.bf16.mxu0 %v12837_v30  ;;  %15897 = vst [vmem:[#allocation58_spill] sm:$0xff] %v12943_v3  ;;  %v12957_v51 = vpack.c.bf16 %v1167_v45, %v1163_v39  ;;  %v1175_v39 = vld [vmem:[%s15566_s5 + $0x1f8] sm:$0xff] }
  0x30   :  { %8959 = vmatprep.subr.bf16.mxu1 %v12849_v38  ;;  %v8830_v48 = vld [vmem:[%s15568_s1 + $0x2] ss:$8 sm:$0xf] }
  0x31   :  { %15899 = vst [vmem:[#allocation60_spill] sm:$0xff] %v12957_v51  ;;  %v13402_v35 = vld [vmem:[%s15565_s0 + $0x58] sm:$0xff] }
  0x32   :  { %8929 = vmatpush1.bf16.msra.mxu0 %v12867_v58  ;;  %v13374_v58 = vld [vmem:[%s15565_s0 + $0x50] sm:$0xff] }
  0x33   :  { %8961 = vmatpush1.bf16.msra.mxu1 %v12871_v0  ;;  %8931 = vmatprep.subr.bf16.mxu0 %v12873_v6  ;;  %v1160_v6 = vld [vmem:[%s15566_s5 + $0x180] sm:$0xff] }
  0x34   :  { %8963 = vmatprep.subr.bf16.mxu1 %v12885_v31  ;;  %v12945_v31 = vpack.c.bf16 %v1165_v36, %v1161_v34  ;;  %v1164_v0 = vld [vmem:[%s15566_s5 + $0x1a0] sm:$0xff]  ;;  %v1173_v34 = vld [vmem:[%s15566_s5 + $0x1e8] sm:$0xff]  ;;  %v1171_v36 = vld [vmem:[%s15566_s5 + $0x1d8] sm:$0xff] }
  0x35   :  { %v12975_v45 = vpack.c.bf16 %v1164_v0, %v1160_v6  ;;  %v1168_v0 = vld [vmem:[%s15566_s5 + $0x1c0] sm:$0xff] }
  0x36   :  { %8933 = vmatpush1.bf16.msra.mxu0 %v12903_v56  ;;  %15898 = vst [vmem:[#allocation59_spill] sm:$0xff] %v12945_v31  ;;  %v1172_v6 = vld [vmem:[%s15566_s5 + $0x1e0] sm:$0xff] }
  0x37   :  { %8965 = vmatpush1.bf16.msra.mxu1 %v12907_v57  ;;  %8935 = vmatprep.subr.bf16.mxu0 %v12909_v9  ;;  %15900 = vst [vmem:[#allocation61_spill] sm:$0xff] %v12975_v45  ;;  %v12981_v9 = vpack.c.bf16 %v1173_v34, %v1169_v16  ;;  %v12984_v57 = vpack.c.bf16 %v1175_v39, %v1171_v36  ;;  %v1174_v16 = vld [vmem:[%s15566_s5 + $0x1f0] sm:$0xff]  ;;  %v1049_v36 = vld [vmem:[%s15567_s4 + $0x8] sm:$0xff]  ;;  %v35_v56 = vld [vmem:[%s15569_s2] sm:$0xf] }
  0x38   :  { %8967 = vmatprep.subr.bf16.mxu1 %v12921_v14  ;;  %v12979_v14 = vpack.c.bf16 %v1166_v12, %v1162_v8  ;;  %v1170_v8 = vld [vmem:[%s15566_s5 + $0x1d0] sm:$0xff]  ;;  %v12999_v12 = vpack.c.bf16 %v1172_v6, %v1168_v0  ;;  %v1053_v39 = vld [vmem:[%s15567_s4 + $0x28] sm:$0xff]  ;;  %v1051_v0 = vld [vmem:[%s15567_s4 + $0x18] sm:$0xff] }
  0x39   :  { %15902 = vst [vmem:[#allocation63_spill] sm:$0xff] %v12981_v9  ;;  %15903 = vst [vmem:[#allocation64_spill] sm:$0xff] %v12984_v57  ;;  %v13004_v34 = vpack.c.bf16 %v1174_v16, %v1170_v8  ;;  %v13017_v6 = vpack.c.bf16 %v1053_v39, %v1049_v36  ;;  %v1055_v8 = vld [vmem:[%s15567_s4 + $0x38] sm:$0xff]  ;;  %v1048_v16 = vld [vmem:[%s15567_s4] sm:$0xff] }
  0x3a   :  { %8937 = vmatpush1.bf16.msra.mxu0 %v12939_v47  ;;  %15901 = vst [vmem:[#allocation62_spill] sm:$0xff] %v12979_v14  ;;  %15904 = vst [vmem:[#allocation65_spill] sm:$0xff] %v12999_v12  ;;  %v1050_v36 = vld [vmem:[%s15567_s4 + $0x10] sm:$0xff] }
  0x3b   :  { %8969 = vmatpush1.bf16.msra.mxu1 %v12943_v3  ;;  %8939 = vmatprep.subr.bf16.mxu0 %v12945_v31  ;;  %15905 = vst [vmem:[#allocation66_spill] sm:$0xff] %v13004_v34  ;;  %15906 = vst [vmem:[#allocation67_spill] sm:$0xff] %v13017_v6  ;;  %v1054_v39 = vld [vmem:[%s15567_s4 + $0x30] sm:$0xff] }
  0x3c   :  { %8971 = vmatprep.subr.bf16.mxu1 %v12957_v51  ;;  %v1098_v51 = vld [vmem:[%s15567_s4 + $0x190] sm:$0xff] }
  0x3d   :  { %v8829_v47 = vld [vmem:[%s15568_s1 + $0x1] ss:$8 sm:$0xf] }
  0x3e   :  { %8941 = vmatpush1.bf16.msra.mxu0 %v12975_v45 }
  0x3f   :  { %8973 = vmatpush1.bf16.msra.mxu1 %v12979_v14  ;;  %8943 = vmatprep.subr.bf16.mxu0 %v12981_v9  ;;  %v13041_v14 = vpack.c.bf16 %v1054_v39, %v1050_v36  ;;  %v1063_v36 = vld [vmem:[%s15567_s4 + $0x78] sm:$0xff]  ;;  %v1056_v39 = vld [vmem:[%s15567_s4 + $0x40] sm:$0xff] }
  0x40   :  { %8975 = vmatprep.subr.bf16.mxu1 %v12984_v57  ;;  %v15908_v57 = vmov 0.0  }
  0x41   :  { %15910 = vst [vmem:[#allocation70_spill] sm:$0xff] %v13041_v14 }
  0x42   :  { %8945 = vmatpush1.bf16.msra.mxu0 %v12999_v12  ;;  %v13028_v12 = vpack.c.bf16 %v1055_v8, %v1051_v0  ;;  %v1061_v0 = vld [vmem:[%s15567_s4 + $0x68] sm:$0xff]  ;;  %v1059_v8 = vld [vmem:[%s15567_s4 + $0x58] sm:$0xff] }
  0x43   :  { %8977 = vmatpush1.bf16.msra.mxu1 %v13004_v34  ;;  %v1052_v34 = vld [vmem:[%s15567_s4 + $0x20] sm:$0xff]  ;;  %8979 = vmatprep.subr.bf16.mxu0 %v13017_v6 }
  0x44   :  { %15907 = vst [vmem:[#allocation68_spill] sm:$0xff] %v13028_v12  ;;  %v13031_v9 = vpack.c.bf16 %v1052_v34, %v1048_v16  ;;  %9011 = vmatprep.subr.bf16.mxu1 %v13028_v12  ;;  %v1057_v34 = vld [vmem:[%s15567_s4 + $0x48] sm:$0xff]  ;;  %v13067_v12 = vpack.c.bf16 %v1063_v36, %v1059_v8  ;;  %v1067_v36 = vld [vmem:[%s15567_s4 + $0x98] sm:$0xff] }
  0x45   :  { %1241 = vmatmul.mubr.f32.vlgmr.msra.gmra.mrb[2].mxu0 %v15908_v57  ;;  %v13055_v16 = vpack.c.bf16 %v1061_v0, %v1057_v34  ;;  %v1058_v34 = vld [vmem:[%s15567_s4 + $0x50] sm:$0xff]  ;;  %v1069_v8 = vld [vmem:[%s15567_s4 + $0xa8] sm:$0xff] }
  0x46   :  { %15909 = vst [vmem:[#allocation69_spill] sm:$0xff] %v13031_v9  ;;  %1312 = vmatmul.mubr.f32.vlgmr.msra.gmra.mrb[2].mxu1 %v15908_v57  ;;  %8981 = vmatpush1.bf16.msra.mxu0 %v13031_v9  ;;  %v1060_v9 = vld [vmem:[%s15567_s4 + $0x60] sm:$0xff]  ;;  %15912 = vst [vmem:[#allocation72_spill] sm:$0xff] %v13067_v12  ;;  %v1062_v0 = vld [vmem:[%s15567_s4 + $0x70] sm:$0xff] }
  0x47   :  { %9013 = vmatpush1.bf16.msra.mxu1 %v13041_v14  ;;  %15911 = vst [vmem:[#allocation71_spill] sm:$0xff] %v13055_v16  ;;  %1382 = vmatprep.mubr.f32.mxu0 %v15908_v57  ;;  %v13069_v6 = vpack.c.bf16 %v1060_v9, %v1056_v39  ;;  %v13079_v14 = vpack.c.bf16 %v1062_v0, %v1058_v34  ;;  %v1065_v9 = vld [vmem:[%s15567_s4 + $0x88] sm:$0xff]  ;;  %v1071_v34 = vld [vmem:[%s15567_s4 + $0xb8] sm:$0xff]  ;;  %v1064_v0 = vld [vmem:[%s15567_s4 + $0x80] sm:$0xff] }
  0x48   :  { %1453 = vmatprep.mubr.f32.mxu1 %v15908_v57  ;;  %8983 = vmatprep.subr.bf16.mxu0 %v13055_v16  ;;  %v13093_v39 = vpack.c.bf16 %v1069_v8, %v1065_v9  ;;  %v1066_v9 = vld [vmem:[%s15567_s4 + $0x90] sm:$0xff] }
  0x49   :  { %15913 = vst [vmem:[#allocation73_spill] sm:$0xff] %v13069_v6  ;;  %15914 = vst [vmem:[#allocation74_spill] sm:$0xff] %v13079_v14  ;;  %9015 = vmatprep.subr.bf16.mxu1 %v13067_v12  ;;  %v13104_v12 = vpack.c.bf16 %v1071_v34, %v1067_v36  ;;  %v1070_v8 = vld [vmem:[%s15567_s4 + $0xb0] sm:$0xff]  ;;  %v1077_v36 = vld [vmem:[%s15567_s4 + $0xe8] sm:$0xff] }
  0x4a   :  { %8985 = vmatpush1.bf16.msra.mxu0 %v13069_v6  ;;  %15915 = vst [vmem:[#allocation75_spill] sm:$0xff] %v13093_v39  ;;  %v1068_v6 = vld [vmem:[%s15567_s4 + $0xa0] sm:$0xff]  ;;  %v1075_v34 = vld [vmem:[%s15567_s4 + $0xd8] sm:$0xff] }
  0x4b   :  { %9017 = vmatpush1.bf16.msra.mxu1 %v13079_v14  ;;  %15916 = vst [vmem:[#allocation76_spill] sm:$0xff] %v13104_v12  ;;  %v13106_v16 = vpack.c.bf16 %v1068_v6, %v1064_v0  ;;  %8987 = vmatprep.subr.bf16.mxu0 %v13093_v39  ;;  %v13115_v14 = vpack.c.bf16 %v1070_v8, %v1066_v9  ;;  %v1073_v6 = vld [vmem:[%s15567_s4 + $0xc8] sm:$0xff]  ;;  %v1079_v9 = vld [vmem:[%s15567_s4 + $0xf8] sm:$0xff]  ;;  %v1072_v8 = vld [vmem:[%s15567_s4 + $0xc0] sm:$0xff] }
  0x4c   :  { %9019 = vmatprep.subr.bf16.mxu1 %v13104_v12  ;;  %v13129_v0 = vpack.c.bf16 %v1077_v36, %v1073_v6  ;;  %v13140_v12 = vpack.c.bf16 %v1079_v9, %v1075_v34  ;;  %v1074_v6 = vld [vmem:[%s15567_s4 + $0xd0] sm:$0xff]  ;;  %v1085_v34 = vld [vmem:[%s15567_s4 + $0x128] sm:$0xff]  ;;  %v1083_v9 = vld [vmem:[%s15567_s4 + $0x118] sm:$0xff] }
  0x4d   :  { %15917 = vst [vmem:[#allocation77_spill] sm:$0xff] %v13106_v16  ;;  %15918 = vst [vmem:[#allocation78_spill] sm:$0xff] %v13115_v14  ;;  %v1078_v36 = vld [vmem:[%s15567_s4 + $0xf0] sm:$0xff] }
  0x4e   :  { %8989 = vmatpush1.bf16.msra.mxu0 %v13106_v16  ;;  %15919 = vst [vmem:[#allocation79_spill] sm:$0xff] %v13129_v0  ;;  %v1076_v16 = vld [vmem:[%s15567_s4 + $0xe0] sm:$0xff]  ;;  %15920 = vst [vmem:[#allocation80_spill] sm:$0xff] %v13140_v12 }
  0x4f   :  { %9021 = vmatpush1.bf16.msra.mxu1 %v13115_v14  ;;  %v13142_v39 = vpack.c.bf16 %v1076_v16, %v1072_v8  ;;  %8991 = vmatprep.subr.bf16.mxu0 %v13129_v0  ;;  %v13151_v14 = vpack.c.bf16 %v1078_v36, %v1074_v6  ;;  %v1081_v16 = vld [vmem:[%s15567_s4 + $0x108] sm:$0xff]  ;;  %v1087_v6 = vld [vmem:[%s15567_s4 + $0x138] sm:$0xff]  ;;  %v1080_v36 = vld [vmem:[%s15567_s4 + $0x100] sm:$0xff] }
  0x50   :  { %9023 = vmatprep.subr.bf16.mxu1 %v13140_v12  ;;  %v13165_v8 = vpack.c.bf16 %v1085_v34, %v1081_v16  ;;  %v13176_v12 = vpack.c.bf16 %v1087_v6, %v1083_v9  ;;  %v1082_v16 = vld [vmem:[%s15567_s4 + $0x110] sm:$0xff]  ;;  %v1093_v9 = vld [vmem:[%s15567_s4 + $0x168] sm:$0xff]  ;;  %v1091_v6 = vld [vmem:[%s15567_s4 + $0x158] sm:$0xff] }
  0x51   :  { %15921 = vst [vmem:[#allocation81_spill] sm:$0xff] %v13142_v39  ;;  %15922 = vst [vmem:[#allocation82_spill] sm:$0xff] %v13151_v14  ;;  %v1086_v34 = vld [vmem:[%s15567_s4 + $0x130] sm:$0xff] }
  0x52   :  { %8993 = vmatpush1.bf16.msra.mxu0 %v13142_v39  ;;  %15923 = vst [vmem:[#allocation83_spill] sm:$0xff] %v13165_v8  ;;  %v1084_v39 = vld [vmem:[%s15567_s4 + $0x120] sm:$0xff]  ;;  %15924 = vst [vmem:[#allocation84_spill] sm:$0xff] %v13176_v12 }
  0x53   :  { %9025 = vmatpush1.bf16.msra.mxu1 %v13151_v14  ;;  %v13178_v0 = vpack.c.bf16 %v1084_v39, %v1080_v36  ;;  %8995 = vmatprep.subr.bf16.mxu0 %v13165_v8  ;;  %v13187_v14 = vpack.c.bf16 %v1086_v34, %v1082_v16  ;;  %v1089_v39 = vld [vmem:[%s15567_s4 + $0x148] sm:$0xff]  ;;  %v1095_v16 = vld [vmem:[%s15567_s4 + $0x178] sm:$0xff]  ;;  %v1088_v34 = vld [vmem:[%s15567_s4 + $0x140] sm:$0xff] }
  0x54   :  { %9027 = vmatprep.subr.bf16.mxu1 %v13176_v12  ;;  %v13201_v36 = vpack.c.bf16 %v1093_v9, %v1089_v39  ;;  %v13212_v12 = vpack.c.bf16 %v1095_v16, %v1091_v6  ;;  %v1090_v39 = vld [vmem:[%s15567_s4 + $0x150] sm:$0xff]  ;;  %v1099_v6 = vld [vmem:[%s15567_s4 + $0x198] sm:$0xff] }
  0x55   :  { %15925 = vst [vmem:[#allocation85_spill] sm:$0xff] %v13178_v0  ;;  %15926 = vst [vmem:[#allocation86_spill] sm:$0xff] %v13187_v14  ;;  %v1094_v9 = vld [vmem:[%s15567_s4 + $0x170] sm:$0xff]  ;;  %v1103_v16 = vld [vmem:[%s15567_s4 + $0x1b8] sm:$0xff] }
  0x56   :  { %8997 = vmatpush1.bf16.msra.mxu0 %v13178_v0  ;;  %15927 = vst [vmem:[#allocation87_spill] sm:$0xff] %v13201_v36  ;;  %v1092_v0 = vld [vmem:[%s15567_s4 + $0x160] sm:$0xff]  ;;  %15928 = vst [vmem:[#allocation88_spill] sm:$0xff] %v13212_v12  ;;  %v13226_v45 = vpack.c.bf16 %v1094_v9, %v1090_v39  ;;  %v13241_v39 = vpack.c.bf16 %v1103_v16, %v1099_v6  ;;  %v1109_v6 = vld [vmem:[%s15567_s4 + $0x1e8] sm:$0xff] }
  0x57   :  { %9029 = vmatpush1.bf16.msra.mxu1 %v13187_v14  ;;  %v13214_v8 = vpack.c.bf16 %v1092_v0, %v1088_v34  ;;  %v1097_v14 = vld [vmem:[%s15567_s4 + $0x188] sm:$0xff]  ;;  %8999 = vmatprep.subr.bf16.mxu0 %v13201_v36  ;;  %v1096_v9 = vld [vmem:[%s15567_s4 + $0x180] sm:$0xff] }
  0x58   :  { %15930 = vst [vmem:[#allocation90_spill] sm:$0xff] %v13226_v45  ;;  %v1101_v0 = vld [vmem:[%s15567_s4 + $0x1a8] sm:$0xff]  ;;  %9031 = vmatprep.subr.bf16.mxu1 %v13212_v12  ;;  %15932 = vst [vmem:[#allocation92_spill] sm:$0xff] %v13241_v39  ;;  %v1100_v36 = vld [vmem:[%s15567_s4 + $0x1a0] sm:$0xff] }
  0x59   :  { %15929 = vst [vmem:[#allocation89_spill] sm:$0xff] %v13214_v8  ;;  %v13239_v34 = vpack.c.bf16 %v1101_v0, %v1097_v14  ;;  %v13253_v12 = vpack.c.bf16 %v1100_v36, %v1096_v9  ;;  %v1102_v14 = vld [vmem:[%s15567_s4 + $0x1b0] sm:$0xff]  ;;  %v1105_v0 = vld [vmem:[%s15567_s4 + $0x1c8] sm:$0xff]  ;;  %v1107_v9 = vld [vmem:[%s15567_s4 + $0x1d8] sm:$0xff] }
  0x5a   :  { %9001 = vmatpush1.bf16.msra.mxu0 %v13214_v8  ;;  %v13266_v16 = vpack.c.bf16 %v1102_v14, %v1098_v51  ;;  %v13268_v36 = vpack.c.bf16 %v1109_v6, %v1105_v0  ;;  %v1104_v8 = vld [vmem:[%s15567_s4 + $0x1c0] sm:$0xff]  ;;  %v1106_v14 = vld [vmem:[%s15567_s4 + $0x1d0] sm:$0xff] }
  0x5b   :  { %15931 = vst [vmem:[#allocation91_spill] sm:$0xff] %v13239_v34  ;;  %9033 = vmatpush1.bf16.msra.mxu1 %v13226_v45  ;;  %15933 = vst [vmem:[#allocation93_spill] sm:$0xff] %v13253_v12  ;;  %9003 = vmatprep.subr.bf16.mxu0 %v13239_v34  ;;  %v1111_v45 = vld [vmem:[%s15567_s4 + $0x1f8] sm:$0xff]  ;;  %v1108_v51 = vld [vmem:[%s15567_s4 + $0x1e0] sm:$0xff] }
  0x5c   :  { %9035 = vmatprep.subr.bf16.mxu1 %v13241_v39  ;;  %15934 = vst [vmem:[#allocation94_spill] sm:$0xff] %v13266_v16  ;;  %15935 = vst [vmem:[#allocation95_spill] sm:$0xff] %v13268_v36  ;;  %v13279_v31 = vpack.c.bf16 %v1111_v45, %v1107_v9  ;;  %v1110_v0 = vld [vmem:[%s15567_s4 + $0x1f0] sm:$0xff]  ;;  %v13291_v6 = vpack.c.bf16 %v1108_v51, %v1104_v8  ;;  %v37_v8 = vld [vmem:[%s15565_s0 + $0x8] sm:$0xff]  ;;  %v15939_v51 = vmov 1  }
  0x5d   :  { %v13295_v45 = vpack.c.bf16 %v1110_v0, %v1106_v14  ;;  %60 = vperm.xlu1 %11993, %v37_v8   ;;  %525 = vperm.xlu0 %11995, %v37_v8   ;;  %v38_v9 = vld [vmem:[%s15565_s0 + $0x10] sm:$0xff]  ;;  %v39_v14 = vld [vmem:[%s15565_s0 + $0x18] sm:$0xff]  ;;  %v15940_v0 = vmov 0  }
  0x5e   :  { %15936 = vst [vmem:[#allocation96_spill] sm:$0xff] %v13279_v31  ;;  %9005 = vmatpush1.bf16.msra.mxu0 %v13253_v12  ;;  %15937 = vst [vmem:[#allocation97_spill] sm:$0xff] %v13291_v6 }
  0x5f   :  { %9037 = vmatpush1.bf16.msra.mxu1 %v13266_v16  ;;  %9007 = vmatprep.subr.bf16.mxu0 %v13268_v36  ;;  %15938 = vst [vmem:[#allocation98_spill] sm:$0xff] %v13295_v45  ;;  %v13338_v36 = vld [vmem:[%s15565_s0 + $0x40] sm:$0xff]  ;;  %v13348_v16 = vld [vmem:[%s15565_s0 + $0x48] sm:$0xff] }
  0x60   :  { %9039 = vmatprep.subr.bf16.mxu1 %v13279_v31 }
  0x61   :  { %11994 = vset.pattern.permute.xlu1 %v15939_v51  ;;  %529 = vperm.xlu0 %11995, %v38_v9  }
  0x62   :  { %9009 = vmatpush1.bf16.msra.mxu0 %v13291_v6  ;;  %310 = vperm.xlu1 %11994, %v37_v8   ;;  %v41_v8 = vld [vmem:[%s15565_s0 + $0x28] sm:$0xff]  ;;  %v134_v6 = vlaneseq }
  0x63   :  { %9041 = vmatpush1.bf16.msra.mxu1 %v13295_v45  ;;  %9043 = vmatprep.subr.bf16.mxu0 %v12429_v4  ;;  %v42_v4 = vld [vmem:[%s15565_s0 + $0x30] sm:$0xff]  ;;  %v15941_v45 = vmov 2  }
  0x64   :  { %9075 = vmatprep.subr.bf16.mxu1 %v12442_v10  ;;  %v40_v10 = vld [vmem:[%s15565_s0 + $0x20] sm:$0xff]  ;;  %v135_v31 = vshrl.u32 %v134_v6, 7 }
  0x65   :  { %11999 = vset.pattern.permute.xlu0 %v15939_v51  ;;  %v52_v6 = vld [vmem:[%s15568_s1] ss:$8 sm:$0xf] }
  0x66   :  { %11996 = vset.pattern.permute.xlu1 %v15940_v0  ;;  %318 = vperm.xlu0 %11999, %v39_v14   ;;  %v13353_v12 = vsub.s32 1, %v135_v31  ;;  %v13355_v39 = vsub.s32 3, %v135_v31  ;;  %v13411_v23 = vsub.s32 2, %v135_v31 }
  0x67   :  { %65 = vperm.xlu1 %11996, %v38_v9  }
  0x68   :  { %v13363_v3 = vrot.slane %v52_v6, %v13353_v12  ;;  %v13377_v38 = vrot.slane %v52_v6, %v13355_v39  ;;  %v13391_v52 = vrot.slane %v8829_v47, %v13353_v12  ;;  %v13409_v27 = vrot.slane %v35_v56, %v13355_v39 }
  0x69   :  { %v13423_v49 = vrot.slane %v8830_v48, %v13353_v12 }
  0x6a   :  { %322 = vperm.xlu0 %11999, %v40_v10   ;;  %15944 = vst [vmem:[#allocation101_spill] sm:$0xff] %v13363_v3  ;;  %15945 = vst [vmem:[#allocation102_spill] sm:$0xff] %v13377_v38 }
  0x6b   :  { %11997 = vset.pattern.permute.xlu1 %v15939_v51  ;;  %15948 = vst [vmem:[#allocation105_spill] sm:$0xff] %v13391_v52  ;;  %15951 = vst [vmem:[#allocation108_spill] sm:$0xff] %v13409_v27 }
  0x6c   :  { %314 = vperm.xlu1 %11997, %v38_v9   ;;  %v13331_v9 = vld [vmem:[%s15565_s0 + $0x38] sm:$0xff]  ;;  %15953 = vst [vmem:[#allocation110_spill] sm:$0xff] %v13423_v49 }
  0x6e   :  { %12003 = vset.pattern.permute.xlu0 %v15940_v0 }
  0x6f   :  { %80 = vperm.xlu0 %12003, %v41_v8  }
  0x70   :  { %11998 = vset.pattern.permute.xlu1 %v15940_v0 }
  0x71   :  { %70 = vperm.xlu1 %11998, %v39_v14  }
  0x73   :  { %85 = vperm.xlu0 %12003, %v42_v4  }
  0x75   :  { %12000 = vset.pattern.permute.xlu1 %v15941_v45 }
  0x76   :  { %533 = vperm.xlu1 %12000, %v39_v14   ;;  %v13343_v14 = vsub.s32 0, %v135_v31 }
  0x77   :  { %12007 = vset.pattern.permute.xlu0 %v15941_v45 }
  0x78   :  { %545 = vperm.xlu0 %12007, %v42_v4   ;;  %15942 = vst [vmem:[#allocation99_spill] sm:$0xff] %v13343_v14  ;;  %v13360_v34 = vrot.slane %v52_v6, %v13343_v14  ;;  %v13383_v18 = vrot.slane %v8829_v47, %v13343_v14  ;;  %v13386_v17 = vrot.slane %v35_v56, %v13343_v14 }
  0x79   :  { %v13416_v62 = vrot.slane %v8830_v48, %v13343_v14 }
  0x7a   :  { %12001 = vset.pattern.permute.xlu1 %v15940_v0  ;;  %15943 = vst [vmem:[#allocation100_spill] sm:$0xff] %v13360_v34  ;;  %15946 = vst [vmem:[#allocation103_spill] sm:$0xff] %v13383_v18 }
  0x7b   :  { %75 = vperm.xlu1 %12001, %v40_v10   ;;  %15947 = vst [vmem:[#allocation104_spill] sm:$0xff] %v13386_v17  ;;  %15952 = vst [vmem:[#allocation109_spill] sm:$0xff] %v13416_v62 }
  0x7c   :  { %549 = vperm.xlu0 %12007, %v13331_v9  }
  0x7f   :  { %12002 = vset.pattern.permute.xlu1 %v15941_v45 }
  0x80   :  { %12011 = vset.pattern.permute.xlu0 %v15939_v51  ;;  %537 = vperm.xlu1 %12002, %v40_v10  }
  0x81   :  { %338 = vperm.xlu0 %12011, %v13338_v36  }
  0x84   :  { %12004 = vset.pattern.permute.xlu1 %v15939_v51 }
  0x85   :  { %342 = vperm.xlu0 %12011, %v13348_v16   ;;  %326 = vperm.xlu1 %12004, %v41_v8  }
  0x89   :  { %12015 = vset.pattern.permute.xlu0 %v15940_v0  ;;  %12005 = vset.pattern.permute.xlu1 %v15941_v45 }
  0x8a   :  { %105 = vperm.xlu0 %12015, %v13374_v58   ;;  %541 = vperm.xlu1 %12005, %v41_v8  }
  0x8e   :  { %110 = vperm.xlu0 %12015, %v13402_v35   ;;  %12006 = vset.pattern.permute.xlu1 %v15939_v51 }
  0x8f   :  { %330 = vperm.xlu1 %12006, %v42_v4  }
  0x92   :  { %12019 = vset.pattern.permute.xlu0 %v15941_v45 }
  0x93   :  { %565 = vperm.xlu0 %12019, %v13402_v35   ;;  %12008 = vset.pattern.permute.xlu1 %v15940_v0 }
  0x94   :  { %90 = vperm.xlu1 %12008, %v13331_v9  }
  0x97   :  { %v56_v10 = vpop.permute.xlu0 %55 }
  0x98   :  { %v154_v30 = vmul.f32 %v13360_v34, %v56_v10  ;;  %v155_v63 = vmul.f32 %v13363_v3, %v56_v10  ;;  %v13397_v34 = vrot.slane %v35_v56, %v13353_v12  ;;  %v157_v8 = vmul.f32 %v13377_v38, %v56_v10  ;;  %v522_v61 = vpop.permute.xlu1 %521  ;;  %12009 = vset.pattern.permute.xlu1 %v15939_v51 }
  0x99   :  { %v13406_v3 = vrot.slane %v8829_v47, %v13355_v39  ;;  %334 = vperm.xlu1 %12009, %v13331_v9  }
  0x9a   :  { %15949 = vst [vmem:[#allocation106_spill] sm:$0xff] %v13397_v34  ;;  %v239_v7 = vadd.f32 %v13386_v17, %v154_v30  ;;  %v240_v60 = vadd.f32 %v13397_v34, %v155_v63  ;;  %v242_v30 = vadd.f32 %v13409_v27, %v157_v8  ;;  %v13428_v17 = vrot.slane %v8830_v48, %v13355_v39 }
  0x9b   :  { %15950 = vst [vmem:[#allocation107_spill] sm:$0xff] %v13406_v3  ;;  %v606_v34 = vmul.f32 %v13423_v49, %v522_v61 }
  0x9c   :  { %v307_v50 = vpop.permute.xlu0 %306  ;;  %15954 = vst [vmem:[#allocation111_spill] sm:$0xff] %v13428_v17  ;;  %v608_v8 = vmul.f32 %v13428_v17, %v522_v61 }
  0x9d   :  { %v390_v21 = vmul.f32 %v13383_v18, %v307_v50  ;;  %v391_v38 = vmul.f32 %v13391_v52, %v307_v50  ;;  %v393_v31 = vmul.f32 %v13406_v3, %v307_v50  ;;  %v13431_v18 = vrot.slane %v52_v6, %v13411_v23  ;;  %v13442_v6 = vld [vmem:[%s15565_s0 + $0x60] sm:$0xff]  ;;  %12010 = vset.pattern.permute.xlu1 %v15940_v0 }
  0x9e   :  { %v605_v52 = vmul.f32 %v13416_v62, %v522_v61  ;;  %569 = vperm.xlu0 %12019, %v13442_v6   ;;  %95 = vperm.xlu1 %12010, %v13338_v36  }
  0x9f   :  { %15955 = vst [vmem:[#allocation112_spill] sm:$0xff] %v13431_v18  ;;  %v454_v14 = vadd.f32 %v390_v21, %v239_v7  ;;  %v455_v63 = vadd.f32 %v391_v38, %v240_v60  ;;  %v457_v4 = vadd.f32 %v393_v31, %v242_v30  ;;  %v156_v7 = vmul.f32 %v13431_v18, %v56_v10 }
  0xa0   :  { %v13447_v60 = vrot.slane %v8829_v47, %v13411_v23  ;;  %v13450_v21 = vrot.slane %v35_v56, %v13411_v23  ;;  %v13457_v47 = vrot.slane %v8830_v48, %v13411_v23 }
  0xa1   :  { %v669_v38 = vadd.f32 %v605_v52, %v454_v14  ;;  %v670_v31 = vadd.f32 %v606_v34, %v455_v63  ;;  %v672_v27 = vadd.f32 %v608_v8, %v457_v4  ;;  %v13462_v52 = vld [vmem:[%s15565_s0 + $0x68] sm:$0xff] }
  0xa2   :  { %v392_v3 = vmul.f32 %v13447_v60, %v307_v50  ;;  %v241_v10 = vadd.f32 %v13450_v21, %v156_v7  ;;  %12023 = vset.pattern.permute.xlu0 %v15939_v51  ;;  %v607_v48 = vmul.f32 %v13457_v47, %v522_v61  ;;  %12012 = vset.pattern.permute.xlu1 %v15941_v45 }
  0xa3   :  { %358 = vperm.xlu0 %12023, %v13462_v52   ;;  %553 = vperm.xlu1 %12012, %v13338_v36  }
  0xa4   :  { %v456_v50 = vadd.f32 %v392_v3, %v241_v10  ;;  %v15960_v10 = vld [vmem:[#allocation36_spill] sm:$0xff] }
  0xa7   :  { %12013 = vset.pattern.permute.xlu1 %v15940_v0 }
  0xa8   :  { %100 = vperm.xlu1 %12013, %v13348_v16  }
  0xac   :  { %12014 = vset.pattern.permute.xlu1 %v15941_v45 }
  0xad   :  { %557 = vperm.xlu1 %12014, %v13348_v16   ;;  %v15958_v16 = vld [vmem:[#allocation34_spill] sm:$0xff] }
  0xb1   :  { %12016 = vset.pattern.permute.xlu1 %v15939_v51 }
  0xb2   :  { %346 = vperm.xlu1 %12016, %v13374_v58  }
  0xb6   :  { %12017 = vset.pattern.permute.xlu1 %v15941_v45 }
  0xb7   :  { %561 = vperm.xlu1 %12017, %v13374_v58   ;;  %v15957_v58 = vld [vmem:[#allocation33_spill] sm:$0xff] }
  0xbb   :  { %12018 = vset.pattern.permute.xlu1 %v15939_v51 }
  0xbc   :  { %350 = vperm.xlu1 %12018, %v13402_v35   ;;  %v15956_v35 = vld [vmem:[#allocation32_spill] sm:$0xff] }
  0xc0   :  { %12020 = vset.pattern.permute.xlu1 %v15940_v0 }
  0xc1   :  { %115 = vperm.xlu1 %12020, %v13442_v6  }
  0xc5   :  { %12021 = vset.pattern.permute.xlu1 %v15939_v51 }
  0xc6   :  { %354 = vperm.xlu1 %12021, %v13442_v6   ;;  %v15959_v6 = vld [vmem:[#allocation35_spill] sm:$0xff] }
  0xca   :  { %12022 = vset.pattern.permute.xlu1 %v15940_v0 }
  0xcb   :  { %120 = vperm.xlu1 %12022, %v13462_v52  }
  0xcf   :  { %12024 = vset.pattern.permute.xlu1 %v15941_v45 }
  0xd0   :  { %573 = vperm.xlu1 %12024, %v13462_v52   ;;  %v15965_v52 = vld [vmem:[#allocation41_spill] sm:$0xff] }
  0xd4   :  { %12025 = vset.pattern.permute.xlu1 %v15940_v0 }
  0xf8   :  { %v951_v49 = vpop.f32.mrb[0].mxu0 }
  0xf9   :  { %v1027_v30 = vadd.f32 %v951_v49, %v669_v38  ;;  %v1022_v17 = vpop.f32.mrb[0].mxu1  ;;  %v953_v62 = vpop.f32.mrb[1].mxu0 }
  0xfa   :  { %v1028_v56 = vadd.f32 %v953_v62, %v670_v31  ;;  %v1024_v18 = vpop.f32.mrb[1].mxu1  ;;  %v671_v62 = vadd.f32 %v607_v48, %v456_v50  ;;  %v15963_v50 = vld [vmem:[#allocation39_spill] sm:$0xff]  ;;  %v15964_v48 = vld [vmem:[#allocation40_spill] sm:$0xff] }
  0xfb   :  { %12031 = vtanh.f32 %v1027_v30  ;;  %v1030_v49 = vadd.f32 %v1024_v18, %v672_v27 }
  0xfc   :  { %12033 = vtanh.f32 %v1028_v56  ;;  %v1029_v34 = vadd.f32 %v1022_v17, %v671_v62  ;;  %v15961_v56 = vld [vmem:[#allocation37_spill] sm:$0xff]  ;;  %v15966_v62 = vld [vmem:[#allocation42_spill] sm:$0xff] }
  0xfd   :  { %12035 = vtanh.f32 %v1030_v49  ;;  %v15962_v49 = vld [vmem:[#allocation38_spill] sm:$0xff] }
  0xfe   :  { %12037 = vtanh.f32 %v1029_v34  ;;  %v15967_v34 = vld [vmem:[#allocation43_spill] sm:$0xff] }
 0x105   :  { %v12032_v27 = vpop.eup %12031 }
 0x106   :  { %v1035_v18 = vmul.f32 0.5, %v12032_v27  ;;  %v12034_v9 = vpop.eup %12033  ;;  %v15968_v27 = vld [vmem:[#allocation44_spill] sm:$0xff] }
 0x107   :  { %v1036_v63 = vmul.f32 0.5, %v12034_v9  ;;  %v12036_v3 = vpop.eup %12035  ;;  %v15970_v9 = vld [vmem:[#allocation46_spill] sm:$0xff] }
 0x108   :  { %v1039_v14 = vadd.f32 0.5, %v1035_v18  ;;  %v12038_v17 = vpop.eup %12037  ;;  %v15969_v18 = vld [vmem:[#allocation45_spill] sm:$0xff] }
 0x109   :  { %v1040_v61 = vadd.f32 0.5, %v1036_v63  ;;  %v1037_v36 = vmul.f32 0.5, %v12038_v17  ;;  %v15972_v63 = vld [vmem:[#allocation48_spill] sm:$0xff]  ;;  %v15977_v17 = vld [vmem:[#allocation53_spill] sm:$0xff] }
 0x10a   :  { %v1044_v4 = vmul.f32 %v12036_v3, %v1039_v14  ;;  %v15971_v14 = vld [vmem:[#allocation47_spill] sm:$0xff]  ;;  %v15973_v3 = vld [vmem:[#allocation49_spill] sm:$0xff] }
 0x10b   :  { %v1043_v8 = vmul.f32 0.0, %v1040_v61  ;;  %v1041_v38 = vadd.f32 0.5, %v1037_v36  ;;  %v15974_v61 = vld [vmem:[#allocation50_spill] sm:$0xff] }
 0x10c   :  { %v15978_v36 = vld [vmem:[#allocation54_spill] sm:$0xff] }
 0x10d   :  { %v13475_v7 = vadd.f32 %v1044_v4, %v1043_v8  ;;  %v15975_v4 = vld [vmem:[#allocation51_spill] sm:$0xff]  ;;  %v15976_v8 = vld [vmem:[#allocation52_spill] sm:$0xff] }
 0x10f   :  { %12039 = vtanh.f32 %v13475_v7 }
 0x119   :  { %v12040_v31 = vpop.eup %12039 }
 0x11a   :  { %v1047_v30 = vmul.f32 %v12040_v31, %v1041_v38  ;;  %v15979_v38 = vld [vmem:[#allocation55_spill] sm:$0xff]  ;;  %v15980_v31 = vld [vmem:[#allocation56_spill] sm:$0xff] }
 0x11c   :  { %1383 = vmatmul.mubr.f32.vlgmr.msra.gmra.mrb[2].mxu0 %v1047_v30  ;;  %1454 = vmatmul.mubr.f32.vlgmr.msra.gmra.mrb[2].mxu1 %v1047_v30 }
 0x11d   :  { %9045 = vmatpush1.bf16.msra.mxu0 %v12444_v11  ;;  %9077 = vmatpush1.bf16.msra.mxu1 %v12456_v15 }
 0x11e   :  { %9047 = vmatprep.subr.bf16.mxu0 %v12469_v19  ;;  %9079 = vmatprep.subr.bf16.mxu1 %v12471_v20 }
 0x11f   :  { %1591 = vmatprep.mubr.f32.mxu0 %v15908_v57  ;;  %1662 = vmatprep.mubr.f32.mxu1 %v15908_v57 }
 0x121   :  { %9049 = vmatpush1.bf16.msra.mxu0 %v12483_v24  ;;  %9081 = vmatpush1.bf16.msra.mxu1 %v12496_v28 }
 0x122   :  { %9051 = vmatprep.subr.bf16.mxu0 %v12498_v29  ;;  %9083 = vmatprep.subr.bf16.mxu1 %v12509_v33 }
 0x125   :  { %9053 = vmatpush1.bf16.msra.mxu0 %v12521_v37  ;;  %9085 = vmatpush1.bf16.msra.mxu1 %v12534_v41 }
 0x126   :  { %9055 = vmatprep.subr.bf16.mxu0 %v12536_v42  ;;  %9087 = vmatprep.subr.bf16.mxu1 %v12548_v46 }
 0x129   :  { %9057 = vmatpush1.bf16.msra.mxu0 %v12569_v53  ;;  %9089 = vmatpush1.bf16.msra.mxu1 %v12573_v54 }
 0x12a   :  { %9059 = vmatprep.subr.bf16.mxu0 %v12575_v55  ;;  %9091 = vmatprep.subr.bf16.mxu1 %v12587_v59 }
 0x12d   :  { %9061 = vmatpush1.bf16.msra.mxu0 %v12605_v1  ;;  %9093 = vmatpush1.bf16.msra.mxu1 %v12609_v2 }
 0x12e   :  { %9063 = vmatprep.subr.bf16.mxu0 %v12611_v5  ;;  %9095 = vmatprep.subr.bf16.mxu1 %v12623_v13 }
 0x131   :  { %9065 = vmatpush1.bf16.msra.mxu0 %v12641_v22  ;;  %9097 = vmatpush1.bf16.msra.mxu1 %v12648_v25 }
 0x132   :  { %9067 = vmatprep.subr.bf16.mxu0 %v12650_v26  ;;  %9099 = vmatprep.subr.bf16.mxu1 %v12662_v32 }
 0x135   :  { %9069 = vmatpush1.bf16.msra.mxu0 %v12680_v40  ;;  %9101 = vmatpush1.bf16.msra.mxu1 %v12684_v43 }
 0x136   :  { %9071 = vmatprep.subr.bf16.mxu0 %v12686_v44  ;;  %9103 = vmatprep.subr.bf16.mxu1 %v15956_v35 }
 0x139   :  { %9073 = vmatpush1.bf16.msra.mxu0 %v15957_v58  ;;  %9105 = vmatpush1.bf16.msra.mxu1 %v15958_v16 }
 0x13a   :  { %9107 = vmatprep.subr.bf16.mxu0 %v15959_v6  ;;  %9139 = vmatprep.subr.bf16.mxu1 %v15960_v10 }
 0x13c   :  { %1592 = vmatmul.mubr.f32.vlgmr.msra.gmra.mrb[4].mxu0 %v1047_v30  ;;  %1663 = vmatmul.mubr.f32.vlgmr.msra.gmra.mrb[4].mxu1 %v1047_v30  ;;  %v15981_v30 = vld [vmem:[#allocation57_spill] sm:$0xff] }
 0x13d   :  { %9109 = vmatpush1.bf16.msra.mxu0 %v15961_v56  ;;  %9141 = vmatpush1.bf16.msra.mxu1 %v15962_v49  ;;  %v16011_v56 = vld [vmem:[#allocation112_spill] sm:$0xff] }
 0x13e   :  { %9111 = vmatprep.subr.bf16.mxu0 %v15963_v50  ;;  %9143 = vmatprep.subr.bf16.mxu1 %v15964_v48  ;;  %v16009_v50 = vld [vmem:[#allocation110_spill] sm:$0xff] }
 0x13f   :  { %1754 = vmatprep.mubr.f32.mxu0 %v15908_v57  ;;  %1825 = vmatprep.mubr.f32.mxu1 %v15908_v57 }
 0x141   :  { %9113 = vmatpush1.bf16.msra.mxu0 %v15965_v52  ;;  %9145 = vmatpush1.bf16.msra.mxu1 %v15966_v62  ;;  %v16007_v62 = vld [vmem:[#allocation108_spill] sm:$0xff] }
 0x142   :  { %9115 = vmatprep.subr.bf16.mxu0 %v15967_v34  ;;  %9147 = vmatprep.subr.bf16.mxu1 %v15968_v27  ;;  %v16003_v34 = vld [vmem:[#allocation104_spill] sm:$0xff] }
 0x145   :  { %9117 = vmatpush1.bf16.msra.mxu0 %v15969_v18  ;;  %9149 = vmatpush1.bf16.msra.mxu1 %v15970_v9 }
 0x146   :  { %9119 = vmatprep.subr.bf16.mxu0 %v15971_v14  ;;  %9151 = vmatprep.subr.bf16.mxu1 %v15972_v63  ;;  %v15982_v14 = vld [vmem:[#allocation58_spill] sm:$0xff]  ;;  %v15983_v63 = vld [vmem:[#allocation59_spill] sm:$0xff] }
 0x149   :  { %9121 = vmatpush1.bf16.msra.mxu0 %v15973_v3  ;;  %9153 = vmatpush1.bf16.msra.mxu1 %v15974_v61  ;;  %v15984_v3 = vld [vmem:[#allocation60_spill] sm:$0xff]  ;;  %v15985_v61 = vld [vmem:[#allocation61_spill] sm:$0xff] }
 0x14a   :  { %9123 = vmatprep.subr.bf16.mxu0 %v15975_v4  ;;  %9155 = vmatprep.subr.bf16.mxu1 %v15976_v8  ;;  %v15986_v4 = vld [vmem:[#allocation62_spill] sm:$0xff]  ;;  %v15987_v8 = vld [vmem:[#allocation63_spill] sm:$0xff] }
 0x14d   :  { %9125 = vmatpush1.bf16.msra.mxu0 %v15977_v17  ;;  %9157 = vmatpush1.bf16.msra.mxu1 %v15978_v36  ;;  %v15988_v17 = vld [vmem:[#allocation64_spill] sm:$0xff]  ;;  %v15989_v36 = vld [vmem:[#allocation65_spill] sm:$0xff] }
 0x14e   :  { %9127 = vmatprep.subr.bf16.mxu0 %v15979_v38  ;;  %9159 = vmatprep.subr.bf16.mxu1 %v15980_v31  ;;  %v15990_v38 = vld [vmem:[#allocation66_spill] sm:$0xff]  ;;  %v15991_v31 = vld [vmem:[#allocation67_spill] sm:$0xff] }
 0x151   :  { %9129 = vmatpush1.bf16.msra.mxu0 %v15981_v30  ;;  %9161 = vmatpush1.bf16.msra.mxu1 %v15982_v14  ;;  %v15992_v30 = vld [vmem:[#allocation68_spill] sm:$0xff] }
 0x152   :  { %9131 = vmatprep.subr.bf16.mxu0 %v15983_v63  ;;  %9163 = vmatprep.subr.bf16.mxu1 %v15984_v3  ;;  %v50_v3 = vld [vmem:[%s15565_s0 + $0x70] sm:$0xff] }
 0x153   :  { %362 = vperm.xlu0 %12023, %v50_v3   ;;  %125 = vperm.xlu1 %12025, %v50_v3  }
 0x155   :  { %9133 = vmatpush1.bf16.msra.mxu0 %v15985_v61  ;;  %9165 = vmatpush1.bf16.msra.mxu1 %v15986_v4 }
 0x156   :  { %9135 = vmatprep.subr.bf16.mxu0 %v15987_v8  ;;  %9167 = vmatprep.subr.bf16.mxu1 %v15988_v17  ;;  %v51_v17 = vld [vmem:[%s15565_s0 + $0x78] sm:$0xff] }
 0x157   :  { %12027 = vset.pattern.permute.xlu0 %v15940_v0  ;;  %12026 = vset.pattern.permute.xlu1 %v15941_v45  ;;  %v1460_v0 = vld [vmem:[%s15570_s6] sm:$0xf] }
 0x158   :  { %130 = vperm.xlu0 %12027, %v51_v17   ;;  %577 = vperm.xlu1 %12026, %v50_v3   ;;  %v13583_v3 = vrot.slane %v1460_v0, %v13355_v39 }
 0x159   :  { %9137 = vmatpush1.bf16.msra.mxu0 %v15989_v36  ;;  %9169 = vmatpush1.bf16.msra.mxu1 %v15990_v38  ;;  %v13580_v38 = vrot.slane %v1460_v0, %v13353_v12 }
 0x15a   :  { %9171 = vmatprep.subr.bf16.mxu0 %v15991_v31  ;;  %9203 = vmatprep.subr.bf16.mxu1 %v15992_v30  ;;  %v15993_v30 = vld [vmem:[#allocation99_spill] sm:$0xff]  ;;  %15996 = vst [vmem:[#allocation114_spill] sm:$0xff] %v13583_v3 }
 0x15b   :  { %v13577_v31 = vrot.slane %v1460_v0, %v15993_v30  ;;  %15995 = vst [vmem:[#allocation113_spill] sm:$0xff] %v13580_v38  ;;  %v13589_v30 = vrot.slane %v1460_v0, %v13411_v23 }
 0x15c   :  { %12028 = vset.pattern.permute.xlu1 %v15939_v51  ;;  %12030 = vset.pattern.permute.xlu0 %v15941_v45 }
 0x15d   :  { %366 = vperm.xlu1 %12028, %v51_v17   ;;  %15994 = vst [vmem:[#allocation99_spill] sm:$0xff] %v13577_v31  ;;  %15997 = vst [vmem:[#allocation115_spill] sm:$0xff] %v13589_v30 }
 0x161   :  { %12029 = vset.pattern.permute.xlu1 %v15941_v45 }
 0x162   :  { %581 = vperm.xlu1 %12029, %v51_v17  }
 0x1ef   :  { %v1384_v51 = vpop.f32.mrb[2].mxu0  ;;  %v1455_v36 = vpop.f32.mrb[2].mxu1 }
 0x1f0   :  { %v1482_v8 = vadd.f32 %v13577_v31, %v1384_v51  ;;  %v1386_v4 = vpop.f32.mrb[3].mxu0  ;;  %v1457_v45 = vpop.f32.mrb[3].mxu1  ;;  %v1484_v12 = vadd.f32 %v13589_v30, %v1455_v36  ;;  %v16002_v30 = vld [vmem:[#allocation103_spill] sm:$0xff] }
 0x1f1   :  { %v1483_v17 = vadd.f32 %v13580_v38, %v1386_v4  ;;  %v1485_v61 = vadd.f32 %v13583_v3, %v1457_v45  ;;  %v61_v31 = vpop.permute.xlu1 %60  ;;  %v16000_v3 = vld [vmem:[#allocation102_spill] sm:$0xff] }
 0x1f2   :  { %12041 = vtanh.f32 %v1482_v8  ;;  %v15998_v8 = vld [vmem:[#allocation100_spill] sm:$0xff]  ;;  %v161_v23 = vmul.f32 %v16000_v3, %v61_v31 }
 0x1f3   :  { %12043 = vtanh.f32 %v1483_v17  ;;  %v158_v38 = vmul.f32 %v15998_v8, %v61_v31  ;;  %v15999_v17 = vld [vmem:[#allocation101_spill] sm:$0xff]  ;;  %v16006_v8 = vld [vmem:[#allocation107_spill] sm:$0xff] }
 0x1f4   :  { %12045 = vtanh.f32 %v1485_v61  ;;  %v159_v61 = vmul.f32 %v15999_v17, %v61_v31  ;;  %v246_v17 = vadd.f32 %v16007_v62, %v161_v23 }
 0x1f5   :  { %12047 = vtanh.f32 %v1484_v12  ;;  %v311_v36 = vpop.permute.xlu1 %310 }
 0x1fc   :  { %v12042_v39 = vpop.eup %12041 }
 0x1fd   :  { %v1490_v63 = vmul.f32 0.5, %v12042_v39  ;;  %v12044_v14 = vpop.eup %12043  ;;  %v394_v39 = vmul.f32 %v16002_v30, %v311_v36 }
 0x1fe   :  { %v1491_v51 = vmul.f32 0.5, %v12044_v14  ;;  %v12046_v18 = vpop.eup %12045  ;;  %v16004_v14 = vld [vmem:[#allocation105_spill] sm:$0xff] }
 0x1ff   :  { %v1494_v9 = vadd.f32 0.5, %v1490_v63  ;;  %v243_v63 = vadd.f32 %v16003_v34, %v158_v38  ;;  %v395_v12 = vmul.f32 %v16004_v14, %v311_v36  ;;  %v12048_v52 = vpop.eup %12047  ;;  %v16010_v34 = vld [vmem:[#allocation111_spill] sm:$0xff]  ;;  %v160_v14 = vmul.f32 %v16011_v56, %v61_v31 }
 0x200   :  { %v1495_v27 = vadd.f32 0.5, %v1491_v51  ;;  %v526_v51 = vpop.permute.xlu0 %525  ;;  %v1492_v49 = vmul.f32 0.5, %v12048_v52 }
 0x201   :  { %v1499_v4 = vmul.f32 %v12046_v18, %v1494_v9  ;;  %v16005_v18 = vld [vmem:[#allocation106_spill] sm:$0xff]  ;;  %v458_v3 = vadd.f32 %v394_v39, %v243_v63  ;;  %v610_v30 = vmul.f32 %v16009_v50, %v526_v51 }
 0x202   :  { %v1498_v45 = vmul.f32 0.0, %v1495_v27  ;;  %v244_v9 = vadd.f32 %v16005_v18, %v159_v61  ;;  %v397_v27 = vmul.f32 %v16006_v8, %v311_v36  ;;  %v1496_v8 = vadd.f32 0.5, %v1492_v49 }
 0x203   :  { %v611_v49 = vmul.f32 %v13457_v47, %v526_v51 }
 0x204   :  { %v13595_v0 = vadd.f32 %v1499_v4, %v1498_v45  ;;  %v16008_v4 = vld [vmem:[#allocation109_spill] sm:$0xff]  ;;  %v459_v48 = vadd.f32 %v395_v12, %v244_v9  ;;  %v461_v38 = vadd.f32 %v397_v27, %v246_v17  ;;  %v396_v12 = vmul.f32 %v13447_v60, %v311_v36  ;;  %v13613_v17 = vld [vmem:[%s15571_s7] ss:$0 sm:$0xff]  ;;  %v16015_v36 = vld [vmem:[#allocation72_spill] sm:$0xff] }
 0x205   :  { %v609_v45 = vmul.f32 %v16008_v4, %v526_v51  ;;  %v245_v9 = vadd.f32 %v13450_v21, %v160_v14  ;;  %v16018_v14 = vld [vmem:[#allocation75_spill] sm:$0xff] }
 0x206   :  { %16001 = vst [vmem:[#allocation116_spill] sm:$0xff] %v13595_v0  ;;  %12049 = vtanh.f32 %v13595_v0  ;;  %v612_v0 = vmul.f32 %v16010_v34, %v526_v51  ;;  %v674_v18 = vadd.f32 %v610_v30, %v459_v48  ;;  %v16012_v48 = vld [vmem:[#allocation69_spill] sm:$0xff]  ;;  %v16013_v30 = vld [vmem:[#allocation70_spill] sm:$0xff]  ;;  %v16019_v51 = vld [vmem:[#allocation76_spill] sm:$0xff] }
 0x207   :  { %v673_v10 = vadd.f32 %v609_v45, %v458_v3 }
 0x208   :  { %v676_v62 = vadd.f32 %v612_v0, %v461_v38  ;;  %v16014_v0 = vld [vmem:[#allocation71_spill] sm:$0xff]  ;;  %v16020_v38 = vld [vmem:[#allocation77_spill] sm:$0xff] }
 0x20f   :  { %v1593_v6 = vpop.f32.mrb[4].mxu0  ;;  %v1664_v61 = vpop.f32.mrb[4].mxu1 }
 0x210   :  { %v1669_v16 = vadd.f32 %v1593_v6, %v673_v10  ;;  %v1595_v23 = vpop.f32.mrb[5].mxu0  ;;  %v1666_v39 = vpop.f32.mrb[5].mxu1  ;;  %v460_v10 = vadd.f32 %v396_v12, %v245_v9  ;;  %v16023_v12 = vld [vmem:[#allocation80_spill] sm:$0xff] }
 0x211   :  { %v12050_v63 = vpop.eup %12049  ;;  %v1670_v52 = vadd.f32 %v1595_v23, %v674_v18  ;;  %v1672_v31 = vadd.f32 %v1666_v39, %v676_v62  ;;  %v16016_v62 = vld [vmem:[#allocation73_spill] sm:$0xff]  ;;  %v16021_v23 = vld [vmem:[#allocation78_spill] sm:$0xff] }
 0x212   :  { %12051 = vtanh.f32 %v1669_v16  ;;  %v1502_v3 = vmul.f32 %v12050_v63, %v1496_v8  ;;  %v675_v16 = vadd.f32 %v611_v49, %v460_v10  ;;  %v16017_v8 = vld [vmem:[#allocation74_spill] sm:$0xff]  ;;  %v16022_v63 = vld [vmem:[#allocation79_spill] sm:$0xff]  ;;  %v16024_v10 = vld [vmem:[#allocation81_spill] sm:$0xff] }
 0x213   :  { %12053 = vtanh.f32 %v1670_v52  ;;  %v16026_v49 = vld [vmem:[#allocation83_spill] sm:$0xff] }
 0x214   :  { %1755 = vmatmul.mubr.f32.vlgmr.msra.gmra.mrb[6].mxu0 %v1502_v3  ;;  %1826 = vmatmul.mubr.f32.vlgmr.msra.gmra.mrb[6].mxu1 %v1502_v3  ;;  %v1510_v6 = vmul.f32 %v13613_v17, %v1502_v3  ;;  %12055 = vtanh.f32 %v1672_v31  ;;  %v1671_v18 = vadd.f32 %v1664_v61, %v675_v16  ;;  %v16025_v61 = vld [vmem:[#allocation82_spill] sm:$0xff]  ;;  %v16027_v16 = vld [vmem:[#allocation84_spill] sm:$0xff] }
 0x215   :  { %9173 = vmatpush1.bf16.msra.mxu0 %v16012_v48  ;;  %9205 = vmatpush1.bf16.msra.mxu1 %v16013_v30 }
 0x216   :  { %1511 = vadd.xlane.f32.xlu0 %v1510_v6  ;;  %9175 = vmatprep.subr.bf16.mxu0 %v16014_v0  ;;  %12057 = vtanh.f32 %v1671_v18  ;;  %v16031_v18 = vld [vmem:[#allocation87_spill] sm:$0xff] }
 0x217   :  { %9207 = vmatprep.subr.bf16.mxu1 %v16015_v36  ;;  %1896 = vmatprep.mubr.f32.mxu0 %v15908_v57 }
 0x218   :  { %1967 = vmatprep.mubr.f32.mxu1 %v15908_v57 }
 0x219   :  { %9177 = vmatpush1.bf16.msra.mxu0 %v16016_v62  ;;  %9209 = vmatpush1.bf16.msra.mxu1 %v16017_v8 }
 0x21a   :  { %9179 = vmatprep.subr.bf16.mxu0 %v16018_v14  ;;  %9211 = vmatprep.subr.bf16.mxu1 %v16019_v51 }
 0x21c   :  { %v12052_v27 = vpop.eup %12051 }
 0x21d   :  { %v1677_v45 = vmul.f32 0.5, %v12052_v27  ;;  %9181 = vmatpush1.bf16.msra.mxu0 %v16020_v38  ;;  %9213 = vmatpush1.bf16.msra.mxu1 %v16021_v23  ;;  %v12054_v39 = vpop.eup %12053 }
 0x21e   :  { %9183 = vmatprep.subr.bf16.mxu0 %v16022_v63  ;;  %9215 = vmatprep.subr.bf16.mxu1 %v16023_v12  ;;  %v1678_v52 = vmul.f32 0.5, %v12054_v39  ;;  %v12056_v31 = vpop.eup %12055  ;;  %v16029_v63 = vld [vmem:[#allocation85_spill] sm:$0xff]  ;;  %v16032_v39 = vld [vmem:[#allocation88_spill] sm:$0xff] }
 0x21f   :  { %v1681_v9 = vadd.f32 0.5, %v1677_v45  ;;  %v16030_v45 = vld [vmem:[#allocation86_spill] sm:$0xff] }
 0x220   :  { %v1682_v3 = vadd.f32 0.5, %v1678_v52  ;;  %v16033_v52 = vld [vmem:[#allocation89_spill] sm:$0xff] }
 0x221   :  { %v1686_v6 = vmul.f32 %v12056_v31, %v1681_v9  ;;  %9185 = vmatpush1.bf16.msra.mxu0 %v16024_v10  ;;  %9217 = vmatpush1.bf16.msra.mxu1 %v16025_v61  ;;  %v12058_v9 = vpop.eup %12057  ;;  %v16034_v31 = vld [vmem:[#allocation90_spill] sm:$0xff] }
 0x222   :  { %9187 = vmatprep.subr.bf16.mxu0 %v16026_v49  ;;  %9219 = vmatprep.subr.bf16.mxu1 %v16027_v16  ;;  %v1685_v27 = vmul.f32 %v1682_v3, %v13475_v7  ;;  %v16035_v16 = vld [vmem:[#allocation91_spill] sm:$0xff]  ;;  %v16036_v7 = vld [vmem:[#allocation92_spill] sm:$0xff]  ;;  %v1679_v3 = vmul.f32 0.5, %v12058_v9 }
 0x223   :  { %v16043_v49 = vld [vmem:[#allocation3_spill] sm:$0xff]  ;;  %v16047_v9 = vld [vmem:[#allocation36_spill] sm:$0xff] }
 0x224   :  { %v13636_v23 = vadd.f32 %v1686_v6, %v1685_v27  ;;  %v16037_v6 = vld [vmem:[#allocation93_spill] sm:$0xff]  ;;  %v16038_v27 = vld [vmem:[#allocation94_spill] sm:$0xff] }
 0x225   :  { %9189 = vmatpush1.bf16.msra.mxu0 %v16029_v63  ;;  %9221 = vmatpush1.bf16.msra.mxu1 %v16030_v45  ;;  %v16039_v45 = vld [vmem:[#allocation95_spill] sm:$0xff] }
 0x226   :  { %16028 = vst [vmem:[#allocation112_spill] sm:$0xff] %v13636_v23  ;;  %9191 = vmatprep.subr.bf16.mxu0 %v16031_v18  ;;  %9223 = vmatprep.subr.bf16.mxu1 %v16032_v39  ;;  %12059 = vtanh.f32 %v13636_v23  ;;  %v16040_v18 = vld [vmem:[#allocation96_spill] sm:$0xff]  ;;  %v1683_v39 = vadd.f32 0.5, %v1679_v3  ;;  %v16041_v23 = vld [vmem:[#allocation97_spill] sm:$0xff] }
 0x227   :  { %v16048_v3 = vld [vmem:[#allocation37_spill] sm:$0xff] }
 0x229   :  { %9193 = vmatpush1.bf16.msra.mxu0 %v16033_v52  ;;  %9225 = vmatpush1.bf16.msra.mxu1 %v16034_v31  ;;  %v16042_v52 = vld [vmem:[#allocation98_spill] sm:$0xff] }
 0x22a   :  { %9195 = vmatprep.subr.bf16.mxu0 %v16035_v16  ;;  %9227 = vmatprep.subr.bf16.mxu1 %v16036_v7  ;;  %v16044_v16 = vld [vmem:[#allocation4_spill] sm:$0xff] }
 0x22d   :  { %9197 = vmatpush1.bf16.msra.mxu0 %v16037_v6  ;;  %9229 = vmatpush1.bf16.msra.mxu1 %v16038_v27 }
 0x22e   :  { %9199 = vmatprep.subr.bf16.mxu0 %v16039_v45  ;;  %9231 = vmatprep.subr.bf16.mxu1 %v16040_v18 }
 0x230   :  { %v12060_v63 = vpop.eup %12059 }
 0x231   :  { %9201 = vmatpush1.bf16.msra.mxu0 %v16041_v23  ;;  %9233 = vmatpush1.bf16.msra.mxu1 %v16042_v52  ;;  %v1689_v31 = vmul.f32 %v12060_v63, %v1683_v39  ;;  %v16045_v63 = vld [vmem:[#allocation34_spill] sm:$0xff]  ;;  %v16046_v39 = vld [vmem:[#allocation35_spill] sm:$0xff] }
 0x232   :  { %9235 = vmatprep.subr.bf16.mxu0 %v16043_v49  ;;  %9267 = vmatprep.subr.bf16.mxu1 %v16044_v16 }
 0x234   :  { %1897 = vmatmul.mubr.f32.vlgmr.msra.gmra.mrb[6].mxu0 %v1689_v31  ;;  %1968 = vmatmul.mubr.f32.vlgmr.msra.gmra.mrb[6].mxu1 %v1689_v31 }
 0x235   :  { %9237 = vmatpush1.bf16.msra.mxu0 %v12444_v11  ;;  %9269 = vmatpush1.bf16.msra.mxu1 %v12456_v15 }
 0x236   :  { %9239 = vmatprep.subr.bf16.mxu0 %v12469_v19  ;;  %9271 = vmatprep.subr.bf16.mxu1 %v12471_v20 }
 0x237   :  { %2076 = vmatprep.mubr.f32.mxu0 %v15908_v57  ;;  %2147 = vmatprep.mubr.f32.mxu1 %v15908_v57 }
 0x239   :  { %9241 = vmatpush1.bf16.msra.mxu0 %v12483_v24  ;;  %9273 = vmatpush1.bf16.msra.mxu1 %v12496_v28 }
 0x23a   :  { %9243 = vmatprep.subr.bf16.mxu0 %v12498_v29  ;;  %9275 = vmatprep.subr.bf16.mxu1 %v12509_v33 }
 0x23d   :  { %9245 = vmatpush1.bf16.msra.mxu0 %v12521_v37  ;;  %9277 = vmatpush1.bf16.msra.mxu1 %v12534_v41 }
 0x23e   :  { %9247 = vmatprep.subr.bf16.mxu0 %v12536_v42  ;;  %9279 = vmatprep.subr.bf16.mxu1 %v12548_v46  ;;  %v530_v46 = vpop.permute.xlu0 %529 }
 0x241   :  { %9249 = vmatpush1.bf16.msra.mxu0 %v12569_v53  ;;  %9281 = vmatpush1.bf16.msra.mxu1 %v12573_v54  ;;  %v16090_v53 = vld [vmem:[#allocation104_spill] sm:$0xff] }
 0x242   :  { %9251 = vmatprep.subr.bf16.mxu0 %v12575_v55  ;;  %9283 = vmatprep.subr.bf16.mxu1 %v12587_v59  ;;  %v16084_v55 = vld [vmem:[#allocation100_spill] sm:$0xff] }
 0x245   :  { %9253 = vmatpush1.bf16.msra.mxu0 %v12605_v1  ;;  %9285 = vmatpush1.bf16.msra.mxu1 %v12609_v2 }
 0x246   :  { %9255 = vmatprep.subr.bf16.mxu0 %v12611_v5  ;;  %9287 = vmatprep.subr.bf16.mxu1 %v12623_v13  ;;  %v66_v5 = vpop.permute.xlu1 %65 }
 0x247   :  { %v162_v54 = vmul.f32 %v16084_v55, %v66_v5  ;;  %v16094_v55 = vld [vmem:[#allocation108_spill] sm:$0xff] }
 0x249   :  { %9257 = vmatpush1.bf16.msra.mxu0 %v12641_v22  ;;  %9289 = vmatpush1.bf16.msra.mxu1 %v12648_v25  ;;  %v16081_v22 = vld [vmem:[#allocation113_spill] sm:$0xff] }
 0x24a   :  { %9259 = vmatprep.subr.bf16.mxu0 %v12650_v26  ;;  %9291 = vmatprep.subr.bf16.mxu1 %v12662_v32  ;;  %v16049_v32 = vld [vmem:[#allocation38_spill] sm:$0xff]  ;;  %v16080_v26 = vld [vmem:[#allocation99_spill] sm:$0xff] }
 0x24d   :  { %9261 = vmatpush1.bf16.msra.mxu0 %v12680_v40  ;;  %9293 = vmatpush1.bf16.msra.mxu1 %v12684_v43  ;;  %v16050_v40 = vld [vmem:[#allocation39_spill] sm:$0xff]  ;;  %v16051_v43 = vld [vmem:[#allocation40_spill] sm:$0xff] }
 0x24e   :  { %9263 = vmatprep.subr.bf16.mxu0 %v12686_v44  ;;  %9295 = vmatprep.subr.bf16.mxu1 %v15956_v35  ;;  %v16061_v35 = vld [vmem:[#allocation50_spill] sm:$0xff]  ;;  %v16062_v44 = vld [vmem:[#allocation51_spill] sm:$0xff] }
 0x251   :  { %9265 = vmatpush1.bf16.msra.mxu0 %v15957_v58  ;;  %9297 = vmatpush1.bf16.msra.mxu1 %v16045_v63  ;;  %v16052_v58 = vld [vmem:[#allocation41_spill] sm:$0xff]  ;;  %v16053_v63 = vld [vmem:[#allocation42_spill] sm:$0xff] }
 0x252   :  { %9299 = vmatprep.subr.bf16.mxu0 %v16046_v39  ;;  %9331 = vmatprep.subr.bf16.mxu1 %v16047_v9  ;;  %v16054_v39 = vld [vmem:[#allocation43_spill] sm:$0xff]  ;;  %v16055_v9 = vld [vmem:[#allocation44_spill] sm:$0xff] }
 0x254   :  { %2077 = vmatmul.mubr.f32.vlgmr.msra.gmra.mrb[8].mxu0 %v1689_v31  ;;  %2148 = vmatmul.mubr.f32.vlgmr.msra.gmra.mrb[8].mxu1 %v1689_v31  ;;  %v16056_v31 = vld [vmem:[#allocation45_spill] sm:$0xff] }
 0x255   :  { %9301 = vmatpush1.bf16.msra.mxu0 %v16048_v3  ;;  %9333 = vmatpush1.bf16.msra.mxu1 %v16049_v32  ;;  %v16057_v3 = vld [vmem:[#allocation46_spill] sm:$0xff]  ;;  %v16058_v32 = vld [vmem:[#allocation47_spill] sm:$0xff] }
 0x256   :  { %9303 = vmatprep.subr.bf16.mxu0 %v16050_v40  ;;  %9335 = vmatprep.subr.bf16.mxu1 %v16051_v43  ;;  %v16059_v40 = vld [vmem:[#allocation48_spill] sm:$0xff]  ;;  %v16060_v43 = vld [vmem:[#allocation49_spill] sm:$0xff] }
 0x257   :  { %2239 = vmatprep.mubr.f32.mxu0 %v15908_v57  ;;  %2310 = vmatprep.mubr.f32.mxu1 %v15908_v57 }
 0x259   :  { %9305 = vmatpush1.bf16.msra.mxu0 %v16052_v58  ;;  %9337 = vmatpush1.bf16.msra.mxu1 %v16053_v63  ;;  %v16063_v58 = vld [vmem:[#allocation52_spill] sm:$0xff]  ;;  %v16064_v63 = vld [vmem:[#allocation53_spill] sm:$0xff] }
 0x25a   :  { %9307 = vmatprep.subr.bf16.mxu0 %v16054_v39  ;;  %9339 = vmatprep.subr.bf16.mxu1 %v16055_v9  ;;  %v16065_v39 = vld [vmem:[#allocation54_spill] sm:$0xff]  ;;  %v16066_v9 = vld [vmem:[#allocation55_spill] sm:$0xff] }
 0x25d   :  { %9309 = vmatpush1.bf16.msra.mxu0 %v16056_v31  ;;  %9341 = vmatpush1.bf16.msra.mxu1 %v16057_v3  ;;  %v16067_v31 = vld [vmem:[#allocation56_spill] sm:$0xff]  ;;  %v16068_v3 = vld [vmem:[#allocation57_spill] sm:$0xff] }
 0x25e   :  { %9311 = vmatprep.subr.bf16.mxu0 %v16058_v32  ;;  %9343 = vmatprep.subr.bf16.mxu1 %v16059_v40  ;;  %v16069_v32 = vld [vmem:[#allocation58_spill] sm:$0xff]  ;;  %v16070_v40 = vld [vmem:[#allocation59_spill] sm:$0xff] }
 0x261   :  { %9313 = vmatpush1.bf16.msra.mxu0 %v16060_v43  ;;  %9345 = vmatpush1.bf16.msra.mxu1 %v16061_v35  ;;  %v16071_v43 = vld [vmem:[#allocation60_spill] sm:$0xff]  ;;  %v16072_v35 = vld [vmem:[#allocation61_spill] sm:$0xff] }
 0x262   :  { %9315 = vmatprep.subr.bf16.mxu0 %v16062_v44  ;;  %9347 = vmatprep.subr.bf16.mxu1 %v16063_v58  ;;  %v16073_v44 = vld [vmem:[#allocation62_spill] sm:$0xff]  ;;  %v16074_v58 = vld [vmem:[#allocation63_spill] sm:$0xff] }
 0x265   :  { %9317 = vmatpush1.bf16.msra.mxu0 %v16064_v63  ;;  %9349 = vmatpush1.bf16.msra.mxu1 %v16065_v39  ;;  %v16075_v63 = vld [vmem:[#allocation64_spill] sm:$0xff]  ;;  %v16076_v39 = vld [vmem:[#allocation65_spill] sm:$0xff] }
 0x266   :  { %9319 = vmatprep.subr.bf16.mxu0 %v16066_v9  ;;  %9351 = vmatprep.subr.bf16.mxu1 %v16067_v31  ;;  %v16077_v9 = vld [vmem:[#allocation66_spill] sm:$0xff]  ;;  %v16078_v31 = vld [vmem:[#allocation67_spill] sm:$0xff] }
 0x269   :  { %9321 = vmatpush1.bf16.msra.mxu0 %v16068_v3  ;;  %9353 = vmatpush1.bf16.msra.mxu1 %v16069_v32  ;;  %v16079_v3 = vld [vmem:[#allocation68_spill] sm:$0xff] }
 0x26a   :  { %9323 = vmatprep.subr.bf16.mxu0 %v16070_v40  ;;  %9355 = vmatprep.subr.bf16.mxu1 %v16071_v43 }
 0x26d   :  { %9325 = vmatpush1.bf16.msra.mxu0 %v16072_v35  ;;  %9357 = vmatpush1.bf16.msra.mxu1 %v16073_v44 }
 0x26e   :  { %9327 = vmatprep.subr.bf16.mxu0 %v16074_v58  ;;  %9359 = vmatprep.subr.bf16.mxu1 %v16075_v63  ;;  %v16082_v58 = vld [vmem:[#allocation114_spill] sm:$0xff] }
 0x271   :  { %9329 = vmatpush1.bf16.msra.mxu0 %v16076_v39  ;;  %9361 = vmatpush1.bf16.msra.mxu1 %v16077_v9  ;;  %v16083_v39 = vld [vmem:[#allocation115_spill] sm:$0xff] }
 0x272   :  { %9363 = vmatprep.subr.bf16.mxu0 %v16078_v31  ;;  %9395 = vmatprep.subr.bf16.mxu1 %v16079_v3 }
 0x307   :  { %v1898_v32 = vpop.f32.mrb[6].mxu0  ;;  %v1969_v40 = vpop.f32.mrb[6].mxu1 }
 0x308   :  { %v1974_v43 = vadd.f32 %v1898_v32, %v16080_v26  ;;  %v1900_v25 = vpop.f32.mrb[7].mxu0  ;;  %v1971_v35 = vpop.f32.mrb[7].mxu1  ;;  %v1976_v63 = vadd.f32 %v1969_v40, %v16083_v39  ;;  %v16089_v39 = vld [vmem:[#allocation103_spill] sm:$0xff] }
 0x309   :  { %v1975_v44 = vadd.f32 %v1900_v25, %v16081_v22  ;;  %v1977_v13 = vadd.f32 %v1971_v35, %v16082_v58  ;;  %v16085_v25 = vld [vmem:[#allocation101_spill] sm:$0xff]  ;;  %v315_v22 = vpop.permute.xlu1 %314  ;;  %v16086_v35 = vld [vmem:[#allocation116_spill] sm:$0xff] }
 0x30a   :  { %12061 = vtanh.f32 %v1974_v43  ;;  %v163_v43 = vmul.f32 %v16085_v25, %v66_v5 }
 0x30b   :  { %12063 = vtanh.f32 %v1975_v44 }
 0x30c   :  { %12065 = vtanh.f32 %v1977_v13  ;;  %v16087_v13 = vld [vmem:[#allocation102_spill] sm:$0xff] }
 0x30d   :  { %12067 = vtanh.f32 %v1976_v63  ;;  %v165_v58 = vmul.f32 %v16087_v13, %v66_v5  ;;  %v16091_v63 = vld [vmem:[#allocation105_spill] sm:$0xff] }
 0x30f   :  { %v250_v42 = vadd.f32 %v16094_v55, %v165_v58 }
 0x314   :  { %v12062_v9 = vpop.eup %12061 }
 0x315   :  { %v1982_v31 = vmul.f32 0.5, %v12062_v9  ;;  %v12064_v2 = vpop.eup %12063  ;;  %v398_v9 = vmul.f32 %v16089_v39, %v315_v22  ;;  %v614_v39 = vmul.f32 %v16009_v50, %v530_v46 }
 0x316   :  { %v1983_v1 = vmul.f32 0.5, %v12064_v2  ;;  %v12066_v59 = vpop.eup %12065  ;;  %v399_v2 = vmul.f32 %v16091_v63, %v315_v22  ;;  %v616_v63 = vmul.f32 %v16010_v34, %v530_v46 }
 0x317   :  { %v1986_v3 = vadd.f32 0.5, %v1982_v31  ;;  %v247_v31 = vadd.f32 %v16090_v53, %v162_v54  ;;  %v164_v53 = vmul.f32 %v16011_v56, %v66_v5 }
 0x318   :  { %v1987_v32 = vadd.f32 0.5, %v1983_v1 }
 0x319   :  { %v1991_v26 = vmul.f32 %v12066_v59, %v1986_v3  ;;  %v16092_v59 = vld [vmem:[#allocation106_spill] sm:$0xff]  ;;  %v16093_v3 = vld [vmem:[#allocation107_spill] sm:$0xff] }
 0x31a   :  { %v1990_v44 = vmul.f32 %v1987_v32, %v16086_v35  ;;  %v248_v1 = vadd.f32 %v16092_v59, %v163_v43  ;;  %v401_v25 = vmul.f32 %v16093_v3, %v315_v22  ;;  %v12068_v32 = vpop.eup %12067  ;;  %v462_v35 = vadd.f32 %v398_v9, %v247_v31 }
 0x31b   :  { %v1984_v13 = vmul.f32 0.5, %v12068_v32 }
 0x31c   :  { %v13731_v40 = vadd.f32 %v1991_v26, %v1990_v44  ;;  %v613_v26 = vmul.f32 %v16008_v4, %v530_v46  ;;  %v463_v44 = vadd.f32 %v399_v2, %v248_v1  ;;  %v465_v54 = vadd.f32 %v401_v25, %v250_v42 }
 0x31d   :  { %v1988_v3 = vadd.f32 0.5, %v1984_v13  ;;  %v400_v2 = vmul.f32 %v13447_v60, %v315_v22  ;;  %v249_v1 = vadd.f32 %v13450_v21, %v164_v53  ;;  %v16095_v22 = vld [vmem:[#allocation78_spill] sm:$0xff] }
 0x31e   :  { %16088 = vst [vmem:[#allocation69_spill] sm:$0xff] %v13731_v40  ;;  %12069 = vtanh.f32 %v13731_v40  ;;  %v677_v40 = vadd.f32 %v613_v26, %v462_v35  ;;  %v678_v59 = vadd.f32 %v614_v39, %v463_v44  ;;  %v680_v55 = vadd.f32 %v616_v63, %v465_v54  ;;  %v16097_v44 = vld [vmem:[#allocation83_spill] sm:$0xff]  ;;  %v16098_v54 = vld [vmem:[#allocation84_spill] sm:$0xff] }
 0x31f   :  { %v464_v39 = vadd.f32 %v400_v2, %v249_v1  ;;  %v16101_v2 = vld [vmem:[#allocation86_spill] sm:$0xff]  ;;  %v16102_v1 = vld [vmem:[#allocation87_spill] sm:$0xff] }
 0x327   :  { %v2078_v41 = vpop.f32.mrb[8].mxu0  ;;  %v2149_v43 = vpop.f32.mrb[8].mxu1 }
 0x328   :  { %v2154_v37 = vadd.f32 %v2078_v41, %v677_v40  ;;  %v2080_v58 = vpop.f32.mrb[9].mxu0  ;;  %v2151_v9 = vpop.f32.mrb[9].mxu1  ;;  %v615_v41 = vmul.f32 %v13457_v47, %v530_v46  ;;  %v16096_v40 = vld [vmem:[#allocation79_spill] sm:$0xff] }
 0x329   :  { %v12070_v31 = vpop.eup %12069  ;;  %v2155_v32 = vadd.f32 %v2080_v58, %v678_v59  ;;  %v2157_v42 = vadd.f32 %v2151_v9, %v680_v55 }
 0x32a   :  { %12071 = vtanh.f32 %v2154_v37  ;;  %v1994_v25 = vmul.f32 %v12070_v31, %v1988_v3  ;;  %v679_v37 = vadd.f32 %v615_v41, %v464_v39  ;;  %v16100_v31 = vld [vmem:[#allocation85_spill] sm:$0xff]  ;;  %v16106_v39 = vld [vmem:[#allocation91_spill] sm:$0xff] }
 0x32b   :  { %12073 = vtanh.f32 %v2155_v32  ;;  %v16103_v32 = vld [vmem:[#allocation88_spill] sm:$0xff] }
 0x32c   :  { %2240 = vmatmul.mubr.f32.vlgmr.msra.gmra.mrb[10].mxu0 %v1994_v25  ;;  %2311 = vmatmul.mubr.f32.vlgmr.msra.gmra.mrb[10].mxu1 %v1994_v25  ;;  %v1995_v5 = vmul.f32 %v13613_v17, %v1994_v25  ;;  %12075 = vtanh.f32 %v2157_v42  ;;  %v2156_v46 = vadd.f32 %v2149_v43, %v679_v37  ;;  %v16099_v43 = vld [vmem:[#allocation112_spill] sm:$0xff]  ;;  %v16104_v25 = vld [vmem:[#allocation89_spill] sm:$0xff] }
 0x32d   :  { %9365 = vmatpush1.bf16.msra.mxu0 %v16012_v48  ;;  %9397 = vmatpush1.bf16.msra.mxu1 %v16013_v30 }
 0x32e   :  { %1996 = vadd.xlane.f32.xlu1 %v1995_v5  ;;  %9367 = vmatprep.subr.bf16.mxu0 %v16014_v0  ;;  %12077 = vtanh.f32 %v2156_v46  ;;  %v16105_v5 = vld [vmem:[#allocation90_spill] sm:$0xff] }
 0x32f   :  { %9399 = vmatprep.subr.bf16.mxu1 %v16015_v36  ;;  %2381 = vmatprep.mubr.f32.mxu0 %v15908_v57 }
 0x330   :  { %2452 = vmatprep.mubr.f32.mxu1 %v15908_v57 }
 0x331   :  { %9369 = vmatpush1.bf16.msra.mxu0 %v16016_v62  ;;  %9401 = vmatpush1.bf16.msra.mxu1 %v16017_v8 }
 0x332   :  { %9371 = vmatprep.subr.bf16.mxu0 %v16018_v14  ;;  %9403 = vmatprep.subr.bf16.mxu1 %v16019_v51 }
 0x334   :  { %v12072_v53 = vpop.eup %12071 }
 0x335   :  { %v2162_v55 = vmul.f32 0.5, %v12072_v53  ;;  %9373 = vmatpush1.bf16.msra.mxu0 %v16020_v38  ;;  %9405 = vmatpush1.bf16.msra.mxu1 %v16095_v22  ;;  %v12074_v13 = vpop.eup %12073 }
 0x336   :  { %9375 = vmatprep.subr.bf16.mxu0 %v16096_v40  ;;  %9407 = vmatprep.subr.bf16.mxu1 %v16023_v12  ;;  %v2163_v59 = vmul.f32 0.5, %v12074_v13  ;;  %v12076_v3 = vpop.eup %12075  ;;  %v16108_v13 = vld [vmem:[#allocation14_spill] sm:$0xff] }
 0x337   :  { %v2166_v63 = vadd.f32 0.5, %v2162_v55  ;;  %v16107_v55 = vld [vmem:[#allocation13_spill] sm:$0xff] }
 0x338   :  { %v2167_v35 = vadd.f32 0.5, %v2163_v59  ;;  %v12078_v42 = vpop.eup %12077  ;;  %v16110_v59 = vld [vmem:[#allocation16_spill] sm:$0xff] }
 0x339   :  { %v2171_v26 = vmul.f32 %v12076_v3, %v2166_v63  ;;  %9377 = vmatpush1.bf16.msra.mxu0 %v16024_v10  ;;  %9409 = vmatpush1.bf16.msra.mxu1 %v16025_v61  ;;  %v2164_v41 = vmul.f32 0.5, %v12078_v42  ;;  %v16109_v63 = vld [vmem:[#allocation15_spill] sm:$0xff]  ;;  %v16111_v3 = vld [vmem:[#allocation17_spill] sm:$0xff]  ;;  %v16116_v42 = vld [vmem:[#allocation22_spill] sm:$0xff] }
 0x33a   :  { %9379 = vmatprep.subr.bf16.mxu0 %v16097_v44  ;;  %9411 = vmatprep.subr.bf16.mxu1 %v16098_v54  ;;  %v2170_v58 = vmul.f32 %v2167_v35, %v16099_v43  ;;  %v16112_v35 = vld [vmem:[#allocation18_spill] sm:$0xff]  ;;  %v16114_v43 = vld [vmem:[#allocation20_spill] sm:$0xff] }
 0x33b   :  { %v2168_v37 = vadd.f32 0.5, %v2164_v41  ;;  %v16117_v41 = vld [vmem:[#allocation23_spill] sm:$0xff] }
 0x33c   :  { %v13767_v9 = vadd.f32 %v2171_v26, %v2170_v58  ;;  %v16113_v26 = vld [vmem:[#allocation19_spill] sm:$0xff]  ;;  %v16115_v58 = vld [vmem:[#allocation21_spill] sm:$0xff] }
 0x33d   :  { %9381 = vmatpush1.bf16.msra.mxu0 %v16100_v31  ;;  %9413 = vmatpush1.bf16.msra.mxu1 %v16101_v2 }
 0x33e   :  { %9383 = vmatprep.subr.bf16.mxu0 %v16102_v1  ;;  %9415 = vmatprep.subr.bf16.mxu1 %v16103_v32  ;;  %12079 = vtanh.f32 %v13767_v9 }
 0x341   :  { %9385 = vmatpush1.bf16.msra.mxu0 %v16104_v25  ;;  %9417 = vmatpush1.bf16.msra.mxu1 %v16105_v5 }
 0x342   :  { %9387 = vmatprep.subr.bf16.mxu0 %v16106_v39  ;;  %9419 = vmatprep.subr.bf16.mxu1 %v16036_v7 }
 0x345   :  { %9389 = vmatpush1.bf16.msra.mxu0 %v16037_v6  ;;  %9421 = vmatpush1.bf16.msra.mxu1 %v16038_v27 }
 0x346   :  { %9391 = vmatprep.subr.bf16.mxu0 %v16039_v45  ;;  %9423 = vmatprep.subr.bf16.mxu1 %v16040_v18 }
 0x348   :  { %v12080_v46 = vpop.eup %12079 }
 0x349   :  { %9393 = vmatpush1.bf16.msra.mxu0 %v16041_v23  ;;  %9425 = vmatpush1.bf16.msra.mxu1 %v16042_v52  ;;  %v2174_v53 = vmul.f32 %v12080_v46, %v2168_v37  ;;  %v16118_v37 = vld [vmem:[#allocation24_spill] sm:$0xff]  ;;  %v16119_v46 = vld [vmem:[#allocation25_spill] sm:$0xff] }
 0x34a   :  { %9427 = vmatprep.subr.bf16.mxu0 %v16043_v49  ;;  %9459 = vmatprep.subr.bf16.mxu1 %v16044_v16  ;;  %v16173_v16 = vld [vmem:[#allocation105_spill] sm:$0xff] }
 0x34c   :  { %2382 = vmatmul.mubr.f32.vlgmr.msra.gmra.mrb[10].mxu0 %v2174_v53  ;;  %2453 = vmatmul.mubr.f32.vlgmr.msra.gmra.mrb[10].mxu1 %v2174_v53 }
 0x34d   :  { %9429 = vmatpush1.bf16.msra.mxu0 %v12444_v11  ;;  %9461 = vmatpush1.bf16.msra.mxu1 %v12456_v15 }
 0x34e   :  { %9431 = vmatprep.subr.bf16.mxu0 %v12469_v19  ;;  %9463 = vmatprep.subr.bf16.mxu1 %v12471_v20  ;;  %v16168_v19 = vld [vmem:[#allocation101_spill] sm:$0xff] }
 0x34f   :  { %2561 = vmatprep.mubr.f32.mxu0 %v15908_v57  ;;  %2632 = vmatprep.mubr.f32.mxu1 %v15908_v57 }
 0x351   :  { %9433 = vmatpush1.bf16.msra.mxu0 %v12483_v24  ;;  %9465 = vmatpush1.bf16.msra.mxu1 %v12496_v28  ;;  %v71_v28 = vpop.permute.xlu1 %70 }
 0x352   :  { %9435 = vmatprep.subr.bf16.mxu0 %v12498_v29  ;;  %9467 = vmatprep.subr.bf16.mxu1 %v12509_v33  ;;  %v167_v15 = vmul.f32 %v16168_v19, %v71_v28  ;;  %v16176_v19 = vld [vmem:[#allocation108_spill] sm:$0xff] }
 0x355   :  { %9437 = vmatpush1.bf16.msra.mxu0 %v16107_v55  ;;  %9469 = vmatpush1.bf16.msra.mxu1 %v16108_v13  ;;  %v16164_v55 = vld [vmem:[#allocation113_spill] sm:$0xff] }
 0x356   :  { %9439 = vmatprep.subr.bf16.mxu0 %v16109_v63  ;;  %9471 = vmatprep.subr.bf16.mxu1 %v16110_v59  ;;  %v16120_v63 = vld [vmem:[#allocation26_spill] sm:$0xff]  ;;  %v16121_v59 = vld [vmem:[#allocation27_spill] sm:$0xff] }
 0x359   :  { %9441 = vmatpush1.bf16.msra.mxu0 %v16111_v3  ;;  %9473 = vmatpush1.bf16.msra.mxu1 %v16112_v35  ;;  %v16122_v3 = vld [vmem:[#allocation28_spill] sm:$0xff]  ;;  %v16123_v35 = vld [vmem:[#allocation29_spill] sm:$0xff] }
 0x35a   :  { %9443 = vmatprep.subr.bf16.mxu0 %v16113_v26  ;;  %9475 = vmatprep.subr.bf16.mxu1 %v16114_v43  ;;  %v16124_v26 = vld [vmem:[#allocation30_spill] sm:$0xff]  ;;  %v16125_v43 = vld [vmem:[#allocation31_spill] sm:$0xff] }
 0x35d   :  { %9445 = vmatpush1.bf16.msra.mxu0 %v16115_v58  ;;  %9477 = vmatpush1.bf16.msra.mxu1 %v16116_v42  ;;  %v16126_v58 = vld [vmem:[#allocation32_spill] sm:$0xff]  ;;  %v16127_v42 = vld [vmem:[#allocation33_spill] sm:$0xff] }
 0x35e   :  { %9447 = vmatprep.subr.bf16.mxu0 %v16117_v41  ;;  %9479 = vmatprep.subr.bf16.mxu1 %v16118_v37  ;;  %v16128_v41 = vld [vmem:[#allocation34_spill] sm:$0xff]  ;;  %v16129_v37 = vld [vmem:[#allocation35_spill] sm:$0xff] }
 0x361   :  { %9449 = vmatpush1.bf16.msra.mxu0 %v16119_v46  ;;  %9481 = vmatpush1.bf16.msra.mxu1 %v16120_v63  ;;  %v16130_v46 = vld [vmem:[#allocation36_spill] sm:$0xff]  ;;  %v16163_v63 = vld [vmem:[#allocation99_spill] sm:$0xff] }
 0x362   :  { %9451 = vmatprep.subr.bf16.mxu0 %v16121_v59  ;;  %9483 = vmatprep.subr.bf16.mxu1 %v16122_v3  ;;  %v16131_v59 = vld [vmem:[#allocation37_spill] sm:$0xff]  ;;  %v16132_v3 = vld [vmem:[#allocation38_spill] sm:$0xff] }
 0x365   :  { %9453 = vmatpush1.bf16.msra.mxu0 %v16123_v35  ;;  %9485 = vmatpush1.bf16.msra.mxu1 %v16124_v26  ;;  %v16133_v35 = vld [vmem:[#allocation39_spill] sm:$0xff]  ;;  %v16134_v26 = vld [vmem:[#allocation40_spill] sm:$0xff] }
 0x366   :  { %9455 = vmatprep.subr.bf16.mxu0 %v16125_v43  ;;  %9487 = vmatprep.subr.bf16.mxu1 %v16126_v58  ;;  %v16144_v58 = vld [vmem:[#allocation50_spill] sm:$0xff]  ;;  %v16145_v43 = vld [vmem:[#allocation51_spill] sm:$0xff] }
 0x369   :  { %9457 = vmatpush1.bf16.msra.mxu0 %v16127_v42  ;;  %9489 = vmatpush1.bf16.msra.mxu1 %v16128_v41  ;;  %v16135_v42 = vld [vmem:[#allocation41_spill] sm:$0xff]  ;;  %v16136_v41 = vld [vmem:[#allocation42_spill] sm:$0xff] }
 0x36a   :  { %9491 = vmatprep.subr.bf16.mxu0 %v16129_v37  ;;  %9523 = vmatprep.subr.bf16.mxu1 %v16130_v46  ;;  %v16137_v37 = vld [vmem:[#allocation43_spill] sm:$0xff]  ;;  %v16138_v46 = vld [vmem:[#allocation44_spill] sm:$0xff] }
 0x36c   :  { %2562 = vmatmul.mubr.f32.vlgmr.msra.gmra.mrb[12].mxu0 %v2174_v53  ;;  %2633 = vmatmul.mubr.f32.vlgmr.msra.gmra.mrb[12].mxu1 %v2174_v53  ;;  %v16139_v53 = vld [vmem:[#allocation45_spill] sm:$0xff] }
 0x36d   :  { %9493 = vmatpush1.bf16.msra.mxu0 %v16131_v59  ;;  %9525 = vmatpush1.bf16.msra.mxu1 %v16132_v3  ;;  %v16140_v59 = vld [vmem:[#allocation46_spill] sm:$0xff]  ;;  %v16141_v3 = vld [vmem:[#allocation47_spill] sm:$0xff] }
 0x36e   :  { %9495 = vmatprep.subr.bf16.mxu0 %v16133_v35  ;;  %9527 = vmatprep.subr.bf16.mxu1 %v16134_v26  ;;  %v16142_v35 = vld [vmem:[#allocation48_spill] sm:$0xff]  ;;  %v16143_v26 = vld [vmem:[#allocation49_spill] sm:$0xff] }
 0x36f   :  { %2724 = vmatprep.mubr.f32.mxu0 %v15908_v57  ;;  %2795 = vmatprep.mubr.f32.mxu1 %v15908_v57 }
 0x371   :  { %9497 = vmatpush1.bf16.msra.mxu0 %v16135_v42  ;;  %9529 = vmatpush1.bf16.msra.mxu1 %v16136_v41  ;;  %v16146_v42 = vld [vmem:[#allocation52_spill] sm:$0xff]  ;;  %v16147_v41 = vld [vmem:[#allocation53_spill] sm:$0xff] }
 0x372   :  { %9499 = vmatprep.subr.bf16.mxu0 %v16137_v37  ;;  %9531 = vmatprep.subr.bf16.mxu1 %v16138_v46  ;;  %v16148_v37 = vld [vmem:[#allocation54_spill] sm:$0xff]  ;;  %v16149_v46 = vld [vmem:[#allocation55_spill] sm:$0xff] }
 0x375   :  { %9501 = vmatpush1.bf16.msra.mxu0 %v16139_v53  ;;  %9533 = vmatpush1.bf16.msra.mxu1 %v16140_v59  ;;  %v16150_v53 = vld [vmem:[#allocation56_spill] sm:$0xff]  ;;  %v16151_v59 = vld [vmem:[#allocation57_spill] sm:$0xff] }
 0x376   :  { %9503 = vmatprep.subr.bf16.mxu0 %v16141_v3  ;;  %9535 = vmatprep.subr.bf16.mxu1 %v16142_v35  ;;  %v16152_v3 = vld [vmem:[#allocation58_spill] sm:$0xff]  ;;  %v16153_v35 = vld [vmem:[#allocation59_spill] sm:$0xff] }
 0x379   :  { %9505 = vmatpush1.bf16.msra.mxu0 %v16143_v26  ;;  %9537 = vmatpush1.bf16.msra.mxu1 %v16144_v58  ;;  %v16154_v26 = vld [vmem:[#allocation60_spill] sm:$0xff]  ;;  %v16155_v58 = vld [vmem:[#allocation61_spill] sm:$0xff] }
 0x37a   :  { %9507 = vmatprep.subr.bf16.mxu0 %v16145_v43  ;;  %9539 = vmatprep.subr.bf16.mxu1 %v16146_v42  ;;  %v16156_v43 = vld [vmem:[#allocation62_spill] sm:$0xff]  ;;  %v16157_v42 = vld [vmem:[#allocation63_spill] sm:$0xff] }
 0x37d   :  { %9509 = vmatpush1.bf16.msra.mxu0 %v16147_v41  ;;  %9541 = vmatpush1.bf16.msra.mxu1 %v16148_v37  ;;  %v16158_v41 = vld [vmem:[#allocation64_spill] sm:$0xff]  ;;  %v16159_v37 = vld [vmem:[#allocation65_spill] sm:$0xff] }
 0x37e   :  { %9511 = vmatprep.subr.bf16.mxu0 %v16149_v46  ;;  %9543 = vmatprep.subr.bf16.mxu1 %v16150_v53  ;;  %v16160_v46 = vld [vmem:[#allocation66_spill] sm:$0xff]  ;;  %v16161_v53 = vld [vmem:[#allocation67_spill] sm:$0xff] }
 0x381   :  { %9513 = vmatpush1.bf16.msra.mxu0 %v16151_v59  ;;  %9545 = vmatpush1.bf16.msra.mxu1 %v16152_v3  ;;  %v16162_v59 = vld [vmem:[#allocation68_spill] sm:$0xff] }
 0x382   :  { %9515 = vmatprep.subr.bf16.mxu0 %v16153_v35  ;;  %9547 = vmatprep.subr.bf16.mxu1 %v16154_v26 }
 0x385   :  { %9517 = vmatpush1.bf16.msra.mxu0 %v16155_v58  ;;  %9549 = vmatpush1.bf16.msra.mxu1 %v16156_v43 }
 0x386   :  { %9519 = vmatprep.subr.bf16.mxu0 %v16157_v42  ;;  %9551 = vmatprep.subr.bf16.mxu1 %v16158_v41  ;;  %v16165_v42 = vld [vmem:[#allocation114_spill] sm:$0xff] }
 0x389   :  { %9521 = vmatpush1.bf16.msra.mxu0 %v16159_v37  ;;  %9553 = vmatpush1.bf16.msra.mxu1 %v16160_v46  ;;  %v16166_v37 = vld [vmem:[#allocation115_spill] sm:$0xff] }
 0x38a   :  { %9555 = vmatprep.subr.bf16.mxu0 %v16161_v53  ;;  %9587 = vmatprep.subr.bf16.mxu1 %v16162_v59 }
 0x41f   :  { %v2383_v3 = vpop.f32.mrb[10].mxu0  ;;  %v2454_v35 = vpop.f32.mrb[10].mxu1 }
 0x420   :  { %v2459_v26 = vadd.f32 %v2383_v3, %v16163_v63  ;;  %v2385_v13 = vpop.f32.mrb[11].mxu0  ;;  %v2456_v58 = vpop.f32.mrb[11].mxu1  ;;  %v2461_v41 = vadd.f32 %v2454_v35, %v16166_v37  ;;  %v16167_v3 = vld [vmem:[#allocation100_spill] sm:$0xff]  ;;  %v16171_v35 = vld [vmem:[#allocation103_spill] sm:$0xff] }
 0x421   :  { %v2460_v43 = vadd.f32 %v2385_v13, %v16164_v55  ;;  %v2462_v33 = vadd.f32 %v2456_v58, %v16165_v42  ;;  %v166_v63 = vmul.f32 %v16167_v3, %v71_v28  ;;  %v16169_v55 = vld [vmem:[#allocation102_spill] sm:$0xff]  ;;  %v16175_v3 = vld [vmem:[#allocation107_spill] sm:$0xff] }
 0x422   :  { %12081 = vtanh.f32 %v2459_v26  ;;  %v169_v58 = vmul.f32 %v16169_v55, %v71_v28 }
 0x423   :  { %12083 = vtanh.f32 %v2460_v43  ;;  %v319_v43 = vpop.permute.xlu0 %318 }
 0x424   :  { %12085 = vtanh.f32 %v2462_v33  ;;  %v16170_v33 = vld [vmem:[#allocation69_spill] sm:$0xff]  ;;  %v402_v37 = vmul.f32 %v16171_v35, %v319_v43  ;;  %v405_v52 = vmul.f32 %v16175_v3, %v319_v43 }
 0x425   :  { %12087 = vtanh.f32 %v2461_v41 }
 0x42c   :  { %v12082_v46 = vpop.eup %12081 }
 0x42d   :  { %v2467_v29 = vmul.f32 0.5, %v12082_v46  ;;  %v12084_v53 = vpop.eup %12083  ;;  %v16172_v46 = vld [vmem:[#allocation104_spill] sm:$0xff] }
 0x42e   :  { %v2468_v24 = vmul.f32 0.5, %v12084_v53  ;;  %v12086_v20 = vpop.eup %12085  ;;  %v251_v11 = vadd.f32 %v16172_v46, %v166_v63  ;;  %v16174_v53 = vld [vmem:[#allocation106_spill] sm:$0xff] }
 0x42f   :  { %v2471_v59 = vadd.f32 0.5, %v2467_v29  ;;  %v403_v29 = vmul.f32 %v16173_v16, %v319_v43  ;;  %v252_v49 = vadd.f32 %v16174_v53, %v167_v15 }
 0x430   :  { %v2472_v13 = vadd.f32 0.5, %v2468_v24  ;;  %v254_v24 = vadd.f32 %v16176_v19, %v169_v58  ;;  %v404_v58 = vmul.f32 %v13447_v60, %v319_v43 }
 0x431   :  { %v2476_v26 = vmul.f32 %v12086_v20, %v2471_v59  ;;  %v534_v20 = vpop.permute.xlu1 %533  ;;  %v466_v59 = vadd.f32 %v402_v37, %v251_v11  ;;  %v467_v35 = vadd.f32 %v403_v29, %v252_v49 }
 0x432   :  { %v2475_v42 = vmul.f32 %v2472_v13, %v16170_v33  ;;  %v617_v13 = vmul.f32 %v16008_v4, %v534_v20  ;;  %v12088_v33 = vpop.eup %12087  ;;  %v618_v63 = vmul.f32 %v16009_v50, %v534_v20  ;;  %v469_v46 = vadd.f32 %v405_v52, %v254_v24 }
 0x433   :  { %v2469_v15 = vmul.f32 0.5, %v12088_v33 }
 0x434   :  { %v13865_v41 = vadd.f32 %v2476_v26, %v2475_v42  ;;  %v620_v42 = vmul.f32 %v16010_v34, %v534_v20  ;;  %v168_v26 = vmul.f32 %v16011_v56, %v71_v28  ;;  %v681_v53 = vadd.f32 %v617_v13, %v466_v59 }
 0x435   :  { %v682_v3 = vadd.f32 %v618_v63, %v467_v35  ;;  %v2473_v4 = vadd.f32 0.5, %v2469_v15  ;;  %v619_v59 = vmul.f32 %v13457_v47, %v534_v20  ;;  %v16178_v15 = vld [vmem:[#allocation3_spill] sm:$0xff] }
 0x436   :  { %12089 = vtanh.f32 %v13865_v41  ;;  %v684_v16 = vadd.f32 %v620_v42, %v469_v46  ;;  %v253_v11 = vadd.f32 %v13450_v21, %v168_v26  ;;  %v16177_v42 = vld [vmem:[#allocation98_spill] sm:$0xff] }
 0x438   :  { %v468_v28 = vadd.f32 %v404_v58, %v253_v11  ;;  %v16179_v58 = vld [vmem:[#allocation4_spill] sm:$0xff]  ;;  %v16180_v11 = vld [vmem:[#allocation5_spill] sm:$0xff] }
 0x43f   :  { %v2563_v19 = vpop.f32.mrb[12].mxu0  ;;  %v2634_v37 = vpop.f32.mrb[12].mxu1 }
 0x440   :  { %v2639_v55 = vadd.f32 %v2563_v19, %v681_v53  ;;  %v2565_v49 = vpop.f32.mrb[13].mxu0  ;;  %v2636_v29 = vpop.f32.mrb[13].mxu1  ;;  %v683_v19 = vadd.f32 %v619_v59, %v468_v28  ;;  %v16186_v28 = vld [vmem:[#allocation11_spill] sm:$0xff]  ;;  %v16187_v59 = vld [vmem:[#allocation12_spill] sm:$0xff] }
 0x441   :  { %v12090_v50 = vpop.eup %12089  ;;  %v2640_v52 = vadd.f32 %v2565_v49, %v682_v3  ;;  %v2642_v24 = vadd.f32 %v2636_v29, %v684_v16  ;;  %v16182_v49 = vld [vmem:[#allocation7_spill] sm:$0xff]  ;;  %v16183_v29 = vld [vmem:[#allocation8_spill] sm:$0xff] }
 0x442   :  { %12091 = vtanh.f32 %v2639_v55  ;;  %v2479_v34 = vmul.f32 %v12090_v50, %v2473_v4  ;;  %v2641_v50 = vadd.f32 %v2634_v37, %v683_v19  ;;  %v16181_v37 = vld [vmem:[#allocation6_spill] sm:$0xff] }
 0x443   :  { %12093 = vtanh.f32 %v2640_v52  ;;  %v16184_v52 = vld [vmem:[#allocation9_spill] sm:$0xff]  ;;  %v16189_v19 = vld [vmem:[#allocation14_spill] sm:$0xff] }
 0x444   :  { %2725 = vmatmul.mubr.f32.vlgmr.msra.gmra.mrb[14].mxu0 %v2479_v34  ;;  %2796 = vmatmul.mubr.f32.vlgmr.msra.gmra.mrb[14].mxu1 %v2479_v34  ;;  %v2480_v43 = vmul.f32 %v13613_v17, %v2479_v34  ;;  %12095 = vtanh.f32 %v2642_v24  ;;  %v16185_v24 = vld [vmem:[#allocation10_spill] sm:$0xff] }
 0x445   :  { %9557 = vmatpush1.bf16.msra.mxu0 %v16012_v48  ;;  %9589 = vmatpush1.bf16.msra.mxu1 %v16013_v30  ;;  %12097 = vtanh.f32 %v2641_v50  ;;  %v16190_v50 = vld [vmem:[#allocation15_spill] sm:$0xff] }
 0x446   :  { %2481 = vadd.xlane.f32.xlu0 %v2480_v43  ;;  %9559 = vmatprep.subr.bf16.mxu0 %v16014_v0  ;;  %v16188_v43 = vld [vmem:[#allocation13_spill] sm:$0xff] }
 0x447   :  { %9591 = vmatprep.subr.bf16.mxu1 %v16015_v36  ;;  %2866 = vmatprep.mubr.f32.mxu0 %v15908_v57 }
 0x448   :  { %2937 = vmatprep.mubr.f32.mxu1 %v15908_v57 }
 0x449   :  { %9561 = vmatpush1.bf16.msra.mxu0 %v16016_v62  ;;  %9593 = vmatpush1.bf16.msra.mxu1 %v16017_v8 }
 0x44a   :  { %9563 = vmatprep.subr.bf16.mxu0 %v16018_v14  ;;  %9595 = vmatprep.subr.bf16.mxu1 %v16019_v51 }
 0x44c   :  { %v12092_v34 = vpop.eup %12091 }
 0x44d   :  { %v2647_v4 = vmul.f32 0.5, %v12092_v34  ;;  %9565 = vmatpush1.bf16.msra.mxu0 %v16020_v38  ;;  %9597 = vmatpush1.bf16.msra.mxu1 %v16095_v22  ;;  %v12094_v17 = vpop.eup %12093  ;;  %v16191_v34 = vld [vmem:[#allocation16_spill] sm:$0xff] }
 0x44e   :  { %9567 = vmatprep.subr.bf16.mxu0 %v16096_v40  ;;  %9599 = vmatprep.subr.bf16.mxu1 %v16023_v12  ;;  %v2648_v55 = vmul.f32 0.5, %v12094_v17  ;;  %v12096_v3 = vpop.eup %12095  ;;  %v16193_v17 = vld [vmem:[#allocation18_spill] sm:$0xff] }
 0x44f   :  { %v2651_v16 = vadd.f32 0.5, %v2647_v4  ;;  %v12098_v13 = vpop.eup %12097  ;;  %v16192_v4 = vld [vmem:[#allocation17_spill] sm:$0xff] }
 0x450   :  { %v2652_v35 = vadd.f32 0.5, %v2648_v55  ;;  %v16195_v55 = vld [vmem:[#allocation20_spill] sm:$0xff] }
 0x451   :  { %v2656_v46 = vmul.f32 %v12096_v3, %v2651_v16  ;;  %9569 = vmatpush1.bf16.msra.mxu0 %v16024_v10  ;;  %9601 = vmatpush1.bf16.msra.mxu1 %v16025_v61  ;;  %v16194_v16 = vld [vmem:[#allocation19_spill] sm:$0xff]  ;;  %v16196_v3 = vld [vmem:[#allocation21_spill] sm:$0xff] }
 0x452   :  { %9571 = vmatprep.subr.bf16.mxu0 %v16097_v44  ;;  %9603 = vmatprep.subr.bf16.mxu1 %v16098_v54  ;;  %v2655_v53 = vmul.f32 %v2652_v35, %v13767_v9  ;;  %v2649_v9 = vmul.f32 0.5, %v12098_v13  ;;  %v16197_v35 = vld [vmem:[#allocation22_spill] sm:$0xff]  ;;  %v16200_v13 = vld [vmem:[#allocation25_spill] sm:$0xff] }
 0x454   :  { %v13898_v20 = vadd.f32 %v2656_v46, %v2655_v53  ;;  %v2653_v33 = vadd.f32 0.5, %v2649_v9  ;;  %v16198_v46 = vld [vmem:[#allocation23_spill] sm:$0xff]  ;;  %v16199_v53 = vld [vmem:[#allocation24_spill] sm:$0xff]  ;;  %v16201_v9 = vld [vmem:[#allocation26_spill] sm:$0xff] }
 0x455   :  { %9573 = vmatpush1.bf16.msra.mxu0 %v16100_v31  ;;  %9605 = vmatpush1.bf16.msra.mxu1 %v16101_v2 }
 0x456   :  { %9575 = vmatprep.subr.bf16.mxu0 %v16102_v1  ;;  %9607 = vmatprep.subr.bf16.mxu1 %v16103_v32  ;;  %12099 = vtanh.f32 %v13898_v20 }
 0x459   :  { %9577 = vmatpush1.bf16.msra.mxu0 %v16104_v25  ;;  %9609 = vmatpush1.bf16.msra.mxu1 %v16105_v5 }
 0x45a   :  { %9579 = vmatprep.subr.bf16.mxu0 %v16106_v39  ;;  %9611 = vmatprep.subr.bf16.mxu1 %v16036_v7 }
 0x45d   :  { %9581 = vmatpush1.bf16.msra.mxu0 %v16037_v6  ;;  %9613 = vmatpush1.bf16.msra.mxu1 %v16038_v27 }
 0x45e   :  { %9583 = vmatprep.subr.bf16.mxu0 %v16039_v45  ;;  %9615 = vmatprep.subr.bf16.mxu1 %v16040_v18 }
 0x460   :  { %v12100_v63 = vpop.eup %12099 }
 0x461   :  { %9585 = vmatpush1.bf16.msra.mxu0 %v16041_v23  ;;  %9617 = vmatpush1.bf16.msra.mxu1 %v16177_v42  ;;  %v2659_v26 = vmul.f32 %v12100_v63, %v2653_v33  ;;  %v16202_v33 = vld [vmem:[#allocation27_spill] sm:$0xff]  ;;  %v16203_v63 = vld [vmem:[#allocation28_spill] sm:$0xff] }
 0x462   :  { %9619 = vmatprep.subr.bf16.mxu0 %v16178_v15  ;;  %9651 = vmatprep.subr.bf16.mxu1 %v16179_v58 }
 0x464   :  { %2867 = vmatmul.mubr.f32.vlgmr.msra.gmra.mrb[14].mxu0 %v2659_v26  ;;  %2938 = vmatmul.mubr.f32.vlgmr.msra.gmra.mrb[14].mxu1 %v2659_v26 }
 0x465   :  { %9621 = vmatpush1.bf16.msra.mxu0 %v16180_v11  ;;  %9653 = vmatpush1.bf16.msra.mxu1 %v16181_v37  ;;  %v16259_v37 = vld [vmem:[#allocation110_spill] sm:$0xff] }
 0x466   :  { %9623 = vmatprep.subr.bf16.mxu0 %v16182_v49  ;;  %9655 = vmatprep.subr.bf16.mxu1 %v16183_v29  ;;  %v16258_v49 = vld [vmem:[#allocation109_spill] sm:$0xff] }
 0x467   :  { %3046 = vmatprep.mubr.f32.mxu0 %v15908_v57  ;;  %3117 = vmatprep.mubr.f32.mxu1 %v15908_v57 }
 0x469   :  { %9625 = vmatpush1.bf16.msra.mxu0 %v16184_v52  ;;  %9657 = vmatpush1.bf16.msra.mxu1 %v16185_v24  ;;  %v16248_v24 = vld [vmem:[#allocation100_spill] sm:$0xff] }
 0x46a   :  { %9627 = vmatprep.subr.bf16.mxu0 %v16186_v28  ;;  %9659 = vmatprep.subr.bf16.mxu1 %v16187_v59  ;;  %v76_v28 = vpop.permute.xlu1 %75 }
 0x46b   :  { %v170_v52 = vmul.f32 %v16248_v24, %v76_v28 }
 0x46d   :  { %9629 = vmatpush1.bf16.msra.mxu0 %v16188_v43  ;;  %9661 = vmatpush1.bf16.msra.mxu1 %v16189_v19 }
 0x46e   :  { %9631 = vmatprep.subr.bf16.mxu0 %v16190_v50  ;;  %9663 = vmatprep.subr.bf16.mxu1 %v16191_v34  ;;  %v16245_v34 = vld [vmem:[#allocation113_spill] sm:$0xff] }
 0x471   :  { %9633 = vmatpush1.bf16.msra.mxu0 %v16192_v4  ;;  %9665 = vmatpush1.bf16.msra.mxu1 %v16193_v17  ;;  %v16204_v17 = vld [vmem:[#allocation29_spill] sm:$0xff] }
 0x472   :  { %9635 = vmatprep.subr.bf16.mxu0 %v16194_v16  ;;  %9667 = vmatprep.subr.bf16.mxu1 %v16195_v55  ;;  %v16205_v16 = vld [vmem:[#allocation30_spill] sm:$0xff]  ;;  %v16206_v55 = vld [vmem:[#allocation31_spill] sm:$0xff] }
 0x475   :  { %9637 = vmatpush1.bf16.msra.mxu0 %v16196_v3  ;;  %9669 = vmatpush1.bf16.msra.mxu1 %v16197_v35  ;;  %v16207_v3 = vld [vmem:[#allocation32_spill] sm:$0xff]  ;;  %v16208_v35 = vld [vmem:[#allocation33_spill] sm:$0xff] }
 0x476   :  { %9639 = vmatprep.subr.bf16.mxu0 %v16198_v46  ;;  %9671 = vmatprep.subr.bf16.mxu1 %v16199_v53  ;;  %v16209_v46 = vld [vmem:[#allocation34_spill] sm:$0xff]  ;;  %v16210_v53 = vld [vmem:[#allocation35_spill] sm:$0xff] }
 0x479   :  { %9641 = vmatpush1.bf16.msra.mxu0 %v16200_v13  ;;  %9673 = vmatpush1.bf16.msra.mxu1 %v16201_v9  ;;  %v16211_v13 = vld [vmem:[#allocation36_spill] sm:$0xff]  ;;  %v16244_v9 = vld [vmem:[#allocation99_spill] sm:$0xff] }
 0x47a   :  { %9643 = vmatprep.subr.bf16.mxu0 %v16202_v33  ;;  %9675 = vmatprep.subr.bf16.mxu1 %v16203_v63  ;;  %v16212_v33 = vld [vmem:[#allocation37_spill] sm:$0xff]  ;;  %v16213_v63 = vld [vmem:[#allocation38_spill] sm:$0xff] }
 0x47d   :  { %9645 = vmatpush1.bf16.msra.mxu0 %v16204_v17  ;;  %9677 = vmatpush1.bf16.msra.mxu1 %v16205_v16  ;;  %v16214_v17 = vld [vmem:[#allocation39_spill] sm:$0xff]  ;;  %v16215_v16 = vld [vmem:[#allocation40_spill] sm:$0xff] }
 0x47e   :  { %9647 = vmatprep.subr.bf16.mxu0 %v16206_v55  ;;  %9679 = vmatprep.subr.bf16.mxu1 %v16207_v3  ;;  %v16225_v3 = vld [vmem:[#allocation50_spill] sm:$0xff]  ;;  %v16226_v55 = vld [vmem:[#allocation51_spill] sm:$0xff] }
 0x481   :  { %9649 = vmatpush1.bf16.msra.mxu0 %v16208_v35  ;;  %9681 = vmatpush1.bf16.msra.mxu1 %v16209_v46  ;;  %v16216_v35 = vld [vmem:[#allocation41_spill] sm:$0xff]  ;;  %v16217_v46 = vld [vmem:[#allocation42_spill] sm:$0xff] }
 0x482   :  { %9683 = vmatprep.subr.bf16.mxu0 %v16210_v53  ;;  %9715 = vmatprep.subr.bf16.mxu1 %v16211_v13  ;;  %v16218_v53 = vld [vmem:[#allocation43_spill] sm:$0xff]  ;;  %v16219_v13 = vld [vmem:[#allocation44_spill] sm:$0xff] }
 0x484   :  { %3047 = vmatmul.mubr.f32.vlgmr.msra.gmra.mrb[16].mxu0 %v2659_v26  ;;  %3118 = vmatmul.mubr.f32.vlgmr.msra.gmra.mrb[16].mxu1 %v2659_v26  ;;  %v16220_v26 = vld [vmem:[#allocation45_spill] sm:$0xff] }
 0x485   :  { %9685 = vmatpush1.bf16.msra.mxu0 %v16212_v33  ;;  %9717 = vmatpush1.bf16.msra.mxu1 %v16213_v63  ;;  %v16221_v33 = vld [vmem:[#allocation46_spill] sm:$0xff]  ;;  %v16222_v63 = vld [vmem:[#allocation47_spill] sm:$0xff] }
 0x486   :  { %9687 = vmatprep.subr.bf16.mxu0 %v16214_v17  ;;  %9719 = vmatprep.subr.bf16.mxu1 %v16215_v16  ;;  %v16223_v17 = vld [vmem:[#allocation48_spill] sm:$0xff]  ;;  %v16224_v16 = vld [vmem:[#allocation49_spill] sm:$0xff] }
 0x487   :  { %3209 = vmatprep.mubr.f32.mxu0 %v15908_v57  ;;  %3280 = vmatprep.mubr.f32.mxu1 %v15908_v57 }
 0x489   :  { %9689 = vmatpush1.bf16.msra.mxu0 %v16216_v35  ;;  %9721 = vmatpush1.bf16.msra.mxu1 %v16217_v46  ;;  %v16227_v35 = vld [vmem:[#allocation52_spill] sm:$0xff]  ;;  %v16228_v46 = vld [vmem:[#allocation53_spill] sm:$0xff] }
 0x48a   :  { %9691 = vmatprep.subr.bf16.mxu0 %v16218_v53  ;;  %9723 = vmatprep.subr.bf16.mxu1 %v16219_v13  ;;  %v16229_v53 = vld [vmem:[#allocation54_spill] sm:$0xff]  ;;  %v16230_v13 = vld [vmem:[#allocation55_spill] sm:$0xff] }
 0x48d   :  { %9693 = vmatpush1.bf16.msra.mxu0 %v16220_v26  ;;  %9725 = vmatpush1.bf16.msra.mxu1 %v16221_v33  ;;  %v16231_v26 = vld [vmem:[#allocation56_spill] sm:$0xff]  ;;  %v16232_v33 = vld [vmem:[#allocation57_spill] sm:$0xff] }
 0x48e   :  { %9695 = vmatprep.subr.bf16.mxu0 %v16222_v63  ;;  %9727 = vmatprep.subr.bf16.mxu1 %v16223_v17  ;;  %v16233_v63 = vld [vmem:[#allocation58_spill] sm:$0xff]  ;;  %v16234_v17 = vld [vmem:[#allocation59_spill] sm:$0xff] }
 0x491   :  { %9697 = vmatpush1.bf16.msra.mxu0 %v16224_v16  ;;  %9729 = vmatpush1.bf16.msra.mxu1 %v16225_v3  ;;  %v16235_v16 = vld [vmem:[#allocation60_spill] sm:$0xff]  ;;  %v16236_v3 = vld [vmem:[#allocation61_spill] sm:$0xff] }
 0x492   :  { %9699 = vmatprep.subr.bf16.mxu0 %v16226_v55  ;;  %9731 = vmatprep.subr.bf16.mxu1 %v16227_v35  ;;  %v16237_v55 = vld [vmem:[#allocation62_spill] sm:$0xff]  ;;  %v16238_v35 = vld [vmem:[#allocation63_spill] sm:$0xff] }
 0x495   :  { %9701 = vmatpush1.bf16.msra.mxu0 %v16228_v46  ;;  %9733 = vmatpush1.bf16.msra.mxu1 %v16229_v53  ;;  %v16239_v46 = vld [vmem:[#allocation64_spill] sm:$0xff]  ;;  %v16240_v53 = vld [vmem:[#allocation65_spill] sm:$0xff] }
 0x496   :  { %9703 = vmatprep.subr.bf16.mxu0 %v16230_v13  ;;  %9735 = vmatprep.subr.bf16.mxu1 %v16231_v26  ;;  %v16241_v13 = vld [vmem:[#allocation66_spill] sm:$0xff]  ;;  %v16242_v26 = vld [vmem:[#allocation67_spill] sm:$0xff] }
 0x499   :  { %9705 = vmatpush1.bf16.msra.mxu0 %v16232_v33  ;;  %9737 = vmatpush1.bf16.msra.mxu1 %v16233_v63  ;;  %v16243_v33 = vld [vmem:[#allocation68_spill] sm:$0xff] }
 0x49a   :  { %9707 = vmatprep.subr.bf16.mxu0 %v16234_v17  ;;  %9739 = vmatprep.subr.bf16.mxu1 %v16235_v16 }
 0x49d   :  { %9709 = vmatpush1.bf16.msra.mxu0 %v16236_v3  ;;  %9741 = vmatpush1.bf16.msra.mxu1 %v16237_v55 }
 0x49e   :  { %9711 = vmatprep.subr.bf16.mxu0 %v16238_v35  ;;  %9743 = vmatprep.subr.bf16.mxu1 %v16239_v46  ;;  %v16246_v35 = vld [vmem:[#allocation114_spill] sm:$0xff] }
 0x4a1   :  { %9713 = vmatpush1.bf16.msra.mxu0 %v16240_v53  ;;  %9745 = vmatpush1.bf16.msra.mxu1 %v16241_v13  ;;  %v16247_v53 = vld [vmem:[#allocation115_spill] sm:$0xff] }
 0x4a2   :  { %9747 = vmatprep.subr.bf16.mxu0 %v16242_v26  ;;  %9779 = vmatprep.subr.bf16.mxu1 %v16243_v33 }
 0x537   :  { %v2868_v63 = vpop.f32.mrb[14].mxu0  ;;  %v2939_v17 = vpop.f32.mrb[14].mxu1 }
 0x538   :  { %v2944_v16 = vadd.f32 %v2868_v63, %v16244_v9  ;;  %v2870_v4 = vpop.f32.mrb[15].mxu0  ;;  %v2941_v3 = vpop.f32.mrb[15].mxu1  ;;  %v2946_v46 = vadd.f32 %v2939_v17, %v16247_v53 }
 0x539   :  { %v2945_v55 = vadd.f32 %v2870_v4, %v16245_v34  ;;  %v2947_v50 = vadd.f32 %v2941_v3, %v16246_v35  ;;  %v16249_v4 = vld [vmem:[#allocation101_spill] sm:$0xff]  ;;  %v323_v35 = vpop.permute.xlu0 %322 }
 0x53a   :  { %12101 = vtanh.f32 %v2944_v16  ;;  %v171_v16 = vmul.f32 %v16249_v4, %v76_v28  ;;  %v16257_v4 = vld [vmem:[#allocation108_spill] sm:$0xff] }
 0x53b   :  { %12103 = vtanh.f32 %v2945_v55  ;;  %v16250_v55 = vld [vmem:[#allocation102_spill] sm:$0xff] }
 0x53c   :  { %12105 = vtanh.f32 %v2947_v50  ;;  %v173_v50 = vmul.f32 %v16250_v55, %v76_v28 }
 0x53d   :  { %12107 = vtanh.f32 %v2946_v46 }
 0x53e   :  { %v258_v29 = vadd.f32 %v16257_v4, %v173_v50 }
 0x544   :  { %v12102_v13 = vpop.eup %12101 }
 0x545   :  { %v2952_v19 = vmul.f32 0.5, %v12102_v13  ;;  %v12104_v26 = vpop.eup %12103  ;;  %v16252_v13 = vld [vmem:[#allocation103_spill] sm:$0xff] }
 0x546   :  { %v2953_v33 = vmul.f32 0.5, %v12104_v26  ;;  %v12106_v59 = vpop.eup %12105  ;;  %v406_v53 = vmul.f32 %v16252_v13, %v323_v35  ;;  %v16254_v26 = vld [vmem:[#allocation105_spill] sm:$0xff] }
 0x547   :  { %v2956_v43 = vadd.f32 0.5, %v2952_v19  ;;  %v16253_v19 = vld [vmem:[#allocation104_spill] sm:$0xff]  ;;  %v407_v34 = vmul.f32 %v16254_v26, %v323_v35 }
 0x548   :  { %v2957_v63 = vadd.f32 0.5, %v2953_v33  ;;  %v255_v46 = vadd.f32 %v16253_v19, %v170_v52  ;;  %v16256_v33 = vld [vmem:[#allocation107_spill] sm:$0xff] }
 0x549   :  { %v2961_v9 = vmul.f32 %v12106_v59, %v2956_v43  ;;  %v16255_v59 = vld [vmem:[#allocation106_spill] sm:$0xff]  ;;  %v409_v24 = vmul.f32 %v16256_v33, %v323_v35  ;;  %v16260_v19 = vld [vmem:[#allocation111_spill] sm:$0xff] }
 0x54a   :  { %v2960_v3 = vmul.f32 %v2957_v63, %v13865_v41  ;;  %v256_v43 = vadd.f32 %v16255_v59, %v171_v16  ;;  %v12108_v41 = vpop.eup %12107  ;;  %v538_v63 = vpop.permute.xlu1 %537  ;;  %v470_v55 = vadd.f32 %v406_v53, %v255_v46 }
 0x54b   :  { %v622_v13 = vmul.f32 %v16259_v37, %v538_v63  ;;  %v2954_v11 = vmul.f32 0.5, %v12108_v41  ;;  %v473_v52 = vadd.f32 %v409_v24, %v258_v29  ;;  %v624_v26 = vmul.f32 %v16260_v19, %v538_v63 }
 0x54c   :  { %v13993_v17 = vadd.f32 %v2961_v9, %v2960_v3  ;;  %v621_v9 = vmul.f32 %v16258_v49, %v538_v63  ;;  %v471_v3 = vadd.f32 %v407_v34, %v256_v43  ;;  %v408_v34 = vmul.f32 %v13447_v60, %v323_v35 }
 0x54d   :  { %v2958_v15 = vadd.f32 0.5, %v2954_v11  ;;  %v688_v42 = vadd.f32 %v624_v26, %v473_v52  ;;  %v14011_v11 = vld [vmem:[%s15571_s7] ss:$0 sm:$0xff] }
 0x54e   :  { %16251 = vst [vmem:[#allocation70_spill] sm:$0xff] %v13993_v17  ;;  %12109 = vtanh.f32 %v13993_v17  ;;  %v172_v17 = vmul.f32 %v16011_v56, %v76_v28  ;;  %v685_v58 = vadd.f32 %v621_v9, %v470_v55  ;;  %v686_v33 = vadd.f32 %v622_v13, %v471_v3 }
 0x54f   :  { %v623_v55 = vmul.f32 %v13457_v47, %v538_v63 }
 0x550   :  { %v257_v43 = vadd.f32 %v13450_v21, %v172_v17 }
 0x552   :  { %v472_v28 = vadd.f32 %v408_v34, %v257_v43  ;;  %v16263_v34 = vld [vmem:[#allocation4_spill] sm:$0xff] }
 0x557   :  { %v3048_v16 = vpop.f32.mrb[16].mxu0  ;;  %v3119_v59 = vpop.f32.mrb[16].mxu1 }
 0x558   :  { %v3124_v50 = vadd.f32 %v3048_v16, %v685_v58  ;;  %v3050_v4 = vpop.f32.mrb[17].mxu0  ;;  %v3121_v53 = vpop.f32.mrb[17].mxu1 }
 0x559   :  { %v12110_v46 = vpop.eup %12109  ;;  %v3125_v41 = vadd.f32 %v3050_v4, %v686_v33  ;;  %v3127_v29 = vadd.f32 %v3121_v53, %v688_v42  ;;  %v687_v42 = vadd.f32 %v623_v55, %v472_v28  ;;  %v16261_v53 = vld [vmem:[#allocation98_spill] sm:$0xff]  ;;  %v16268_v28 = vld [vmem:[#allocation9_spill] sm:$0xff] }
 0x55a   :  { %12111 = vtanh.f32 %v3124_v50  ;;  %v2964_v24 = vmul.f32 %v12110_v46, %v2958_v15  ;;  %v16262_v46 = vld [vmem:[#allocation3_spill] sm:$0xff]  ;;  %v16269_v55 = vld [vmem:[#allocation10_spill] sm:$0xff] }
 0x55b   :  { %12113 = vtanh.f32 %v3125_v41  ;;  %v3126_v15 = vadd.f32 %v3119_v59, %v687_v42  ;;  %v16264_v41 = vld [vmem:[#allocation5_spill] sm:$0xff]  ;;  %v16270_v42 = vld [vmem:[#allocation11_spill] sm:$0xff] }
 0x55c   :  { %3210 = vmatmul.mubr.f32.vlgmr.msra.gmra.mrb[18].mxu0 %v2964_v24  ;;  %3281 = vmatmul.mubr.f32.vlgmr.msra.gmra.mrb[18].mxu1 %v2964_v24  ;;  %v2965_v58 = vmul.f32 %v14011_v11, %v2964_v24  ;;  %12115 = vtanh.f32 %v3127_v29  ;;  %v16265_v29 = vld [vmem:[#allocation6_spill] sm:$0xff]  ;;  %v16266_v24 = vld [vmem:[#allocation7_spill] sm:$0xff] }
 0x55d   :  { %9749 = vmatpush1.bf16.msra.mxu0 %v16012_v48  ;;  %9781 = vmatpush1.bf16.msra.mxu1 %v16013_v30  ;;  %12117 = vtanh.f32 %v3126_v15  ;;  %v16271_v15 = vld [vmem:[#allocation12_spill] sm:$0xff] }
 0x55e   :  { %2966 = vadd.xlane.f32.xlu0 %v2965_v58  ;;  %9751 = vmatprep.subr.bf16.mxu0 %v16014_v0  ;;  %v16267_v58 = vld [vmem:[#allocation8_spill] sm:$0xff] }
 0x55f   :  { %9783 = vmatprep.subr.bf16.mxu1 %v16015_v36  ;;  %3351 = vmatprep.mubr.f32.mxu0 %v15908_v57 }
 0x560   :  { %3422 = vmatprep.mubr.f32.mxu1 %v15908_v57 }
 0x561   :  { %9753 = vmatpush1.bf16.msra.mxu0 %v16016_v62  ;;  %9785 = vmatpush1.bf16.msra.mxu1 %v16017_v8 }
 0x562   :  { %9755 = vmatprep.subr.bf16.mxu0 %v16018_v14  ;;  %9787 = vmatprep.subr.bf16.mxu1 %v16019_v51 }
 0x564   :  { %v12112_v35 = vpop.eup %12111 }
 0x565   :  { %v3132_v4 = vmul.f32 0.5, %v12112_v35  ;;  %9757 = vmatpush1.bf16.msra.mxu0 %v16020_v38  ;;  %9789 = vmatpush1.bf16.msra.mxu1 %v16095_v22  ;;  %v12114_v17 = vpop.eup %12113  ;;  %v16272_v35 = vld [vmem:[#allocation13_spill] sm:$0xff] }
 0x566   :  { %9759 = vmatprep.subr.bf16.mxu0 %v16096_v40  ;;  %9791 = vmatprep.subr.bf16.mxu1 %v16023_v12  ;;  %v3133_v26 = vmul.f32 0.5, %v12114_v17  ;;  %v12116_v33 = vpop.eup %12115  ;;  %v16274_v17 = vld [vmem:[#allocation15_spill] sm:$0xff] }
 0x567   :  { %v3136_v13 = vadd.f32 0.5, %v3132_v4  ;;  %v12118_v52 = vpop.eup %12117  ;;  %v16273_v4 = vld [vmem:[#allocation14_spill] sm:$0xff] }
 0x568   :  { %v3137_v63 = vadd.f32 0.5, %v3133_v26  ;;  %v16276_v26 = vld [vmem:[#allocation17_spill] sm:$0xff] }
 0x569   :  { %v3141_v9 = vmul.f32 %v12116_v33, %v3136_v13  ;;  %9761 = vmatpush1.bf16.msra.mxu0 %v16024_v10  ;;  %9793 = vmatpush1.bf16.msra.mxu1 %v16025_v61  ;;  %v16275_v13 = vld [vmem:[#allocation16_spill] sm:$0xff]  ;;  %v16277_v33 = vld [vmem:[#allocation18_spill] sm:$0xff] }
 0x56a   :  { %9763 = vmatprep.subr.bf16.mxu0 %v16097_v44  ;;  %9795 = vmatprep.subr.bf16.mxu1 %v16098_v54  ;;  %v3140_v59 = vmul.f32 %v3137_v63, %v13898_v20  ;;  %v3134_v20 = vmul.f32 0.5, %v12118_v52  ;;  %v16278_v63 = vld [vmem:[#allocation19_spill] sm:$0xff]  ;;  %v16281_v52 = vld [vmem:[#allocation22_spill] sm:$0xff] }
 0x56c   :  { %v14034_v3 = vadd.f32 %v3141_v9, %v3140_v59  ;;  %v3138_v16 = vadd.f32 0.5, %v3134_v20  ;;  %v16279_v9 = vld [vmem:[#allocation20_spill] sm:$0xff]  ;;  %v16280_v59 = vld [vmem:[#allocation21_spill] sm:$0xff]  ;;  %v16282_v20 = vld [vmem:[#allocation23_spill] sm:$0xff] }
 0x56d   :  { %9765 = vmatpush1.bf16.msra.mxu0 %v16100_v31  ;;  %9797 = vmatpush1.bf16.msra.mxu1 %v16101_v2 }
 0x56e   :  { %9767 = vmatprep.subr.bf16.mxu0 %v16102_v1  ;;  %9799 = vmatprep.subr.bf16.mxu1 %v16103_v32  ;;  %12119 = vtanh.f32 %v14034_v3 }
 0x571   :  { %9769 = vmatpush1.bf16.msra.mxu0 %v16104_v25  ;;  %9801 = vmatpush1.bf16.msra.mxu1 %v16105_v5 }
 0x572   :  { %9771 = vmatprep.subr.bf16.mxu0 %v16106_v39  ;;  %9803 = vmatprep.subr.bf16.mxu1 %v16036_v7 }
 0x575   :  { %9773 = vmatpush1.bf16.msra.mxu0 %v16037_v6  ;;  %9805 = vmatpush1.bf16.msra.mxu1 %v16038_v27 }
 0x576   :  { %9775 = vmatprep.subr.bf16.mxu0 %v16039_v45  ;;  %9807 = vmatprep.subr.bf16.mxu1 %v16040_v18 }
 0x578   :  { %v12120_v50 = vpop.eup %12119 }
 0x579   :  { %9777 = vmatpush1.bf16.msra.mxu0 %v16041_v23  ;;  %9809 = vmatpush1.bf16.msra.mxu1 %v16261_v53  ;;  %v3144_v43 = vmul.f32 %v12120_v50, %v3138_v16  ;;  %v16283_v16 = vld [vmem:[#allocation24_spill] sm:$0xff]  ;;  %v16284_v50 = vld [vmem:[#allocation25_spill] sm:$0xff] }
 0x57a   :  { %9811 = vmatprep.subr.bf16.mxu0 %v16262_v46  ;;  %9843 = vmatprep.subr.bf16.mxu1 %v16263_v34 }
 0x57c   :  { %3352 = vmatmul.mubr.f32.vlgmr.msra.gmra.mrb[18].mxu0 %v3144_v43  ;;  %3423 = vmatmul.mubr.f32.vlgmr.msra.gmra.mrb[18].mxu1 %v3144_v43 }
 0x57d   :  { %9813 = vmatpush1.bf16.msra.mxu0 %v16264_v41  ;;  %9845 = vmatpush1.bf16.msra.mxu1 %v16265_v29 }
 0x57e   :  { %9815 = vmatprep.subr.bf16.mxu0 %v16266_v24  ;;  %9847 = vmatprep.subr.bf16.mxu1 %v16267_v58  ;;  %v81_v58 = vpop.permute.xlu0 %80  ;;  %v16332_v24 = vld [vmem:[#allocation100_spill] sm:$0xff] }
 0x57f   :  { %3531 = vmatprep.mubr.f32.mxu0 %v15908_v57  ;;  %3602 = vmatprep.mubr.f32.mxu1 %v15908_v57  ;;  %v174_v29 = vmul.f32 %v16332_v24, %v81_v58 }
 0x581   :  { %9817 = vmatpush1.bf16.msra.mxu0 %v16268_v28  ;;  %9849 = vmatpush1.bf16.msra.mxu1 %v16269_v55 }
 0x582   :  { %9819 = vmatprep.subr.bf16.mxu0 %v16270_v42  ;;  %9851 = vmatprep.subr.bf16.mxu1 %v16271_v15 }
 0x585   :  { %9821 = vmatpush1.bf16.msra.mxu0 %v16272_v35  ;;  %9853 = vmatpush1.bf16.msra.mxu1 %v16273_v4  ;;  %v16329_v35 = vld [vmem:[#allocation113_spill] sm:$0xff] }
 0x586   :  { %9823 = vmatprep.subr.bf16.mxu0 %v16274_v17  ;;  %9855 = vmatprep.subr.bf16.mxu1 %v16275_v13  ;;  %v16285_v17 = vld [vmem:[#allocation26_spill] sm:$0xff]  ;;  %v16286_v13 = vld [vmem:[#allocation27_spill] sm:$0xff] }
 0x589   :  { %9825 = vmatpush1.bf16.msra.mxu0 %v16276_v26  ;;  %9857 = vmatpush1.bf16.msra.mxu1 %v16277_v33  ;;  %v16287_v26 = vld [vmem:[#allocation28_spill] sm:$0xff]  ;;  %v16288_v33 = vld [vmem:[#allocation29_spill] sm:$0xff] }
 0x58a   :  { %9827 = vmatprep.subr.bf16.mxu0 %v16278_v63  ;;  %9859 = vmatprep.subr.bf16.mxu1 %v16279_v9  ;;  %v16289_v63 = vld [vmem:[#allocation30_spill] sm:$0xff]  ;;  %v16290_v9 = vld [vmem:[#allocation31_spill] sm:$0xff] }
 0x58d   :  { %9829 = vmatpush1.bf16.msra.mxu0 %v16280_v59  ;;  %9861 = vmatpush1.bf16.msra.mxu1 %v16281_v52  ;;  %v16291_v59 = vld [vmem:[#allocation32_spill] sm:$0xff]  ;;  %v16292_v52 = vld [vmem:[#allocation33_spill] sm:$0xff] }
 0x58e   :  { %9831 = vmatprep.subr.bf16.mxu0 %v16282_v20  ;;  %9863 = vmatprep.subr.bf16.mxu1 %v16283_v16  ;;  %v16293_v20 = vld [vmem:[#allocation34_spill] sm:$0xff]  ;;  %v16294_v16 = vld [vmem:[#allocation35_spill] sm:$0xff] }
 0x591   :  { %9833 = vmatpush1.bf16.msra.mxu0 %v16284_v50  ;;  %9865 = vmatpush1.bf16.msra.mxu1 %v16285_v17  ;;  %v16295_v50 = vld [vmem:[#allocation36_spill] sm:$0xff]  ;;  %v16328_v17 = vld [vmem:[#allocation99_spill] sm:$0xff] }
 0x592   :  { %9835 = vmatprep.subr.bf16.mxu0 %v16286_v13  ;;  %9867 = vmatprep.subr.bf16.mxu1 %v16287_v26  ;;  %v16296_v13 = vld [vmem:[#allocation37_spill] sm:$0xff]  ;;  %v16297_v26 = vld [vmem:[#allocation38_spill] sm:$0xff] }
 0x595   :  { %9837 = vmatpush1.bf16.msra.mxu0 %v16288_v33  ;;  %9869 = vmatpush1.bf16.msra.mxu1 %v16289_v63  ;;  %v16298_v33 = vld [vmem:[#allocation39_spill] sm:$0xff]  ;;  %v16299_v63 = vld [vmem:[#allocation40_spill] sm:$0xff] }
 0x596   :  { %9839 = vmatprep.subr.bf16.mxu0 %v16290_v9  ;;  %9871 = vmatprep.subr.bf16.mxu1 %v16291_v59  ;;  %v16309_v59 = vld [vmem:[#allocation50_spill] sm:$0xff]  ;;  %v16310_v9 = vld [vmem:[#allocation51_spill] sm:$0xff] }
 0x599   :  { %9841 = vmatpush1.bf16.msra.mxu0 %v16292_v52  ;;  %9873 = vmatpush1.bf16.msra.mxu1 %v16293_v20  ;;  %v16300_v52 = vld [vmem:[#allocation41_spill] sm:$0xff]  ;;  %v16301_v20 = vld [vmem:[#allocation42_spill] sm:$0xff] }
 0x59a   :  { %9875 = vmatprep.subr.bf16.mxu0 %v16294_v16  ;;  %9907 = vmatprep.subr.bf16.mxu1 %v16295_v50  ;;  %v16302_v16 = vld [vmem:[#allocation43_spill] sm:$0xff]  ;;  %v16303_v50 = vld [vmem:[#allocation44_spill] sm:$0xff] }
 0x59c   :  { %3532 = vmatmul.mubr.f32.vlgmr.msra.gmra.mrb[20].mxu0 %v3144_v43  ;;  %3603 = vmatmul.mubr.f32.vlgmr.msra.gmra.mrb[20].mxu1 %v3144_v43  ;;  %v16304_v43 = vld [vmem:[#allocation45_spill] sm:$0xff] }
 0x59d   :  { %9877 = vmatpush1.bf16.msra.mxu0 %v16296_v13  ;;  %9909 = vmatpush1.bf16.msra.mxu1 %v16297_v26  ;;  %v16305_v13 = vld [vmem:[#allocation46_spill] sm:$0xff]  ;;  %v16306_v26 = vld [vmem:[#allocation47_spill] sm:$0xff] }
 0x59e   :  { %9879 = vmatprep.subr.bf16.mxu0 %v16298_v33  ;;  %9911 = vmatprep.subr.bf16.mxu1 %v16299_v63  ;;  %v16307_v33 = vld [vmem:[#allocation48_spill] sm:$0xff]  ;;  %v16308_v63 = vld [vmem:[#allocation49_spill] sm:$0xff] }
 0x59f   :  { %3694 = vmatprep.mubr.f32.mxu0 %v15908_v57  ;;  %3765 = vmatprep.mubr.f32.mxu1 %v15908_v57 }
 0x5a1   :  { %9881 = vmatpush1.bf16.msra.mxu0 %v16300_v52  ;;  %9913 = vmatpush1.bf16.msra.mxu1 %v16301_v20  ;;  %v16311_v52 = vld [vmem:[#allocation52_spill] sm:$0xff]  ;;  %v16312_v20 = vld [vmem:[#allocation53_spill] sm:$0xff] }
 0x5a2   :  { %9883 = vmatprep.subr.bf16.mxu0 %v16302_v16  ;;  %9915 = vmatprep.subr.bf16.mxu1 %v16303_v50  ;;  %v16313_v16 = vld [vmem:[#allocation54_spill] sm:$0xff]  ;;  %v16314_v50 = vld [vmem:[#allocation55_spill] sm:$0xff] }
 0x5a5   :  { %9885 = vmatpush1.bf16.msra.mxu0 %v16304_v43  ;;  %9917 = vmatpush1.bf16.msra.mxu1 %v16305_v13  ;;  %v16315_v43 = vld [vmem:[#allocation56_spill] sm:$0xff]  ;;  %v16316_v13 = vld [vmem:[#allocation57_spill] sm:$0xff] }
 0x5a6   :  { %9887 = vmatprep.subr.bf16.mxu0 %v16306_v26  ;;  %9919 = vmatprep.subr.bf16.mxu1 %v16307_v33  ;;  %v16317_v26 = vld [vmem:[#allocation58_spill] sm:$0xff]  ;;  %v16318_v33 = vld [vmem:[#allocation59_spill] sm:$0xff] }
 0x5a9   :  { %9889 = vmatpush1.bf16.msra.mxu0 %v16308_v63  ;;  %9921 = vmatpush1.bf16.msra.mxu1 %v16309_v59  ;;  %v16319_v63 = vld [vmem:[#allocation60_spill] sm:$0xff]  ;;  %v16320_v59 = vld [vmem:[#allocation61_spill] sm:$0xff] }
 0x5aa   :  { %9891 = vmatprep.subr.bf16.mxu0 %v16310_v9  ;;  %9923 = vmatprep.subr.bf16.mxu1 %v16311_v52  ;;  %v16321_v9 = vld [vmem:[#allocation62_spill] sm:$0xff]  ;;  %v16322_v52 = vld [vmem:[#allocation63_spill] sm:$0xff] }
 0x5ad   :  { %9893 = vmatpush1.bf16.msra.mxu0 %v16312_v20  ;;  %9925 = vmatpush1.bf16.msra.mxu1 %v16313_v16  ;;  %v16323_v20 = vld [vmem:[#allocation64_spill] sm:$0xff]  ;;  %v16324_v16 = vld [vmem:[#allocation65_spill] sm:$0xff] }
 0x5ae   :  { %9895 = vmatprep.subr.bf16.mxu0 %v16314_v50  ;;  %9927 = vmatprep.subr.bf16.mxu1 %v16315_v43  ;;  %v16325_v50 = vld [vmem:[#allocation66_spill] sm:$0xff]  ;;  %v16326_v43 = vld [vmem:[#allocation67_spill] sm:$0xff] }
 0x5b1   :  { %9897 = vmatpush1.bf16.msra.mxu0 %v16316_v13  ;;  %9929 = vmatpush1.bf16.msra.mxu1 %v16317_v26  ;;  %v16327_v13 = vld [vmem:[#allocation68_spill] sm:$0xff] }
 0x5b2   :  { %9899 = vmatprep.subr.bf16.mxu0 %v16318_v33  ;;  %9931 = vmatprep.subr.bf16.mxu1 %v16319_v63 }
 0x5b5   :  { %9901 = vmatpush1.bf16.msra.mxu0 %v16320_v59  ;;  %9933 = vmatpush1.bf16.msra.mxu1 %v16321_v9 }
 0x5b6   :  { %9903 = vmatprep.subr.bf16.mxu0 %v16322_v52  ;;  %9935 = vmatprep.subr.bf16.mxu1 %v16323_v20  ;;  %v16330_v52 = vld [vmem:[#allocation114_spill] sm:$0xff] }
 0x5b9   :  { %9905 = vmatpush1.bf16.msra.mxu0 %v16324_v16  ;;  %9937 = vmatpush1.bf16.msra.mxu1 %v16325_v50  ;;  %v16331_v16 = vld [vmem:[#allocation115_spill] sm:$0xff] }
 0x5ba   :  { %9939 = vmatprep.subr.bf16.mxu0 %v16326_v43  ;;  %9971 = vmatprep.subr.bf16.mxu1 %v16327_v13 }
 0x64f   :  { %v3353_v26 = vpop.f32.mrb[18].mxu0  ;;  %v3424_v33 = vpop.f32.mrb[18].mxu1 }
 0x650   :  { %v3429_v63 = vadd.f32 %v3353_v26, %v16328_v17  ;;  %v3355_v4 = vpop.f32.mrb[19].mxu0  ;;  %v3426_v59 = vpop.f32.mrb[19].mxu1  ;;  %v3431_v20 = vadd.f32 %v3424_v33, %v16331_v16 }
 0x651   :  { %v3430_v9 = vadd.f32 %v3355_v4, %v16329_v35  ;;  %v3432_v15 = vadd.f32 %v3426_v59, %v16330_v52  ;;  %v16333_v4 = vld [vmem:[#allocation101_spill] sm:$0xff]  ;;  %v327_v35 = vpop.permute.xlu1 %326  ;;  %v16334_v59 = vld [vmem:[#allocation70_spill] sm:$0xff] }
 0x652   :  { %12121 = vtanh.f32 %v3429_v63  ;;  %v175_v63 = vmul.f32 %v16333_v4, %v81_v58  ;;  %v16342_v4 = vld [vmem:[#allocation108_spill] sm:$0xff] }
 0x653   :  { %12123 = vtanh.f32 %v3430_v9 }
 0x654   :  { %12125 = vtanh.f32 %v3432_v15  ;;  %v16335_v15 = vld [vmem:[#allocation102_spill] sm:$0xff] }
 0x655   :  { %12127 = vtanh.f32 %v3431_v20  ;;  %v177_v52 = vmul.f32 %v16335_v15, %v81_v58 }
 0x657   :  { %v262_v34 = vadd.f32 %v16342_v4, %v177_v52 }
 0x65c   :  { %v12122_v50 = vpop.eup %12121 }
 0x65d   :  { %v3437_v42 = vmul.f32 0.5, %v12122_v50  ;;  %v12124_v43 = vpop.eup %12123  ;;  %v16337_v50 = vld [vmem:[#allocation103_spill] sm:$0xff] }
 0x65e   :  { %v3438_v13 = vmul.f32 0.5, %v12124_v43  ;;  %v12126_v28 = vpop.eup %12125  ;;  %v410_v16 = vmul.f32 %v16337_v50, %v327_v35  ;;  %v16339_v43 = vld [vmem:[#allocation105_spill] sm:$0xff] }
 0x65f   :  { %v3441_v55 = vadd.f32 0.5, %v3437_v42  ;;  %v16338_v42 = vld [vmem:[#allocation104_spill] sm:$0xff]  ;;  %v411_v41 = vmul.f32 %v16339_v43, %v327_v35  ;;  %v12128_v46 = vpop.eup %12127 }
 0x660   :  { %v3442_v26 = vadd.f32 0.5, %v3438_v13  ;;  %v259_v20 = vadd.f32 %v16338_v42, %v174_v29  ;;  %v16341_v13 = vld [vmem:[#allocation107_spill] sm:$0xff]  ;;  %v3439_v15 = vmul.f32 0.5, %v12128_v46  ;;  %v176_v42 = vmul.f32 %v16011_v56, %v81_v58 }
 0x661   :  { %v3446_v17 = vmul.f32 %v12126_v28, %v3441_v55  ;;  %v16340_v28 = vld [vmem:[#allocation106_spill] sm:$0xff]  ;;  %v413_v24 = vmul.f32 %v16341_v13, %v327_v35 }
 0x662   :  { %v3445_v9 = vmul.f32 %v3442_v26, %v16334_v59  ;;  %v260_v55 = vadd.f32 %v16340_v28, %v175_v63  ;;  %v542_v26 = vpop.permute.xlu1 %541  ;;  %v474_v59 = vadd.f32 %v410_v16, %v259_v20  ;;  %v3443_v53 = vadd.f32 0.5, %v3439_v15 }
 0x663   :  { %v626_v50 = vmul.f32 %v16259_v37, %v542_v26  ;;  %v477_v29 = vadd.f32 %v413_v24, %v262_v34  ;;  %v628_v43 = vmul.f32 %v16260_v19, %v542_v26  ;;  %v627_v15 = vmul.f32 %v13457_v47, %v542_v26 }
 0x664   :  { %v14129_v33 = vadd.f32 %v3446_v17, %v3445_v9  ;;  %v625_v17 = vmul.f32 %v16258_v49, %v542_v26  ;;  %v475_v9 = vadd.f32 %v411_v41, %v260_v55  ;;  %v412_v41 = vmul.f32 %v13447_v60, %v327_v35 }
 0x665   :  { %v692_v23 = vadd.f32 %v628_v43, %v477_v29  ;;  %v261_v55 = vadd.f32 %v13450_v21, %v176_v42 }
 0x666   :  { %16336 = vst [vmem:[#allocation71_spill] sm:$0xff] %v14129_v33  ;;  %12129 = vtanh.f32 %v14129_v33  ;;  %v689_v33 = vadd.f32 %v625_v17, %v474_v59  ;;  %v690_v13 = vadd.f32 %v626_v50, %v475_v9 }
 0x667   :  { %v476_v50 = vadd.f32 %v412_v41, %v261_v55  ;;  %v16345_v41 = vld [vmem:[#allocation3_spill] sm:$0xff]  ;;  %v16346_v55 = vld [vmem:[#allocation4_spill] sm:$0xff] }
 0x66f   :  { %v3533_v63 = vpop.f32.mrb[20].mxu0  ;;  %v3604_v28 = vpop.f32.mrb[20].mxu1 }
 0x670   :  { %v3609_v52 = vadd.f32 %v3533_v63, %v689_v33  ;;  %v3535_v4 = vpop.f32.mrb[21].mxu0  ;;  %v3606_v16 = vpop.f32.mrb[21].mxu1 }
 0x671   :  { %v12130_v20 = vpop.eup %12129  ;;  %v3610_v46 = vadd.f32 %v3535_v4, %v690_v13  ;;  %v3612_v34 = vadd.f32 %v3606_v16, %v692_v23  ;;  %v691_v23 = vadd.f32 %v627_v15, %v476_v50  ;;  %v16344_v16 = vld [vmem:[#allocation98_spill] sm:$0xff]  ;;  %v16351_v50 = vld [vmem:[#allocation9_spill] sm:$0xff] }
 0x672   :  { %12131 = vtanh.f32 %v3609_v52  ;;  %v3449_v24 = vmul.f32 %v12130_v20, %v3443_v53  ;;  %v16343_v52 = vld [vmem:[#allocation97_spill] sm:$0xff]  ;;  %v16352_v15 = vld [vmem:[#allocation10_spill] sm:$0xff] }
 0x673   :  { %12133 = vtanh.f32 %v3610_v46  ;;  %v3611_v53 = vadd.f32 %v3604_v28, %v691_v23  ;;  %v16347_v46 = vld [vmem:[#allocation5_spill] sm:$0xff]  ;;  %v16353_v23 = vld [vmem:[#allocation11_spill] sm:$0xff] }
 0x674   :  { %3695 = vmatmul.mubr.f32.vlgmr.msra.gmra.mrb[22].mxu0 %v3449_v24  ;;  %3766 = vmatmul.mubr.f32.vlgmr.msra.gmra.mrb[22].mxu1 %v3449_v24  ;;  %v3450_v58 = vmul.f32 %v14011_v11, %v3449_v24  ;;  %12135 = vtanh.f32 %v3612_v34  ;;  %v16348_v34 = vld [vmem:[#allocation6_spill] sm:$0xff]  ;;  %v16349_v24 = vld [vmem:[#allocation7_spill] sm:$0xff] }
 0x675   :  { %9941 = vmatpush1.bf16.msra.mxu0 %v16012_v48  ;;  %9973 = vmatpush1.bf16.msra.mxu1 %v16013_v30  ;;  %12137 = vtanh.f32 %v3611_v53  ;;  %v16354_v53 = vld [vmem:[#allocation12_spill] sm:$0xff] }
 0x676   :  { %3451 = vadd.xlane.f32.xlu1 %v3450_v58  ;;  %9943 = vmatprep.subr.bf16.mxu0 %v16014_v0  ;;  %v16350_v58 = vld [vmem:[#allocation8_spill] sm:$0xff] }
 0x677   :  { %9975 = vmatprep.subr.bf16.mxu1 %v16015_v36  ;;  %3836 = vmatprep.mubr.f32.mxu0 %v15908_v57 }
 0x678   :  { %3907 = vmatprep.mubr.f32.mxu1 %v15908_v57 }
 0x679   :  { %9945 = vmatpush1.bf16.msra.mxu0 %v16016_v62  ;;  %9977 = vmatpush1.bf16.msra.mxu1 %v16017_v8 }
 0x67a   :  { %9947 = vmatprep.subr.bf16.mxu0 %v16018_v14  ;;  %9979 = vmatprep.subr.bf16.mxu1 %v16019_v51 }
 0x67c   :  { %v12132_v35 = vpop.eup %12131 }
 0x67d   :  { %v3617_v4 = vmul.f32 0.5, %v12132_v35  ;;  %9949 = vmatpush1.bf16.msra.mxu0 %v16020_v38  ;;  %9981 = vmatpush1.bf16.msra.mxu1 %v16095_v22  ;;  %v12134_v33 = vpop.eup %12133  ;;  %v16355_v35 = vld [vmem:[#allocation13_spill] sm:$0xff] }
 0x67e   :  { %9951 = vmatprep.subr.bf16.mxu0 %v16096_v40  ;;  %9983 = vmatprep.subr.bf16.mxu1 %v16023_v12  ;;  %v3618_v43 = vmul.f32 0.5, %v12134_v33  ;;  %v12136_v13 = vpop.eup %12135  ;;  %v16357_v33 = vld [vmem:[#allocation15_spill] sm:$0xff] }
 0x67f   :  { %v3621_v42 = vadd.f32 0.5, %v3617_v4  ;;  %v12138_v9 = vpop.eup %12137  ;;  %v16356_v4 = vld [vmem:[#allocation14_spill] sm:$0xff] }
 0x680   :  { %v3622_v26 = vadd.f32 0.5, %v3618_v43  ;;  %v16359_v43 = vld [vmem:[#allocation17_spill] sm:$0xff] }
 0x681   :  { %v3626_v59 = vmul.f32 %v12136_v13, %v3621_v42  ;;  %9953 = vmatpush1.bf16.msra.mxu0 %v16024_v10  ;;  %9985 = vmatpush1.bf16.msra.mxu1 %v16025_v61  ;;  %v16358_v42 = vld [vmem:[#allocation16_spill] sm:$0xff]  ;;  %v16360_v13 = vld [vmem:[#allocation18_spill] sm:$0xff] }
 0x682   :  { %9955 = vmatprep.subr.bf16.mxu0 %v16097_v44  ;;  %9987 = vmatprep.subr.bf16.mxu1 %v16098_v54  ;;  %v3625_v28 = vmul.f32 %v3622_v26, %v14034_v3  ;;  %v3619_v3 = vmul.f32 0.5, %v12138_v9  ;;  %v16361_v26 = vld [vmem:[#allocation19_spill] sm:$0xff]  ;;  %v16364_v9 = vld [vmem:[#allocation22_spill] sm:$0xff] }
 0x684   :  { %v14165_v17 = vadd.f32 %v3626_v59, %v3625_v28  ;;  %v3623_v29 = vadd.f32 0.5, %v3619_v3  ;;  %v16362_v59 = vld [vmem:[#allocation20_spill] sm:$0xff]  ;;  %v16363_v28 = vld [vmem:[#allocation21_spill] sm:$0xff]  ;;  %v16365_v3 = vld [vmem:[#allocation23_spill] sm:$0xff] }
 0x685   :  { %9957 = vmatpush1.bf16.msra.mxu0 %v16100_v31  ;;  %9989 = vmatpush1.bf16.msra.mxu1 %v16101_v2 }
 0x686   :  { %9959 = vmatprep.subr.bf16.mxu0 %v16102_v1  ;;  %9991 = vmatprep.subr.bf16.mxu1 %v16103_v32  ;;  %12139 = vtanh.f32 %v14165_v17 }
 0x689   :  { %9961 = vmatpush1.bf16.msra.mxu0 %v16104_v25  ;;  %9993 = vmatpush1.bf16.msra.mxu1 %v16105_v5 }
 0x68a   :  { %9963 = vmatprep.subr.bf16.mxu0 %v16106_v39  ;;  %9995 = vmatprep.subr.bf16.mxu1 %v16036_v7 }
 0x68d   :  { %9965 = vmatpush1.bf16.msra.mxu0 %v16037_v6  ;;  %9997 = vmatpush1.bf16.msra.mxu1 %v16038_v27 }
 0x68e   :  { %9967 = vmatprep.subr.bf16.mxu0 %v16039_v45  ;;  %9999 = vmatprep.subr.bf16.mxu1 %v16040_v18 }
 0x690   :  { %v12140_v63 = vpop.eup %12139 }
 0x691   :  { %9969 = vmatpush1.bf16.msra.mxu0 %v16343_v52  ;;  %10001 = vmatpush1.bf16.msra.mxu1 %v16344_v16  ;;  %v3629_v20 = vmul.f32 %v12140_v63, %v3623_v29  ;;  %v16366_v29 = vld [vmem:[#allocation24_spill] sm:$0xff]  ;;  %v16367_v63 = vld [vmem:[#allocation25_spill] sm:$0xff] }
 0x692   :  { %10003 = vmatprep.subr.bf16.mxu0 %v16345_v41  ;;  %10035 = vmatprep.subr.bf16.mxu1 %v16346_v55 }
 0x694   :  { %3837 = vmatmul.mubr.f32.vlgmr.msra.gmra.mrb[22].mxu0 %v3629_v20  ;;  %3908 = vmatmul.mubr.f32.vlgmr.msra.gmra.mrb[22].mxu1 %v3629_v20 }
 0x695   :  { %10005 = vmatpush1.bf16.msra.mxu0 %v16347_v46  ;;  %10037 = vmatpush1.bf16.msra.mxu1 %v16348_v34 }
 0x696   :  { %10007 = vmatprep.subr.bf16.mxu0 %v16349_v24  ;;  %10039 = vmatprep.subr.bf16.mxu1 %v16350_v58  ;;  %v86_v58 = vpop.permute.xlu0 %85  ;;  %v16415_v24 = vld [vmem:[#allocation100_spill] sm:$0xff] }
 0x697   :  { %4016 = vmatprep.mubr.f32.mxu0 %v15908_v57  ;;  %4087 = vmatprep.mubr.f32.mxu1 %v15908_v57  ;;  %v178_v34 = vmul.f32 %v16415_v24, %v86_v58 }
 0x699   :  { %10009 = vmatpush1.bf16.msra.mxu0 %v16351_v50  ;;  %10041 = vmatpush1.bf16.msra.mxu1 %v16352_v15 }
 0x69a   :  { %10011 = vmatprep.subr.bf16.mxu0 %v16353_v23  ;;  %10043 = vmatprep.subr.bf16.mxu1 %v16354_v53 }
 0x69d   :  { %10013 = vmatpush1.bf16.msra.mxu0 %v16355_v35  ;;  %10045 = vmatpush1.bf16.msra.mxu1 %v16356_v4  ;;  %v16412_v35 = vld [vmem:[#allocation113_spill] sm:$0xff] }
 0x69e   :  { %10015 = vmatprep.subr.bf16.mxu0 %v16357_v33  ;;  %10047 = vmatprep.subr.bf16.mxu1 %v16358_v42  ;;  %v16368_v33 = vld [vmem:[#allocation26_spill] sm:$0xff]  ;;  %v16369_v42 = vld [vmem:[#allocation27_spill] sm:$0xff] }
 0x6a1   :  { %10017 = vmatpush1.bf16.msra.mxu0 %v16359_v43  ;;  %10049 = vmatpush1.bf16.msra.mxu1 %v16360_v13  ;;  %v16370_v43 = vld [vmem:[#allocation28_spill] sm:$0xff]  ;;  %v16371_v13 = vld [vmem:[#allocation29_spill] sm:$0xff] }
 0x6a2   :  { %10019 = vmatprep.subr.bf16.mxu0 %v16361_v26  ;;  %10051 = vmatprep.subr.bf16.mxu1 %v16362_v59  ;;  %v16372_v26 = vld [vmem:[#allocation30_spill] sm:$0xff]  ;;  %v16373_v59 = vld [vmem:[#allocation31_spill] sm:$0xff] }
 0x6a5   :  { %10021 = vmatpush1.bf16.msra.mxu0 %v16363_v28  ;;  %10053 = vmatpush1.bf16.msra.mxu1 %v16364_v9  ;;  %v16374_v28 = vld [vmem:[#allocation32_spill] sm:$0xff]  ;;  %v16375_v9 = vld [vmem:[#allocation33_spill] sm:$0xff] }
 0x6a6   :  { %10023 = vmatprep.subr.bf16.mxu0 %v16365_v3  ;;  %10055 = vmatprep.subr.bf16.mxu1 %v16366_v29  ;;  %v16376_v3 = vld [vmem:[#allocation34_spill] sm:$0xff]  ;;  %v16377_v29 = vld [vmem:[#allocation35_spill] sm:$0xff] }
 0x6a9   :  { %10025 = vmatpush1.bf16.msra.mxu0 %v16367_v63  ;;  %10057 = vmatpush1.bf16.msra.mxu1 %v16368_v33  ;;  %v16378_v63 = vld [vmem:[#allocation36_spill] sm:$0xff]  ;;  %v16411_v33 = vld [vmem:[#allocation99_spill] sm:$0xff] }
 0x6aa   :  { %10027 = vmatprep.subr.bf16.mxu0 %v16369_v42  ;;  %10059 = vmatprep.subr.bf16.mxu1 %v16370_v43  ;;  %v16379_v42 = vld [vmem:[#allocation37_spill] sm:$0xff]  ;;  %v16380_v43 = vld [vmem:[#allocation38_spill] sm:$0xff] }
 0x6ad   :  { %10029 = vmatpush1.bf16.msra.mxu0 %v16371_v13  ;;  %10061 = vmatpush1.bf16.msra.mxu1 %v16372_v26  ;;  %v16381_v13 = vld [vmem:[#allocation39_spill] sm:$0xff]  ;;  %v16382_v26 = vld [vmem:[#allocation40_spill] sm:$0xff] }
 0x6ae   :  { %10031 = vmatprep.subr.bf16.mxu0 %v16373_v59  ;;  %10063 = vmatprep.subr.bf16.mxu1 %v16374_v28  ;;  %v16392_v28 = vld [vmem:[#allocation50_spill] sm:$0xff]  ;;  %v16393_v59 = vld [vmem:[#allocation51_spill] sm:$0xff] }
 0x6b1   :  { %10033 = vmatpush1.bf16.msra.mxu0 %v16375_v9  ;;  %10065 = vmatpush1.bf16.msra.mxu1 %v16376_v3  ;;  %v16383_v9 = vld [vmem:[#allocation41_spill] sm:$0xff]  ;;  %v16384_v3 = vld [vmem:[#allocation42_spill] sm:$0xff] }
 0x6b2   :  { %10067 = vmatprep.subr.bf16.mxu0 %v16377_v29  ;;  %10099 = vmatprep.subr.bf16.mxu1 %v16378_v63  ;;  %v16385_v29 = vld [vmem:[#allocation43_spill] sm:$0xff]  ;;  %v16386_v63 = vld [vmem:[#allocation44_spill] sm:$0xff] }
 0x6b4   :  { %4017 = vmatmul.mubr.f32.vlgmr.msra.gmra.mrb[24].mxu0 %v3629_v20  ;;  %4088 = vmatmul.mubr.f32.vlgmr.msra.gmra.mrb[24].mxu1 %v3629_v20  ;;  %v16387_v20 = vld [vmem:[#allocation45_spill] sm:$0xff] }
 0x6b5   :  { %10069 = vmatpush1.bf16.msra.mxu0 %v16379_v42  ;;  %10101 = vmatpush1.bf16.msra.mxu1 %v16380_v43  ;;  %v16388_v42 = vld [vmem:[#allocation46_spill] sm:$0xff]  ;;  %v16389_v43 = vld [vmem:[#allocation47_spill] sm:$0xff] }
 0x6b6   :  { %10071 = vmatprep.subr.bf16.mxu0 %v16381_v13  ;;  %10103 = vmatprep.subr.bf16.mxu1 %v16382_v26  ;;  %v16390_v13 = vld [vmem:[#allocation48_spill] sm:$0xff]  ;;  %v16391_v26 = vld [vmem:[#allocation49_spill] sm:$0xff] }
 0x6b7   :  { %4179 = vmatprep.mubr.f32.mxu0 %v15908_v57  ;;  %4250 = vmatprep.mubr.f32.mxu1 %v15908_v57 }
 0x6b9   :  { %10073 = vmatpush1.bf16.msra.mxu0 %v16383_v9  ;;  %10105 = vmatpush1.bf16.msra.mxu1 %v16384_v3  ;;  %v16394_v9 = vld [vmem:[#allocation52_spill] sm:$0xff]  ;;  %v16395_v3 = vld [vmem:[#allocation53_spill] sm:$0xff] }
 0x6ba   :  { %10075 = vmatprep.subr.bf16.mxu0 %v16385_v29  ;;  %10107 = vmatprep.subr.bf16.mxu1 %v16386_v63  ;;  %v16396_v29 = vld [vmem:[#allocation54_spill] sm:$0xff]  ;;  %v16397_v63 = vld [vmem:[#allocation55_spill] sm:$0xff] }
 0x6bd   :  { %10077 = vmatpush1.bf16.msra.mxu0 %v16387_v20  ;;  %10109 = vmatpush1.bf16.msra.mxu1 %v16388_v42  ;;  %v16398_v20 = vld [vmem:[#allocation56_spill] sm:$0xff]  ;;  %v16399_v42 = vld [vmem:[#allocation57_spill] sm:$0xff] }
 0x6be   :  { %10079 = vmatprep.subr.bf16.mxu0 %v16389_v43  ;;  %10111 = vmatprep.subr.bf16.mxu1 %v16390_v13  ;;  %v16400_v43 = vld [vmem:[#allocation58_spill] sm:$0xff]  ;;  %v16401_v13 = vld [vmem:[#allocation59_spill] sm:$0xff] }
 0x6c1   :  { %10081 = vmatpush1.bf16.msra.mxu0 %v16391_v26  ;;  %10113 = vmatpush1.bf16.msra.mxu1 %v16392_v28  ;;  %v16402_v26 = vld [vmem:[#allocation60_spill] sm:$0xff]  ;;  %v16403_v28 = vld [vmem:[#allocation61_spill] sm:$0xff] }
 0x6c2   :  { %10083 = vmatprep.subr.bf16.mxu0 %v16393_v59  ;;  %10115 = vmatprep.subr.bf16.mxu1 %v16394_v9  ;;  %v16404_v59 = vld [vmem:[#allocation62_spill] sm:$0xff]  ;;  %v16405_v9 = vld [vmem:[#allocation63_spill] sm:$0xff] }
 0x6c5   :  { %10085 = vmatpush1.bf16.msra.mxu0 %v16395_v3  ;;  %10117 = vmatpush1.bf16.msra.mxu1 %v16396_v29  ;;  %v16406_v3 = vld [vmem:[#allocation64_spill] sm:$0xff]  ;;  %v16407_v29 = vld [vmem:[#allocation65_spill] sm:$0xff] }
 0x6c6   :  { %10087 = vmatprep.subr.bf16.mxu0 %v16397_v63  ;;  %10119 = vmatprep.subr.bf16.mxu1 %v16398_v20  ;;  %v16408_v63 = vld [vmem:[#allocation66_spill] sm:$0xff]  ;;  %v16409_v20 = vld [vmem:[#allocation67_spill] sm:$0xff] }
 0x6c9   :  { %10089 = vmatpush1.bf16.msra.mxu0 %v16399_v42  ;;  %10121 = vmatpush1.bf16.msra.mxu1 %v16400_v43  ;;  %v16410_v42 = vld [vmem:[#allocation68_spill] sm:$0xff] }
 0x6ca   :  { %10091 = vmatprep.subr.bf16.mxu0 %v16401_v13  ;;  %10123 = vmatprep.subr.bf16.mxu1 %v16402_v26 }
 0x6cd   :  { %10093 = vmatpush1.bf16.msra.mxu0 %v16403_v28  ;;  %10125 = vmatpush1.bf16.msra.mxu1 %v16404_v59 }
 0x6ce   :  { %10095 = vmatprep.subr.bf16.mxu0 %v16405_v9  ;;  %10127 = vmatprep.subr.bf16.mxu1 %v16406_v3  ;;  %v16413_v9 = vld [vmem:[#allocation114_spill] sm:$0xff] }
 0x6d1   :  { %10097 = vmatpush1.bf16.msra.mxu0 %v16407_v29  ;;  %10129 = vmatpush1.bf16.msra.mxu1 %v16408_v63  ;;  %v16414_v29 = vld [vmem:[#allocation115_spill] sm:$0xff] }
 0x6d2   :  { %10131 = vmatprep.subr.bf16.mxu0 %v16409_v20  ;;  %10163 = vmatprep.subr.bf16.mxu1 %v16410_v42 }
 0x767   :  { %v3838_v43 = vpop.f32.mrb[22].mxu0  ;;  %v3909_v13 = vpop.f32.mrb[22].mxu1 }
 0x768   :  { %v3914_v26 = vadd.f32 %v3838_v43, %v16411_v33  ;;  %v3840_v4 = vpop.f32.mrb[23].mxu0  ;;  %v3911_v28 = vpop.f32.mrb[23].mxu1  ;;  %v3916_v3 = vadd.f32 %v3909_v13, %v16414_v29 }
 0x769   :  { %v3915_v59 = vadd.f32 %v3840_v4, %v16412_v35  ;;  %v3917_v53 = vadd.f32 %v3911_v28, %v16413_v9  ;;  %v16416_v4 = vld [vmem:[#allocation101_spill] sm:$0xff]  ;;  %v16417_v35 = vld [vmem:[#allocation71_spill] sm:$0xff]  ;;  %v331_v9 = vpop.permute.xlu1 %330 }
 0x76a   :  { %12141 = vtanh.f32 %v3914_v26  ;;  %v179_v26 = vmul.f32 %v16416_v4, %v86_v58  ;;  %v16425_v4 = vld [vmem:[#allocation108_spill] sm:$0xff] }
 0x76b   :  { %12143 = vtanh.f32 %v3915_v59  ;;  %v16418_v59 = vld [vmem:[#allocation102_spill] sm:$0xff] }
 0x76c   :  { %12145 = vtanh.f32 %v3917_v53  ;;  %v181_v53 = vmul.f32 %v16418_v59, %v86_v58 }
 0x76d   :  { %12147 = vtanh.f32 %v3916_v3 }
 0x76e   :  { %v266_v55 = vadd.f32 %v16425_v4, %v181_v53 }
 0x774   :  { %v12142_v63 = vpop.eup %12141 }
 0x775   :  { %v3922_v23 = vmul.f32 0.5, %v12142_v63  ;;  %v12144_v20 = vpop.eup %12143  ;;  %v16420_v63 = vld [vmem:[#allocation103_spill] sm:$0xff] }
 0x776   :  { %v3923_v42 = vmul.f32 0.5, %v12144_v20  ;;  %v12146_v50 = vpop.eup %12145  ;;  %v414_v29 = vmul.f32 %v16420_v63, %v331_v9  ;;  %v16422_v20 = vld [vmem:[#allocation105_spill] sm:$0xff] }
 0x777   :  { %v3926_v15 = vadd.f32 0.5, %v3922_v23  ;;  %v16421_v23 = vld [vmem:[#allocation104_spill] sm:$0xff]  ;;  %v415_v46 = vmul.f32 %v16422_v20, %v331_v9 }
 0x778   :  { %v3927_v43 = vadd.f32 0.5, %v3923_v42  ;;  %v263_v3 = vadd.f32 %v16421_v23, %v178_v34  ;;  %v16424_v42 = vld [vmem:[#allocation107_spill] sm:$0xff]  ;;  %v180_v23 = vmul.f32 %v16011_v56, %v86_v58 }
 0x779   :  { %v3931_v33 = vmul.f32 %v12146_v50, %v3926_v15  ;;  %v16423_v50 = vld [vmem:[#allocation106_spill] sm:$0xff]  ;;  %v417_v24 = vmul.f32 %v16424_v42, %v331_v9 }
 0x77a   :  { %v3930_v28 = vmul.f32 %v3927_v43, %v16417_v35  ;;  %v264_v15 = vadd.f32 %v16423_v50, %v179_v26  ;;  %v12148_v35 = vpop.eup %12147  ;;  %v546_v43 = vpop.permute.xlu0 %545  ;;  %v478_v59 = vadd.f32 %v414_v29, %v263_v3 }
 0x77b   :  { %v630_v63 = vmul.f32 %v16259_v37, %v546_v43  ;;  %v3924_v41 = vmul.f32 0.5, %v12148_v35  ;;  %v481_v34 = vadd.f32 %v417_v24, %v266_v55  ;;  %v632_v20 = vmul.f32 %v16260_v19, %v546_v43 }
 0x77c   :  { %v14260_v13 = vadd.f32 %v3931_v33, %v3930_v28  ;;  %v629_v33 = vmul.f32 %v16258_v49, %v546_v43  ;;  %v479_v28 = vadd.f32 %v415_v46, %v264_v15  ;;  %v416_v46 = vmul.f32 %v13447_v60, %v331_v9 }
 0x77d   :  { %v3928_v16 = vadd.f32 0.5, %v3924_v41  ;;  %v696_v52 = vadd.f32 %v632_v20, %v481_v34  ;;  %v265_v15 = vadd.f32 %v13450_v21, %v180_v23  ;;  %v631_v41 = vmul.f32 %v13457_v47, %v546_v43 }
 0x77e   :  { %16419 = vst [vmem:[#allocation72_spill] sm:$0xff] %v14260_v13  ;;  %12149 = vtanh.f32 %v14260_v13  ;;  %v693_v13 = vadd.f32 %v629_v33, %v478_v59  ;;  %v694_v42 = vadd.f32 %v630_v63, %v479_v28 }
 0x77f   :  { %v480_v59 = vadd.f32 %v416_v46, %v265_v15  ;;  %v16430_v15 = vld [vmem:[#allocation5_spill] sm:$0xff] }
 0x787   :  { %v4018_v26 = vpop.f32.mrb[24].mxu0  ;;  %v4089_v50 = vpop.f32.mrb[24].mxu1 }
 0x788   :  { %v4094_v53 = vadd.f32 %v4018_v26, %v693_v13  ;;  %v4020_v4 = vpop.f32.mrb[25].mxu0  ;;  %v4091_v29 = vpop.f32.mrb[25].mxu1  ;;  %v16426_v26 = vld [vmem:[#allocation97_spill] sm:$0xff] }
 0x789   :  { %v12150_v3 = vpop.eup %12149  ;;  %v4095_v35 = vadd.f32 %v4020_v4, %v694_v42  ;;  %v4097_v55 = vadd.f32 %v4091_v29, %v696_v52  ;;  %v695_v52 = vadd.f32 %v631_v41, %v480_v59  ;;  %v16428_v29 = vld [vmem:[#allocation3_spill] sm:$0xff]  ;;  %v16435_v59 = vld [vmem:[#allocation10_spill] sm:$0xff] }
 0x78a   :  { %12151 = vtanh.f32 %v4094_v53  ;;  %v3934_v24 = vmul.f32 %v12150_v3, %v3928_v16  ;;  %v16427_v53 = vld [vmem:[#allocation98_spill] sm:$0xff]  ;;  %v16429_v3 = vld [vmem:[#allocation4_spill] sm:$0xff]  ;;  %v16436_v41 = vld [vmem:[#allocation11_spill] sm:$0xff] }
 0x78b   :  { %12153 = vtanh.f32 %v4095_v35  ;;  %v16431_v35 = vld [vmem:[#allocation6_spill] sm:$0xff] }
 0x78c   :  { %4180 = vmatmul.mubr.f32.vlgmr.msra.gmra.mrb[26].mxu0 %v3934_v24  ;;  %4251 = vmatmul.mubr.f32.vlgmr.msra.gmra.mrb[26].mxu1 %v3934_v24  ;;  %v3935_v58 = vmul.f32 %v14011_v11, %v3934_v24  ;;  %12155 = vtanh.f32 %v4097_v55  ;;  %v4096_v11 = vadd.f32 %v4089_v50, %v695_v52  ;;  %v16432_v55 = vld [vmem:[#allocation7_spill] sm:$0xff]  ;;  %v16433_v24 = vld [vmem:[#allocation8_spill] sm:$0xff] }
 0x78d   :  { %10133 = vmatpush1.bf16.msra.mxu0 %v16012_v48  ;;  %10165 = vmatpush1.bf16.msra.mxu1 %v16013_v30  ;;  %v16437_v52 = vld [vmem:[#allocation12_spill] sm:$0xff] }
 0x78e   :  { %3936 = vadd.xlane.f32.xlu0 %v3935_v58  ;;  %10135 = vmatprep.subr.bf16.mxu0 %v16014_v0  ;;  %12157 = vtanh.f32 %v4096_v11  ;;  %v16434_v58 = vld [vmem:[#allocation9_spill] sm:$0xff] }
 0x78f   :  { %10167 = vmatprep.subr.bf16.mxu1 %v16015_v36  ;;  %4321 = vmatprep.mubr.f32.mxu0 %v15908_v57  ;;  %v16438_v11 = vld [vmem:[#allocation13_spill] sm:$0xff] }
 0x790   :  { %4392 = vmatprep.mubr.f32.mxu1 %v15908_v57 }
 0x791   :  { %10137 = vmatpush1.bf16.msra.mxu0 %v16016_v62  ;;  %10169 = vmatpush1.bf16.msra.mxu1 %v16017_v8 }
 0x792   :  { %10139 = vmatprep.subr.bf16.mxu0 %v16018_v14  ;;  %10171 = vmatprep.subr.bf16.mxu1 %v16019_v51 }
 0x794   :  { %v12152_v16 = vpop.eup %12151 }
 0x795   :  { %v4102_v9 = vmul.f32 0.5, %v12152_v16  ;;  %10141 = vmatpush1.bf16.msra.mxu0 %v16020_v38  ;;  %10173 = vmatpush1.bf16.msra.mxu1 %v16095_v22  ;;  %v12154_v4 = vpop.eup %12153  ;;  %v16439_v16 = vld [vmem:[#allocation14_spill] sm:$0xff] }
 0x796   :  { %10143 = vmatprep.subr.bf16.mxu0 %v16096_v40  ;;  %10175 = vmatprep.subr.bf16.mxu1 %v16023_v12  ;;  %v4103_v63 = vmul.f32 0.5, %v12154_v4  ;;  %v12156_v23 = vpop.eup %12155  ;;  %v16441_v4 = vld [vmem:[#allocation16_spill] sm:$0xff] }
 0x797   :  { %v4106_v13 = vadd.f32 0.5, %v4102_v9  ;;  %v16440_v9 = vld [vmem:[#allocation15_spill] sm:$0xff] }
 0x798   :  { %v4107_v20 = vadd.f32 0.5, %v4103_v63  ;;  %v12158_v33 = vpop.eup %12157  ;;  %v16443_v63 = vld [vmem:[#allocation18_spill] sm:$0xff] }
 0x799   :  { %v4111_v42 = vmul.f32 %v12156_v23, %v4106_v13  ;;  %10145 = vmatpush1.bf16.msra.mxu0 %v16024_v10  ;;  %10177 = vmatpush1.bf16.msra.mxu1 %v16025_v61  ;;  %v16442_v13 = vld [vmem:[#allocation17_spill] sm:$0xff]  ;;  %v16444_v23 = vld [vmem:[#allocation19_spill] sm:$0xff] }
 0x79a   :  { %10147 = vmatprep.subr.bf16.mxu0 %v16097_v44  ;;  %10179 = vmatprep.subr.bf16.mxu1 %v16098_v54  ;;  %v4110_v50 = vmul.f32 %v4107_v20, %v14165_v17  ;;  %v4104_v17 = vmul.f32 0.5, %v12158_v33  ;;  %v16445_v20 = vld [vmem:[#allocation20_spill] sm:$0xff]  ;;  %v16448_v33 = vld [vmem:[#allocation23_spill] sm:$0xff] }
 0x79c   :  { %v14296_v43 = vadd.f32 %v4111_v42, %v4110_v50  ;;  %v4108_v28 = vadd.f32 0.5, %v4104_v17  ;;  %v16446_v42 = vld [vmem:[#allocation21_spill] sm:$0xff]  ;;  %v16447_v50 = vld [vmem:[#allocation22_spill] sm:$0xff]  ;;  %v16449_v17 = vld [vmem:[#allocation24_spill] sm:$0xff] }
 0x79d   :  { %10149 = vmatpush1.bf16.msra.mxu0 %v16100_v31  ;;  %10181 = vmatpush1.bf16.msra.mxu1 %v16101_v2 }
 0x79e   :  { %10151 = vmatprep.subr.bf16.mxu0 %v16102_v1  ;;  %10183 = vmatprep.subr.bf16.mxu1 %v16103_v32  ;;  %12159 = vtanh.f32 %v14296_v43 }
 0x7a1   :  { %10153 = vmatpush1.bf16.msra.mxu0 %v16104_v25  ;;  %10185 = vmatpush1.bf16.msra.mxu1 %v16105_v5 }
 0x7a2   :  { %10155 = vmatprep.subr.bf16.mxu0 %v16106_v39  ;;  %10187 = vmatprep.subr.bf16.mxu1 %v16036_v7 }
 0x7a5   :  { %10157 = vmatpush1.bf16.msra.mxu0 %v16037_v6  ;;  %10189 = vmatpush1.bf16.msra.mxu1 %v16038_v27 }
 0x7a6   :  { %10159 = vmatprep.subr.bf16.mxu0 %v16039_v45  ;;  %10191 = vmatprep.subr.bf16.mxu1 %v16040_v18 }
 0x7a8   :  { %v12160_v34 = vpop.eup %12159 }
 0x7a9   :  { %10161 = vmatpush1.bf16.msra.mxu0 %v16426_v26  ;;  %10193 = vmatpush1.bf16.msra.mxu1 %v16427_v53  ;;  %v4114_v46 = vmul.f32 %v12160_v34, %v4108_v28  ;;  %v16450_v28 = vld [vmem:[#allocation25_spill] sm:$0xff]  ;;  %v16451_v34 = vld [vmem:[#allocation26_spill] sm:$0xff] }
 0x7aa   :  { %10195 = vmatprep.subr.bf16.mxu0 %v16428_v29  ;;  %10227 = vmatprep.subr.bf16.mxu1 %v16429_v3 }
 0x7ac   :  { %4322 = vmatmul.mubr.f32.vlgmr.msra.gmra.mrb[26].mxu0 %v4114_v46  ;;  %4393 = vmatmul.mubr.f32.vlgmr.msra.gmra.mrb[26].mxu1 %v4114_v46 }
 0x7ad   :  { %10197 = vmatpush1.bf16.msra.mxu0 %v16430_v15  ;;  %10229 = vmatpush1.bf16.msra.mxu1 %v16431_v35  ;;  %v16504_v35 = vld [vmem:[#allocation104_spill] sm:$0xff] }
 0x7ae   :  { %10199 = vmatprep.subr.bf16.mxu0 %v16432_v55  ;;  %10231 = vmatprep.subr.bf16.mxu1 %v16433_v24  ;;  %v16498_v24 = vld [vmem:[#allocation100_spill] sm:$0xff] }
 0x7af   :  { %4501 = vmatprep.mubr.f32.mxu0 %v15908_v57  ;;  %4572 = vmatprep.mubr.f32.mxu1 %v15908_v57 }
 0x7b1   :  { %10201 = vmatpush1.bf16.msra.mxu0 %v16434_v58  ;;  %10233 = vmatpush1.bf16.msra.mxu1 %v16435_v59 }
 0x7b2   :  { %10203 = vmatprep.subr.bf16.mxu0 %v16436_v41  ;;  %10235 = vmatprep.subr.bf16.mxu1 %v16437_v52  ;;  %v91_v41 = vpop.permute.xlu1 %90 }
 0x7b3   :  { %v182_v55 = vmul.f32 %v16498_v24, %v91_v41 }
 0x7b5   :  { %10205 = vmatpush1.bf16.msra.mxu0 %v16438_v11  ;;  %10237 = vmatpush1.bf16.msra.mxu1 %v16439_v16  ;;  %v16495_v16 = vld [vmem:[#allocation113_spill] sm:$0xff] }
 0x7b6   :  { %10207 = vmatprep.subr.bf16.mxu0 %v16440_v9  ;;  %10239 = vmatprep.subr.bf16.mxu1 %v16441_v4  ;;  %v16452_v4 = vld [vmem:[#allocation27_spill] sm:$0xff] }
 0x7b9   :  { %10209 = vmatpush1.bf16.msra.mxu0 %v16442_v13  ;;  %10241 = vmatpush1.bf16.msra.mxu1 %v16443_v63  ;;  %v16453_v13 = vld [vmem:[#allocation28_spill] sm:$0xff]  ;;  %v16454_v63 = vld [vmem:[#allocation29_spill] sm:$0xff] }
 0x7ba   :  { %10211 = vmatprep.subr.bf16.mxu0 %v16444_v23  ;;  %10243 = vmatprep.subr.bf16.mxu1 %v16445_v20  ;;  %v16455_v23 = vld [vmem:[#allocation30_spill] sm:$0xff]  ;;  %v16456_v20 = vld [vmem:[#allocation31_spill] sm:$0xff] }
 0x7bd   :  { %10213 = vmatpush1.bf16.msra.mxu0 %v16446_v42  ;;  %10245 = vmatpush1.bf16.msra.mxu1 %v16447_v50  ;;  %v16457_v42 = vld [vmem:[#allocation32_spill] sm:$0xff]  ;;  %v16458_v50 = vld [vmem:[#allocation33_spill] sm:$0xff] }
 0x7be   :  { %10215 = vmatprep.subr.bf16.mxu0 %v16448_v33  ;;  %10247 = vmatprep.subr.bf16.mxu1 %v16449_v17  ;;  %v16459_v33 = vld [vmem:[#allocation34_spill] sm:$0xff]  ;;  %v16460_v17 = vld [vmem:[#allocation35_spill] sm:$0xff] }
 0x7c1   :  { %10217 = vmatpush1.bf16.msra.mxu0 %v16450_v28  ;;  %10249 = vmatpush1.bf16.msra.mxu1 %v16451_v34  ;;  %v16461_v28 = vld [vmem:[#allocation36_spill] sm:$0xff]  ;;  %v16494_v34 = vld [vmem:[#allocation99_spill] sm:$0xff] }
 0x7c2   :  { %10219 = vmatprep.subr.bf16.mxu0 %v16452_v4  ;;  %10251 = vmatprep.subr.bf16.mxu1 %v16453_v13  ;;  %v16462_v4 = vld [vmem:[#allocation37_spill] sm:$0xff]  ;;  %v16463_v13 = vld [vmem:[#allocation38_spill] sm:$0xff] }
 0x7c5   :  { %10221 = vmatpush1.bf16.msra.mxu0 %v16454_v63  ;;  %10253 = vmatpush1.bf16.msra.mxu1 %v16455_v23  ;;  %v16464_v63 = vld [vmem:[#allocation39_spill] sm:$0xff]  ;;  %v16465_v23 = vld [vmem:[#allocation40_spill] sm:$0xff] }
 0x7c6   :  { %10223 = vmatprep.subr.bf16.mxu0 %v16456_v20  ;;  %10255 = vmatprep.subr.bf16.mxu1 %v16457_v42  ;;  %v16475_v42 = vld [vmem:[#allocation50_spill] sm:$0xff]  ;;  %v16476_v20 = vld [vmem:[#allocation51_spill] sm:$0xff] }
 0x7c9   :  { %10225 = vmatpush1.bf16.msra.mxu0 %v16458_v50  ;;  %10257 = vmatpush1.bf16.msra.mxu1 %v16459_v33  ;;  %v16466_v50 = vld [vmem:[#allocation41_spill] sm:$0xff]  ;;  %v16467_v33 = vld [vmem:[#allocation42_spill] sm:$0xff] }
 0x7ca   :  { %10259 = vmatprep.subr.bf16.mxu0 %v16460_v17  ;;  %10291 = vmatprep.subr.bf16.mxu1 %v16461_v28  ;;  %v16468_v17 = vld [vmem:[#allocation43_spill] sm:$0xff]  ;;  %v16469_v28 = vld [vmem:[#allocation44_spill] sm:$0xff] }
 0x7cc   :  { %4502 = vmatmul.mubr.f32.vlgmr.msra.gmra.mrb[28].mxu0 %v4114_v46  ;;  %4573 = vmatmul.mubr.f32.vlgmr.msra.gmra.mrb[28].mxu1 %v4114_v46  ;;  %v16470_v46 = vld [vmem:[#allocation45_spill] sm:$0xff] }
 0x7cd   :  { %10261 = vmatpush1.bf16.msra.mxu0 %v16462_v4  ;;  %10293 = vmatpush1.bf16.msra.mxu1 %v16463_v13  ;;  %v16471_v4 = vld [vmem:[#allocation46_spill] sm:$0xff]  ;;  %v16472_v13 = vld [vmem:[#allocation47_spill] sm:$0xff] }
 0x7ce   :  { %10263 = vmatprep.subr.bf16.mxu0 %v16464_v63  ;;  %10295 = vmatprep.subr.bf16.mxu1 %v16465_v23  ;;  %v16473_v63 = vld [vmem:[#allocation48_spill] sm:$0xff]  ;;  %v16474_v23 = vld [vmem:[#allocation49_spill] sm:$0xff] }
 0x7cf   :  { %4664 = vmatprep.mubr.f32.mxu0 %v15908_v57  ;;  %4735 = vmatprep.mubr.f32.mxu1 %v15908_v57 }
 0x7d1   :  { %10265 = vmatpush1.bf16.msra.mxu0 %v16466_v50  ;;  %10297 = vmatpush1.bf16.msra.mxu1 %v16467_v33  ;;  %v16477_v50 = vld [vmem:[#allocation52_spill] sm:$0xff]  ;;  %v16478_v33 = vld [vmem:[#allocation53_spill] sm:$0xff] }
 0x7d2   :  { %10267 = vmatprep.subr.bf16.mxu0 %v16468_v17  ;;  %10299 = vmatprep.subr.bf16.mxu1 %v16469_v28  ;;  %v16479_v17 = vld [vmem:[#allocation54_spill] sm:$0xff]  ;;  %v16480_v28 = vld [vmem:[#allocation55_spill] sm:$0xff] }
 0x7d5   :  { %10269 = vmatpush1.bf16.msra.mxu0 %v16470_v46  ;;  %10301 = vmatpush1.bf16.msra.mxu1 %v16471_v4  ;;  %v16481_v46 = vld [vmem:[#allocation56_spill] sm:$0xff]  ;;  %v16482_v4 = vld [vmem:[#allocation57_spill] sm:$0xff] }
 0x7d6   :  { %10271 = vmatprep.subr.bf16.mxu0 %v16472_v13  ;;  %10303 = vmatprep.subr.bf16.mxu1 %v16473_v63  ;;  %v16483_v13 = vld [vmem:[#allocation58_spill] sm:$0xff]  ;;  %v16484_v63 = vld [vmem:[#allocation59_spill] sm:$0xff] }
 0x7d9   :  { %10273 = vmatpush1.bf16.msra.mxu0 %v16474_v23  ;;  %10305 = vmatpush1.bf16.msra.mxu1 %v16475_v42  ;;  %v16485_v23 = vld [vmem:[#allocation60_spill] sm:$0xff]  ;;  %v16486_v42 = vld [vmem:[#allocation61_spill] sm:$0xff] }
 0x7da   :  { %10275 = vmatprep.subr.bf16.mxu0 %v16476_v20  ;;  %10307 = vmatprep.subr.bf16.mxu1 %v16477_v50  ;;  %v16487_v20 = vld [vmem:[#allocation62_spill] sm:$0xff]  ;;  %v16488_v50 = vld [vmem:[#allocation63_spill] sm:$0xff] }
 0x7dd   :  { %10277 = vmatpush1.bf16.msra.mxu0 %v16478_v33  ;;  %10309 = vmatpush1.bf16.msra.mxu1 %v16479_v17  ;;  %v16489_v33 = vld [vmem:[#allocation64_spill] sm:$0xff]  ;;  %v16490_v17 = vld [vmem:[#allocation65_spill] sm:$0xff] }
 0x7de   :  { %10279 = vmatprep.subr.bf16.mxu0 %v16480_v28  ;;  %10311 = vmatprep.subr.bf16.mxu1 %v16481_v46  ;;  %v16491_v28 = vld [vmem:[#allocation66_spill] sm:$0xff]  ;;  %v16492_v46 = vld [vmem:[#allocation67_spill] sm:$0xff] }
 0x7e1   :  { %10281 = vmatpush1.bf16.msra.mxu0 %v16482_v4  ;;  %10313 = vmatpush1.bf16.msra.mxu1 %v16483_v13  ;;  %v16493_v4 = vld [vmem:[#allocation68_spill] sm:$0xff] }
 0x7e2   :  { %10283 = vmatprep.subr.bf16.mxu0 %v16484_v63  ;;  %10315 = vmatprep.subr.bf16.mxu1 %v16485_v23 }
 0x7e5   :  { %10285 = vmatpush1.bf16.msra.mxu0 %v16486_v42  ;;  %10317 = vmatpush1.bf16.msra.mxu1 %v16487_v20 }
 0x7e6   :  { %10287 = vmatprep.subr.bf16.mxu0 %v16488_v50  ;;  %10319 = vmatprep.subr.bf16.mxu1 %v16489_v33  ;;  %v16496_v50 = vld [vmem:[#allocation114_spill] sm:$0xff] }
 0x7e9   :  { %10289 = vmatpush1.bf16.msra.mxu0 %v16490_v17  ;;  %10321 = vmatpush1.bf16.msra.mxu1 %v16491_v28  ;;  %v16497_v17 = vld [vmem:[#allocation115_spill] sm:$0xff] }
 0x7ea   :  { %10323 = vmatprep.subr.bf16.mxu0 %v16492_v46  ;;  %10355 = vmatprep.subr.bf16.mxu1 %v16493_v4 }
 0x87f   :  { %v4323_v13 = vpop.f32.mrb[26].mxu0  ;;  %v4394_v63 = vpop.f32.mrb[26].mxu1 }
 0x880   :  { %v4399_v23 = vadd.f32 %v4323_v13, %v16494_v34  ;;  %v4325_v9 = vpop.f32.mrb[27].mxu0  ;;  %v4396_v42 = vpop.f32.mrb[27].mxu1  ;;  %v4401_v33 = vadd.f32 %v4394_v63, %v16497_v17 }
 0x881   :  { %v4400_v20 = vadd.f32 %v4325_v9, %v16495_v16  ;;  %v4402_v11 = vadd.f32 %v4396_v42, %v16496_v50  ;;  %v16499_v9 = vld [vmem:[#allocation101_spill] sm:$0xff]  ;;  %v16500_v16 = vld [vmem:[#allocation72_spill] sm:$0xff]  ;;  %v335_v50 = vpop.permute.xlu1 %334 }
 0x882   :  { %12161 = vtanh.f32 %v4399_v23  ;;  %v183_v23 = vmul.f32 %v16499_v9, %v91_v41  ;;  %v16508_v9 = vld [vmem:[#allocation108_spill] sm:$0xff] }
 0x883   :  { %12163 = vtanh.f32 %v4400_v20  ;;  %v16501_v20 = vld [vmem:[#allocation102_spill] sm:$0xff] }
 0x884   :  { %12165 = vtanh.f32 %v4402_v11  ;;  %v185_v11 = vmul.f32 %v16501_v20, %v91_v41 }
 0x885   :  { %12167 = vtanh.f32 %v4401_v33  ;;  %v16505_v33 = vld [vmem:[#allocation105_spill] sm:$0xff] }
 0x886   :  { %v270_v15 = vadd.f32 %v16508_v9, %v185_v11 }
 0x88c   :  { %v12162_v28 = vpop.eup %12161 }
 0x88d   :  { %v4407_v52 = vmul.f32 0.5, %v12162_v28  ;;  %v12164_v46 = vpop.eup %12163  ;;  %v16503_v28 = vld [vmem:[#allocation103_spill] sm:$0xff] }
 0x88e   :  { %v4408_v59 = vmul.f32 0.5, %v12164_v46  ;;  %v12166_v58 = vpop.eup %12165  ;;  %v418_v17 = vmul.f32 %v16503_v28, %v335_v50  ;;  %v419_v46 = vmul.f32 %v16505_v33, %v335_v50 }
 0x88f   :  { %v4411_v4 = vadd.f32 0.5, %v4407_v52  ;;  %v267_v52 = vadd.f32 %v16504_v35, %v182_v55  ;;  %v184_v35 = vmul.f32 %v16011_v56, %v91_v41 }
 0x890   :  { %v4412_v13 = vadd.f32 0.5, %v4408_v59 }
 0x891   :  { %v4416_v34 = vmul.f32 %v12166_v58, %v4411_v4  ;;  %v16506_v58 = vld [vmem:[#allocation106_spill] sm:$0xff]  ;;  %v16507_v4 = vld [vmem:[#allocation107_spill] sm:$0xff]  ;;  %v482_v20 = vadd.f32 %v418_v17, %v267_v52 }
 0x892   :  { %v4415_v42 = vmul.f32 %v4412_v13, %v16500_v16  ;;  %v268_v59 = vadd.f32 %v16506_v58, %v183_v23  ;;  %v421_v24 = vmul.f32 %v16507_v4, %v335_v50  ;;  %v12168_v16 = vpop.eup %12167  ;;  %v550_v13 = vpop.permute.xlu0 %549 }
 0x893   :  { %v634_v28 = vmul.f32 %v16259_v37, %v550_v13  ;;  %v4409_v3 = vmul.f32 0.5, %v12168_v16  ;;  %v636_v33 = vmul.f32 %v16260_v19, %v550_v13 }
 0x894   :  { %v14391_v63 = vadd.f32 %v4416_v34, %v4415_v42  ;;  %v633_v34 = vmul.f32 %v16258_v49, %v550_v13  ;;  %v483_v42 = vadd.f32 %v419_v46, %v268_v59  ;;  %v485_v55 = vadd.f32 %v421_v24, %v270_v15 }
 0x895   :  { %v4413_v29 = vadd.f32 0.5, %v4409_v3  ;;  %v420_v46 = vmul.f32 %v13447_v60, %v335_v50  ;;  %v269_v59 = vadd.f32 %v13450_v21, %v184_v35  ;;  %v14409_v3 = vld [vmem:[%s15571_s7] ss:$0 sm:$0xff] }
 0x896   :  { %16502 = vst [vmem:[#allocation73_spill] sm:$0xff] %v14391_v63  ;;  %12169 = vtanh.f32 %v14391_v63  ;;  %v697_v63 = vadd.f32 %v633_v34, %v482_v20  ;;  %v698_v4 = vadd.f32 %v634_v28, %v483_v42  ;;  %v700_v53 = vadd.f32 %v636_v33, %v485_v55 }
 0x897   :  { %v484_v20 = vadd.f32 %v420_v46, %v269_v59  ;;  %v16510_v46 = vld [vmem:[#allocation3_spill] sm:$0xff]  ;;  %v16511_v59 = vld [vmem:[#allocation4_spill] sm:$0xff] }
 0x89f   :  { %v4503_v23 = vpop.f32.mrb[28].mxu0  ;;  %v4574_v58 = vpop.f32.mrb[28].mxu1 }
 0x8a0   :  { %v4579_v11 = vadd.f32 %v4503_v23, %v697_v63  ;;  %v4505_v9 = vpop.f32.mrb[29].mxu0  ;;  %v4576_v17 = vpop.f32.mrb[29].mxu1  ;;  %v635_v63 = vmul.f32 %v13457_v47, %v550_v13 }
 0x8a1   :  { %v12170_v52 = vpop.eup %12169  ;;  %v4580_v16 = vadd.f32 %v4505_v9, %v698_v4  ;;  %v4582_v15 = vadd.f32 %v4576_v17, %v700_v53  ;;  %v16509_v17 = vld [vmem:[#allocation98_spill] sm:$0xff] }
 0x8a2   :  { %12171 = vtanh.f32 %v4579_v11  ;;  %v4419_v24 = vmul.f32 %v12170_v52, %v4413_v29  ;;  %v699_v53 = vadd.f32 %v635_v63, %v484_v20  ;;  %v16516_v20 = vld [vmem:[#allocation9_spill] sm:$0xff]  ;;  %v16517_v63 = vld [vmem:[#allocation10_spill] sm:$0xff] }
 0x8a3   :  { %12173 = vtanh.f32 %v4580_v16  ;;  %v16512_v16 = vld [vmem:[#allocation5_spill] sm:$0xff] }
 0x8a4   :  { %4665 = vmatmul.mubr.f32.vlgmr.msra.gmra.mrb[30].mxu0 %v4419_v24  ;;  %4736 = vmatmul.mubr.f32.vlgmr.msra.gmra.mrb[30].mxu1 %v4419_v24  ;;  %v4420_v41 = vmul.f32 %v14409_v3, %v4419_v24  ;;  %12175 = vtanh.f32 %v4582_v15  ;;  %v4581_v29 = vadd.f32 %v4574_v58, %v699_v53  ;;  %v16513_v15 = vld [vmem:[#allocation6_spill] sm:$0xff]  ;;  %v16514_v24 = vld [vmem:[#allocation7_spill] sm:$0xff] }
 0x8a5   :  { %10325 = vmatpush1.bf16.msra.mxu0 %v16012_v48  ;;  %10357 = vmatpush1.bf16.msra.mxu1 %v16013_v30  ;;  %v16518_v53 = vld [vmem:[#allocation11_spill] sm:$0xff] }
 0x8a6   :  { %4421 = vadd.xlane.f32.xlu1 %v4420_v41  ;;  %10327 = vmatprep.subr.bf16.mxu0 %v16014_v0  ;;  %12177 = vtanh.f32 %v4581_v29  ;;  %v16515_v41 = vld [vmem:[#allocation8_spill] sm:$0xff] }
 0x8a7   :  { %10359 = vmatprep.subr.bf16.mxu1 %v16015_v36  ;;  %4806 = vmatprep.mubr.f32.mxu0 %v15908_v57  ;;  %v16519_v29 = vld [vmem:[#allocation12_spill] sm:$0xff] }
 0x8a8   :  { %4877 = vmatprep.mubr.f32.mxu1 %v15908_v57 }
 0x8a9   :  { %10329 = vmatpush1.bf16.msra.mxu0 %v16016_v62  ;;  %10361 = vmatpush1.bf16.msra.mxu1 %v16017_v8 }
 0x8aa   :  { %10331 = vmatprep.subr.bf16.mxu0 %v16018_v14  ;;  %10363 = vmatprep.subr.bf16.mxu1 %v16019_v51 }
 0x8ac   :  { %v12172_v35 = vpop.eup %12171 }
 0x8ad   :  { %v4587_v50 = vmul.f32 0.5, %v12172_v35  ;;  %10333 = vmatpush1.bf16.msra.mxu0 %v16020_v38  ;;  %10365 = vmatpush1.bf16.msra.mxu1 %v16095_v22  ;;  %v12174_v9 = vpop.eup %12173  ;;  %v16520_v35 = vld [vmem:[#allocation13_spill] sm:$0xff] }
 0x8ae   :  { %10335 = vmatprep.subr.bf16.mxu0 %v16096_v40  ;;  %10367 = vmatprep.subr.bf16.mxu1 %v16023_v12  ;;  %v4588_v33 = vmul.f32 0.5, %v12174_v9  ;;  %v12176_v4 = vpop.eup %12175  ;;  %v16522_v9 = vld [vmem:[#allocation15_spill] sm:$0xff] }
 0x8af   :  { %v4591_v28 = vadd.f32 0.5, %v4587_v50  ;;  %v16521_v50 = vld [vmem:[#allocation14_spill] sm:$0xff] }
 0x8b0   :  { %v4592_v13 = vadd.f32 0.5, %v4588_v33  ;;  %v12178_v55 = vpop.eup %12177  ;;  %v16524_v33 = vld [vmem:[#allocation17_spill] sm:$0xff] }
 0x8b1   :  { %v4596_v34 = vmul.f32 %v12176_v4, %v4591_v28  ;;  %10337 = vmatpush1.bf16.msra.mxu0 %v16024_v10  ;;  %10369 = vmatpush1.bf16.msra.mxu1 %v16025_v61  ;;  %v16523_v28 = vld [vmem:[#allocation16_spill] sm:$0xff]  ;;  %v16525_v4 = vld [vmem:[#allocation18_spill] sm:$0xff] }
 0x8b2   :  { %10339 = vmatprep.subr.bf16.mxu0 %v16097_v44  ;;  %10371 = vmatprep.subr.bf16.mxu1 %v16098_v54  ;;  %v4595_v58 = vmul.f32 %v4592_v13, %v14296_v43  ;;  %v4589_v43 = vmul.f32 0.5, %v12178_v55  ;;  %v16526_v13 = vld [vmem:[#allocation19_spill] sm:$0xff]  ;;  %v16529_v55 = vld [vmem:[#allocation22_spill] sm:$0xff] }
 0x8b4   :  { %v14432_v42 = vadd.f32 %v4596_v34, %v4595_v58  ;;  %v4593_v23 = vadd.f32 0.5, %v4589_v43  ;;  %v16527_v34 = vld [vmem:[#allocation20_spill] sm:$0xff]  ;;  %v16528_v58 = vld [vmem:[#allocation21_spill] sm:$0xff]  ;;  %v16530_v43 = vld [vmem:[#allocation23_spill] sm:$0xff] }
 0x8b5   :  { %10341 = vmatpush1.bf16.msra.mxu0 %v16100_v31  ;;  %10373 = vmatpush1.bf16.msra.mxu1 %v16101_v2 }
 0x8b6   :  { %10343 = vmatprep.subr.bf16.mxu0 %v16102_v1  ;;  %10375 = vmatprep.subr.bf16.mxu1 %v16103_v32  ;;  %12179 = vtanh.f32 %v14432_v42 }
 0x8b9   :  { %10345 = vmatpush1.bf16.msra.mxu0 %v16104_v25  ;;  %10377 = vmatpush1.bf16.msra.mxu1 %v16105_v5 }
 0x8ba   :  { %10347 = vmatprep.subr.bf16.mxu0 %v16106_v39  ;;  %10379 = vmatprep.subr.bf16.mxu1 %v16036_v7 }
 0x8bd   :  { %10349 = vmatpush1.bf16.msra.mxu0 %v16037_v6  ;;  %10381 = vmatpush1.bf16.msra.mxu1 %v16038_v27 }
 0x8be   :  { %10351 = vmatprep.subr.bf16.mxu0 %v16039_v45  ;;  %10383 = vmatprep.subr.bf16.mxu1 %v16040_v18 }
 0x8c0   :  { %v12180_v11 = vpop.eup %12179 }
 0x8c1   :  { %10353 = vmatpush1.bf16.msra.mxu0 %v16426_v26  ;;  %10385 = vmatpush1.bf16.msra.mxu1 %v16509_v17  ;;  %v4599_v52 = vmul.f32 %v12180_v11, %v4593_v23  ;;  %v16531_v23 = vld [vmem:[#allocation24_spill] sm:$0xff]  ;;  %v16532_v11 = vld [vmem:[#allocation25_spill] sm:$0xff] }
 0x8c2   :  { %10387 = vmatprep.subr.bf16.mxu0 %v16510_v46  ;;  %10419 = vmatprep.subr.bf16.mxu1 %v16511_v59  ;;  %v16586_v59 = vld [vmem:[#allocation105_spill] sm:$0xff] }
 0x8c4   :  { %4807 = vmatmul.mubr.f32.vlgmr.msra.gmra.mrb[30].mxu0 %v4599_v52  ;;  %4878 = vmatmul.mubr.f32.vlgmr.msra.gmra.mrb[30].mxu1 %v4599_v52 }
 0x8c5   :  { %10389 = vmatpush1.bf16.msra.mxu0 %v16512_v16  ;;  %10421 = vmatpush1.bf16.msra.mxu1 %v16513_v15 }
 0x8c6   :  { %10391 = vmatprep.subr.bf16.mxu0 %v16514_v24  ;;  %10423 = vmatprep.subr.bf16.mxu1 %v16515_v41  ;;  %v16581_v24 = vld [vmem:[#allocation101_spill] sm:$0xff] }
 0x8c7   :  { %4986 = vmatprep.mubr.f32.mxu0 %v15908_v57  ;;  %5057 = vmatprep.mubr.f32.mxu1 %v15908_v57 }
 0x8c9   :  { %10393 = vmatpush1.bf16.msra.mxu0 %v16516_v20  ;;  %10425 = vmatpush1.bf16.msra.mxu1 %v16517_v63  ;;  %v96_v63 = vpop.permute.xlu1 %95 }
 0x8ca   :  { %10395 = vmatprep.subr.bf16.mxu0 %v16518_v53  ;;  %10427 = vmatprep.subr.bf16.mxu1 %v16519_v29  ;;  %v187_v15 = vmul.f32 %v16581_v24, %v96_v63  ;;  %v16589_v24 = vld [vmem:[#allocation108_spill] sm:$0xff] }
 0x8cd   :  { %10397 = vmatpush1.bf16.msra.mxu0 %v16520_v35  ;;  %10429 = vmatpush1.bf16.msra.mxu1 %v16521_v50  ;;  %v16577_v35 = vld [vmem:[#allocation113_spill] sm:$0xff] }
 0x8ce   :  { %10399 = vmatprep.subr.bf16.mxu0 %v16522_v9  ;;  %10431 = vmatprep.subr.bf16.mxu1 %v16523_v28  ;;  %v16533_v9 = vld [vmem:[#allocation26_spill] sm:$0xff]  ;;  %v16534_v28 = vld [vmem:[#allocation27_spill] sm:$0xff] }
 0x8d1   :  { %10401 = vmatpush1.bf16.msra.mxu0 %v16524_v33  ;;  %10433 = vmatpush1.bf16.msra.mxu1 %v16525_v4  ;;  %v16535_v33 = vld [vmem:[#allocation28_spill] sm:$0xff]  ;;  %v16536_v4 = vld [vmem:[#allocation29_spill] sm:$0xff] }
 0x8d2   :  { %10403 = vmatprep.subr.bf16.mxu0 %v16526_v13  ;;  %10435 = vmatprep.subr.bf16.mxu1 %v16527_v34  ;;  %v16537_v13 = vld [vmem:[#allocation30_spill] sm:$0xff]  ;;  %v16538_v34 = vld [vmem:[#allocation31_spill] sm:$0xff] }
 0x8d5   :  { %10405 = vmatpush1.bf16.msra.mxu0 %v16528_v58  ;;  %10437 = vmatpush1.bf16.msra.mxu1 %v16529_v55  ;;  %v16539_v58 = vld [vmem:[#allocation32_spill] sm:$0xff]  ;;  %v16540_v55 = vld [vmem:[#allocation33_spill] sm:$0xff] }
 0x8d6   :  { %10407 = vmatprep.subr.bf16.mxu0 %v16530_v43  ;;  %10439 = vmatprep.subr.bf16.mxu1 %v16531_v23  ;;  %v16541_v43 = vld [vmem:[#allocation34_spill] sm:$0xff]  ;;  %v16542_v23 = vld [vmem:[#allocation35_spill] sm:$0xff] }
 0x8d9   :  { %10409 = vmatpush1.bf16.msra.mxu0 %v16532_v11  ;;  %10441 = vmatpush1.bf16.msra.mxu1 %v16533_v9  ;;  %v16543_v11 = vld [vmem:[#allocation36_spill] sm:$0xff]  ;;  %v16576_v9 = vld [vmem:[#allocation99_spill] sm:$0xff] }
 0x8da   :  { %10411 = vmatprep.subr.bf16.mxu0 %v16534_v28  ;;  %10443 = vmatprep.subr.bf16.mxu1 %v16535_v33  ;;  %v16544_v28 = vld [vmem:[#allocation37_spill] sm:$0xff]  ;;  %v16545_v33 = vld [vmem:[#allocation38_spill] sm:$0xff] }
 0x8dd   :  { %10413 = vmatpush1.bf16.msra.mxu0 %v16536_v4  ;;  %10445 = vmatpush1.bf16.msra.mxu1 %v16537_v13  ;;  %v16546_v4 = vld [vmem:[#allocation39_spill] sm:$0xff]  ;;  %v16547_v13 = vld [vmem:[#allocation40_spill] sm:$0xff] }
 0x8de   :  { %10415 = vmatprep.subr.bf16.mxu0 %v16538_v34  ;;  %10447 = vmatprep.subr.bf16.mxu1 %v16539_v58  ;;  %v16557_v58 = vld [vmem:[#allocation50_spill] sm:$0xff]  ;;  %v16558_v34 = vld [vmem:[#allocation51_spill] sm:$0xff] }
 0x8e1   :  { %10417 = vmatpush1.bf16.msra.mxu0 %v16540_v55  ;;  %10449 = vmatpush1.bf16.msra.mxu1 %v16541_v43  ;;  %v16548_v55 = vld [vmem:[#allocation41_spill] sm:$0xff]  ;;  %v16549_v43 = vld [vmem:[#allocation42_spill] sm:$0xff] }
 0x8e2   :  { %10451 = vmatprep.subr.bf16.mxu0 %v16542_v23  ;;  %10483 = vmatprep.subr.bf16.mxu1 %v16543_v11  ;;  %v16550_v23 = vld [vmem:[#allocation43_spill] sm:$0xff]  ;;  %v16551_v11 = vld [vmem:[#allocation44_spill] sm:$0xff] }
 0x8e4   :  { %4987 = vmatmul.mubr.f32.vlgmr.msra.gmra.mrb[32].mxu0 %v4599_v52  ;;  %5058 = vmatmul.mubr.f32.vlgmr.msra.gmra.mrb[32].mxu1 %v4599_v52  ;;  %v16552_v52 = vld [vmem:[#allocation45_spill] sm:$0xff] }
 0x8e5   :  { %10453 = vmatpush1.bf16.msra.mxu0 %v16544_v28  ;;  %10485 = vmatpush1.bf16.msra.mxu1 %v16545_v33  ;;  %v16553_v28 = vld [vmem:[#allocation46_spill] sm:$0xff]  ;;  %v16554_v33 = vld [vmem:[#allocation47_spill] sm:$0xff] }
 0x8e6   :  { %10455 = vmatprep.subr.bf16.mxu0 %v16546_v4  ;;  %10487 = vmatprep.subr.bf16.mxu1 %v16547_v13  ;;  %v16555_v4 = vld [vmem:[#allocation48_spill] sm:$0xff]  ;;  %v16556_v13 = vld [vmem:[#allocation49_spill] sm:$0xff] }
 0x8e7   :  { %5149 = vmatprep.mubr.f32.mxu0 %v15908_v57  ;;  %5220 = vmatprep.mubr.f32.mxu1 %v15908_v57 }
 0x8e9   :  { %10457 = vmatpush1.bf16.msra.mxu0 %v16548_v55  ;;  %10489 = vmatpush1.bf16.msra.mxu1 %v16549_v43  ;;  %v16559_v55 = vld [vmem:[#allocation52_spill] sm:$0xff]  ;;  %v16560_v43 = vld [vmem:[#allocation53_spill] sm:$0xff] }
 0x8ea   :  { %10459 = vmatprep.subr.bf16.mxu0 %v16550_v23  ;;  %10491 = vmatprep.subr.bf16.mxu1 %v16551_v11  ;;  %v16561_v23 = vld [vmem:[#allocation54_spill] sm:$0xff]  ;;  %v16562_v11 = vld [vmem:[#allocation55_spill] sm:$0xff] }
 0x8ed   :  { %10461 = vmatpush1.bf16.msra.mxu0 %v16552_v52  ;;  %10493 = vmatpush1.bf16.msra.mxu1 %v16553_v28  ;;  %v16563_v52 = vld [vmem:[#allocation56_spill] sm:$0xff]  ;;  %v16564_v28 = vld [vmem:[#allocation57_spill] sm:$0xff] }
 0x8ee   :  { %10463 = vmatprep.subr.bf16.mxu0 %v16554_v33  ;;  %10495 = vmatprep.subr.bf16.mxu1 %v16555_v4  ;;  %v16565_v33 = vld [vmem:[#allocation58_spill] sm:$0xff]  ;;  %v16566_v4 = vld [vmem:[#allocation59_spill] sm:$0xff] }
 0x8f1   :  { %10465 = vmatpush1.bf16.msra.mxu0 %v16556_v13  ;;  %10497 = vmatpush1.bf16.msra.mxu1 %v16557_v58  ;;  %v16567_v13 = vld [vmem:[#allocation60_spill] sm:$0xff]  ;;  %v16568_v58 = vld [vmem:[#allocation61_spill] sm:$0xff] }
 0x8f2   :  { %10467 = vmatprep.subr.bf16.mxu0 %v16558_v34  ;;  %10499 = vmatprep.subr.bf16.mxu1 %v16559_v55  ;;  %v16569_v34 = vld [vmem:[#allocation62_spill] sm:$0xff]  ;;  %v16570_v55 = vld [vmem:[#allocation63_spill] sm:$0xff] }
 0x8f5   :  { %10469 = vmatpush1.bf16.msra.mxu0 %v16560_v43  ;;  %10501 = vmatpush1.bf16.msra.mxu1 %v16561_v23  ;;  %v16571_v43 = vld [vmem:[#allocation64_spill] sm:$0xff]  ;;  %v16572_v23 = vld [vmem:[#allocation65_spill] sm:$0xff] }
 0x8f6   :  { %10471 = vmatprep.subr.bf16.mxu0 %v16562_v11  ;;  %10503 = vmatprep.subr.bf16.mxu1 %v16563_v52  ;;  %v16573_v11 = vld [vmem:[#allocation66_spill] sm:$0xff]  ;;  %v16574_v52 = vld [vmem:[#allocation67_spill] sm:$0xff] }
 0x8f9   :  { %10473 = vmatpush1.bf16.msra.mxu0 %v16564_v28  ;;  %10505 = vmatpush1.bf16.msra.mxu1 %v16565_v33  ;;  %v16575_v28 = vld [vmem:[#allocation68_spill] sm:$0xff] }
 0x8fa   :  { %10475 = vmatprep.subr.bf16.mxu0 %v16566_v4  ;;  %10507 = vmatprep.subr.bf16.mxu1 %v16567_v13 }
 0x8fd   :  { %10477 = vmatpush1.bf16.msra.mxu0 %v16568_v58  ;;  %10509 = vmatpush1.bf16.msra.mxu1 %v16569_v34 }
 0x8fe   :  { %10479 = vmatprep.subr.bf16.mxu0 %v16570_v55  ;;  %10511 = vmatprep.subr.bf16.mxu1 %v16571_v43  ;;  %v16578_v55 = vld [vmem:[#allocation114_spill] sm:$0xff] }
 0x901   :  { %10481 = vmatpush1.bf16.msra.mxu0 %v16572_v23  ;;  %10513 = vmatpush1.bf16.msra.mxu1 %v16573_v11  ;;  %v16579_v23 = vld [vmem:[#allocation115_spill] sm:$0xff] }
 0x902   :  { %10515 = vmatprep.subr.bf16.mxu0 %v16574_v52  ;;  %10547 = vmatprep.subr.bf16.mxu1 %v16575_v28 }
 0x997   :  { %v4808_v33 = vpop.f32.mrb[30].mxu0  ;;  %v4879_v4 = vpop.f32.mrb[30].mxu1 }
 0x998   :  { %v4884_v13 = vadd.f32 %v4808_v33, %v16576_v9  ;;  %v4810_v50 = vpop.f32.mrb[31].mxu0  ;;  %v4881_v58 = vpop.f32.mrb[31].mxu1  ;;  %v4886_v43 = vadd.f32 %v4879_v4, %v16579_v23  ;;  %v16580_v33 = vld [vmem:[#allocation100_spill] sm:$0xff]  ;;  %v16584_v4 = vld [vmem:[#allocation103_spill] sm:$0xff] }
 0x999   :  { %v4885_v34 = vadd.f32 %v4810_v50, %v16577_v35  ;;  %v4887_v29 = vadd.f32 %v4881_v58, %v16578_v55  ;;  %v186_v9 = vmul.f32 %v16580_v33, %v96_v63  ;;  %v16582_v35 = vld [vmem:[#allocation102_spill] sm:$0xff]  ;;  %v16588_v33 = vld [vmem:[#allocation107_spill] sm:$0xff] }
 0x99a   :  { %12181 = vtanh.f32 %v4884_v13  ;;  %v189_v58 = vmul.f32 %v16582_v35, %v96_v63 }
 0x99b   :  { %12183 = vtanh.f32 %v4885_v34  ;;  %v339_v34 = vpop.permute.xlu0 %338 }
 0x99c   :  { %12185 = vtanh.f32 %v4887_v29  ;;  %v16583_v29 = vld [vmem:[#allocation73_spill] sm:$0xff]  ;;  %v422_v23 = vmul.f32 %v16584_v4, %v339_v34  ;;  %v425_v17 = vmul.f32 %v16588_v33, %v339_v34 }
 0x99d   :  { %12187 = vtanh.f32 %v4886_v43 }
 0x9a4   :  { %v12182_v11 = vpop.eup %12181 }
 0x9a5   :  { %v4892_v53 = vmul.f32 0.5, %v12182_v11  ;;  %v12184_v52 = vpop.eup %12183  ;;  %v16585_v11 = vld [vmem:[#allocation104_spill] sm:$0xff] }
 0x9a6   :  { %v4893_v20 = vmul.f32 0.5, %v12184_v52  ;;  %v12186_v41 = vpop.eup %12185  ;;  %v271_v16 = vadd.f32 %v16585_v11, %v186_v9  ;;  %v16587_v52 = vld [vmem:[#allocation106_spill] sm:$0xff] }
 0x9a7   :  { %v4896_v28 = vadd.f32 0.5, %v4892_v53  ;;  %v423_v53 = vmul.f32 %v16586_v59, %v339_v34  ;;  %v272_v46 = vadd.f32 %v16587_v52, %v187_v15 }
 0x9a8   :  { %v4897_v50 = vadd.f32 0.5, %v4893_v20  ;;  %v274_v20 = vadd.f32 %v16589_v24, %v189_v58  ;;  %v424_v58 = vmul.f32 %v13447_v60, %v339_v34 }
 0x9a9   :  { %v4901_v13 = vmul.f32 %v12186_v41, %v4896_v28  ;;  %v554_v41 = vpop.permute.xlu1 %553  ;;  %v486_v28 = vadd.f32 %v422_v23, %v271_v16  ;;  %v487_v4 = vadd.f32 %v423_v53, %v272_v46 }
 0x9aa   :  { %v4900_v55 = vmul.f32 %v4897_v50, %v16583_v29  ;;  %v637_v50 = vmul.f32 %v16258_v49, %v554_v41  ;;  %v12188_v29 = vpop.eup %12187  ;;  %v638_v9 = vmul.f32 %v16259_v37, %v554_v41  ;;  %v489_v11 = vadd.f32 %v425_v17, %v274_v20 }
 0x9ab   :  { %v4894_v15 = vmul.f32 0.5, %v12188_v29 }
 0x9ac   :  { %v14530_v43 = vadd.f32 %v4901_v13, %v4900_v55  ;;  %v640_v55 = vmul.f32 %v16260_v19, %v554_v41  ;;  %v188_v13 = vmul.f32 %v16011_v56, %v96_v63  ;;  %v701_v52 = vadd.f32 %v637_v50, %v486_v28 }
 0x9ad   :  { %v702_v33 = vadd.f32 %v638_v9, %v487_v4  ;;  %v4898_v49 = vadd.f32 0.5, %v4894_v15  ;;  %v639_v28 = vmul.f32 %v13457_v47, %v554_v41  ;;  %v16591_v15 = vld [vmem:[#allocation3_spill] sm:$0xff] }
 0x9ae   :  { %12189 = vtanh.f32 %v14530_v43  ;;  %v704_v59 = vadd.f32 %v640_v55, %v489_v11  ;;  %v273_v16 = vadd.f32 %v13450_v21, %v188_v13  ;;  %v16590_v13 = vld [vmem:[#allocation98_spill] sm:$0xff] }
 0x9b0   :  { %v488_v63 = vadd.f32 %v424_v58, %v273_v16  ;;  %v16592_v58 = vld [vmem:[#allocation4_spill] sm:$0xff] }
 0x9b7   :  { %v4988_v24 = vpop.f32.mrb[32].mxu0  ;;  %v5059_v23 = vpop.f32.mrb[32].mxu1 }
 0x9b8   :  { %v5064_v35 = vadd.f32 %v4988_v24, %v701_v52  ;;  %v4990_v46 = vpop.f32.mrb[33].mxu0  ;;  %v5061_v53 = vpop.f32.mrb[33].mxu1  ;;  %v703_v24 = vadd.f32 %v639_v28, %v488_v63  ;;  %v16598_v63 = vld [vmem:[#allocation10_spill] sm:$0xff]  ;;  %v16599_v28 = vld [vmem:[#allocation11_spill] sm:$0xff] }
 0x9b9   :  { %v12190_v37 = vpop.eup %12189  ;;  %v5065_v17 = vadd.f32 %v4990_v46, %v702_v33  ;;  %v5067_v20 = vadd.f32 %v5061_v53, %v704_v59  ;;  %v16594_v46 = vld [vmem:[#allocation6_spill] sm:$0xff]  ;;  %v16595_v53 = vld [vmem:[#allocation7_spill] sm:$0xff] }
 0x9ba   :  { %12191 = vtanh.f32 %v5064_v35  ;;  %v4904_v19 = vmul.f32 %v12190_v37, %v4898_v49  ;;  %v5066_v37 = vadd.f32 %v5059_v23, %v703_v24  ;;  %v16593_v23 = vld [vmem:[#allocation5_spill] sm:$0xff] }
 0x9bb   :  { %12193 = vtanh.f32 %v5065_v17  ;;  %v16596_v17 = vld [vmem:[#allocation8_spill] sm:$0xff]  ;;  %v16601_v24 = vld [vmem:[#allocation13_spill] sm:$0xff] }
 0x9bc   :  { %5150 = vmatmul.mubr.f32.vlgmr.msra.gmra.mrb[34].mxu0 %v4904_v19  ;;  %5221 = vmatmul.mubr.f32.vlgmr.msra.gmra.mrb[34].mxu1 %v4904_v19  ;;  %v4905_v34 = vmul.f32 %v14409_v3, %v4904_v19  ;;  %12195 = vtanh.f32 %v5067_v20  ;;  %v16597_v20 = vld [vmem:[#allocation9_spill] sm:$0xff] }
 0x9bd   :  { %10517 = vmatpush1.bf16.msra.mxu0 %v16012_v48  ;;  %10549 = vmatpush1.bf16.msra.mxu1 %v16013_v30  ;;  %12197 = vtanh.f32 %v5066_v37  ;;  %v16602_v37 = vld [vmem:[#allocation14_spill] sm:$0xff] }
 0x9be   :  { %4906 = vadd.xlane.f32.xlu0 %v4905_v34  ;;  %10519 = vmatprep.subr.bf16.mxu0 %v16014_v0  ;;  %v16600_v34 = vld [vmem:[#allocation12_spill] sm:$0xff] }
 0x9bf   :  { %10551 = vmatprep.subr.bf16.mxu1 %v16015_v36  ;;  %5291 = vmatprep.mubr.f32.mxu0 %v15908_v57 }
 0x9c0   :  { %5362 = vmatprep.mubr.f32.mxu1 %v15908_v57 }
 0x9c1   :  { %10521 = vmatpush1.bf16.msra.mxu0 %v16016_v62  ;;  %10553 = vmatpush1.bf16.msra.mxu1 %v16017_v8 }
 0x9c2   :  { %10523 = vmatprep.subr.bf16.mxu0 %v16018_v14  ;;  %10555 = vmatprep.subr.bf16.mxu1 %v16019_v51 }
 0x9c4   :  { %v12192_v49 = vpop.eup %12191 }
 0x9c5   :  { %v5072_v19 = vmul.f32 0.5, %v12192_v49  ;;  %10525 = vmatpush1.bf16.msra.mxu0 %v16020_v38  ;;  %10557 = vmatpush1.bf16.msra.mxu1 %v16095_v22  ;;  %v12194_v59 = vpop.eup %12193  ;;  %v16603_v49 = vld [vmem:[#allocation15_spill] sm:$0xff] }
 0x9c6   :  { %10527 = vmatprep.subr.bf16.mxu0 %v16096_v40  ;;  %10559 = vmatprep.subr.bf16.mxu1 %v16023_v12  ;;  %v5073_v33 = vmul.f32 0.5, %v12194_v59  ;;  %v12196_v4 = vpop.eup %12195  ;;  %v16605_v59 = vld [vmem:[#allocation17_spill] sm:$0xff] }
 0x9c7   :  { %v5076_v35 = vadd.f32 0.5, %v5072_v19  ;;  %v12198_v29 = vpop.eup %12197  ;;  %v16604_v19 = vld [vmem:[#allocation16_spill] sm:$0xff] }
 0x9c8   :  { %v5077_v11 = vadd.f32 0.5, %v5073_v33  ;;  %v16607_v33 = vld [vmem:[#allocation19_spill] sm:$0xff] }
 0x9c9   :  { %v5081_v52 = vmul.f32 %v12196_v4, %v5076_v35  ;;  %10529 = vmatpush1.bf16.msra.mxu0 %v16024_v10  ;;  %10561 = vmatpush1.bf16.msra.mxu1 %v16025_v61  ;;  %v16606_v35 = vld [vmem:[#allocation18_spill] sm:$0xff]  ;;  %v16608_v4 = vld [vmem:[#allocation20_spill] sm:$0xff] }
 0x9ca   :  { %10531 = vmatprep.subr.bf16.mxu0 %v16097_v44  ;;  %10563 = vmatprep.subr.bf16.mxu1 %v16098_v54  ;;  %v5080_v41 = vmul.f32 %v5077_v11, %v14432_v42  ;;  %v5074_v42 = vmul.f32 0.5, %v12198_v29  ;;  %v16609_v11 = vld [vmem:[#allocation21_spill] sm:$0xff]  ;;  %v16612_v29 = vld [vmem:[#allocation24_spill] sm:$0xff] }
 0x9cc   :  { %v14563_v50 = vadd.f32 %v5081_v52, %v5080_v41  ;;  %v5078_v9 = vadd.f32 0.5, %v5074_v42  ;;  %v16610_v52 = vld [vmem:[#allocation22_spill] sm:$0xff]  ;;  %v16611_v41 = vld [vmem:[#allocation23_spill] sm:$0xff]  ;;  %v16613_v42 = vld [vmem:[#allocation25_spill] sm:$0xff] }
 0x9cd   :  { %10533 = vmatpush1.bf16.msra.mxu0 %v16100_v31  ;;  %10565 = vmatpush1.bf16.msra.mxu1 %v16101_v2 }
 0x9ce   :  { %10535 = vmatprep.subr.bf16.mxu0 %v16102_v1  ;;  %10567 = vmatprep.subr.bf16.mxu1 %v16103_v32  ;;  %12199 = vtanh.f32 %v14563_v50 }
 0x9d1   :  { %10537 = vmatpush1.bf16.msra.mxu0 %v16104_v25  ;;  %10569 = vmatpush1.bf16.msra.mxu1 %v16105_v5 }
 0x9d2   :  { %10539 = vmatprep.subr.bf16.mxu0 %v16106_v39  ;;  %10571 = vmatprep.subr.bf16.mxu1 %v16036_v7 }
 0x9d5   :  { %10541 = vmatpush1.bf16.msra.mxu0 %v16037_v6  ;;  %10573 = vmatpush1.bf16.msra.mxu1 %v16038_v27 }
 0x9d6   :  { %10543 = vmatprep.subr.bf16.mxu0 %v16039_v45  ;;  %10575 = vmatprep.subr.bf16.mxu1 %v16040_v18 }
 0x9d8   :  { %v12200_v55 = vpop.eup %12199 }
 0x9d9   :  { %10545 = vmatpush1.bf16.msra.mxu0 %v16426_v26  ;;  %10577 = vmatpush1.bf16.msra.mxu1 %v16590_v13  ;;  %v5084_v16 = vmul.f32 %v12200_v55, %v5078_v9  ;;  %v16614_v9 = vld [vmem:[#allocation26_spill] sm:$0xff]  ;;  %v16615_v55 = vld [vmem:[#allocation27_spill] sm:$0xff] }
 0x9da   :  { %10579 = vmatprep.subr.bf16.mxu0 %v16591_v15  ;;  %10611 = vmatprep.subr.bf16.mxu1 %v16592_v58 }
 0x9dc   :  { %5292 = vmatmul.mubr.f32.vlgmr.msra.gmra.mrb[34].mxu0 %v5084_v16  ;;  %5363 = vmatmul.mubr.f32.vlgmr.msra.gmra.mrb[34].mxu1 %v5084_v16 }
 0x9dd   :  { %10581 = vmatpush1.bf16.msra.mxu0 %v16593_v23  ;;  %10613 = vmatpush1.bf16.msra.mxu1 %v16594_v46  ;;  %v16671_v46 = vld [vmem:[#allocation109_spill] sm:$0xff]  ;;  %v16672_v23 = vld [vmem:[#allocation110_spill] sm:$0xff] }
 0x9de   :  { %10583 = vmatprep.subr.bf16.mxu0 %v16595_v53  ;;  %10615 = vmatprep.subr.bf16.mxu1 %v16596_v17 }
 0x9df   :  { %5471 = vmatprep.mubr.f32.mxu0 %v15908_v57  ;;  %5542 = vmatprep.mubr.f32.mxu1 %v15908_v57 }
 0x9e1   :  { %10585 = vmatpush1.bf16.msra.mxu0 %v16597_v20  ;;  %10617 = vmatpush1.bf16.msra.mxu1 %v16598_v63  ;;  %v101_v63 = vpop.permute.xlu1 %100  ;;  %v16661_v20 = vld [vmem:[#allocation100_spill] sm:$0xff] }
 0x9e2   :  { %10587 = vmatprep.subr.bf16.mxu0 %v16599_v28  ;;  %10619 = vmatprep.subr.bf16.mxu1 %v16600_v34  ;;  %v190_v17 = vmul.f32 %v16661_v20, %v101_v63 }
 0x9e5   :  { %10589 = vmatpush1.bf16.msra.mxu0 %v16601_v24  ;;  %10621 = vmatpush1.bf16.msra.mxu1 %v16602_v37 }
 0x9e6   :  { %10591 = vmatprep.subr.bf16.mxu0 %v16603_v49  ;;  %10623 = vmatprep.subr.bf16.mxu1 %v16604_v19  ;;  %v16658_v49 = vld [vmem:[#allocation113_spill] sm:$0xff] }
 0x9e9   :  { %10593 = vmatpush1.bf16.msra.mxu0 %v16605_v59  ;;  %10625 = vmatpush1.bf16.msra.mxu1 %v16606_v35  ;;  %v16616_v59 = vld [vmem:[#allocation28_spill] sm:$0xff]  ;;  %v16617_v35 = vld [vmem:[#allocation29_spill] sm:$0xff] }
 0x9ea   :  { %10595 = vmatprep.subr.bf16.mxu0 %v16607_v33  ;;  %10627 = vmatprep.subr.bf16.mxu1 %v16608_v4  ;;  %v16618_v33 = vld [vmem:[#allocation30_spill] sm:$0xff]  ;;  %v16619_v4 = vld [vmem:[#allocation31_spill] sm:$0xff] }
 0x9ed   :  { %10597 = vmatpush1.bf16.msra.mxu0 %v16609_v11  ;;  %10629 = vmatpush1.bf16.msra.mxu1 %v16610_v52  ;;  %v16620_v11 = vld [vmem:[#allocation32_spill] sm:$0xff]  ;;  %v16621_v52 = vld [vmem:[#allocation33_spill] sm:$0xff] }
 0x9ee   :  { %10599 = vmatprep.subr.bf16.mxu0 %v16611_v41  ;;  %10631 = vmatprep.subr.bf16.mxu1 %v16612_v29  ;;  %v16622_v41 = vld [vmem:[#allocation34_spill] sm:$0xff]  ;;  %v16623_v29 = vld [vmem:[#allocation35_spill] sm:$0xff] }
 0x9f1   :  { %10601 = vmatpush1.bf16.msra.mxu0 %v16613_v42  ;;  %10633 = vmatpush1.bf16.msra.mxu1 %v16614_v9  ;;  %v16624_v42 = vld [vmem:[#allocation36_spill] sm:$0xff]  ;;  %v16657_v9 = vld [vmem:[#allocation99_spill] sm:$0xff] }
 0x9f2   :  { %10603 = vmatprep.subr.bf16.mxu0 %v16615_v55  ;;  %10635 = vmatprep.subr.bf16.mxu1 %v16616_v59  ;;  %v16625_v55 = vld [vmem:[#allocation37_spill] sm:$0xff]  ;;  %v16626_v59 = vld [vmem:[#allocation38_spill] sm:$0xff] }
 0x9f5   :  { %10605 = vmatpush1.bf16.msra.mxu0 %v16617_v35  ;;  %10637 = vmatpush1.bf16.msra.mxu1 %v16618_v33  ;;  %v16627_v35 = vld [vmem:[#allocation39_spill] sm:$0xff]  ;;  %v16628_v33 = vld [vmem:[#allocation40_spill] sm:$0xff] }
 0x9f6   :  { %10607 = vmatprep.subr.bf16.mxu0 %v16619_v4  ;;  %10639 = vmatprep.subr.bf16.mxu1 %v16620_v11  ;;  %v16638_v11 = vld [vmem:[#allocation50_spill] sm:$0xff]  ;;  %v16639_v4 = vld [vmem:[#allocation51_spill] sm:$0xff] }
 0x9f9   :  { %10609 = vmatpush1.bf16.msra.mxu0 %v16621_v52  ;;  %10641 = vmatpush1.bf16.msra.mxu1 %v16622_v41  ;;  %v16629_v52 = vld [vmem:[#allocation41_spill] sm:$0xff]  ;;  %v16630_v41 = vld [vmem:[#allocation42_spill] sm:$0xff] }
 0x9fa   :  { %10643 = vmatprep.subr.bf16.mxu0 %v16623_v29  ;;  %10675 = vmatprep.subr.bf16.mxu1 %v16624_v42  ;;  %v16631_v29 = vld [vmem:[#allocation43_spill] sm:$0xff]  ;;  %v16632_v42 = vld [vmem:[#allocation44_spill] sm:$0xff] }
 0x9fc   :  { %5472 = vmatmul.mubr.f32.vlgmr.msra.gmra.mrb[36].mxu0 %v5084_v16  ;;  %5543 = vmatmul.mubr.f32.vlgmr.msra.gmra.mrb[36].mxu1 %v5084_v16  ;;  %v16633_v16 = vld [vmem:[#allocation45_spill] sm:$0xff] }
 0x9fd   :  { %10645 = vmatpush1.bf16.msra.mxu0 %v16625_v55  ;;  %10677 = vmatpush1.bf16.msra.mxu1 %v16626_v59  ;;  %v16634_v55 = vld [vmem:[#allocation46_spill] sm:$0xff]  ;;  %v16635_v59 = vld [vmem:[#allocation47_spill] sm:$0xff] }
 0x9fe   :  { %10647 = vmatprep.subr.bf16.mxu0 %v16627_v35  ;;  %10679 = vmatprep.subr.bf16.mxu1 %v16628_v33  ;;  %v16636_v35 = vld [vmem:[#allocation48_spill] sm:$0xff]  ;;  %v16637_v33 = vld [vmem:[#allocation49_spill] sm:$0xff] }
 0x9ff   :  { %5634 = vmatprep.mubr.f32.mxu0 %v15908_v57  ;;  %5705 = vmatprep.mubr.f32.mxu1 %v15908_v57 }
 0xa01   :  { %10649 = vmatpush1.bf16.msra.mxu0 %v16629_v52  ;;  %10681 = vmatpush1.bf16.msra.mxu1 %v16630_v41  ;;  %v16640_v52 = vld [vmem:[#allocation52_spill] sm:$0xff]  ;;  %v16641_v41 = vld [vmem:[#allocation53_spill] sm:$0xff] }
 0xa02   :  { %10651 = vmatprep.subr.bf16.mxu0 %v16631_v29  ;;  %10683 = vmatprep.subr.bf16.mxu1 %v16632_v42  ;;  %v16642_v29 = vld [vmem:[#allocation54_spill] sm:$0xff]  ;;  %v16643_v42 = vld [vmem:[#allocation55_spill] sm:$0xff] }
 0xa05   :  { %10653 = vmatpush1.bf16.msra.mxu0 %v16633_v16  ;;  %10685 = vmatpush1.bf16.msra.mxu1 %v16634_v55  ;;  %v16644_v16 = vld [vmem:[#allocation56_spill] sm:$0xff]  ;;  %v16645_v55 = vld [vmem:[#allocation57_spill] sm:$0xff] }
 0xa06   :  { %10655 = vmatprep.subr.bf16.mxu0 %v16635_v59  ;;  %10687 = vmatprep.subr.bf16.mxu1 %v16636_v35  ;;  %v16646_v59 = vld [vmem:[#allocation58_spill] sm:$0xff]  ;;  %v16647_v35 = vld [vmem:[#allocation59_spill] sm:$0xff] }
 0xa09   :  { %10657 = vmatpush1.bf16.msra.mxu0 %v16637_v33  ;;  %10689 = vmatpush1.bf16.msra.mxu1 %v16638_v11  ;;  %v16648_v33 = vld [vmem:[#allocation60_spill] sm:$0xff]  ;;  %v16649_v11 = vld [vmem:[#allocation61_spill] sm:$0xff] }
 0xa0a   :  { %10659 = vmatprep.subr.bf16.mxu0 %v16639_v4  ;;  %10691 = vmatprep.subr.bf16.mxu1 %v16640_v52  ;;  %v16650_v4 = vld [vmem:[#allocation62_spill] sm:$0xff]  ;;  %v16651_v52 = vld [vmem:[#allocation63_spill] sm:$0xff] }
 0xa0d   :  { %10661 = vmatpush1.bf16.msra.mxu0 %v16641_v41  ;;  %10693 = vmatpush1.bf16.msra.mxu1 %v16642_v29  ;;  %v16652_v41 = vld [vmem:[#allocation64_spill] sm:$0xff]  ;;  %v16653_v29 = vld [vmem:[#allocation65_spill] sm:$0xff] }
 0xa0e   :  { %10663 = vmatprep.subr.bf16.mxu0 %v16643_v42  ;;  %10695 = vmatprep.subr.bf16.mxu1 %v16644_v16  ;;  %v16654_v42 = vld [vmem:[#allocation66_spill] sm:$0xff]  ;;  %v16655_v16 = vld [vmem:[#allocation67_spill] sm:$0xff] }
 0xa11   :  { %10665 = vmatpush1.bf16.msra.mxu0 %v16645_v55  ;;  %10697 = vmatpush1.bf16.msra.mxu1 %v16646_v59  ;;  %v16656_v55 = vld [vmem:[#allocation68_spill] sm:$0xff] }
 0xa12   :  { %10667 = vmatprep.subr.bf16.mxu0 %v16647_v35  ;;  %10699 = vmatprep.subr.bf16.mxu1 %v16648_v33 }
 0xa15   :  { %10669 = vmatpush1.bf16.msra.mxu0 %v16649_v11  ;;  %10701 = vmatpush1.bf16.msra.mxu1 %v16650_v4 }
 0xa16   :  { %10671 = vmatprep.subr.bf16.mxu0 %v16651_v52  ;;  %10703 = vmatprep.subr.bf16.mxu1 %v16652_v41  ;;  %v16659_v52 = vld [vmem:[#allocation114_spill] sm:$0xff] }
 0xa19   :  { %10673 = vmatpush1.bf16.msra.mxu0 %v16653_v29  ;;  %10705 = vmatpush1.bf16.msra.mxu1 %v16654_v42  ;;  %v16660_v29 = vld [vmem:[#allocation115_spill] sm:$0xff] }
 0xa1a   :  { %10707 = vmatprep.subr.bf16.mxu0 %v16655_v16  ;;  %10739 = vmatprep.subr.bf16.mxu1 %v16656_v55 }
 0xaaf   :  { %v5293_v59 = vpop.f32.mrb[34].mxu0  ;;  %v5364_v35 = vpop.f32.mrb[34].mxu1 }
 0xab0   :  { %v5369_v33 = vadd.f32 %v5293_v59, %v16657_v9  ;;  %v5295_v19 = vpop.f32.mrb[35].mxu0  ;;  %v5366_v11 = vpop.f32.mrb[35].mxu1  ;;  %v5371_v41 = vadd.f32 %v5364_v35, %v16660_v29 }
 0xab1   :  { %v5370_v4 = vadd.f32 %v5295_v19, %v16658_v49  ;;  %v5372_v37 = vadd.f32 %v5366_v11, %v16659_v52  ;;  %v16662_v19 = vld [vmem:[#allocation101_spill] sm:$0xff]  ;;  %v343_v52 = vpop.permute.xlu0 %342 }
 0xab2   :  { %12201 = vtanh.f32 %v5369_v33  ;;  %v191_v33 = vmul.f32 %v16662_v19, %v101_v63  ;;  %v16670_v19 = vld [vmem:[#allocation108_spill] sm:$0xff] }
 0xab3   :  { %12203 = vtanh.f32 %v5370_v4  ;;  %v16663_v4 = vld [vmem:[#allocation102_spill] sm:$0xff] }
 0xab4   :  { %12205 = vtanh.f32 %v5372_v37  ;;  %v193_v37 = vmul.f32 %v16663_v4, %v101_v63 }
 0xab5   :  { %12207 = vtanh.f32 %v5371_v41 }
 0xab6   :  { %v278_v53 = vadd.f32 %v16670_v19, %v193_v37 }
 0xabc   :  { %v12202_v42 = vpop.eup %12201 }
 0xabd   :  { %v5377_v24 = vmul.f32 0.5, %v12202_v42  ;;  %v12204_v16 = vpop.eup %12203  ;;  %v16665_v42 = vld [vmem:[#allocation103_spill] sm:$0xff] }
 0xabe   :  { %v5378_v55 = vmul.f32 0.5, %v12204_v16  ;;  %v12206_v28 = vpop.eup %12205  ;;  %v426_v29 = vmul.f32 %v16665_v42, %v343_v52  ;;  %v16667_v16 = vld [vmem:[#allocation105_spill] sm:$0xff] }
 0xabf   :  { %v5381_v34 = vadd.f32 0.5, %v5377_v24  ;;  %v16666_v24 = vld [vmem:[#allocation104_spill] sm:$0xff]  ;;  %v427_v49 = vmul.f32 %v16667_v16, %v343_v52 }
 0xac0   :  { %v5382_v59 = vadd.f32 0.5, %v5378_v55  ;;  %v275_v41 = vadd.f32 %v16666_v24, %v190_v17  ;;  %v16669_v55 = vld [vmem:[#allocation107_spill] sm:$0xff] }
 0xac1   :  { %v5386_v9 = vmul.f32 %v12206_v28, %v5381_v34  ;;  %v16668_v28 = vld [vmem:[#allocation106_spill] sm:$0xff]  ;;  %v429_v20 = vmul.f32 %v16669_v55, %v343_v52  ;;  %v16673_v24 = vld [vmem:[#allocation111_spill] sm:$0xff] }
 0xac2   :  { %v5385_v11 = vmul.f32 %v5382_v59, %v14530_v43  ;;  %v276_v34 = vadd.f32 %v16668_v28, %v191_v33  ;;  %v12208_v43 = vpop.eup %12207  ;;  %v558_v59 = vpop.permute.xlu1 %557  ;;  %v490_v4 = vadd.f32 %v426_v29, %v275_v41 }
 0xac3   :  { %v642_v42 = vmul.f32 %v16672_v23, %v558_v59  ;;  %v5379_v58 = vmul.f32 0.5, %v12208_v43  ;;  %v493_v17 = vadd.f32 %v429_v20, %v278_v53  ;;  %v644_v16 = vmul.f32 %v16673_v24, %v558_v59 }
 0xac4   :  { %v14658_v35 = vadd.f32 %v5386_v9, %v5385_v11  ;;  %v641_v9 = vmul.f32 %v16671_v46, %v558_v59  ;;  %v491_v11 = vadd.f32 %v427_v49, %v276_v34  ;;  %v428_v49 = vmul.f32 %v13447_v60, %v343_v52 }
 0xac5   :  { %v5383_v13 = vadd.f32 0.5, %v5379_v58  ;;  %v708_v26 = vadd.f32 %v644_v16, %v493_v17 }
 0xac6   :  { %16664 = vst [vmem:[#allocation74_spill] sm:$0xff] %v14658_v35  ;;  %12209 = vtanh.f32 %v14658_v35  ;;  %v192_v35 = vmul.f32 %v16011_v56, %v101_v63  ;;  %v705_v15 = vadd.f32 %v641_v9, %v490_v4  ;;  %v706_v55 = vadd.f32 %v642_v42, %v491_v11 }
 0xac8   :  { %v277_v34 = vadd.f32 %v13450_v21, %v192_v35 }
 0xaca   :  { %v492_v4 = vadd.f32 %v428_v49, %v277_v34  ;;  %v16677_v49 = vld [vmem:[#allocation4_spill] sm:$0xff]  ;;  %v16678_v34 = vld [vmem:[#allocation5_spill] sm:$0xff] }
 0xacf   :  { %v5473_v33 = vpop.f32.mrb[36].mxu0  ;;  %v5544_v28 = vpop.f32.mrb[36].mxu1 }
 0xad0   :  { %v5549_v37 = vadd.f32 %v5473_v33, %v705_v15  ;;  %v5475_v19 = vpop.f32.mrb[37].mxu0  ;;  %v5546_v29 = vpop.f32.mrb[37].mxu1  ;;  %v643_v15 = vmul.f32 %v13457_v47, %v558_v59  ;;  %v16674_v33 = vld [vmem:[#allocation97_spill] sm:$0xff] }
 0xad1   :  { %v12210_v41 = vpop.eup %12209  ;;  %v5550_v43 = vadd.f32 %v5475_v19, %v706_v55  ;;  %v5552_v53 = vadd.f32 %v5546_v29, %v708_v26 }
 0xad2   :  { %12211 = vtanh.f32 %v5549_v37  ;;  %v5389_v20 = vmul.f32 %v12210_v41, %v5383_v13  ;;  %v707_v26 = vadd.f32 %v643_v15, %v492_v4  ;;  %v16675_v37 = vld [vmem:[#allocation98_spill] sm:$0xff]  ;;  %v16676_v41 = vld [vmem:[#allocation3_spill] sm:$0xff] }
 0xad3   :  { %12213 = vtanh.f32 %v5550_v43  ;;  %v16679_v43 = vld [vmem:[#allocation6_spill] sm:$0xff]  ;;  %v16684_v15 = vld [vmem:[#allocation11_spill] sm:$0xff] }
 0xad4   :  { %5635 = vmatmul.mubr.f32.vlgmr.msra.gmra.mrb[38].mxu0 %v5389_v20  ;;  %5706 = vmatmul.mubr.f32.vlgmr.msra.gmra.mrb[38].mxu1 %v5389_v20  ;;  %v5390_v63 = vmul.f32 %v14409_v3, %v5389_v20  ;;  %12215 = vtanh.f32 %v5552_v53  ;;  %v5551_v3 = vadd.f32 %v5544_v28, %v707_v26  ;;  %v16680_v53 = vld [vmem:[#allocation7_spill] sm:$0xff]  ;;  %v16681_v20 = vld [vmem:[#allocation8_spill] sm:$0xff]  ;;  %v16683_v4 = vld [vmem:[#allocation10_spill] sm:$0xff] }
 0xad5   :  { %10709 = vmatpush1.bf16.msra.mxu0 %v16012_v48  ;;  %10741 = vmatpush1.bf16.msra.mxu1 %v16013_v30  ;;  %v16685_v26 = vld [vmem:[#allocation12_spill] sm:$0xff] }
 0xad6   :  { %5391 = vadd.xlane.f32.xlu1 %v5390_v63  ;;  %10711 = vmatprep.subr.bf16.mxu0 %v16014_v0  ;;  %12217 = vtanh.f32 %v5551_v3  ;;  %v16682_v63 = vld [vmem:[#allocation9_spill] sm:$0xff] }
 0xad7   :  { %10743 = vmatprep.subr.bf16.mxu1 %v16015_v36  ;;  %5776 = vmatprep.mubr.f32.mxu0 %v15908_v57  ;;  %v16686_v3 = vld [vmem:[#allocation13_spill] sm:$0xff] }
 0xad8   :  { %5847 = vmatprep.mubr.f32.mxu1 %v15908_v57 }
 0xad9   :  { %10713 = vmatpush1.bf16.msra.mxu0 %v16016_v62  ;;  %10745 = vmatpush1.bf16.msra.mxu1 %v16017_v8 }
 0xada   :  { %10715 = vmatprep.subr.bf16.mxu0 %v16018_v14  ;;  %10747 = vmatprep.subr.bf16.mxu1 %v16019_v51 }
 0xadc   :  { %v12212_v13 = vpop.eup %12211 }
 0xadd   :  { %v5557_v58 = vmul.f32 0.5, %v12212_v13  ;;  %10717 = vmatpush1.bf16.msra.mxu0 %v16020_v38  ;;  %10749 = vmatpush1.bf16.msra.mxu1 %v16095_v22  ;;  %v12214_v52 = vpop.eup %12213  ;;  %v16687_v13 = vld [vmem:[#allocation14_spill] sm:$0xff] }
 0xade   :  { %10719 = vmatprep.subr.bf16.mxu0 %v16096_v40  ;;  %10751 = vmatprep.subr.bf16.mxu1 %v16023_v12  ;;  %v5558_v35 = vmul.f32 0.5, %v12214_v52  ;;  %v12216_v42 = vpop.eup %12215  ;;  %v16689_v52 = vld [vmem:[#allocation16_spill] sm:$0xff] }
 0xadf   :  { %v5561_v19 = vadd.f32 0.5, %v5557_v58  ;;  %v16688_v58 = vld [vmem:[#allocation15_spill] sm:$0xff] }
 0xae0   :  { %v5562_v16 = vadd.f32 0.5, %v5558_v35  ;;  %v12218_v9 = vpop.eup %12217  ;;  %v16691_v35 = vld [vmem:[#allocation18_spill] sm:$0xff] }
 0xae1   :  { %v5566_v55 = vmul.f32 %v12216_v42, %v5561_v19  ;;  %10721 = vmatpush1.bf16.msra.mxu0 %v16024_v10  ;;  %10753 = vmatpush1.bf16.msra.mxu1 %v16025_v61  ;;  %v16690_v19 = vld [vmem:[#allocation17_spill] sm:$0xff]  ;;  %v16692_v42 = vld [vmem:[#allocation19_spill] sm:$0xff] }
 0xae2   :  { %10723 = vmatprep.subr.bf16.mxu0 %v16097_v44  ;;  %10755 = vmatprep.subr.bf16.mxu1 %v16098_v54  ;;  %v5565_v28 = vmul.f32 %v5562_v16, %v14563_v50  ;;  %v5559_v50 = vmul.f32 0.5, %v12218_v9  ;;  %v16693_v16 = vld [vmem:[#allocation20_spill] sm:$0xff]  ;;  %v16696_v9 = vld [vmem:[#allocation23_spill] sm:$0xff] }
 0xae4   :  { %v14694_v59 = vadd.f32 %v5566_v55, %v5565_v28  ;;  %v5563_v11 = vadd.f32 0.5, %v5559_v50  ;;  %v16694_v55 = vld [vmem:[#allocation21_spill] sm:$0xff]  ;;  %v16695_v28 = vld [vmem:[#allocation22_spill] sm:$0xff]  ;;  %v16697_v50 = vld [vmem:[#allocation24_spill] sm:$0xff] }
 0xae5   :  { %10725 = vmatpush1.bf16.msra.mxu0 %v16100_v31  ;;  %10757 = vmatpush1.bf16.msra.mxu1 %v16101_v2 }
 0xae6   :  { %10727 = vmatprep.subr.bf16.mxu0 %v16102_v1  ;;  %10759 = vmatprep.subr.bf16.mxu1 %v16103_v32  ;;  %12219 = vtanh.f32 %v14694_v59 }
 0xae9   :  { %10729 = vmatpush1.bf16.msra.mxu0 %v16104_v25  ;;  %10761 = vmatpush1.bf16.msra.mxu1 %v16105_v5 }
 0xaea   :  { %10731 = vmatprep.subr.bf16.mxu0 %v16106_v39  ;;  %10763 = vmatprep.subr.bf16.mxu1 %v16036_v7 }
 0xaed   :  { %10733 = vmatpush1.bf16.msra.mxu0 %v16037_v6  ;;  %10765 = vmatpush1.bf16.msra.mxu1 %v16038_v27 }
 0xaee   :  { %10735 = vmatprep.subr.bf16.mxu0 %v16039_v45  ;;  %10767 = vmatprep.subr.bf16.mxu1 %v16040_v18 }
 0xaf0   :  { %v12220_v17 = vpop.eup %12219 }
 0xaf1   :  { %10737 = vmatpush1.bf16.msra.mxu0 %v16674_v33  ;;  %10769 = vmatpush1.bf16.msra.mxu1 %v16675_v37  ;;  %v5569_v29 = vmul.f32 %v12220_v17, %v5563_v11  ;;  %v16698_v11 = vld [vmem:[#allocation25_spill] sm:$0xff]  ;;  %v16699_v17 = vld [vmem:[#allocation26_spill] sm:$0xff] }
 0xaf2   :  { %10771 = vmatprep.subr.bf16.mxu0 %v16676_v41  ;;  %10803 = vmatprep.subr.bf16.mxu1 %v16677_v49 }
 0xaf4   :  { %5777 = vmatmul.mubr.f32.vlgmr.msra.gmra.mrb[38].mxu0 %v5569_v29  ;;  %5848 = vmatmul.mubr.f32.vlgmr.msra.gmra.mrb[38].mxu1 %v5569_v29 }
 0xaf5   :  { %10773 = vmatpush1.bf16.msra.mxu0 %v16678_v34  ;;  %10805 = vmatpush1.bf16.msra.mxu1 %v16679_v43 }
 0xaf6   :  { %10775 = vmatprep.subr.bf16.mxu0 %v16680_v53  ;;  %10807 = vmatprep.subr.bf16.mxu1 %v16681_v20  ;;  %v16746_v20 = vld [vmem:[#allocation100_spill] sm:$0xff] }
 0xaf7   :  { %5956 = vmatprep.mubr.f32.mxu0 %v15908_v57  ;;  %6027 = vmatprep.mubr.f32.mxu1 %v15908_v57 }
 0xaf9   :  { %10777 = vmatpush1.bf16.msra.mxu0 %v16682_v63  ;;  %10809 = vmatpush1.bf16.msra.mxu1 %v16683_v4  ;;  %v106_v63 = vpop.permute.xlu0 %105 }
 0xafa   :  { %10779 = vmatprep.subr.bf16.mxu0 %v16684_v15  ;;  %10811 = vmatprep.subr.bf16.mxu1 %v16685_v26  ;;  %v194_v53 = vmul.f32 %v16746_v20, %v106_v63 }
 0xafd   :  { %10781 = vmatpush1.bf16.msra.mxu0 %v16686_v3  ;;  %10813 = vmatpush1.bf16.msra.mxu1 %v16687_v13  ;;  %v16743_v13 = vld [vmem:[#allocation113_spill] sm:$0xff] }
 0xafe   :  { %10783 = vmatprep.subr.bf16.mxu0 %v16688_v58  ;;  %10815 = vmatprep.subr.bf16.mxu1 %v16689_v52  ;;  %v16700_v52 = vld [vmem:[#allocation27_spill] sm:$0xff] }
 0xb01   :  { %10785 = vmatpush1.bf16.msra.mxu0 %v16690_v19  ;;  %10817 = vmatpush1.bf16.msra.mxu1 %v16691_v35  ;;  %v16701_v19 = vld [vmem:[#allocation28_spill] sm:$0xff]  ;;  %v16702_v35 = vld [vmem:[#allocation29_spill] sm:$0xff] }
 0xb02   :  { %10787 = vmatprep.subr.bf16.mxu0 %v16692_v42  ;;  %10819 = vmatprep.subr.bf16.mxu1 %v16693_v16  ;;  %v16703_v42 = vld [vmem:[#allocation30_spill] sm:$0xff]  ;;  %v16704_v16 = vld [vmem:[#allocation31_spill] sm:$0xff] }
 0xb05   :  { %10789 = vmatpush1.bf16.msra.mxu0 %v16694_v55  ;;  %10821 = vmatpush1.bf16.msra.mxu1 %v16695_v28  ;;  %v16705_v55 = vld [vmem:[#allocation32_spill] sm:$0xff]  ;;  %v16706_v28 = vld [vmem:[#allocation33_spill] sm:$0xff] }
 0xb06   :  { %10791 = vmatprep.subr.bf16.mxu0 %v16696_v9  ;;  %10823 = vmatprep.subr.bf16.mxu1 %v16697_v50  ;;  %v16707_v9 = vld [vmem:[#allocation34_spill] sm:$0xff]  ;;  %v16708_v50 = vld [vmem:[#allocation35_spill] sm:$0xff] }
 0xb09   :  { %10793 = vmatpush1.bf16.msra.mxu0 %v16698_v11  ;;  %10825 = vmatpush1.bf16.msra.mxu1 %v16699_v17  ;;  %v16709_v11 = vld [vmem:[#allocation36_spill] sm:$0xff]  ;;  %v16742_v17 = vld [vmem:[#allocation99_spill] sm:$0xff] }
 0xb0a   :  { %10795 = vmatprep.subr.bf16.mxu0 %v16700_v52  ;;  %10827 = vmatprep.subr.bf16.mxu1 %v16701_v19  ;;  %v16710_v52 = vld [vmem:[#allocation37_spill] sm:$0xff]  ;;  %v16711_v19 = vld [vmem:[#allocation38_spill] sm:$0xff] }
 0xb0d   :  { %10797 = vmatpush1.bf16.msra.mxu0 %v16702_v35  ;;  %10829 = vmatpush1.bf16.msra.mxu1 %v16703_v42  ;;  %v16712_v35 = vld [vmem:[#allocation39_spill] sm:$0xff]  ;;  %v16713_v42 = vld [vmem:[#allocation40_spill] sm:$0xff] }
 0xb0e   :  { %10799 = vmatprep.subr.bf16.mxu0 %v16704_v16  ;;  %10831 = vmatprep.subr.bf16.mxu1 %v16705_v55  ;;  %v16723_v55 = vld [vmem:[#allocation50_spill] sm:$0xff]  ;;  %v16724_v16 = vld [vmem:[#allocation51_spill] sm:$0xff] }
 0xb11   :  { %10801 = vmatpush1.bf16.msra.mxu0 %v16706_v28  ;;  %10833 = vmatpush1.bf16.msra.mxu1 %v16707_v9  ;;  %v16714_v28 = vld [vmem:[#allocation41_spill] sm:$0xff]  ;;  %v16715_v9 = vld [vmem:[#allocation42_spill] sm:$0xff] }
 0xb12   :  { %10835 = vmatprep.subr.bf16.mxu0 %v16708_v50  ;;  %10867 = vmatprep.subr.bf16.mxu1 %v16709_v11  ;;  %v16716_v50 = vld [vmem:[#allocation43_spill] sm:$0xff]  ;;  %v16717_v11 = vld [vmem:[#allocation44_spill] sm:$0xff] }
 0xb14   :  { %5957 = vmatmul.mubr.f32.vlgmr.msra.gmra.mrb[40].mxu0 %v5569_v29  ;;  %6028 = vmatmul.mubr.f32.vlgmr.msra.gmra.mrb[40].mxu1 %v5569_v29  ;;  %v16718_v29 = vld [vmem:[#allocation45_spill] sm:$0xff] }
 0xb15   :  { %10837 = vmatpush1.bf16.msra.mxu0 %v16710_v52  ;;  %10869 = vmatpush1.bf16.msra.mxu1 %v16711_v19  ;;  %v16719_v52 = vld [vmem:[#allocation46_spill] sm:$0xff]  ;;  %v16720_v19 = vld [vmem:[#allocation47_spill] sm:$0xff] }
 0xb16   :  { %10839 = vmatprep.subr.bf16.mxu0 %v16712_v35  ;;  %10871 = vmatprep.subr.bf16.mxu1 %v16713_v42  ;;  %v16721_v35 = vld [vmem:[#allocation48_spill] sm:$0xff]  ;;  %v16722_v42 = vld [vmem:[#allocation49_spill] sm:$0xff] }
 0xb17   :  { %6119 = vmatprep.mubr.f32.mxu0 %v15908_v57  ;;  %6190 = vmatprep.mubr.f32.mxu1 %v15908_v57 }
 0xb19   :  { %10841 = vmatpush1.bf16.msra.mxu0 %v16714_v28  ;;  %10873 = vmatpush1.bf16.msra.mxu1 %v16715_v9  ;;  %v16725_v28 = vld [vmem:[#allocation52_spill] sm:$0xff]  ;;  %v16726_v9 = vld [vmem:[#allocation53_spill] sm:$0xff] }
 0xb1a   :  { %10843 = vmatprep.subr.bf16.mxu0 %v16716_v50  ;;  %10875 = vmatprep.subr.bf16.mxu1 %v16717_v11  ;;  %v16727_v50 = vld [vmem:[#allocation54_spill] sm:$0xff]  ;;  %v16728_v11 = vld [vmem:[#allocation55_spill] sm:$0xff] }
 0xb1d   :  { %10845 = vmatpush1.bf16.msra.mxu0 %v16718_v29  ;;  %10877 = vmatpush1.bf16.msra.mxu1 %v16719_v52  ;;  %v16729_v29 = vld [vmem:[#allocation56_spill] sm:$0xff]  ;;  %v16730_v52 = vld [vmem:[#allocation57_spill] sm:$0xff] }
 0xb1e   :  { %10847 = vmatprep.subr.bf16.mxu0 %v16720_v19  ;;  %10879 = vmatprep.subr.bf16.mxu1 %v16721_v35  ;;  %v16731_v19 = vld [vmem:[#allocation58_spill] sm:$0xff]  ;;  %v16732_v35 = vld [vmem:[#allocation59_spill] sm:$0xff] }
 0xb21   :  { %10849 = vmatpush1.bf16.msra.mxu0 %v16722_v42  ;;  %10881 = vmatpush1.bf16.msra.mxu1 %v16723_v55  ;;  %v16733_v42 = vld [vmem:[#allocation60_spill] sm:$0xff]  ;;  %v16734_v55 = vld [vmem:[#allocation61_spill] sm:$0xff] }
 0xb22   :  { %10851 = vmatprep.subr.bf16.mxu0 %v16724_v16  ;;  %10883 = vmatprep.subr.bf16.mxu1 %v16725_v28  ;;  %v16735_v16 = vld [vmem:[#allocation62_spill] sm:$0xff]  ;;  %v16736_v28 = vld [vmem:[#allocation63_spill] sm:$0xff] }
 0xb25   :  { %10853 = vmatpush1.bf16.msra.mxu0 %v16726_v9  ;;  %10885 = vmatpush1.bf16.msra.mxu1 %v16727_v50  ;;  %v16737_v9 = vld [vmem:[#allocation64_spill] sm:$0xff]  ;;  %v16738_v50 = vld [vmem:[#allocation65_spill] sm:$0xff] }
 0xb26   :  { %10855 = vmatprep.subr.bf16.mxu0 %v16728_v11  ;;  %10887 = vmatprep.subr.bf16.mxu1 %v16729_v29  ;;  %v16739_v11 = vld [vmem:[#allocation66_spill] sm:$0xff]  ;;  %v16740_v29 = vld [vmem:[#allocation67_spill] sm:$0xff] }
 0xb29   :  { %10857 = vmatpush1.bf16.msra.mxu0 %v16730_v52  ;;  %10889 = vmatpush1.bf16.msra.mxu1 %v16731_v19  ;;  %v16741_v52 = vld [vmem:[#allocation68_spill] sm:$0xff] }
 0xb2a   :  { %10859 = vmatprep.subr.bf16.mxu0 %v16732_v35  ;;  %10891 = vmatprep.subr.bf16.mxu1 %v16733_v42 }
 0xb2d   :  { %10861 = vmatpush1.bf16.msra.mxu0 %v16734_v55  ;;  %10893 = vmatpush1.bf16.msra.mxu1 %v16735_v16 }
 0xb2e   :  { %10863 = vmatprep.subr.bf16.mxu0 %v16736_v28  ;;  %10895 = vmatprep.subr.bf16.mxu1 %v16737_v9  ;;  %v16744_v28 = vld [vmem:[#allocation114_spill] sm:$0xff] }
 0xb31   :  { %10865 = vmatpush1.bf16.msra.mxu0 %v16738_v50  ;;  %10897 = vmatpush1.bf16.msra.mxu1 %v16739_v11  ;;  %v16745_v50 = vld [vmem:[#allocation115_spill] sm:$0xff] }
 0xb32   :  { %10899 = vmatprep.subr.bf16.mxu0 %v16740_v29  ;;  %10931 = vmatprep.subr.bf16.mxu1 %v16741_v52 }
 0xbc7   :  { %v5778_v19 = vpop.f32.mrb[38].mxu0  ;;  %v5849_v35 = vpop.f32.mrb[38].mxu1 }
 0xbc8   :  { %v5854_v42 = vadd.f32 %v5778_v19, %v16742_v17  ;;  %v5780_v58 = vpop.f32.mrb[39].mxu0  ;;  %v5851_v55 = vpop.f32.mrb[39].mxu1  ;;  %v5856_v9 = vadd.f32 %v5849_v35, %v16745_v50 }
 0xbc9   :  { %v5855_v16 = vadd.f32 %v5780_v58, %v16743_v13  ;;  %v5857_v3 = vadd.f32 %v5851_v55, %v16744_v28  ;;  %v16747_v58 = vld [vmem:[#allocation101_spill] sm:$0xff]  ;;  %v347_v13 = vpop.permute.xlu1 %346  ;;  %v16748_v55 = vld [vmem:[#allocation74_spill] sm:$0xff] }
 0xbca   :  { %12221 = vtanh.f32 %v5854_v42  ;;  %v195_v42 = vmul.f32 %v16747_v58, %v106_v63  ;;  %v16756_v58 = vld [vmem:[#allocation108_spill] sm:$0xff] }
 0xbcb   :  { %12223 = vtanh.f32 %v5855_v16 }
 0xbcc   :  { %12225 = vtanh.f32 %v5857_v3  ;;  %v16749_v3 = vld [vmem:[#allocation102_spill] sm:$0xff] }
 0xbcd   :  { %12227 = vtanh.f32 %v5856_v9  ;;  %v197_v28 = vmul.f32 %v16749_v3, %v106_v63 }
 0xbcf   :  { %v282_v34 = vadd.f32 %v16756_v58, %v197_v28 }
 0xbd4   :  { %v12222_v11 = vpop.eup %12221 }
 0xbd5   :  { %v5862_v26 = vmul.f32 0.5, %v12222_v11  ;;  %v12224_v29 = vpop.eup %12223  ;;  %v16751_v11 = vld [vmem:[#allocation103_spill] sm:$0xff] }
 0xbd6   :  { %v5863_v52 = vmul.f32 0.5, %v12224_v29  ;;  %v12226_v4 = vpop.eup %12225  ;;  %v430_v50 = vmul.f32 %v16751_v11, %v347_v13  ;;  %v16753_v29 = vld [vmem:[#allocation105_spill] sm:$0xff] }
 0xbd7   :  { %v5866_v15 = vadd.f32 0.5, %v5862_v26  ;;  %v16752_v26 = vld [vmem:[#allocation104_spill] sm:$0xff]  ;;  %v431_v43 = vmul.f32 %v16753_v29, %v347_v13  ;;  %v12228_v49 = vpop.eup %12227 }
 0xbd8   :  { %v5867_v19 = vadd.f32 0.5, %v5863_v52  ;;  %v279_v9 = vadd.f32 %v16752_v26, %v194_v53  ;;  %v16755_v52 = vld [vmem:[#allocation107_spill] sm:$0xff]  ;;  %v5864_v3 = vmul.f32 0.5, %v12228_v49  ;;  %v196_v26 = vmul.f32 %v16011_v56, %v106_v63 }
 0xbd9   :  { %v5871_v17 = vmul.f32 %v12226_v4, %v5866_v15  ;;  %v16754_v4 = vld [vmem:[#allocation106_spill] sm:$0xff]  ;;  %v433_v20 = vmul.f32 %v16755_v52, %v347_v13  ;;  %v14807_v63 = vld [vmem:[%s15571_s7] ss:$0 sm:$0xff] }
 0xbda   :  { %v5870_v16 = vmul.f32 %v5867_v19, %v16748_v55  ;;  %v280_v15 = vadd.f32 %v16754_v4, %v195_v42  ;;  %v562_v19 = vpop.permute.xlu1 %561  ;;  %v494_v55 = vadd.f32 %v430_v50, %v279_v9  ;;  %v5868_v41 = vadd.f32 0.5, %v5864_v3 }
 0xbdb   :  { %v646_v11 = vmul.f32 %v16672_v23, %v562_v19  ;;  %v497_v53 = vadd.f32 %v433_v20, %v282_v34  ;;  %v648_v29 = vmul.f32 %v16673_v24, %v562_v19 }
 0xbdc   :  { %v14789_v35 = vadd.f32 %v5871_v17, %v5870_v16  ;;  %v645_v17 = vmul.f32 %v16671_v46, %v562_v19  ;;  %v495_v16 = vadd.f32 %v431_v43, %v280_v15  ;;  %v432_v43 = vmul.f32 %v13447_v60, %v347_v13 }
 0xbdd   :  { %v712_v37 = vadd.f32 %v648_v29, %v497_v53  ;;  %v281_v15 = vadd.f32 %v13450_v21, %v196_v26 }
 0xbde   :  { %16750 = vst [vmem:[#allocation75_spill] sm:$0xff] %v14789_v35  ;;  %12229 = vtanh.f32 %v14789_v35  ;;  %v709_v35 = vadd.f32 %v645_v17, %v494_v55  ;;  %v710_v52 = vadd.f32 %v646_v11, %v495_v16  ;;  %v647_v11 = vmul.f32 %v13457_v47, %v562_v19 }
 0xbe7   :  { %v5958_v42 = vpop.f32.mrb[40].mxu0  ;;  %v6029_v4 = vpop.f32.mrb[40].mxu1 }
 0xbe8   :  { %v6034_v28 = vadd.f32 %v5958_v42, %v709_v35  ;;  %v5960_v58 = vpop.f32.mrb[41].mxu0  ;;  %v6031_v50 = vpop.f32.mrb[41].mxu1  ;;  %v496_v35 = vadd.f32 %v432_v43, %v281_v15  ;;  %v16759_v43 = vld [vmem:[#allocation4_spill] sm:$0xff] }
 0xbe9   :  { %v12230_v9 = vpop.eup %12229  ;;  %v6035_v49 = vadd.f32 %v5960_v58, %v710_v52  ;;  %v6037_v34 = vadd.f32 %v6031_v50, %v712_v37  ;;  %v16757_v50 = vld [vmem:[#allocation98_spill] sm:$0xff] }
 0xbea   :  { %12231 = vtanh.f32 %v6034_v28  ;;  %v5874_v20 = vmul.f32 %v12230_v9, %v5868_v41  ;;  %v711_v37 = vadd.f32 %v647_v11, %v496_v35  ;;  %v16758_v9 = vld [vmem:[#allocation3_spill] sm:$0xff]  ;;  %v16764_v35 = vld [vmem:[#allocation9_spill] sm:$0xff]  ;;  %v16765_v11 = vld [vmem:[#allocation10_spill] sm:$0xff] }
 0xbeb   :  { %12233 = vtanh.f32 %v6035_v49  ;;  %v16760_v49 = vld [vmem:[#allocation5_spill] sm:$0xff] }
 0xbec   :  { %6120 = vmatmul.mubr.f32.vlgmr.msra.gmra.mrb[42].mxu0 %v5874_v20  ;;  %6191 = vmatmul.mubr.f32.vlgmr.msra.gmra.mrb[42].mxu1 %v5874_v20  ;;  %v5875_v3 = vmul.f32 %v14807_v63, %v5874_v20  ;;  %12235 = vtanh.f32 %v6037_v34  ;;  %v6036_v41 = vadd.f32 %v6029_v4, %v711_v37  ;;  %v16761_v34 = vld [vmem:[#allocation6_spill] sm:$0xff]  ;;  %v16762_v20 = vld [vmem:[#allocation7_spill] sm:$0xff] }
 0xbed   :  { %10901 = vmatpush1.bf16.msra.mxu0 %v16012_v48  ;;  %10933 = vmatpush1.bf16.msra.mxu1 %v16013_v30  ;;  %v16766_v37 = vld [vmem:[#allocation11_spill] sm:$0xff] }
 0xbee   :  { %5876 = vadd.xlane.f32.xlu0 %v5875_v3  ;;  %10903 = vmatprep.subr.bf16.mxu0 %v16014_v0  ;;  %12237 = vtanh.f32 %v6036_v41  ;;  %v16763_v3 = vld [vmem:[#allocation8_spill] sm:$0xff] }
 0xbef   :  { %10935 = vmatprep.subr.bf16.mxu1 %v16015_v36  ;;  %6261 = vmatprep.mubr.f32.mxu0 %v15908_v57  ;;  %v16767_v41 = vld [vmem:[#allocation12_spill] sm:$0xff] }
 0xbf0   :  { %6332 = vmatprep.mubr.f32.mxu1 %v15908_v57 }
 0xbf1   :  { %10905 = vmatpush1.bf16.msra.mxu0 %v16016_v62  ;;  %10937 = vmatpush1.bf16.msra.mxu1 %v16017_v8 }
 0xbf2   :  { %10907 = vmatprep.subr.bf16.mxu0 %v16018_v14  ;;  %10939 = vmatprep.subr.bf16.mxu1 %v16019_v51 }
 0xbf4   :  { %v12232_v13 = vpop.eup %12231 }
 0xbf5   :  { %v6042_v58 = vmul.f32 0.5, %v12232_v13  ;;  %10909 = vmatpush1.bf16.msra.mxu0 %v16020_v38  ;;  %10941 = vmatpush1.bf16.msra.mxu1 %v16095_v22  ;;  %v12234_v26 = vpop.eup %12233  ;;  %v16768_v13 = vld [vmem:[#allocation13_spill] sm:$0xff] }
 0xbf6   :  { %10911 = vmatprep.subr.bf16.mxu0 %v16096_v40  ;;  %10943 = vmatprep.subr.bf16.mxu1 %v16023_v12  ;;  %v6043_v52 = vmul.f32 0.5, %v12234_v26  ;;  %v12236_v19 = vpop.eup %12235  ;;  %v16770_v26 = vld [vmem:[#allocation15_spill] sm:$0xff] }
 0xbf7   :  { %v6046_v29 = vadd.f32 0.5, %v6042_v58  ;;  %v16769_v58 = vld [vmem:[#allocation14_spill] sm:$0xff] }
 0xbf8   :  { %v6047_v55 = vadd.f32 0.5, %v6043_v52  ;;  %v12238_v53 = vpop.eup %12237  ;;  %v16772_v52 = vld [vmem:[#allocation17_spill] sm:$0xff] }
 0xbf9   :  { %v6051_v17 = vmul.f32 %v12236_v19, %v6046_v29  ;;  %10913 = vmatpush1.bf16.msra.mxu0 %v16024_v10  ;;  %10945 = vmatpush1.bf16.msra.mxu1 %v16025_v61  ;;  %v16771_v29 = vld [vmem:[#allocation16_spill] sm:$0xff]  ;;  %v16773_v19 = vld [vmem:[#allocation18_spill] sm:$0xff] }
 0xbfa   :  { %10915 = vmatprep.subr.bf16.mxu0 %v16097_v44  ;;  %10947 = vmatprep.subr.bf16.mxu1 %v16098_v54  ;;  %v6050_v4 = vmul.f32 %v6047_v55, %v14694_v59  ;;  %v6044_v59 = vmul.f32 0.5, %v12238_v53  ;;  %v16774_v55 = vld [vmem:[#allocation19_spill] sm:$0xff]  ;;  %v16777_v53 = vld [vmem:[#allocation22_spill] sm:$0xff] }
 0xbfc   :  { %v14830_v16 = vadd.f32 %v6051_v17, %v6050_v4  ;;  %v6048_v42 = vadd.f32 0.5, %v6044_v59  ;;  %v16775_v17 = vld [vmem:[#allocation20_spill] sm:$0xff]  ;;  %v16776_v4 = vld [vmem:[#allocation21_spill] sm:$0xff]  ;;  %v16778_v59 = vld [vmem:[#allocation23_spill] sm:$0xff] }
 0xbfd   :  { %10917 = vmatpush1.bf16.msra.mxu0 %v16100_v31  ;;  %10949 = vmatpush1.bf16.msra.mxu1 %v16101_v2 }
 0xbfe   :  { %10919 = vmatprep.subr.bf16.mxu0 %v16102_v1  ;;  %10951 = vmatprep.subr.bf16.mxu1 %v16103_v32  ;;  %12239 = vtanh.f32 %v14830_v16 }
 0xc01   :  { %10921 = vmatpush1.bf16.msra.mxu0 %v16104_v25  ;;  %10953 = vmatpush1.bf16.msra.mxu1 %v16105_v5 }
 0xc02   :  { %10923 = vmatprep.subr.bf16.mxu0 %v16106_v39  ;;  %10955 = vmatprep.subr.bf16.mxu1 %v16036_v7 }
 0xc05   :  { %10925 = vmatpush1.bf16.msra.mxu0 %v16037_v6  ;;  %10957 = vmatpush1.bf16.msra.mxu1 %v16038_v27 }
 0xc06   :  { %10927 = vmatprep.subr.bf16.mxu0 %v16039_v45  ;;  %10959 = vmatprep.subr.bf16.mxu1 %v16040_v18 }
 0xc08   :  { %v12240_v28 = vpop.eup %12239 }
 0xc09   :  { %10929 = vmatpush1.bf16.msra.mxu0 %v16674_v33  ;;  %10961 = vmatpush1.bf16.msra.mxu1 %v16757_v50  ;;  %v6054_v15 = vmul.f32 %v12240_v28, %v6048_v42  ;;  %v16779_v42 = vld [vmem:[#allocation24_spill] sm:$0xff]  ;;  %v16780_v28 = vld [vmem:[#allocation25_spill] sm:$0xff] }
 0xc0a   :  { %10963 = vmatprep.subr.bf16.mxu0 %v16758_v9  ;;  %10995 = vmatprep.subr.bf16.mxu1 %v16759_v43 }
 0xc0c   :  { %6262 = vmatmul.mubr.f32.vlgmr.msra.gmra.mrb[42].mxu0 %v6054_v15  ;;  %6333 = vmatmul.mubr.f32.vlgmr.msra.gmra.mrb[42].mxu1 %v6054_v15 }
 0xc0d   :  { %10965 = vmatpush1.bf16.msra.mxu0 %v16760_v49  ;;  %10997 = vmatpush1.bf16.msra.mxu1 %v16761_v34 }
 0xc0e   :  { %10967 = vmatprep.subr.bf16.mxu0 %v16762_v20  ;;  %10999 = vmatprep.subr.bf16.mxu1 %v16763_v3  ;;  %v111_v3 = vpop.permute.xlu0 %110  ;;  %v16828_v20 = vld [vmem:[#allocation100_spill] sm:$0xff] }
 0xc0f   :  { %6441 = vmatprep.mubr.f32.mxu0 %v15908_v57  ;;  %6512 = vmatprep.mubr.f32.mxu1 %v15908_v57  ;;  %v198_v34 = vmul.f32 %v16828_v20, %v111_v3 }
 0xc11   :  { %10969 = vmatpush1.bf16.msra.mxu0 %v16764_v35  ;;  %11001 = vmatpush1.bf16.msra.mxu1 %v16765_v11 }
 0xc12   :  { %10971 = vmatprep.subr.bf16.mxu0 %v16766_v37  ;;  %11003 = vmatprep.subr.bf16.mxu1 %v16767_v41 }
 0xc15   :  { %10973 = vmatpush1.bf16.msra.mxu0 %v16768_v13  ;;  %11005 = vmatpush1.bf16.msra.mxu1 %v16769_v58  ;;  %v16825_v13 = vld [vmem:[#allocation113_spill] sm:$0xff] }
 0xc16   :  { %10975 = vmatprep.subr.bf16.mxu0 %v16770_v26  ;;  %11007 = vmatprep.subr.bf16.mxu1 %v16771_v29  ;;  %v16781_v26 = vld [vmem:[#allocation26_spill] sm:$0xff]  ;;  %v16782_v29 = vld [vmem:[#allocation27_spill] sm:$0xff] }
 0xc19   :  { %10977 = vmatpush1.bf16.msra.mxu0 %v16772_v52  ;;  %11009 = vmatpush1.bf16.msra.mxu1 %v16773_v19  ;;  %v16783_v52 = vld [vmem:[#allocation28_spill] sm:$0xff]  ;;  %v16784_v19 = vld [vmem:[#allocation29_spill] sm:$0xff] }
 0xc1a   :  { %10979 = vmatprep.subr.bf16.mxu0 %v16774_v55  ;;  %11011 = vmatprep.subr.bf16.mxu1 %v16775_v17  ;;  %v16785_v55 = vld [vmem:[#allocation30_spill] sm:$0xff]  ;;  %v16786_v17 = vld [vmem:[#allocation31_spill] sm:$0xff] }
 0xc1d   :  { %10981 = vmatpush1.bf16.msra.mxu0 %v16776_v4  ;;  %11013 = vmatpush1.bf16.msra.mxu1 %v16777_v53  ;;  %v16787_v4 = vld [vmem:[#allocation32_spill] sm:$0xff]  ;;  %v16788_v53 = vld [vmem:[#allocation33_spill] sm:$0xff] }
 0xc1e   :  { %10983 = vmatprep.subr.bf16.mxu0 %v16778_v59  ;;  %11015 = vmatprep.subr.bf16.mxu1 %v16779_v42  ;;  %v16789_v59 = vld [vmem:[#allocation34_spill] sm:$0xff]  ;;  %v16790_v42 = vld [vmem:[#allocation35_spill] sm:$0xff] }
 0xc21   :  { %10985 = vmatpush1.bf16.msra.mxu0 %v16780_v28  ;;  %11017 = vmatpush1.bf16.msra.mxu1 %v16781_v26  ;;  %v16791_v28 = vld [vmem:[#allocation36_spill] sm:$0xff]  ;;  %v16824_v26 = vld [vmem:[#allocation99_spill] sm:$0xff] }
 0xc22   :  { %10987 = vmatprep.subr.bf16.mxu0 %v16782_v29  ;;  %11019 = vmatprep.subr.bf16.mxu1 %v16783_v52  ;;  %v16792_v29 = vld [vmem:[#allocation37_spill] sm:$0xff]  ;;  %v16793_v52 = vld [vmem:[#allocation38_spill] sm:$0xff] }
 0xc25   :  { %10989 = vmatpush1.bf16.msra.mxu0 %v16784_v19  ;;  %11021 = vmatpush1.bf16.msra.mxu1 %v16785_v55  ;;  %v16794_v19 = vld [vmem:[#allocation39_spill] sm:$0xff]  ;;  %v16795_v55 = vld [vmem:[#allocation40_spill] sm:$0xff] }
 0xc26   :  { %10991 = vmatprep.subr.bf16.mxu0 %v16786_v17  ;;  %11023 = vmatprep.subr.bf16.mxu1 %v16787_v4  ;;  %v16805_v4 = vld [vmem:[#allocation50_spill] sm:$0xff]  ;;  %v16806_v17 = vld [vmem:[#allocation51_spill] sm:$0xff] }
 0xc29   :  { %10993 = vmatpush1.bf16.msra.mxu0 %v16788_v53  ;;  %11025 = vmatpush1.bf16.msra.mxu1 %v16789_v59  ;;  %v16796_v53 = vld [vmem:[#allocation41_spill] sm:$0xff]  ;;  %v16797_v59 = vld [vmem:[#allocation42_spill] sm:$0xff] }
 0xc2a   :  { %11027 = vmatprep.subr.bf16.mxu0 %v16790_v42  ;;  %11059 = vmatprep.subr.bf16.mxu1 %v16791_v28  ;;  %v16798_v42 = vld [vmem:[#allocation43_spill] sm:$0xff]  ;;  %v16799_v28 = vld [vmem:[#allocation44_spill] sm:$0xff] }
 0xc2c   :  { %6442 = vmatmul.mubr.f32.vlgmr.msra.gmra.mrb[44].mxu0 %v6054_v15  ;;  %6513 = vmatmul.mubr.f32.vlgmr.msra.gmra.mrb[44].mxu1 %v6054_v15  ;;  %v16800_v15 = vld [vmem:[#allocation45_spill] sm:$0xff] }
 0xc2d   :  { %11029 = vmatpush1.bf16.msra.mxu0 %v16792_v29  ;;  %11061 = vmatpush1.bf16.msra.mxu1 %v16793_v52  ;;  %v16801_v29 = vld [vmem:[#allocation46_spill] sm:$0xff]  ;;  %v16802_v52 = vld [vmem:[#allocation47_spill] sm:$0xff] }
 0xc2e   :  { %11031 = vmatprep.subr.bf16.mxu0 %v16794_v19  ;;  %11063 = vmatprep.subr.bf16.mxu1 %v16795_v55  ;;  %v16803_v19 = vld [vmem:[#allocation48_spill] sm:$0xff]  ;;  %v16804_v55 = vld [vmem:[#allocation49_spill] sm:$0xff] }
 0xc2f   :  { %6604 = vmatprep.mubr.f32.mxu0 %v15908_v57  ;;  %6675 = vmatprep.mubr.f32.mxu1 %v15908_v57 }
 0xc31   :  { %11033 = vmatpush1.bf16.msra.mxu0 %v16796_v53  ;;  %11065 = vmatpush1.bf16.msra.mxu1 %v16797_v59  ;;  %v16807_v53 = vld [vmem:[#allocation52_spill] sm:$0xff]  ;;  %v16808_v59 = vld [vmem:[#allocation53_spill] sm:$0xff] }
 0xc32   :  { %11035 = vmatprep.subr.bf16.mxu0 %v16798_v42  ;;  %11067 = vmatprep.subr.bf16.mxu1 %v16799_v28  ;;  %v16809_v42 = vld [vmem:[#allocation54_spill] sm:$0xff]  ;;  %v16810_v28 = vld [vmem:[#allocation55_spill] sm:$0xff] }
 0xc35   :  { %11037 = vmatpush1.bf16.msra.mxu0 %v16800_v15  ;;  %11069 = vmatpush1.bf16.msra.mxu1 %v16801_v29  ;;  %v16811_v15 = vld [vmem:[#allocation56_spill] sm:$0xff]  ;;  %v16812_v29 = vld [vmem:[#allocation57_spill] sm:$0xff] }
 0xc36   :  { %11039 = vmatprep.subr.bf16.mxu0 %v16802_v52  ;;  %11071 = vmatprep.subr.bf16.mxu1 %v16803_v19  ;;  %v16813_v52 = vld [vmem:[#allocation58_spill] sm:$0xff]  ;;  %v16814_v19 = vld [vmem:[#allocation59_spill] sm:$0xff] }
 0xc39   :  { %11041 = vmatpush1.bf16.msra.mxu0 %v16804_v55  ;;  %11073 = vmatpush1.bf16.msra.mxu1 %v16805_v4  ;;  %v16815_v55 = vld [vmem:[#allocation60_spill] sm:$0xff]  ;;  %v16816_v4 = vld [vmem:[#allocation61_spill] sm:$0xff] }
 0xc3a   :  { %11043 = vmatprep.subr.bf16.mxu0 %v16806_v17  ;;  %11075 = vmatprep.subr.bf16.mxu1 %v16807_v53  ;;  %v16817_v17 = vld [vmem:[#allocation62_spill] sm:$0xff]  ;;  %v16818_v53 = vld [vmem:[#allocation63_spill] sm:$0xff] }
 0xc3d   :  { %11045 = vmatpush1.bf16.msra.mxu0 %v16808_v59  ;;  %11077 = vmatpush1.bf16.msra.mxu1 %v16809_v42  ;;  %v16819_v59 = vld [vmem:[#allocation64_spill] sm:$0xff]  ;;  %v16820_v42 = vld [vmem:[#allocation65_spill] sm:$0xff] }
 0xc3e   :  { %11047 = vmatprep.subr.bf16.mxu0 %v16810_v28  ;;  %11079 = vmatprep.subr.bf16.mxu1 %v16811_v15  ;;  %v16821_v28 = vld [vmem:[#allocation66_spill] sm:$0xff]  ;;  %v16822_v15 = vld [vmem:[#allocation67_spill] sm:$0xff] }
 0xc41   :  { %11049 = vmatpush1.bf16.msra.mxu0 %v16812_v29  ;;  %11081 = vmatpush1.bf16.msra.mxu1 %v16813_v52  ;;  %v16823_v29 = vld [vmem:[#allocation68_spill] sm:$0xff] }
 0xc42   :  { %11051 = vmatprep.subr.bf16.mxu0 %v16814_v19  ;;  %11083 = vmatprep.subr.bf16.mxu1 %v16815_v55 }
 0xc45   :  { %11053 = vmatpush1.bf16.msra.mxu0 %v16816_v4  ;;  %11085 = vmatpush1.bf16.msra.mxu1 %v16817_v17 }
 0xc46   :  { %11055 = vmatprep.subr.bf16.mxu0 %v16818_v53  ;;  %11087 = vmatprep.subr.bf16.mxu1 %v16819_v59  ;;  %v16826_v53 = vld [vmem:[#allocation114_spill] sm:$0xff] }
 0xc49   :  { %11057 = vmatpush1.bf16.msra.mxu0 %v16820_v42  ;;  %11089 = vmatpush1.bf16.msra.mxu1 %v16821_v28  ;;  %v16827_v42 = vld [vmem:[#allocation115_spill] sm:$0xff] }
 0xc4a   :  { %11091 = vmatprep.subr.bf16.mxu0 %v16822_v15  ;;  %11123 = vmatprep.subr.bf16.mxu1 %v16823_v29 }
 0xcdf   :  { %v6263_v52 = vpop.f32.mrb[42].mxu0  ;;  %v6334_v19 = vpop.f32.mrb[42].mxu1 }
 0xce0   :  { %v6339_v55 = vadd.f32 %v6263_v52, %v16824_v26  ;;  %v6265_v58 = vpop.f32.mrb[43].mxu0  ;;  %v6336_v4 = vpop.f32.mrb[43].mxu1  ;;  %v6341_v59 = vadd.f32 %v6334_v19, %v16827_v42 }
 0xce1   :  { %v6340_v17 = vadd.f32 %v6265_v58, %v16825_v13  ;;  %v6342_v41 = vadd.f32 %v6336_v4, %v16826_v53  ;;  %v16829_v58 = vld [vmem:[#allocation101_spill] sm:$0xff]  ;;  %v16830_v13 = vld [vmem:[#allocation75_spill] sm:$0xff]  ;;  %v351_v53 = vpop.permute.xlu1 %350 }
 0xce2   :  { %12241 = vtanh.f32 %v6339_v55  ;;  %v199_v55 = vmul.f32 %v16829_v58, %v111_v3  ;;  %v16838_v58 = vld [vmem:[#allocation108_spill] sm:$0xff] }
 0xce3   :  { %12243 = vtanh.f32 %v6340_v17  ;;  %v16831_v17 = vld [vmem:[#allocation102_spill] sm:$0xff] }
 0xce4   :  { %12245 = vtanh.f32 %v6342_v41  ;;  %v201_v41 = vmul.f32 %v16831_v17, %v111_v3 }
 0xce5   :  { %12247 = vtanh.f32 %v6341_v59 }
 0xce6   :  { %v286_v43 = vadd.f32 %v16838_v58, %v201_v41 }
 0xcec   :  { %v12242_v28 = vpop.eup %12241 }
 0xced   :  { %v6347_v37 = vmul.f32 0.5, %v12242_v28  ;;  %v12244_v15 = vpop.eup %12243  ;;  %v16833_v28 = vld [vmem:[#allocation103_spill] sm:$0xff] }
 0xcee   :  { %v6348_v29 = vmul.f32 0.5, %v12244_v15  ;;  %v12246_v35 = vpop.eup %12245  ;;  %v434_v42 = vmul.f32 %v16833_v28, %v351_v53  ;;  %v16835_v15 = vld [vmem:[#allocation105_spill] sm:$0xff] }
 0xcef   :  { %v6351_v11 = vadd.f32 0.5, %v6347_v37  ;;  %v16834_v37 = vld [vmem:[#allocation104_spill] sm:$0xff]  ;;  %v435_v49 = vmul.f32 %v16835_v15, %v351_v53 }
 0xcf0   :  { %v6352_v52 = vadd.f32 0.5, %v6348_v29  ;;  %v283_v59 = vadd.f32 %v16834_v37, %v198_v34  ;;  %v16837_v29 = vld [vmem:[#allocation107_spill] sm:$0xff]  ;;  %v200_v37 = vmul.f32 %v16011_v56, %v111_v3 }
 0xcf1   :  { %v6356_v26 = vmul.f32 %v12246_v35, %v6351_v11  ;;  %v16836_v35 = vld [vmem:[#allocation106_spill] sm:$0xff]  ;;  %v437_v20 = vmul.f32 %v16837_v29, %v351_v53 }
 0xcf2   :  { %v6355_v4 = vmul.f32 %v6352_v52, %v16830_v13  ;;  %v284_v11 = vadd.f32 %v16836_v35, %v199_v55  ;;  %v12248_v13 = vpop.eup %12247  ;;  %v566_v52 = vpop.permute.xlu0 %565  ;;  %v498_v17 = vadd.f32 %v434_v42, %v283_v59 }
 0xcf3   :  { %v650_v28 = vmul.f32 %v16672_v23, %v566_v52  ;;  %v6349_v9 = vmul.f32 0.5, %v12248_v13  ;;  %v501_v34 = vadd.f32 %v437_v20, %v286_v43  ;;  %v652_v15 = vmul.f32 %v16673_v24, %v566_v52 }
 0xcf4   :  { %v14925_v19 = vadd.f32 %v6356_v26, %v6355_v4  ;;  %v649_v26 = vmul.f32 %v16671_v46, %v566_v52  ;;  %v499_v4 = vadd.f32 %v435_v49, %v284_v11  ;;  %v436_v49 = vmul.f32 %v13447_v60, %v351_v53 }
 0xcf5   :  { %v6353_v50 = vadd.f32 0.5, %v6349_v9  ;;  %v716_v33 = vadd.f32 %v652_v15, %v501_v34  ;;  %v285_v11 = vadd.f32 %v13450_v21, %v200_v37  ;;  %v651_v9 = vmul.f32 %v13457_v47, %v566_v52 }
 0xcf6   :  { %16832 = vst [vmem:[#allocation76_spill] sm:$0xff] %v14925_v19  ;;  %12249 = vtanh.f32 %v14925_v19  ;;  %v713_v19 = vadd.f32 %v649_v26, %v498_v17  ;;  %v714_v29 = vadd.f32 %v650_v28, %v499_v4 }
 0xcf7   :  { %v500_v17 = vadd.f32 %v436_v49, %v285_v11  ;;  %v16841_v49 = vld [vmem:[#allocation3_spill] sm:$0xff]  ;;  %v16842_v11 = vld [vmem:[#allocation4_spill] sm:$0xff] }
 0xcff   :  { %v6443_v55 = vpop.f32.mrb[44].mxu0  ;;  %v6514_v35 = vpop.f32.mrb[44].mxu1 }
 0xd00   :  { %v6519_v41 = vadd.f32 %v6443_v55, %v713_v19  ;;  %v6445_v58 = vpop.f32.mrb[45].mxu0  ;;  %v6516_v42 = vpop.f32.mrb[45].mxu1 }
 0xd01   :  { %v12250_v59 = vpop.eup %12249  ;;  %v6520_v13 = vadd.f32 %v6445_v58, %v714_v29  ;;  %v6522_v43 = vadd.f32 %v6516_v42, %v716_v33  ;;  %v715_v33 = vadd.f32 %v651_v9, %v500_v17  ;;  %v16840_v42 = vld [vmem:[#allocation98_spill] sm:$0xff]  ;;  %v16847_v17 = vld [vmem:[#allocation9_spill] sm:$0xff] }
 0xd02   :  { %12251 = vtanh.f32 %v6519_v41  ;;  %v6359_v20 = vmul.f32 %v12250_v59, %v6353_v50  ;;  %v16839_v41 = vld [vmem:[#allocation97_spill] sm:$0xff]  ;;  %v16848_v9 = vld [vmem:[#allocation10_spill] sm:$0xff] }
 0xd03   :  { %12253 = vtanh.f32 %v6520_v13  ;;  %v6521_v50 = vadd.f32 %v6514_v35, %v715_v33  ;;  %v16843_v13 = vld [vmem:[#allocation5_spill] sm:$0xff]  ;;  %v16849_v33 = vld [vmem:[#allocation11_spill] sm:$0xff] }
 0xd04   :  { %6605 = vmatmul.mubr.f32.vlgmr.msra.gmra.mrb[46].mxu0 %v6359_v20  ;;  %6676 = vmatmul.mubr.f32.vlgmr.msra.gmra.mrb[46].mxu1 %v6359_v20  ;;  %v6360_v3 = vmul.f32 %v14807_v63, %v6359_v20  ;;  %12255 = vtanh.f32 %v6522_v43  ;;  %v16844_v43 = vld [vmem:[#allocation6_spill] sm:$0xff]  ;;  %v16845_v20 = vld [vmem:[#allocation7_spill] sm:$0xff] }
 0xd05   :  { %11093 = vmatpush1.bf16.msra.mxu0 %v16012_v48  ;;  %11125 = vmatpush1.bf16.msra.mxu1 %v16013_v30  ;;  %12257 = vtanh.f32 %v6521_v50  ;;  %v16850_v50 = vld [vmem:[#allocation12_spill] sm:$0xff] }
 0xd06   :  { %6361 = vadd.xlane.f32.xlu1 %v6360_v3  ;;  %11095 = vmatprep.subr.bf16.mxu0 %v16014_v0  ;;  %v16846_v3 = vld [vmem:[#allocation8_spill] sm:$0xff] }
 0xd07   :  { %11127 = vmatprep.subr.bf16.mxu1 %v16015_v36  ;;  %6746 = vmatprep.mubr.f32.mxu0 %v15908_v57 }
 0xd08   :  { %6817 = vmatprep.mubr.f32.mxu1 %v15908_v57 }
 0xd09   :  { %11097 = vmatpush1.bf16.msra.mxu0 %v16016_v62  ;;  %11129 = vmatpush1.bf16.msra.mxu1 %v16017_v8 }
 0xd0a   :  { %11099 = vmatprep.subr.bf16.mxu0 %v16018_v14  ;;  %11131 = vmatprep.subr.bf16.mxu1 %v16019_v51 }
 0xd0c   :  { %v12252_v53 = vpop.eup %12251 }
 0xd0d   :  { %v6527_v58 = vmul.f32 0.5, %v12252_v53  ;;  %11101 = vmatpush1.bf16.msra.mxu0 %v16020_v38  ;;  %11133 = vmatpush1.bf16.msra.mxu1 %v16095_v22  ;;  %v12254_v19 = vpop.eup %12253  ;;  %v16851_v53 = vld [vmem:[#allocation13_spill] sm:$0xff] }
 0xd0e   :  { %11103 = vmatprep.subr.bf16.mxu0 %v16096_v40  ;;  %11135 = vmatprep.subr.bf16.mxu1 %v16023_v12  ;;  %v6528_v37 = vmul.f32 0.5, %v12254_v19  ;;  %v12256_v15 = vpop.eup %12255  ;;  %v16853_v19 = vld [vmem:[#allocation15_spill] sm:$0xff] }
 0xd0f   :  { %v6531_v28 = vadd.f32 0.5, %v6527_v58  ;;  %v12258_v4 = vpop.eup %12257  ;;  %v16852_v58 = vld [vmem:[#allocation14_spill] sm:$0xff] }
 0xd10   :  { %v6532_v29 = vadd.f32 0.5, %v6528_v37  ;;  %v16855_v37 = vld [vmem:[#allocation17_spill] sm:$0xff] }
 0xd11   :  { %v6536_v52 = vmul.f32 %v12256_v15, %v6531_v28  ;;  %11105 = vmatpush1.bf16.msra.mxu0 %v16024_v10  ;;  %11137 = vmatpush1.bf16.msra.mxu1 %v16025_v61  ;;  %v16854_v28 = vld [vmem:[#allocation16_spill] sm:$0xff]  ;;  %v16856_v15 = vld [vmem:[#allocation18_spill] sm:$0xff] }
 0xd12   :  { %11107 = vmatprep.subr.bf16.mxu0 %v16097_v44  ;;  %11139 = vmatprep.subr.bf16.mxu1 %v16098_v54  ;;  %v6535_v35 = vmul.f32 %v6532_v29, %v14830_v16  ;;  %v6529_v16 = vmul.f32 0.5, %v12258_v4  ;;  %v16857_v29 = vld [vmem:[#allocation19_spill] sm:$0xff]  ;;  %v16860_v4 = vld [vmem:[#allocation22_spill] sm:$0xff] }
 0xd14   :  { %v14961_v26 = vadd.f32 %v6536_v52, %v6535_v35  ;;  %v6533_v34 = vadd.f32 0.5, %v6529_v16  ;;  %v16858_v52 = vld [vmem:[#allocation20_spill] sm:$0xff]  ;;  %v16859_v35 = vld [vmem:[#allocation21_spill] sm:$0xff]  ;;  %v16861_v16 = vld [vmem:[#allocation23_spill] sm:$0xff] }
 0xd15   :  { %11109 = vmatpush1.bf16.msra.mxu0 %v16100_v31  ;;  %11141 = vmatpush1.bf16.msra.mxu1 %v16101_v2 }
 0xd16   :  { %11111 = vmatprep.subr.bf16.mxu0 %v16102_v1  ;;  %11143 = vmatprep.subr.bf16.mxu1 %v16103_v32  ;;  %12259 = vtanh.f32 %v14961_v26 }
 0xd19   :  { %11113 = vmatpush1.bf16.msra.mxu0 %v16104_v25  ;;  %11145 = vmatpush1.bf16.msra.mxu1 %v16105_v5 }
 0xd1a   :  { %11115 = vmatprep.subr.bf16.mxu0 %v16106_v39  ;;  %11147 = vmatprep.subr.bf16.mxu1 %v16036_v7 }
 0xd1d   :  { %11117 = vmatpush1.bf16.msra.mxu0 %v16037_v6  ;;  %11149 = vmatpush1.bf16.msra.mxu1 %v16038_v27 }
 0xd1e   :  { %11119 = vmatprep.subr.bf16.mxu0 %v16039_v45  ;;  %11151 = vmatprep.subr.bf16.mxu1 %v16040_v18 }
 0xd20   :  { %v12260_v55 = vpop.eup %12259 }
 0xd21   :  { %11121 = vmatpush1.bf16.msra.mxu0 %v16839_v41  ;;  %11153 = vmatpush1.bf16.msra.mxu1 %v16840_v42  ;;  %v6539_v59 = vmul.f32 %v12260_v55, %v6533_v34  ;;  %v16862_v34 = vld [vmem:[#allocation24_spill] sm:$0xff]  ;;  %v16863_v55 = vld [vmem:[#allocation25_spill] sm:$0xff] }
 0xd22   :  { %11155 = vmatprep.subr.bf16.mxu0 %v16841_v49  ;;  %11187 = vmatprep.subr.bf16.mxu1 %v16842_v11 }
 0xd24   :  { %6747 = vmatmul.mubr.f32.vlgmr.msra.gmra.mrb[46].mxu0 %v6539_v59  ;;  %6818 = vmatmul.mubr.f32.vlgmr.msra.gmra.mrb[46].mxu1 %v6539_v59 }
 0xd25   :  { %11157 = vmatpush1.bf16.msra.mxu0 %v16843_v13  ;;  %11189 = vmatpush1.bf16.msra.mxu1 %v16844_v43  ;;  %v16917_v13 = vld [vmem:[#allocation104_spill] sm:$0xff] }
 0xd26   :  { %11159 = vmatprep.subr.bf16.mxu0 %v16845_v20  ;;  %11191 = vmatprep.subr.bf16.mxu1 %v16846_v3  ;;  %v16911_v20 = vld [vmem:[#allocation100_spill] sm:$0xff] }
 0xd27   :  { %6926 = vmatprep.mubr.f32.mxu0 %v15908_v57  ;;  %6997 = vmatprep.mubr.f32.mxu1 %v15908_v57 }
 0xd29   :  { %11161 = vmatpush1.bf16.msra.mxu0 %v16847_v17  ;;  %11193 = vmatpush1.bf16.msra.mxu1 %v16848_v9  ;;  %v116_v9 = vpop.permute.xlu1 %115 }
 0xd2a   :  { %11163 = vmatprep.subr.bf16.mxu0 %v16849_v33  ;;  %11195 = vmatprep.subr.bf16.mxu1 %v16850_v50  ;;  %v202_v43 = vmul.f32 %v16911_v20, %v116_v9 }
 0xd2d   :  { %11165 = vmatpush1.bf16.msra.mxu0 %v16851_v53  ;;  %11197 = vmatpush1.bf16.msra.mxu1 %v16852_v58  ;;  %v16908_v53 = vld [vmem:[#allocation113_spill] sm:$0xff] }
 0xd2e   :  { %11167 = vmatprep.subr.bf16.mxu0 %v16853_v19  ;;  %11199 = vmatprep.subr.bf16.mxu1 %v16854_v28  ;;  %v16864_v19 = vld [vmem:[#allocation26_spill] sm:$0xff]  ;;  %v16865_v28 = vld [vmem:[#allocation27_spill] sm:$0xff] }
 0xd31   :  { %11169 = vmatpush1.bf16.msra.mxu0 %v16855_v37  ;;  %11201 = vmatpush1.bf16.msra.mxu1 %v16856_v15  ;;  %v16866_v37 = vld [vmem:[#allocation28_spill] sm:$0xff]  ;;  %v16867_v15 = vld [vmem:[#allocation29_spill] sm:$0xff] }
 0xd32   :  { %11171 = vmatprep.subr.bf16.mxu0 %v16857_v29  ;;  %11203 = vmatprep.subr.bf16.mxu1 %v16858_v52  ;;  %v16868_v29 = vld [vmem:[#allocation30_spill] sm:$0xff]  ;;  %v16869_v52 = vld [vmem:[#allocation31_spill] sm:$0xff] }
 0xd35   :  { %11173 = vmatpush1.bf16.msra.mxu0 %v16859_v35  ;;  %11205 = vmatpush1.bf16.msra.mxu1 %v16860_v4  ;;  %v16870_v35 = vld [vmem:[#allocation32_spill] sm:$0xff]  ;;  %v16871_v4 = vld [vmem:[#allocation33_spill] sm:$0xff] }
 0xd36   :  { %11175 = vmatprep.subr.bf16.mxu0 %v16861_v16  ;;  %11207 = vmatprep.subr.bf16.mxu1 %v16862_v34  ;;  %v16872_v16 = vld [vmem:[#allocation34_spill] sm:$0xff]  ;;  %v16873_v34 = vld [vmem:[#allocation35_spill] sm:$0xff] }
 0xd39   :  { %11177 = vmatpush1.bf16.msra.mxu0 %v16863_v55  ;;  %11209 = vmatpush1.bf16.msra.mxu1 %v16864_v19  ;;  %v16874_v55 = vld [vmem:[#allocation36_spill] sm:$0xff]  ;;  %v16907_v19 = vld [vmem:[#allocation99_spill] sm:$0xff] }
 0xd3a   :  { %11179 = vmatprep.subr.bf16.mxu0 %v16865_v28  ;;  %11211 = vmatprep.subr.bf16.mxu1 %v16866_v37  ;;  %v16875_v28 = vld [vmem:[#allocation37_spill] sm:$0xff]  ;;  %v16876_v37 = vld [vmem:[#allocation38_spill] sm:$0xff] }
 0xd3d   :  { %11181 = vmatpush1.bf16.msra.mxu0 %v16867_v15  ;;  %11213 = vmatpush1.bf16.msra.mxu1 %v16868_v29  ;;  %v16877_v15 = vld [vmem:[#allocation39_spill] sm:$0xff]  ;;  %v16878_v29 = vld [vmem:[#allocation40_spill] sm:$0xff] }
 0xd3e   :  { %11183 = vmatprep.subr.bf16.mxu0 %v16869_v52  ;;  %11215 = vmatprep.subr.bf16.mxu1 %v16870_v35  ;;  %v16888_v35 = vld [vmem:[#allocation50_spill] sm:$0xff]  ;;  %v16889_v52 = vld [vmem:[#allocation51_spill] sm:$0xff] }
 0xd41   :  { %11185 = vmatpush1.bf16.msra.mxu0 %v16871_v4  ;;  %11217 = vmatpush1.bf16.msra.mxu1 %v16872_v16  ;;  %v16879_v4 = vld [vmem:[#allocation41_spill] sm:$0xff]  ;;  %v16880_v16 = vld [vmem:[#allocation42_spill] sm:$0xff] }
 0xd42   :  { %11219 = vmatprep.subr.bf16.mxu0 %v16873_v34  ;;  %11251 = vmatprep.subr.bf16.mxu1 %v16874_v55  ;;  %v16881_v34 = vld [vmem:[#allocation43_spill] sm:$0xff]  ;;  %v16882_v55 = vld [vmem:[#allocation44_spill] sm:$0xff] }
 0xd44   :  { %6927 = vmatmul.mubr.f32.vlgmr.msra.gmra.mrb[48].mxu0 %v6539_v59  ;;  %6998 = vmatmul.mubr.f32.vlgmr.msra.gmra.mrb[48].mxu1 %v6539_v59  ;;  %v16883_v59 = vld [vmem:[#allocation45_spill] sm:$0xff] }
 0xd45   :  { %11221 = vmatpush1.bf16.msra.mxu0 %v16875_v28  ;;  %11253 = vmatpush1.bf16.msra.mxu1 %v16876_v37  ;;  %v16884_v28 = vld [vmem:[#allocation46_spill] sm:$0xff]  ;;  %v16885_v37 = vld [vmem:[#allocation47_spill] sm:$0xff] }
 0xd46   :  { %11223 = vmatprep.subr.bf16.mxu0 %v16877_v15  ;;  %11255 = vmatprep.subr.bf16.mxu1 %v16878_v29  ;;  %v16886_v15 = vld [vmem:[#allocation48_spill] sm:$0xff]  ;;  %v16887_v29 = vld [vmem:[#allocation49_spill] sm:$0xff] }
 0xd47   :  { %7089 = vmatprep.mubr.f32.mxu0 %v15908_v57  ;;  %7160 = vmatprep.mubr.f32.mxu1 %v15908_v57 }
 0xd49   :  { %11225 = vmatpush1.bf16.msra.mxu0 %v16879_v4  ;;  %11257 = vmatpush1.bf16.msra.mxu1 %v16880_v16  ;;  %v16890_v4 = vld [vmem:[#allocation52_spill] sm:$0xff]  ;;  %v16891_v16 = vld [vmem:[#allocation53_spill] sm:$0xff] }
 0xd4a   :  { %11227 = vmatprep.subr.bf16.mxu0 %v16881_v34  ;;  %11259 = vmatprep.subr.bf16.mxu1 %v16882_v55  ;;  %v16892_v34 = vld [vmem:[#allocation54_spill] sm:$0xff]  ;;  %v16893_v55 = vld [vmem:[#allocation55_spill] sm:$0xff] }
 0xd4d   :  { %11229 = vmatpush1.bf16.msra.mxu0 %v16883_v59  ;;  %11261 = vmatpush1.bf16.msra.mxu1 %v16884_v28  ;;  %v16894_v59 = vld [vmem:[#allocation56_spill] sm:$0xff]  ;;  %v16895_v28 = vld [vmem:[#allocation57_spill] sm:$0xff] }
 0xd4e   :  { %11231 = vmatprep.subr.bf16.mxu0 %v16885_v37  ;;  %11263 = vmatprep.subr.bf16.mxu1 %v16886_v15  ;;  %v16896_v37 = vld [vmem:[#allocation58_spill] sm:$0xff]  ;;  %v16897_v15 = vld [vmem:[#allocation59_spill] sm:$0xff] }
 0xd51   :  { %11233 = vmatpush1.bf16.msra.mxu0 %v16887_v29  ;;  %11265 = vmatpush1.bf16.msra.mxu1 %v16888_v35  ;;  %v16898_v29 = vld [vmem:[#allocation60_spill] sm:$0xff]  ;;  %v16899_v35 = vld [vmem:[#allocation61_spill] sm:$0xff] }
 0xd52   :  { %11235 = vmatprep.subr.bf16.mxu0 %v16889_v52  ;;  %11267 = vmatprep.subr.bf16.mxu1 %v16890_v4  ;;  %v16900_v52 = vld [vmem:[#allocation62_spill] sm:$0xff]  ;;  %v16901_v4 = vld [vmem:[#allocation63_spill] sm:$0xff] }
 0xd55   :  { %11237 = vmatpush1.bf16.msra.mxu0 %v16891_v16  ;;  %11269 = vmatpush1.bf16.msra.mxu1 %v16892_v34  ;;  %v16902_v16 = vld [vmem:[#allocation64_spill] sm:$0xff]  ;;  %v16903_v34 = vld [vmem:[#allocation65_spill] sm:$0xff] }
 0xd56   :  { %11239 = vmatprep.subr.bf16.mxu0 %v16893_v55  ;;  %11271 = vmatprep.subr.bf16.mxu1 %v16894_v59  ;;  %v16904_v55 = vld [vmem:[#allocation66_spill] sm:$0xff]  ;;  %v16905_v59 = vld [vmem:[#allocation67_spill] sm:$0xff] }
 0xd59   :  { %11241 = vmatpush1.bf16.msra.mxu0 %v16895_v28  ;;  %11273 = vmatpush1.bf16.msra.mxu1 %v16896_v37  ;;  %v16906_v28 = vld [vmem:[#allocation68_spill] sm:$0xff] }
 0xd5a   :  { %11243 = vmatprep.subr.bf16.mxu0 %v16897_v15  ;;  %11275 = vmatprep.subr.bf16.mxu1 %v16898_v29 }
 0xd5d   :  { %11245 = vmatpush1.bf16.msra.mxu0 %v16899_v35  ;;  %11277 = vmatpush1.bf16.msra.mxu1 %v16900_v52 }
 0xd5e   :  { %11247 = vmatprep.subr.bf16.mxu0 %v16901_v4  ;;  %11279 = vmatprep.subr.bf16.mxu1 %v16902_v16  ;;  %v16909_v4 = vld [vmem:[#allocation114_spill] sm:$0xff] }
 0xd61   :  { %11249 = vmatpush1.bf16.msra.mxu0 %v16903_v34  ;;  %11281 = vmatpush1.bf16.msra.mxu1 %v16904_v55  ;;  %v16910_v34 = vld [vmem:[#allocation115_spill] sm:$0xff] }
 0xd62   :  { %11283 = vmatprep.subr.bf16.mxu0 %v16905_v59  ;;  %11315 = vmatprep.subr.bf16.mxu1 %v16906_v28 }
 0xdf7   :  { %v6748_v37 = vpop.f32.mrb[46].mxu0  ;;  %v6819_v15 = vpop.f32.mrb[46].mxu1 }
 0xdf8   :  { %v6824_v29 = vadd.f32 %v6748_v37, %v16907_v19  ;;  %v6750_v58 = vpop.f32.mrb[47].mxu0  ;;  %v6821_v35 = vpop.f32.mrb[47].mxu1  ;;  %v6826_v16 = vadd.f32 %v6819_v15, %v16910_v34 }
 0xdf9   :  { %v6825_v52 = vadd.f32 %v6750_v58, %v16908_v53  ;;  %v6827_v50 = vadd.f32 %v6821_v35, %v16909_v4  ;;  %v16912_v58 = vld [vmem:[#allocation101_spill] sm:$0xff]  ;;  %v16913_v53 = vld [vmem:[#allocation76_spill] sm:$0xff]  ;;  %v355_v4 = vpop.permute.xlu1 %354 }
 0xdfa   :  { %12261 = vtanh.f32 %v6824_v29  ;;  %v203_v29 = vmul.f32 %v16912_v58, %v116_v9  ;;  %v16921_v58 = vld [vmem:[#allocation108_spill] sm:$0xff] }
 0xdfb   :  { %12263 = vtanh.f32 %v6825_v52  ;;  %v16914_v52 = vld [vmem:[#allocation102_spill] sm:$0xff] }
 0xdfc   :  { %12265 = vtanh.f32 %v6827_v50  ;;  %v205_v50 = vmul.f32 %v16914_v52, %v116_v9 }
 0xdfd   :  { %12267 = vtanh.f32 %v6826_v16  ;;  %v16918_v16 = vld [vmem:[#allocation105_spill] sm:$0xff] }
 0xdfe   :  { %v290_v11 = vadd.f32 %v16921_v58, %v205_v50 }
 0xe04   :  { %v12262_v55 = vpop.eup %12261 }
 0xe05   :  { %v6832_v33 = vmul.f32 0.5, %v12262_v55  ;;  %v12264_v59 = vpop.eup %12263  ;;  %v16916_v55 = vld [vmem:[#allocation103_spill] sm:$0xff] }
 0xe06   :  { %v6833_v17 = vmul.f32 0.5, %v12264_v59  ;;  %v12266_v3 = vpop.eup %12265  ;;  %v438_v34 = vmul.f32 %v16916_v55, %v355_v4  ;;  %v439_v59 = vmul.f32 %v16918_v16, %v355_v4 }
 0xe07   :  { %v6836_v28 = vadd.f32 0.5, %v6832_v33  ;;  %v287_v33 = vadd.f32 %v16917_v13, %v202_v43  ;;  %v204_v13 = vmul.f32 %v16011_v56, %v116_v9 }
 0xe08   :  { %v6837_v37 = vadd.f32 0.5, %v6833_v17 }
 0xe09   :  { %v6841_v19 = vmul.f32 %v12266_v3, %v6836_v28  ;;  %v16919_v3 = vld [vmem:[#allocation106_spill] sm:$0xff]  ;;  %v16920_v28 = vld [vmem:[#allocation107_spill] sm:$0xff]  ;;  %v502_v52 = vadd.f32 %v438_v34, %v287_v33 }
 0xe0a   :  { %v6840_v35 = vmul.f32 %v6837_v37, %v16913_v53  ;;  %v288_v17 = vadd.f32 %v16919_v3, %v203_v29  ;;  %v441_v20 = vmul.f32 %v16920_v28, %v355_v4  ;;  %v12268_v53 = vpop.eup %12267  ;;  %v570_v37 = vpop.permute.xlu0 %569 }
 0xe0b   :  { %v654_v55 = vmul.f32 %v16672_v23, %v570_v37  ;;  %v6834_v49 = vmul.f32 0.5, %v12268_v53  ;;  %v656_v16 = vmul.f32 %v16673_v24, %v570_v37 }
 0xe0c   :  { %v15056_v15 = vadd.f32 %v6841_v19, %v6840_v35  ;;  %v653_v19 = vmul.f32 %v16671_v46, %v570_v37  ;;  %v503_v35 = vadd.f32 %v439_v59, %v288_v17  ;;  %v505_v43 = vadd.f32 %v441_v20, %v290_v11 }
 0xe0d   :  { %v6838_v42 = vadd.f32 0.5, %v6834_v49  ;;  %v440_v59 = vmul.f32 %v13447_v60, %v355_v4  ;;  %v289_v17 = vadd.f32 %v13450_v21, %v204_v13  ;;  %v655_v49 = vmul.f32 %v13457_v47, %v570_v37 }
 0xe0e   :  { %16915 = vst [vmem:[#allocation77_spill] sm:$0xff] %v15056_v15  ;;  %12269 = vtanh.f32 %v15056_v15  ;;  %v717_v15 = vadd.f32 %v653_v19, %v502_v52  ;;  %v718_v28 = vadd.f32 %v654_v55, %v503_v35  ;;  %v720_v41 = vadd.f32 %v656_v16, %v505_v43 }
 0xe0f   :  { %v504_v52 = vadd.f32 %v440_v59, %v289_v17  ;;  %v16926_v17 = vld [vmem:[#allocation5_spill] sm:$0xff] }
 0xe17   :  { %v6928_v29 = vpop.f32.mrb[48].mxu0  ;;  %v6999_v3 = vpop.f32.mrb[48].mxu1 }
 0xe18   :  { %v7004_v50 = vadd.f32 %v6928_v29, %v717_v15  ;;  %v6930_v58 = vpop.f32.mrb[49].mxu0  ;;  %v7001_v34 = vpop.f32.mrb[49].mxu1  ;;  %v16922_v29 = vld [vmem:[#allocation97_spill] sm:$0xff] }
 0xe19   :  { %v12270_v33 = vpop.eup %12269  ;;  %v7005_v53 = vadd.f32 %v6930_v58, %v718_v28  ;;  %v7007_v11 = vadd.f32 %v7001_v34, %v720_v41  ;;  %v719_v41 = vadd.f32 %v655_v49, %v504_v52  ;;  %v16924_v34 = vld [vmem:[#allocation3_spill] sm:$0xff]  ;;  %v16931_v52 = vld [vmem:[#allocation10_spill] sm:$0xff] }
 0xe1a   :  { %12271 = vtanh.f32 %v7004_v50  ;;  %v6844_v20 = vmul.f32 %v12270_v33, %v6838_v42  ;;  %v16923_v50 = vld [vmem:[#allocation98_spill] sm:$0xff]  ;;  %v16925_v33 = vld [vmem:[#allocation4_spill] sm:$0xff]  ;;  %v16932_v49 = vld [vmem:[#allocation11_spill] sm:$0xff] }
 0xe1b   :  { %12273 = vtanh.f32 %v7005_v53  ;;  %v16927_v53 = vld [vmem:[#allocation6_spill] sm:$0xff] }
 0xe1c   :  { %7090 = vmatmul.mubr.f32.vlgmr.msra.gmra.mrb[50].mxu0 %v6844_v20  ;;  %7161 = vmatmul.mubr.f32.vlgmr.msra.gmra.mrb[50].mxu1 %v6844_v20  ;;  %v6845_v9 = vmul.f32 %v14807_v63, %v6844_v20  ;;  %12275 = vtanh.f32 %v7007_v11  ;;  %v7006_v63 = vadd.f32 %v6999_v3, %v719_v41  ;;  %v16928_v11 = vld [vmem:[#allocation7_spill] sm:$0xff]  ;;  %v16929_v20 = vld [vmem:[#allocation8_spill] sm:$0xff] }
 0xe1d   :  { %11285 = vmatpush1.bf16.msra.mxu0 %v16012_v48  ;;  %11317 = vmatpush1.bf16.msra.mxu1 %v16013_v30  ;;  %v16933_v41 = vld [vmem:[#allocation12_spill] sm:$0xff] }
 0xe1e   :  { %6846 = vadd.xlane.f32.xlu0 %v6845_v9  ;;  %11287 = vmatprep.subr.bf16.mxu0 %v16014_v0  ;;  %12277 = vtanh.f32 %v7006_v63  ;;  %v16930_v9 = vld [vmem:[#allocation9_spill] sm:$0xff] }
 0xe1f   :  { %11319 = vmatprep.subr.bf16.mxu1 %v16015_v36  ;;  %7231 = vmatprep.mubr.f32.mxu0 %v15908_v57  ;;  %v16934_v63 = vld [vmem:[#allocation13_spill] sm:$0xff] }
 0xe20   :  { %7302 = vmatprep.mubr.f32.mxu1 %v15908_v57 }
 0xe21   :  { %11289 = vmatpush1.bf16.msra.mxu0 %v16016_v62  ;;  %11321 = vmatpush1.bf16.msra.mxu1 %v16017_v8 }
 0xe22   :  { %11291 = vmatprep.subr.bf16.mxu0 %v16018_v14  ;;  %11323 = vmatprep.subr.bf16.mxu1 %v16019_v51 }
 0xe24   :  { %v12272_v42 = vpop.eup %12271 }
 0xe25   :  { %v7012_v13 = vmul.f32 0.5, %v12272_v42  ;;  %11293 = vmatpush1.bf16.msra.mxu0 %v16020_v38  ;;  %11325 = vmatpush1.bf16.msra.mxu1 %v16095_v22  ;;  %v12274_v4 = vpop.eup %12273  ;;  %v16935_v42 = vld [vmem:[#allocation14_spill] sm:$0xff] }
 0xe26   :  { %11295 = vmatprep.subr.bf16.mxu0 %v16096_v40  ;;  %11327 = vmatprep.subr.bf16.mxu1 %v16023_v12  ;;  %v7013_v15 = vmul.f32 0.5, %v12274_v4  ;;  %v12276_v55 = vpop.eup %12275  ;;  %v16937_v4 = vld [vmem:[#allocation16_spill] sm:$0xff] }
 0xe27   :  { %v7016_v58 = vadd.f32 0.5, %v7012_v13  ;;  %v16936_v13 = vld [vmem:[#allocation15_spill] sm:$0xff] }
 0xe28   :  { %v7017_v16 = vadd.f32 0.5, %v7013_v15  ;;  %v12278_v19 = vpop.eup %12277  ;;  %v16939_v15 = vld [vmem:[#allocation18_spill] sm:$0xff] }
 0xe29   :  { %v7021_v28 = vmul.f32 %v12276_v55, %v7016_v58  ;;  %11297 = vmatpush1.bf16.msra.mxu0 %v16024_v10  ;;  %11329 = vmatpush1.bf16.msra.mxu1 %v16025_v61  ;;  %v16938_v58 = vld [vmem:[#allocation17_spill] sm:$0xff]  ;;  %v16940_v55 = vld [vmem:[#allocation19_spill] sm:$0xff] }
 0xe2a   :  { %11299 = vmatprep.subr.bf16.mxu0 %v16097_v44  ;;  %11331 = vmatprep.subr.bf16.mxu1 %v16098_v54  ;;  %v7020_v3 = vmul.f32 %v7017_v16, %v14961_v26  ;;  %v7014_v26 = vmul.f32 0.5, %v12278_v19  ;;  %v16941_v16 = vld [vmem:[#allocation20_spill] sm:$0xff]  ;;  %v16944_v19 = vld [vmem:[#allocation23_spill] sm:$0xff] }
 0xe2c   :  { %v15092_v37 = vadd.f32 %v7021_v28, %v7020_v3  ;;  %v7018_v35 = vadd.f32 0.5, %v7014_v26  ;;  %v16942_v28 = vld [vmem:[#allocation21_spill] sm:$0xff]  ;;  %v16943_v3 = vld [vmem:[#allocation22_spill] sm:$0xff]  ;;  %v16945_v26 = vld [vmem:[#allocation24_spill] sm:$0xff] }
 0xe2d   :  { %11301 = vmatpush1.bf16.msra.mxu0 %v16100_v31  ;;  %11333 = vmatpush1.bf16.msra.mxu1 %v16101_v2 }
 0xe2e   :  { %11303 = vmatprep.subr.bf16.mxu0 %v16102_v1  ;;  %11335 = vmatprep.subr.bf16.mxu1 %v16103_v32  ;;  %12279 = vtanh.f32 %v15092_v37 }
 0xe31   :  { %11305 = vmatpush1.bf16.msra.mxu0 %v16104_v25  ;;  %11337 = vmatpush1.bf16.msra.mxu1 %v16105_v5 }
 0xe32   :  { %11307 = vmatprep.subr.bf16.mxu0 %v16106_v39  ;;  %11339 = vmatprep.subr.bf16.mxu1 %v16036_v7 }
 0xe35   :  { %11309 = vmatpush1.bf16.msra.mxu0 %v16037_v6  ;;  %11341 = vmatpush1.bf16.msra.mxu1 %v16038_v27 }
 0xe36   :  { %11311 = vmatprep.subr.bf16.mxu0 %v16039_v45  ;;  %11343 = vmatprep.subr.bf16.mxu1 %v16040_v18 }
 0xe38   :  { %v12280_v43 = vpop.eup %12279 }
 0xe39   :  { %11313 = vmatpush1.bf16.msra.mxu0 %v16922_v29  ;;  %11345 = vmatpush1.bf16.msra.mxu1 %v16923_v50  ;;  %v7024_v59 = vmul.f32 %v12280_v43, %v7018_v35  ;;  %v16946_v35 = vld [vmem:[#allocation25_spill] sm:$0xff]  ;;  %v16947_v43 = vld [vmem:[#allocation26_spill] sm:$0xff] }
 0xe3a   :  { %11347 = vmatprep.subr.bf16.mxu0 %v16924_v34  ;;  %11379 = vmatprep.subr.bf16.mxu1 %v16925_v33 }
 0xe3c   :  { %7232 = vmatmul.mubr.f32.vlgmr.msra.gmra.mrb[50].mxu0 %v7024_v59  ;;  %7303 = vmatmul.mubr.f32.vlgmr.msra.gmra.mrb[50].mxu1 %v7024_v59 }
 0xe3d   :  { %11349 = vmatpush1.bf16.msra.mxu0 %v16926_v17  ;;  %11381 = vmatpush1.bf16.msra.mxu1 %v16927_v53  ;;  %v17000_v17 = vld [vmem:[#allocation105_spill] sm:$0xff] }
 0xe3e   :  { %11351 = vmatprep.subr.bf16.mxu0 %v16928_v11  ;;  %11383 = vmatprep.subr.bf16.mxu1 %v16929_v20  ;;  %v16995_v20 = vld [vmem:[#allocation101_spill] sm:$0xff] }
 0xe3f   :  { %7411 = vmatprep.mubr.f32.mxu0 %v15908_v57  ;;  %7482 = vmatprep.mubr.f32.mxu1 %v15908_v57 }
 0xe41   :  { %11353 = vmatpush1.bf16.msra.mxu0 %v16930_v9  ;;  %11385 = vmatpush1.bf16.msra.mxu1 %v16931_v52 }
 0xe42   :  { %11355 = vmatprep.subr.bf16.mxu0 %v16932_v49  ;;  %11387 = vmatprep.subr.bf16.mxu1 %v16933_v41  ;;  %v121_v49 = vpop.permute.xlu1 %120 }
 0xe43   :  { %v207_v11 = vmul.f32 %v16995_v20, %v121_v49  ;;  %v17003_v20 = vld [vmem:[#allocation108_spill] sm:$0xff] }
 0xe45   :  { %11357 = vmatpush1.bf16.msra.mxu0 %v16934_v63  ;;  %11389 = vmatpush1.bf16.msra.mxu1 %v16935_v42  ;;  %v16991_v42 = vld [vmem:[#allocation113_spill] sm:$0xff] }
 0xe46   :  { %11359 = vmatprep.subr.bf16.mxu0 %v16936_v13  ;;  %11391 = vmatprep.subr.bf16.mxu1 %v16937_v4  ;;  %v16948_v4 = vld [vmem:[#allocation27_spill] sm:$0xff] }
 0xe49   :  { %11361 = vmatpush1.bf16.msra.mxu0 %v16938_v58  ;;  %11393 = vmatpush1.bf16.msra.mxu1 %v16939_v15  ;;  %v16949_v58 = vld [vmem:[#allocation28_spill] sm:$0xff]  ;;  %v16950_v15 = vld [vmem:[#allocation29_spill] sm:$0xff] }
 0xe4a   :  { %11363 = vmatprep.subr.bf16.mxu0 %v16940_v55  ;;  %11395 = vmatprep.subr.bf16.mxu1 %v16941_v16  ;;  %v16951_v55 = vld [vmem:[#allocation30_spill] sm:$0xff]  ;;  %v16952_v16 = vld [vmem:[#allocation31_spill] sm:$0xff] }
 0xe4d   :  { %11365 = vmatpush1.bf16.msra.mxu0 %v16942_v28  ;;  %11397 = vmatpush1.bf16.msra.mxu1 %v16943_v3  ;;  %v16953_v28 = vld [vmem:[#allocation32_spill] sm:$0xff]  ;;  %v16954_v3 = vld [vmem:[#allocation33_spill] sm:$0xff] }
 0xe4e   :  { %11367 = vmatprep.subr.bf16.mxu0 %v16944_v19  ;;  %11399 = vmatprep.subr.bf16.mxu1 %v16945_v26  ;;  %v16955_v19 = vld [vmem:[#allocation34_spill] sm:$0xff]  ;;  %v16956_v26 = vld [vmem:[#allocation35_spill] sm:$0xff] }
 0xe51   :  { %11369 = vmatpush1.bf16.msra.mxu0 %v16946_v35  ;;  %11401 = vmatpush1.bf16.msra.mxu1 %v16947_v43  ;;  %v16957_v35 = vld [vmem:[#allocation36_spill] sm:$0xff]  ;;  %v16990_v43 = vld [vmem:[#allocation99_spill] sm:$0xff] }
 0xe52   :  { %11371 = vmatprep.subr.bf16.mxu0 %v16948_v4  ;;  %11403 = vmatprep.subr.bf16.mxu1 %v16949_v58  ;;  %v16958_v4 = vld [vmem:[#allocation37_spill] sm:$0xff]  ;;  %v16959_v58 = vld [vmem:[#allocation38_spill] sm:$0xff] }
 0xe55   :  { %11373 = vmatpush1.bf16.msra.mxu0 %v16950_v15  ;;  %11405 = vmatpush1.bf16.msra.mxu1 %v16951_v55  ;;  %v16960_v15 = vld [vmem:[#allocation39_spill] sm:$0xff]  ;;  %v16961_v55 = vld [vmem:[#allocation40_spill] sm:$0xff] }
 0xe56   :  { %11375 = vmatprep.subr.bf16.mxu0 %v16952_v16  ;;  %11407 = vmatprep.subr.bf16.mxu1 %v16953_v28  ;;  %v16971_v28 = vld [vmem:[#allocation50_spill] sm:$0xff]  ;;  %v16972_v16 = vld [vmem:[#allocation51_spill] sm:$0xff] }
 0xe59   :  { %11377 = vmatpush1.bf16.msra.mxu0 %v16954_v3  ;;  %11409 = vmatpush1.bf16.msra.mxu1 %v16955_v19  ;;  %v16962_v3 = vld [vmem:[#allocation41_spill] sm:$0xff]  ;;  %v16963_v19 = vld [vmem:[#allocation42_spill] sm:$0xff] }
 0xe5a   :  { %11411 = vmatprep.subr.bf16.mxu0 %v16956_v26  ;;  %11443 = vmatprep.subr.bf16.mxu1 %v16957_v35  ;;  %v16964_v26 = vld [vmem:[#allocation43_spill] sm:$0xff]  ;;  %v16965_v35 = vld [vmem:[#allocation44_spill] sm:$0xff] }
 0xe5c   :  { %7412 = vmatmul.mubr.f32.vlgmr.msra.gmra.mrb[52].mxu0 %v7024_v59  ;;  %7483 = vmatmul.mubr.f32.vlgmr.msra.gmra.mrb[52].mxu1 %v7024_v59  ;;  %v16966_v59 = vld [vmem:[#allocation45_spill] sm:$0xff] }
 0xe5d   :  { %11413 = vmatpush1.bf16.msra.mxu0 %v16958_v4  ;;  %11445 = vmatpush1.bf16.msra.mxu1 %v16959_v58  ;;  %v16967_v4 = vld [vmem:[#allocation46_spill] sm:$0xff]  ;;  %v16968_v58 = vld [vmem:[#allocation47_spill] sm:$0xff] }
 0xe5e   :  { %11415 = vmatprep.subr.bf16.mxu0 %v16960_v15  ;;  %11447 = vmatprep.subr.bf16.mxu1 %v16961_v55  ;;  %v16969_v15 = vld [vmem:[#allocation48_spill] sm:$0xff]  ;;  %v16970_v55 = vld [vmem:[#allocation49_spill] sm:$0xff] }
 0xe5f   :  { %7574 = vmatprep.mubr.f32.mxu0 %v15908_v57  ;;  %7645 = vmatprep.mubr.f32.mxu1 %v15908_v57 }
 0xe61   :  { %11417 = vmatpush1.bf16.msra.mxu0 %v16962_v3  ;;  %11449 = vmatpush1.bf16.msra.mxu1 %v16963_v19  ;;  %v16973_v3 = vld [vmem:[#allocation52_spill] sm:$0xff]  ;;  %v16974_v19 = vld [vmem:[#allocation53_spill] sm:$0xff] }
 0xe62   :  { %11419 = vmatprep.subr.bf16.mxu0 %v16964_v26  ;;  %11451 = vmatprep.subr.bf16.mxu1 %v16965_v35  ;;  %v16975_v26 = vld [vmem:[#allocation54_spill] sm:$0xff]  ;;  %v16976_v35 = vld [vmem:[#allocation55_spill] sm:$0xff] }
 0xe65   :  { %11421 = vmatpush1.bf16.msra.mxu0 %v16966_v59  ;;  %11453 = vmatpush1.bf16.msra.mxu1 %v16967_v4  ;;  %v16977_v59 = vld [vmem:[#allocation56_spill] sm:$0xff]  ;;  %v16978_v4 = vld [vmem:[#allocation57_spill] sm:$0xff] }
 0xe66   :  { %11423 = vmatprep.subr.bf16.mxu0 %v16968_v58  ;;  %11455 = vmatprep.subr.bf16.mxu1 %v16969_v15  ;;  %v16979_v58 = vld [vmem:[#allocation58_spill] sm:$0xff]  ;;  %v16980_v15 = vld [vmem:[#allocation59_spill] sm:$0xff] }
 0xe69   :  { %11425 = vmatpush1.bf16.msra.mxu0 %v16970_v55  ;;  %11457 = vmatpush1.bf16.msra.mxu1 %v16971_v28  ;;  %v16981_v55 = vld [vmem:[#allocation60_spill] sm:$0xff]  ;;  %v16982_v28 = vld [vmem:[#allocation61_spill] sm:$0xff] }
 0xe6a   :  { %11427 = vmatprep.subr.bf16.mxu0 %v16972_v16  ;;  %11459 = vmatprep.subr.bf16.mxu1 %v16973_v3  ;;  %v16983_v16 = vld [vmem:[#allocation62_spill] sm:$0xff]  ;;  %v16984_v3 = vld [vmem:[#allocation63_spill] sm:$0xff] }
 0xe6d   :  { %11429 = vmatpush1.bf16.msra.mxu0 %v16974_v19  ;;  %11461 = vmatpush1.bf16.msra.mxu1 %v16975_v26  ;;  %v16985_v19 = vld [vmem:[#allocation64_spill] sm:$0xff]  ;;  %v16986_v26 = vld [vmem:[#allocation65_spill] sm:$0xff] }
 0xe6e   :  { %11431 = vmatprep.subr.bf16.mxu0 %v16976_v35  ;;  %11463 = vmatprep.subr.bf16.mxu1 %v16977_v59  ;;  %v16987_v35 = vld [vmem:[#allocation66_spill] sm:$0xff]  ;;  %v16988_v59 = vld [vmem:[#allocation67_spill] sm:$0xff] }
 0xe71   :  { %11433 = vmatpush1.bf16.msra.mxu0 %v16978_v4  ;;  %11465 = vmatpush1.bf16.msra.mxu1 %v16979_v58  ;;  %v16989_v4 = vld [vmem:[#allocation68_spill] sm:$0xff] }
 0xe72   :  { %11435 = vmatprep.subr.bf16.mxu0 %v16980_v15  ;;  %11467 = vmatprep.subr.bf16.mxu1 %v16981_v55 }
 0xe75   :  { %11437 = vmatpush1.bf16.msra.mxu0 %v16982_v28  ;;  %11469 = vmatpush1.bf16.msra.mxu1 %v16983_v16 }
 0xe76   :  { %11439 = vmatprep.subr.bf16.mxu0 %v16984_v3  ;;  %11471 = vmatprep.subr.bf16.mxu1 %v16985_v19  ;;  %v16992_v3 = vld [vmem:[#allocation114_spill] sm:$0xff] }
 0xe79   :  { %11441 = vmatpush1.bf16.msra.mxu0 %v16986_v26  ;;  %11473 = vmatpush1.bf16.msra.mxu1 %v16987_v35  ;;  %v16993_v26 = vld [vmem:[#allocation115_spill] sm:$0xff] }
 0xe7a   :  { %11475 = vmatprep.subr.bf16.mxu0 %v16988_v59  ;;  %11507 = vmatprep.subr.bf16.mxu1 %v16989_v4 }
 0xf0f   :  { %v7233_v58 = vpop.f32.mrb[50].mxu0  ;;  %v7304_v15 = vpop.f32.mrb[50].mxu1 }
 0xf10   :  { %v7309_v55 = vadd.f32 %v7233_v58, %v16990_v43  ;;  %v7235_v13 = vpop.f32.mrb[51].mxu0  ;;  %v7306_v28 = vpop.f32.mrb[51].mxu1  ;;  %v7311_v19 = vadd.f32 %v7304_v15, %v16993_v26  ;;  %v16994_v58 = vld [vmem:[#allocation100_spill] sm:$0xff]  ;;  %v16998_v15 = vld [vmem:[#allocation103_spill] sm:$0xff] }
 0xf11   :  { %v7310_v16 = vadd.f32 %v7235_v13, %v16991_v42  ;;  %v7312_v63 = vadd.f32 %v7306_v28, %v16992_v3  ;;  %v206_v43 = vmul.f32 %v16994_v58, %v121_v49  ;;  %v16996_v42 = vld [vmem:[#allocation102_spill] sm:$0xff]  ;;  %v17002_v58 = vld [vmem:[#allocation107_spill] sm:$0xff] }
 0xf12   :  { %12281 = vtanh.f32 %v7309_v55  ;;  %v209_v28 = vmul.f32 %v16996_v42, %v121_v49 }
 0xf13   :  { %12283 = vtanh.f32 %v7310_v16  ;;  %v359_v16 = vpop.permute.xlu0 %358 }
 0xf14   :  { %12285 = vtanh.f32 %v7312_v63  ;;  %v16997_v63 = vld [vmem:[#allocation77_spill] sm:$0xff]  ;;  %v442_v26 = vmul.f32 %v16998_v15, %v359_v16  ;;  %v445_v34 = vmul.f32 %v17002_v58, %v359_v16 }
 0xf15   :  { %12287 = vtanh.f32 %v7311_v19 }
 0xf1c   :  { %v12282_v35 = vpop.eup %12281 }
 0xf1d   :  { %v7317_v41 = vmul.f32 0.5, %v12282_v35  ;;  %v12284_v59 = vpop.eup %12283  ;;  %v16999_v35 = vld [vmem:[#allocation104_spill] sm:$0xff] }
 0xf1e   :  { %v7318_v52 = vmul.f32 0.5, %v12284_v59  ;;  %v12286_v9 = vpop.eup %12285  ;;  %v291_v53 = vadd.f32 %v16999_v35, %v206_v43  ;;  %v17001_v59 = vld [vmem:[#allocation106_spill] sm:$0xff] }
 0xf1f   :  { %v7321_v4 = vadd.f32 0.5, %v7317_v41  ;;  %v443_v41 = vmul.f32 %v17000_v17, %v359_v16  ;;  %v292_v33 = vadd.f32 %v17001_v59, %v207_v11 }
 0xf20   :  { %v7322_v13 = vadd.f32 0.5, %v7318_v52  ;;  %v294_v52 = vadd.f32 %v17003_v20, %v209_v28  ;;  %v444_v28 = vmul.f32 %v13447_v60, %v359_v16  ;;  %v15206_v16 = vld [vmem:[%s15571_s7] ss:$0 sm:$0xff] }
 0xf21   :  { %v7326_v55 = vmul.f32 %v12286_v9, %v7321_v4  ;;  %v574_v9 = vpop.permute.xlu1 %573  ;;  %v506_v4 = vadd.f32 %v442_v26, %v291_v53  ;;  %v507_v15 = vadd.f32 %v443_v41, %v292_v33 }
 0xf22   :  { %v7325_v3 = vmul.f32 %v7322_v13, %v16997_v63  ;;  %v657_v13 = vmul.f32 %v16671_v46, %v574_v9  ;;  %v12288_v63 = vpop.eup %12287  ;;  %v658_v43 = vmul.f32 %v16672_v23, %v574_v9  ;;  %v509_v35 = vadd.f32 %v445_v34, %v294_v52 }
 0xf23   :  { %v7319_v11 = vmul.f32 0.5, %v12288_v63 }
 0xf24   :  { %v15190_v19 = vadd.f32 %v7326_v55, %v7325_v3  ;;  %v660_v3 = vmul.f32 %v16673_v24, %v574_v9  ;;  %v208_v55 = vmul.f32 %v16011_v56, %v121_v49  ;;  %v721_v59 = vadd.f32 %v657_v13, %v506_v4 }
 0xf25   :  { %v722_v58 = vadd.f32 %v658_v43, %v507_v15  ;;  %v7323_v46 = vadd.f32 0.5, %v7319_v11  ;;  %v659_v4 = vmul.f32 %v13457_v47, %v574_v9 }
 0xf26   :  { %12289 = vtanh.f32 %v15190_v19  ;;  %v724_v17 = vadd.f32 %v660_v3, %v509_v35  ;;  %v293_v53 = vadd.f32 %v13450_v21, %v208_v55 }
 0xf28   :  { %v508_v49 = vadd.f32 %v444_v28, %v293_v53  ;;  %v17004_v28 = vld [vmem:[#allocation3_spill] sm:$0xff]  ;;  %v17005_v53 = vld [vmem:[#allocation4_spill] sm:$0xff] }
 0xf2f   :  { %v7413_v20 = vpop.f32.mrb[52].mxu0  ;;  %v7484_v26 = vpop.f32.mrb[52].mxu1 }
 0xf30   :  { %v7489_v42 = vadd.f32 %v7413_v20, %v721_v59  ;;  %v7415_v33 = vpop.f32.mrb[53].mxu0  ;;  %v7486_v41 = vpop.f32.mrb[53].mxu1 }
 0xf31   :  { %v12290_v23 = vpop.eup %12289  ;;  %v7490_v34 = vadd.f32 %v7415_v33, %v722_v58  ;;  %v7492_v52 = vadd.f32 %v7486_v41, %v724_v17  ;;  %v17007_v33 = vld [vmem:[#allocation6_spill] sm:$0xff]  ;;  %v17008_v41 = vld [vmem:[#allocation7_spill] sm:$0xff] }
 0xf32   :  { %12291 = vtanh.f32 %v7489_v42  ;;  %v7329_v24 = vmul.f32 %v12290_v23, %v7323_v46  ;;  %v723_v23 = vadd.f32 %v659_v4, %v508_v49  ;;  %v17011_v49 = vld [vmem:[#allocation10_spill] sm:$0xff]  ;;  %v17012_v4 = vld [vmem:[#allocation11_spill] sm:$0xff] }
 0xf33   :  { %12293 = vtanh.f32 %v7490_v34  ;;  %v17009_v34 = vld [vmem:[#allocation8_spill] sm:$0xff] }
 0xf34   :  { %7575 = vmatmul.mubr.f32.vlgmr.msra.gmra.mrb[54].mxu0 %v7329_v24  ;;  %7646 = vmatmul.mubr.f32.vlgmr.msra.gmra.mrb[54].mxu1 %v7329_v24  ;;  %v7330_v20 = vmul.f32 %v15206_v16, %v7329_v24  ;;  %12295 = vtanh.f32 %v7492_v52  ;;  %v7491_v46 = vadd.f32 %v7484_v26, %v723_v23  ;;  %v17006_v26 = vld [vmem:[#allocation5_spill] sm:$0xff] }
 0xf35   :  { %11477 = vmatpush1.bf16.msra.mxu0 %v16012_v48  ;;  %11509 = vmatpush1.bf16.msra.mxu1 %v16013_v30  ;;  %v17010_v52 = vld [vmem:[#allocation9_spill] sm:$0xff] }
 0xf36   :  { %7331 = vadd.xlane.f32.xlu1 %v7330_v20  ;;  %11479 = vmatprep.subr.bf16.mxu0 %v16014_v0  ;;  %12297 = vtanh.f32 %v7491_v46  ;;  %v17013_v20 = vld [vmem:[#allocation12_spill] sm:$0xff]  ;;  %v17014_v23 = vld [vmem:[#allocation13_spill] sm:$0xff]  ;;  %v17015_v46 = vld [vmem:[#allocation14_spill] sm:$0xff] }
 0xf37   :  { %11511 = vmatprep.subr.bf16.mxu1 %v16015_v36  ;;  %7716 = vmatprep.mubr.f32.mxu0 %v15908_v57 }
 0xf38   :  { %7787 = vmatprep.mubr.f32.mxu1 %v15908_v57 }
 0xf39   :  { %11481 = vmatpush1.bf16.msra.mxu0 %v16016_v62  ;;  %11513 = vmatpush1.bf16.msra.mxu1 %v16017_v8 }
 0xf3a   :  { %11483 = vmatprep.subr.bf16.mxu0 %v16018_v14  ;;  %11515 = vmatprep.subr.bf16.mxu1 %v16019_v51 }
 0xf3c   :  { %v12292_v24 = vpop.eup %12291 }
 0xf3d   :  { %v7497_v17 = vmul.f32 0.5, %v12292_v24  ;;  %11485 = vmatpush1.bf16.msra.mxu0 %v16020_v38  ;;  %11517 = vmatpush1.bf16.msra.mxu1 %v16095_v22  ;;  %v12294_v42 = vpop.eup %12293  ;;  %v17016_v24 = vld [vmem:[#allocation15_spill] sm:$0xff] }
 0xf3e   :  { %11487 = vmatprep.subr.bf16.mxu0 %v16096_v40  ;;  %11519 = vmatprep.subr.bf16.mxu1 %v16023_v12  ;;  %v7498_v15 = vmul.f32 0.5, %v12294_v42  ;;  %v12296_v35 = vpop.eup %12295  ;;  %v17018_v42 = vld [vmem:[#allocation17_spill] sm:$0xff] }
 0xf3f   :  { %v7501_v58 = vadd.f32 0.5, %v7497_v17  ;;  %v17017_v17 = vld [vmem:[#allocation16_spill] sm:$0xff] }
 0xf40   :  { %v7502_v59 = vadd.f32 0.5, %v7498_v15  ;;  %v12298_v43 = vpop.eup %12297  ;;  %v17020_v15 = vld [vmem:[#allocation19_spill] sm:$0xff] }
 0xf41   :  { %v7506_v9 = vmul.f32 %v12296_v35, %v7501_v58  ;;  %11489 = vmatpush1.bf16.msra.mxu0 %v16024_v10  ;;  %11521 = vmatpush1.bf16.msra.mxu1 %v16025_v61  ;;  %v17019_v58 = vld [vmem:[#allocation18_spill] sm:$0xff]  ;;  %v17021_v35 = vld [vmem:[#allocation20_spill] sm:$0xff] }
 0xf42   :  { %11491 = vmatprep.subr.bf16.mxu0 %v16097_v44  ;;  %11523 = vmatprep.subr.bf16.mxu1 %v16098_v54  ;;  %v7505_v13 = vmul.f32 %v7502_v59, %v15092_v37  ;;  %v7499_v37 = vmul.f32 0.5, %v12298_v43  ;;  %v17022_v59 = vld [vmem:[#allocation21_spill] sm:$0xff]  ;;  %v17025_v43 = vld [vmem:[#allocation24_spill] sm:$0xff] }
 0xf44   :  { %v15228_v63 = vadd.f32 %v7506_v9, %v7505_v13  ;;  %v7503_v3 = vadd.f32 0.5, %v7499_v37  ;;  %v17023_v9 = vld [vmem:[#allocation22_spill] sm:$0xff]  ;;  %v17024_v13 = vld [vmem:[#allocation23_spill] sm:$0xff]  ;;  %v17026_v37 = vld [vmem:[#allocation25_spill] sm:$0xff] }
 0xf45   :  { %11493 = vmatpush1.bf16.msra.mxu0 %v16100_v31  ;;  %11525 = vmatpush1.bf16.msra.mxu1 %v16101_v2 }
 0xf46   :  { %11495 = vmatprep.subr.bf16.mxu0 %v16102_v1  ;;  %11527 = vmatprep.subr.bf16.mxu1 %v16103_v32  ;;  %12299 = vtanh.f32 %v15228_v63 }
 0xf49   :  { %11497 = vmatpush1.bf16.msra.mxu0 %v16104_v25  ;;  %11529 = vmatpush1.bf16.msra.mxu1 %v16105_v5 }
 0xf4a   :  { %11499 = vmatprep.subr.bf16.mxu0 %v16106_v39  ;;  %11531 = vmatprep.subr.bf16.mxu1 %v16036_v7 }
 0xf4d   :  { %11501 = vmatpush1.bf16.msra.mxu0 %v16037_v6  ;;  %11533 = vmatpush1.bf16.msra.mxu1 %v16038_v27 }
 0xf4e   :  { %11503 = vmatprep.subr.bf16.mxu0 %v16039_v45  ;;  %11535 = vmatprep.subr.bf16.mxu1 %v16040_v18 }
 0xf50   :  { %v12300_v55 = vpop.eup %12299 }
 0xf51   :  { %11505 = vmatpush1.bf16.msra.mxu0 %v16922_v29  ;;  %11537 = vmatpush1.bf16.msra.mxu1 %v16923_v50  ;;  %v7509_v11 = vmul.f32 %v12300_v55, %v7503_v3  ;;  %v17027_v3 = vld [vmem:[#allocation26_spill] sm:$0xff]  ;;  %v17028_v55 = vld [vmem:[#allocation27_spill] sm:$0xff] }
 0xf52   :  { %11539 = vmatprep.subr.bf16.mxu0 %v17004_v28  ;;  %11571 = vmatprep.subr.bf16.mxu1 %v17005_v53 }
 0xf54   :  { %7717 = vmatmul.mubr.f32.vlgmr.msra.gmra.mrb[54].mxu0 %v7509_v11  ;;  %7788 = vmatmul.mubr.f32.vlgmr.msra.gmra.mrb[54].mxu1 %v7509_v11 }
 0xf55   :  { %11541 = vmatpush1.bf16.msra.mxu0 %v17006_v26  ;;  %11573 = vmatpush1.bf16.msra.mxu1 %v17007_v33  ;;  %v17084_v33 = vld [vmem:[#allocation109_spill] sm:$0xff]  ;;  %v17085_v26 = vld [vmem:[#allocation110_spill] sm:$0xff] }
 0xf56   :  { %11543 = vmatprep.subr.bf16.mxu0 %v17008_v41  ;;  %11575 = vmatprep.subr.bf16.mxu1 %v17009_v34 }
 0xf57   :  { %7896 = vmatprep.mubr.f32.mxu0 %v15908_v57  ;;  %7967 = vmatprep.mubr.f32.mxu1 %v15908_v57 }
 0xf59   :  { %11545 = vmatpush1.bf16.msra.mxu0 %v17010_v52  ;;  %11577 = vmatpush1.bf16.msra.mxu1 %v17011_v49  ;;  %v126_v49 = vpop.permute.xlu1 %125  ;;  %v17074_v52 = vld [vmem:[#allocation100_spill] sm:$0xff] }
 0xf5a   :  { %11547 = vmatprep.subr.bf16.mxu0 %v17012_v4  ;;  %11579 = vmatprep.subr.bf16.mxu1 %v17013_v20  ;;  %v210_v34 = vmul.f32 %v17074_v52, %v126_v49 }
 0xf5d   :  { %11549 = vmatpush1.bf16.msra.mxu0 %v17014_v23  ;;  %11581 = vmatpush1.bf16.msra.mxu1 %v17015_v46 }
 0xf5e   :  { %11551 = vmatprep.subr.bf16.mxu0 %v17016_v24  ;;  %11583 = vmatprep.subr.bf16.mxu1 %v17017_v17  ;;  %v17071_v24 = vld [vmem:[#allocation113_spill] sm:$0xff] }
 0xf61   :  { %11553 = vmatpush1.bf16.msra.mxu0 %v17018_v42  ;;  %11585 = vmatpush1.bf16.msra.mxu1 %v17019_v58  ;;  %v17029_v42 = vld [vmem:[#allocation28_spill] sm:$0xff]  ;;  %v17030_v58 = vld [vmem:[#allocation29_spill] sm:$0xff] }
 0xf62   :  { %11555 = vmatprep.subr.bf16.mxu0 %v17020_v15  ;;  %11587 = vmatprep.subr.bf16.mxu1 %v17021_v35  ;;  %v17031_v15 = vld [vmem:[#allocation30_spill] sm:$0xff]  ;;  %v17032_v35 = vld [vmem:[#allocation31_spill] sm:$0xff] }
 0xf65   :  { %11557 = vmatpush1.bf16.msra.mxu0 %v17022_v59  ;;  %11589 = vmatpush1.bf16.msra.mxu1 %v17023_v9  ;;  %v17033_v59 = vld [vmem:[#allocation32_spill] sm:$0xff]  ;;  %v17034_v9 = vld [vmem:[#allocation33_spill] sm:$0xff] }
 0xf66   :  { %11559 = vmatprep.subr.bf16.mxu0 %v17024_v13  ;;  %11591 = vmatprep.subr.bf16.mxu1 %v17025_v43  ;;  %v17035_v13 = vld [vmem:[#allocation34_spill] sm:$0xff]  ;;  %v17036_v43 = vld [vmem:[#allocation35_spill] sm:$0xff] }
 0xf69   :  { %11561 = vmatpush1.bf16.msra.mxu0 %v17026_v37  ;;  %11593 = vmatpush1.bf16.msra.mxu1 %v17027_v3  ;;  %v17037_v37 = vld [vmem:[#allocation36_spill] sm:$0xff]  ;;  %v17070_v3 = vld [vmem:[#allocation99_spill] sm:$0xff] }
 0xf6a   :  { %11563 = vmatprep.subr.bf16.mxu0 %v17028_v55  ;;  %11595 = vmatprep.subr.bf16.mxu1 %v17029_v42  ;;  %v17038_v55 = vld [vmem:[#allocation37_spill] sm:$0xff]  ;;  %v17039_v42 = vld [vmem:[#allocation38_spill] sm:$0xff] }
 0xf6d   :  { %11565 = vmatpush1.bf16.msra.mxu0 %v17030_v58  ;;  %11597 = vmatpush1.bf16.msra.mxu1 %v17031_v15  ;;  %v17040_v58 = vld [vmem:[#allocation39_spill] sm:$0xff]  ;;  %v17041_v15 = vld [vmem:[#allocation40_spill] sm:$0xff] }
 0xf6e   :  { %11567 = vmatprep.subr.bf16.mxu0 %v17032_v35  ;;  %11599 = vmatprep.subr.bf16.mxu1 %v17033_v59  ;;  %v17051_v59 = vld [vmem:[#allocation50_spill] sm:$0xff]  ;;  %v17052_v35 = vld [vmem:[#allocation51_spill] sm:$0xff] }
 0xf71   :  { %11569 = vmatpush1.bf16.msra.mxu0 %v17034_v9  ;;  %11601 = vmatpush1.bf16.msra.mxu1 %v17035_v13  ;;  %v17042_v9 = vld [vmem:[#allocation41_spill] sm:$0xff]  ;;  %v17043_v13 = vld [vmem:[#allocation42_spill] sm:$0xff] }
 0xf72   :  { %11603 = vmatprep.subr.bf16.mxu0 %v17036_v43  ;;  %11635 = vmatprep.subr.bf16.mxu1 %v17037_v37  ;;  %v17044_v43 = vld [vmem:[#allocation43_spill] sm:$0xff]  ;;  %v17045_v37 = vld [vmem:[#allocation44_spill] sm:$0xff] }
 0xf74   :  { %7897 = vmatmul.mubr.f32.vlgmr.msra.gmra.mrb[56].mxu0 %v7509_v11  ;;  %7968 = vmatmul.mubr.f32.vlgmr.msra.gmra.mrb[56].mxu1 %v7509_v11  ;;  %v17046_v11 = vld [vmem:[#allocation45_spill] sm:$0xff] }
 0xf75   :  { %11605 = vmatpush1.bf16.msra.mxu0 %v17038_v55  ;;  %11637 = vmatpush1.bf16.msra.mxu1 %v17039_v42  ;;  %v17047_v55 = vld [vmem:[#allocation46_spill] sm:$0xff]  ;;  %v17048_v42 = vld [vmem:[#allocation47_spill] sm:$0xff] }
 0xf76   :  { %11607 = vmatprep.subr.bf16.mxu0 %v17040_v58  ;;  %11639 = vmatprep.subr.bf16.mxu1 %v17041_v15  ;;  %v17049_v58 = vld [vmem:[#allocation48_spill] sm:$0xff]  ;;  %v17050_v15 = vld [vmem:[#allocation49_spill] sm:$0xff] }
 0xf77   :  { %8059 = vmatprep.mubr.f32.mxu0 %v15908_v57  ;;  %8130 = vmatprep.mubr.f32.mxu1 %v15908_v57 }
 0xf79   :  { %11609 = vmatpush1.bf16.msra.mxu0 %v17042_v9  ;;  %11641 = vmatpush1.bf16.msra.mxu1 %v17043_v13  ;;  %v17053_v9 = vld [vmem:[#allocation52_spill] sm:$0xff]  ;;  %v17054_v13 = vld [vmem:[#allocation53_spill] sm:$0xff] }
 0xf7a   :  { %11611 = vmatprep.subr.bf16.mxu0 %v17044_v43  ;;  %11643 = vmatprep.subr.bf16.mxu1 %v17045_v37  ;;  %v17055_v43 = vld [vmem:[#allocation54_spill] sm:$0xff]  ;;  %v17056_v37 = vld [vmem:[#allocation55_spill] sm:$0xff] }
 0xf7d   :  { %11613 = vmatpush1.bf16.msra.mxu0 %v17046_v11  ;;  %11645 = vmatpush1.bf16.msra.mxu1 %v17047_v55  ;;  %v17057_v11 = vld [vmem:[#allocation56_spill] sm:$0xff]  ;;  %v17058_v55 = vld [vmem:[#allocation57_spill] sm:$0xff] }
 0xf7e   :  { %11615 = vmatprep.subr.bf16.mxu0 %v17048_v42  ;;  %11647 = vmatprep.subr.bf16.mxu1 %v17049_v58  ;;  %v17059_v42 = vld [vmem:[#allocation58_spill] sm:$0xff]  ;;  %v17060_v58 = vld [vmem:[#allocation59_spill] sm:$0xff] }
 0xf81   :  { %11617 = vmatpush1.bf16.msra.mxu0 %v17050_v15  ;;  %11649 = vmatpush1.bf16.msra.mxu1 %v17051_v59  ;;  %v17061_v15 = vld [vmem:[#allocation60_spill] sm:$0xff]  ;;  %v17062_v59 = vld [vmem:[#allocation61_spill] sm:$0xff] }
 0xf82   :  { %11619 = vmatprep.subr.bf16.mxu0 %v17052_v35  ;;  %11651 = vmatprep.subr.bf16.mxu1 %v17053_v9  ;;  %v17063_v35 = vld [vmem:[#allocation62_spill] sm:$0xff]  ;;  %v17064_v9 = vld [vmem:[#allocation63_spill] sm:$0xff] }
 0xf85   :  { %11621 = vmatpush1.bf16.msra.mxu0 %v17054_v13  ;;  %11653 = vmatpush1.bf16.msra.mxu1 %v17055_v43  ;;  %v17065_v13 = vld [vmem:[#allocation64_spill] sm:$0xff]  ;;  %v17066_v43 = vld [vmem:[#allocation65_spill] sm:$0xff] }
 0xf86   :  { %11623 = vmatprep.subr.bf16.mxu0 %v17056_v37  ;;  %11655 = vmatprep.subr.bf16.mxu1 %v17057_v11  ;;  %v17067_v37 = vld [vmem:[#allocation66_spill] sm:$0xff]  ;;  %v17068_v11 = vld [vmem:[#allocation67_spill] sm:$0xff] }
 0xf89   :  { %11625 = vmatpush1.bf16.msra.mxu0 %v17058_v55  ;;  %11657 = vmatpush1.bf16.msra.mxu1 %v17059_v42  ;;  %v17069_v55 = vld [vmem:[#allocation68_spill] sm:$0xff] }
 0xf8a   :  { %11627 = vmatprep.subr.bf16.mxu0 %v17060_v58  ;;  %11659 = vmatprep.subr.bf16.mxu1 %v17061_v15 }
 0xf8d   :  { %11629 = vmatpush1.bf16.msra.mxu0 %v17062_v59  ;;  %11661 = vmatpush1.bf16.msra.mxu1 %v17063_v35 }
 0xf8e   :  { %11631 = vmatprep.subr.bf16.mxu0 %v17064_v9  ;;  %11663 = vmatprep.subr.bf16.mxu1 %v17065_v13  ;;  %v17072_v9 = vld [vmem:[#allocation114_spill] sm:$0xff] }
 0xf91   :  { %11633 = vmatpush1.bf16.msra.mxu0 %v17066_v43  ;;  %11665 = vmatpush1.bf16.msra.mxu1 %v17067_v37  ;;  %v17073_v43 = vld [vmem:[#allocation115_spill] sm:$0xff] }
 0xf92   :  { %11667 = vmatprep.subr.bf16.mxu0 %v17068_v11  ;;  %11699 = vmatprep.subr.bf16.mxu1 %v17069_v55 }
0x1027   :  { %v7718_v42 = vpop.f32.mrb[54].mxu0  ;;  %v7789_v58 = vpop.f32.mrb[54].mxu1 }
0x1028   :  { %v7794_v15 = vadd.f32 %v7718_v42, %v17070_v3  ;;  %v7720_v17 = vpop.f32.mrb[55].mxu0  ;;  %v7791_v59 = vpop.f32.mrb[55].mxu1  ;;  %v7796_v13 = vadd.f32 %v7789_v58, %v17073_v43 }
0x1029   :  { %v7795_v35 = vadd.f32 %v7720_v17, %v17071_v24  ;;  %v7797_v46 = vadd.f32 %v7791_v59, %v17072_v9  ;;  %v17075_v17 = vld [vmem:[#allocation101_spill] sm:$0xff]  ;;  %v363_v9 = vpop.permute.xlu0 %362 }
0x102a   :  { %12301 = vtanh.f32 %v7794_v15  ;;  %v211_v15 = vmul.f32 %v17075_v17, %v126_v49  ;;  %v17083_v17 = vld [vmem:[#allocation108_spill] sm:$0xff] }
0x102b   :  { %12303 = vtanh.f32 %v7795_v35  ;;  %v17076_v35 = vld [vmem:[#allocation102_spill] sm:$0xff] }
0x102c   :  { %12305 = vtanh.f32 %v7797_v46  ;;  %v213_v46 = vmul.f32 %v17076_v35, %v126_v49 }
0x102d   :  { %12307 = vtanh.f32 %v7796_v13 }
0x102e   :  { %v298_v41 = vadd.f32 %v17083_v17, %v213_v46 }
0x1034   :  { %v12302_v37 = vpop.eup %12301 }
0x1035   :  { %v7802_v23 = vmul.f32 0.5, %v12302_v37  ;;  %v12304_v11 = vpop.eup %12303  ;;  %v17078_v37 = vld [vmem:[#allocation103_spill] sm:$0xff] }
0x1036   :  { %v7803_v55 = vmul.f32 0.5, %v12304_v11  ;;  %v12306_v4 = vpop.eup %12305  ;;  %v446_v43 = vmul.f32 %v17078_v37, %v363_v9  ;;  %v17080_v11 = vld [vmem:[#allocation105_spill] sm:$0xff] }
0x1037   :  { %v7806_v20 = vadd.f32 0.5, %v7802_v23  ;;  %v17079_v23 = vld [vmem:[#allocation104_spill] sm:$0xff]  ;;  %v447_v24 = vmul.f32 %v17080_v11, %v363_v9 }
0x1038   :  { %v7807_v42 = vadd.f32 0.5, %v7803_v55  ;;  %v295_v13 = vadd.f32 %v17079_v23, %v210_v34  ;;  %v17082_v55 = vld [vmem:[#allocation107_spill] sm:$0xff] }
0x1039   :  { %v7811_v3 = vmul.f32 %v12306_v4, %v7806_v20  ;;  %v17081_v4 = vld [vmem:[#allocation106_spill] sm:$0xff]  ;;  %v449_v52 = vmul.f32 %v17082_v55, %v363_v9  ;;  %v17086_v23 = vld [vmem:[#allocation111_spill] sm:$0xff] }
0x103a   :  { %v7810_v59 = vmul.f32 %v7807_v42, %v15190_v19  ;;  %v296_v20 = vadd.f32 %v17081_v4, %v211_v15  ;;  %v12308_v19 = vpop.eup %12307  ;;  %v578_v42 = vpop.permute.xlu1 %577  ;;  %v510_v35 = vadd.f32 %v446_v43, %v295_v13 }
0x103b   :  { %v662_v37 = vmul.f32 %v17085_v26, %v578_v42  ;;  %v7804_v53 = vmul.f32 0.5, %v12308_v19  ;;  %v513_v34 = vadd.f32 %v449_v52, %v298_v41  ;;  %v664_v11 = vmul.f32 %v17086_v23, %v578_v42 }
0x103c   :  { %v15323_v58 = vadd.f32 %v7811_v3, %v7810_v59  ;;  %v661_v3 = vmul.f32 %v17084_v33, %v578_v42  ;;  %v511_v59 = vadd.f32 %v447_v24, %v296_v20  ;;  %v448_v24 = vmul.f32 %v13447_v60, %v363_v9 }
0x103d   :  { %v7808_v50 = vadd.f32 0.5, %v7804_v53  ;;  %v728_v29 = vadd.f32 %v664_v11, %v513_v34 }
0x103e   :  { %17077 = vst [vmem:[#allocation80_spill] sm:$0xff] %v15323_v58  ;;  %12309 = vtanh.f32 %v15323_v58  ;;  %v212_v58 = vmul.f32 %v16011_v56, %v126_v49  ;;  %v725_v28 = vadd.f32 %v661_v3, %v510_v35  ;;  %v726_v55 = vadd.f32 %v662_v37, %v511_v59 }
0x1040   :  { %v297_v20 = vadd.f32 %v13450_v21, %v212_v58 }
0x1042   :  { %v512_v35 = vadd.f32 %v448_v24, %v297_v20  ;;  %v17090_v24 = vld [vmem:[#allocation4_spill] sm:$0xff] }
0x1047   :  { %v7898_v15 = vpop.f32.mrb[56].mxu0  ;;  %v7969_v4 = vpop.f32.mrb[56].mxu1 }
0x1048   :  { %v7974_v46 = vadd.f32 %v7898_v15, %v725_v28  ;;  %v7900_v17 = vpop.f32.mrb[57].mxu0  ;;  %v7971_v43 = vpop.f32.mrb[57].mxu1  ;;  %v663_v28 = vmul.f32 %v13457_v47, %v578_v42 }
0x1049   :  { %v12310_v13 = vpop.eup %12309  ;;  %v7975_v19 = vadd.f32 %v7900_v17, %v726_v55  ;;  %v7977_v41 = vadd.f32 %v7971_v43, %v728_v29  ;;  %v17088_v43 = vld [vmem:[#allocation98_spill] sm:$0xff] }
0x104a   :  { %12311 = vtanh.f32 %v7974_v46  ;;  %v7814_v52 = vmul.f32 %v12310_v13, %v7808_v50  ;;  %v727_v29 = vadd.f32 %v663_v28, %v512_v35  ;;  %v17087_v46 = vld [vmem:[#allocation97_spill] sm:$0xff]  ;;  %v17089_v13 = vld [vmem:[#allocation3_spill] sm:$0xff]  ;;  %v17096_v28 = vld [vmem:[#allocation10_spill] sm:$0xff] }
0x104b   :  { %12313 = vtanh.f32 %v7975_v19  ;;  %v17091_v19 = vld [vmem:[#allocation5_spill] sm:$0xff] }
0x104c   :  { %8060 = vmatmul.mubr.f32.vlgmr.msra.gmra.mrb[58].mxu0 %v7814_v52  ;;  %8131 = vmatmul.mubr.f32.vlgmr.msra.gmra.mrb[58].mxu1 %v7814_v52  ;;  %v7815_v49 = vmul.f32 %v15206_v16, %v7814_v52  ;;  %12315 = vtanh.f32 %v7977_v41  ;;  %v7976_v50 = vadd.f32 %v7969_v4, %v727_v29  ;;  %v17092_v41 = vld [vmem:[#allocation6_spill] sm:$0xff]  ;;  %v17093_v52 = vld [vmem:[#allocation7_spill] sm:$0xff]  ;;  %v17095_v35 = vld [vmem:[#allocation9_spill] sm:$0xff] }
0x104d   :  { %11669 = vmatpush1.bf16.msra.mxu0 %v16012_v48  ;;  %11701 = vmatpush1.bf16.msra.mxu1 %v16013_v30  ;;  %v17097_v29 = vld [vmem:[#allocation11_spill] sm:$0xff] }
0x104e   :  { %7816 = vadd.xlane.f32.xlu0 %v7815_v49  ;;  %11671 = vmatprep.subr.bf16.mxu0 %v16014_v0  ;;  %12317 = vtanh.f32 %v7976_v50  ;;  %v17094_v49 = vld [vmem:[#allocation8_spill] sm:$0xff] }
0x104f   :  { %11703 = vmatprep.subr.bf16.mxu1 %v16015_v36  ;;  %8201 = vmatprep.mubr.f32.mxu0 %v15908_v57  ;;  %v17098_v50 = vld [vmem:[#allocation12_spill] sm:$0xff] }
0x1050   :  { %8272 = vmatprep.mubr.f32.mxu1 %v15908_v57 }
0x1051   :  { %11673 = vmatpush1.bf16.msra.mxu0 %v16016_v62  ;;  %11705 = vmatpush1.bf16.msra.mxu1 %v16017_v8 }
0x1052   :  { %11675 = vmatprep.subr.bf16.mxu0 %v16018_v14  ;;  %11707 = vmatprep.subr.bf16.mxu1 %v16019_v51 }
0x1054   :  { %v12312_v53 = vpop.eup %12311 }
0x1055   :  { %v7982_v9 = vmul.f32 0.5, %v12312_v53  ;;  %11677 = vmatpush1.bf16.msra.mxu0 %v16020_v38  ;;  %11709 = vmatpush1.bf16.msra.mxu1 %v16095_v22  ;;  %v12314_v17 = vpop.eup %12313  ;;  %v17099_v53 = vld [vmem:[#allocation13_spill] sm:$0xff] }
0x1056   :  { %11679 = vmatprep.subr.bf16.mxu0 %v16096_v40  ;;  %11711 = vmatprep.subr.bf16.mxu1 %v16023_v12  ;;  %v7983_v37 = vmul.f32 0.5, %v12314_v17  ;;  %v12316_v11 = vpop.eup %12315  ;;  %v17101_v17 = vld [vmem:[#allocation15_spill] sm:$0xff] }
0x1057   :  { %v7986_v58 = vadd.f32 0.5, %v7982_v9  ;;  %v17100_v9 = vld [vmem:[#allocation14_spill] sm:$0xff] }
0x1058   :  { %v7987_v55 = vadd.f32 0.5, %v7983_v37  ;;  %v12318_v59 = vpop.eup %12317  ;;  %v17103_v37 = vld [vmem:[#allocation17_spill] sm:$0xff] }
0x1059   :  { %v7991_v42 = vmul.f32 %v12316_v11, %v7986_v58  ;;  %11681 = vmatpush1.bf16.msra.mxu0 %v16024_v10  ;;  %11713 = vmatpush1.bf16.msra.mxu1 %v16025_v61  ;;  %v17102_v58 = vld [vmem:[#allocation16_spill] sm:$0xff]  ;;  %v17104_v11 = vld [vmem:[#allocation18_spill] sm:$0xff] }
0x105a   :  { %11683 = vmatprep.subr.bf16.mxu0 %v16097_v44  ;;  %11715 = vmatprep.subr.bf16.mxu1 %v16098_v54  ;;  %v7990_v4 = vmul.f32 %v7987_v55, %v15228_v63  ;;  %v7984_v63 = vmul.f32 0.5, %v12318_v59  ;;  %v17105_v55 = vld [vmem:[#allocation19_spill] sm:$0xff]  ;;  %v17108_v59 = vld [vmem:[#allocation22_spill] sm:$0xff] }
0x105c   :  { %v15359_v3 = vadd.f32 %v7991_v42, %v7990_v4  ;;  %v7988_v34 = vadd.f32 0.5, %v7984_v63  ;;  %v17106_v42 = vld [vmem:[#allocation20_spill] sm:$0xff]  ;;  %v17107_v4 = vld [vmem:[#allocation21_spill] sm:$0xff]  ;;  %v17109_v63 = vld [vmem:[#allocation23_spill] sm:$0xff] }
0x105d   :  { %11685 = vmatpush1.bf16.msra.mxu0 %v16100_v31  ;;  %11717 = vmatpush1.bf16.msra.mxu1 %v16101_v2 }
0x105e   :  { %11687 = vmatprep.subr.bf16.mxu0 %v16102_v1  ;;  %11719 = vmatprep.subr.bf16.mxu1 %v16103_v32  ;;  %12319 = vtanh.f32 %v15359_v3 }
0x1061   :  { %11689 = vmatpush1.bf16.msra.mxu0 %v16104_v25  ;;  %11721 = vmatpush1.bf16.msra.mxu1 %v16105_v5 }
0x1062   :  { %11691 = vmatprep.subr.bf16.mxu0 %v16106_v39  ;;  %11723 = vmatprep.subr.bf16.mxu1 %v16036_v7 }
0x1065   :  { %11693 = vmatpush1.bf16.msra.mxu0 %v16037_v6  ;;  %11725 = vmatpush1.bf16.msra.mxu1 %v16038_v27 }
0x1066   :  { %11695 = vmatprep.subr.bf16.mxu0 %v16039_v45  ;;  %11727 = vmatprep.subr.bf16.mxu1 %v16040_v18 }
0x1068   :  { %v12320_v15 = vpop.eup %12319 }
0x1069   :  { %11697 = vmatpush1.bf16.msra.mxu0 %v17087_v46  ;;  %11729 = vmatpush1.bf16.msra.mxu1 %v17088_v43  ;;  %v7994_v20 = vmul.f32 %v12320_v15, %v7988_v34  ;;  %v17110_v34 = vld [vmem:[#allocation24_spill] sm:$0xff]  ;;  %v17111_v15 = vld [vmem:[#allocation25_spill] sm:$0xff] }
0x106a   :  { %11731 = vmatprep.subr.bf16.mxu0 %v17089_v13  ;;  %11763 = vmatprep.subr.bf16.mxu1 %v17090_v24  ;;  %v17112_v13 = vld [vmem:[#allocation26_spill] sm:$0xff]  ;;  %v17113_v24 = vld [vmem:[#allocation27_spill] sm:$0xff] }
0x106c   :  { %8202 = vmatmul.mubr.f32.vlgmr.msra.gmra.mrb[58].mxu0 %v7994_v20  ;;  %8273 = vmatmul.mubr.f32.vlgmr.msra.gmra.mrb[58].mxu1 %v7994_v20 }
0x106d   :  { %11733 = vmatpush1.bf16.msra.mxu0 %v17091_v19  ;;  %11765 = vmatpush1.bf16.msra.mxu1 %v17092_v41  ;;  %v17114_v19 = vld [vmem:[#allocation28_spill] sm:$0xff]  ;;  %v17115_v41 = vld [vmem:[#allocation29_spill] sm:$0xff] }
0x106e   :  { %11735 = vmatprep.subr.bf16.mxu0 %v17093_v52  ;;  %11767 = vmatprep.subr.bf16.mxu1 %v17094_v49  ;;  %v17116_v52 = vld [vmem:[#allocation30_spill] sm:$0xff]  ;;  %v17117_v49 = vld [vmem:[#allocation31_spill] sm:$0xff] }
0x106f   :  { %8381 = vmatprep.mubr.f32.mxu0 %v15908_v57  ;;  %8452 = vmatprep.mubr.f32.mxu1 %v15908_v57 }
0x1071   :  { %11737 = vmatpush1.bf16.msra.mxu0 %v17095_v35  ;;  %11769 = vmatpush1.bf16.msra.mxu1 %v17096_v28  ;;  %v17118_v35 = vld [vmem:[#allocation32_spill] sm:$0xff]  ;;  %v17119_v28 = vld [vmem:[#allocation33_spill] sm:$0xff] }
0x1072   :  { %11739 = vmatprep.subr.bf16.mxu0 %v17097_v29  ;;  %11771 = vmatprep.subr.bf16.mxu1 %v17098_v50  ;;  %v17120_v29 = vld [vmem:[#allocation34_spill] sm:$0xff]  ;;  %v17121_v50 = vld [vmem:[#allocation35_spill] sm:$0xff] }
0x1075   :  { %11741 = vmatpush1.bf16.msra.mxu0 %v17099_v53  ;;  %11773 = vmatpush1.bf16.msra.mxu1 %v17100_v9  ;;  %v17122_v53 = vld [vmem:[#allocation36_spill] sm:$0xff]  ;;  %v17123_v9 = vld [vmem:[#allocation37_spill] sm:$0xff] }
0x1076   :  { %11743 = vmatprep.subr.bf16.mxu0 %v17101_v17  ;;  %11775 = vmatprep.subr.bf16.mxu1 %v17102_v58  ;;  %v17124_v17 = vld [vmem:[#allocation38_spill] sm:$0xff]  ;;  %v17125_v58 = vld [vmem:[#allocation39_spill] sm:$0xff] }
0x1079   :  { %11745 = vmatpush1.bf16.msra.mxu0 %v17103_v37  ;;  %11777 = vmatpush1.bf16.msra.mxu1 %v17104_v11  ;;  %v17126_v37 = vld [vmem:[#allocation40_spill] sm:$0xff]  ;;  %v17127_v11 = vld [vmem:[#allocation41_spill] sm:$0xff] }
0x107a   :  { %11747 = vmatprep.subr.bf16.mxu0 %v17105_v55  ;;  %11779 = vmatprep.subr.bf16.mxu1 %v17106_v42  ;;  %v17128_v55 = vld [vmem:[#allocation42_spill] sm:$0xff]  ;;  %v17129_v42 = vld [vmem:[#allocation43_spill] sm:$0xff] }
0x107d   :  { %11749 = vmatpush1.bf16.msra.mxu0 %v17107_v4  ;;  %11781 = vmatpush1.bf16.msra.mxu1 %v17108_v59  ;;  %v17130_v4 = vld [vmem:[#allocation44_spill] sm:$0xff]  ;;  %v17132_v59 = vld [vmem:[#allocation46_spill] sm:$0xff] }
0x107e   :  { %11751 = vmatprep.subr.bf16.mxu0 %v17109_v63  ;;  %11783 = vmatprep.subr.bf16.mxu1 %v17110_v34  ;;  %v17133_v63 = vld [vmem:[#allocation47_spill] sm:$0xff]  ;;  %v17134_v34 = vld [vmem:[#allocation48_spill] sm:$0xff] }
0x1081   :  { %11753 = vmatpush1.bf16.msra.mxu0 %v17111_v15  ;;  %11785 = vmatpush1.bf16.msra.mxu1 %v17112_v13  ;;  %v17135_v15 = vld [vmem:[#allocation49_spill] sm:$0xff]  ;;  %v17136_v13 = vld [vmem:[#allocation50_spill] sm:$0xff] }
0x1082   :  { %11755 = vmatprep.subr.bf16.mxu0 %v17113_v24  ;;  %11787 = vmatprep.subr.bf16.mxu1 %v17114_v19  ;;  %v17137_v24 = vld [vmem:[#allocation51_spill] sm:$0xff]  ;;  %v17138_v19 = vld [vmem:[#allocation52_spill] sm:$0xff] }
0x1085   :  { %11757 = vmatpush1.bf16.msra.mxu0 %v17115_v41  ;;  %11789 = vmatpush1.bf16.msra.mxu1 %v17116_v52  ;;  %v17139_v41 = vld [vmem:[#allocation53_spill] sm:$0xff]  ;;  %v17140_v52 = vld [vmem:[#allocation54_spill] sm:$0xff] }
0x1086   :  { %11759 = vmatprep.subr.bf16.mxu0 %v17117_v49  ;;  %11791 = vmatprep.subr.bf16.mxu1 %v17118_v35  ;;  %v17141_v49 = vld [vmem:[#allocation55_spill] sm:$0xff]  ;;  %v17142_v35 = vld [vmem:[#allocation56_spill] sm:$0xff] }
0x1089   :  { %11761 = vmatpush1.bf16.msra.mxu0 %v17119_v28  ;;  %11793 = vmatpush1.bf16.msra.mxu1 %v17120_v29  ;;  %v17143_v28 = vld [vmem:[#allocation57_spill] sm:$0xff]  ;;  %v17144_v29 = vld [vmem:[#allocation58_spill] sm:$0xff] }
0x108a   :  { %11795 = vmatprep.subr.bf16.mxu0 %v17121_v50  ;;  %11827 = vmatprep.subr.bf16.mxu1 %v17122_v53  ;;  %v17145_v50 = vld [vmem:[#allocation59_spill] sm:$0xff]  ;;  %v17146_v53 = vld [vmem:[#allocation60_spill] sm:$0xff] }
0x108c   :  { %8382 = vmatmul.mubr.f32.vlgmr.msra.gmra.mrb[60].mxu0 %v7994_v20  ;;  %8453 = vmatmul.mubr.f32.vlgmr.msra.gmra.mrb[60].mxu1 %v7994_v20  ;;  %v17131_v20 = vld [vmem:[#allocation45_spill] sm:$0xff] }
0x108d   :  { %11797 = vmatpush1.bf16.msra.mxu0 %v17123_v9  ;;  %11829 = vmatpush1.bf16.msra.mxu1 %v17124_v17  ;;  %v17147_v9 = vld [vmem:[#allocation61_spill] sm:$0xff]  ;;  %v17148_v17 = vld [vmem:[#allocation62_spill] sm:$0xff] }
0x108e   :  { %11799 = vmatprep.subr.bf16.mxu0 %v17125_v58  ;;  %11831 = vmatprep.subr.bf16.mxu1 %v17126_v37  ;;  %v17149_v58 = vld [vmem:[#allocation63_spill] sm:$0xff]  ;;  %v17150_v37 = vld [vmem:[#allocation64_spill] sm:$0xff] }
0x108f   :  { %8544 = vmatprep.mubr.f32.mxu0 %v15908_v57  ;;  %8615 = vmatprep.mubr.f32.mxu1 %v15908_v57 }
0x1091   :  { %11801 = vmatpush1.bf16.msra.mxu0 %v17127_v11  ;;  %11833 = vmatpush1.bf16.msra.mxu1 %v17128_v55  ;;  %v17151_v11 = vld [vmem:[#allocation65_spill] sm:$0xff]  ;;  %v17152_v55 = vld [vmem:[#allocation66_spill] sm:$0xff] }
0x1092   :  { %11803 = vmatprep.subr.bf16.mxu0 %v17129_v42  ;;  %11835 = vmatprep.subr.bf16.mxu1 %v17130_v4  ;;  %v17153_v42 = vld [vmem:[#allocation67_spill] sm:$0xff]  ;;  %v17154_v4 = vld [vmem:[#allocation68_spill] sm:$0xff] }
0x1095   :  { %11805 = vmatpush1.bf16.msra.mxu0 %v17131_v20  ;;  %11837 = vmatpush1.bf16.msra.mxu1 %v17132_v59 }
0x1096   :  { %11807 = vmatprep.subr.bf16.mxu0 %v17133_v63  ;;  %11839 = vmatprep.subr.bf16.mxu1 %v17134_v34  ;;  %v17155_v63 = vld [vmem:[#allocation99_spill] sm:$0xff] }
0x1099   :  { %11809 = vmatpush1.bf16.msra.mxu0 %v17135_v15  ;;  %11841 = vmatpush1.bf16.msra.mxu1 %v17136_v13 }
0x109a   :  { %11811 = vmatprep.subr.bf16.mxu0 %v17137_v24  ;;  %11843 = vmatprep.subr.bf16.mxu1 %v17138_v19  ;;  %v17156_v24 = vld [vmem:[#allocation113_spill] sm:$0xff] }
0x109d   :  { %11813 = vmatpush1.bf16.msra.mxu0 %v17139_v41  ;;  %11845 = vmatpush1.bf16.msra.mxu1 %v17140_v52  ;;  %v17157_v41 = vld [vmem:[#allocation114_spill] sm:$0xff] }
0x109e   :  { %11815 = vmatprep.subr.bf16.mxu0 %v17141_v49  ;;  %11847 = vmatprep.subr.bf16.mxu1 %v17142_v35  ;;  %v17158_v49 = vld [vmem:[#allocation115_spill] sm:$0xff] }
0x10a1   :  { %11817 = vmatpush1.bf16.msra.mxu0 %v17143_v28  ;;  %11849 = vmatpush1.bf16.msra.mxu1 %v17144_v29 }
0x10a2   :  { %11819 = vmatprep.subr.bf16.mxu0 %v17145_v50  ;;  %11851 = vmatprep.subr.bf16.mxu1 %v17146_v53 }
0x10a5   :  { %11821 = vmatpush1.bf16.msra.mxu0 %v17147_v9  ;;  %11853 = vmatpush1.bf16.msra.mxu1 %v17148_v17 }
0x10a6   :  { %11823 = vmatprep.subr.bf16.mxu0 %v17149_v58  ;;  %11855 = vmatprep.subr.bf16.mxu1 %v17150_v37  ;;  %v131_v58 = vpop.permute.xlu0 %130 }
0x10a9   :  { %11825 = vmatpush1.bf16.msra.mxu0 %v17151_v11  ;;  %11857 = vmatpush1.bf16.msra.mxu1 %v17152_v55  ;;  %v17159_v55 = vld [vmem:[#allocation100_spill] sm:$0xff] }
0x10aa   :  { %11859 = vmatprep.subr.bf16.mxu0 %v17153_v42  ;;  %11891 = vmatprep.subr.bf16.mxu1 %v17154_v4  ;;  %v214_v42 = vmul.f32 %v17159_v55, %v131_v58  ;;  %v17160_v4 = vld [vmem:[#allocation101_spill] sm:$0xff] }
0x113f   :  { %v8203_v20 = vpop.f32.mrb[58].mxu0  ;;  %v8274_v59 = vpop.f32.mrb[58].mxu1 }
0x1140   :  { %v8279_v34 = vadd.f32 %v8203_v20, %v17155_v63  ;;  %v8205_v15 = vpop.f32.mrb[59].mxu0  ;;  %v8276_v13 = vpop.f32.mrb[59].mxu1  ;;  %v8281_v35 = vadd.f32 %v8274_v59, %v17158_v49  ;;  %v215_v20 = vmul.f32 %v17160_v4, %v131_v58  ;;  %v17169_v4 = vld [vmem:[#allocation108_spill] sm:$0xff] }
0x1141   :  { %v8280_v19 = vadd.f32 %v8205_v15, %v17156_v24  ;;  %v8282_v52 = vadd.f32 %v8276_v13, %v17157_v41  ;;  %v17161_v15 = vld [vmem:[#allocation80_spill] sm:$0xff] }
0x1142   :  { %12321 = vtanh.f32 %v8279_v34  ;;  %v367_v34 = vpop.permute.xlu1 %366 }
0x1143   :  { %12323 = vtanh.f32 %v8280_v19  ;;  %v17162_v19 = vld [vmem:[#allocation102_spill] sm:$0xff] }
0x1144   :  { %12325 = vtanh.f32 %v8282_v52  ;;  %v217_v52 = vmul.f32 %v17162_v19, %v131_v58 }
0x1145   :  { %12327 = vtanh.f32 %v8281_v35 }
0x1146   :  { %v302_v24 = vadd.f32 %v17169_v4, %v217_v52 }
0x114c   :  { %v12322_v28 = vpop.eup %12321 }
0x114d   :  { %v8287_v29 = vmul.f32 0.5, %v12322_v28  ;;  %v12324_v50 = vpop.eup %12323  ;;  %v17164_v28 = vld [vmem:[#allocation103_spill] sm:$0xff] }
0x114e   :  { %v8288_v9 = vmul.f32 0.5, %v12324_v50  ;;  %v12326_v17 = vpop.eup %12325  ;;  %v450_v49 = vmul.f32 %v17164_v28, %v367_v34  ;;  %v17166_v50 = vld [vmem:[#allocation105_spill] sm:$0xff] }
0x114f   :  { %v8291_v53 = vadd.f32 0.5, %v8287_v29  ;;  %v17165_v29 = vld [vmem:[#allocation104_spill] sm:$0xff]  ;;  %v451_v41 = vmul.f32 %v17166_v50, %v367_v34  ;;  %v12328_v63 = vpop.eup %12327  ;;  %v216_v50 = vmul.f32 %v16011_v56, %v131_v58 }
0x1150   :  { %v8292_v37 = vadd.f32 0.5, %v8288_v9  ;;  %v299_v35 = vadd.f32 %v17165_v29, %v214_v42  ;;  %v8289_v28 = vmul.f32 0.5, %v12328_v63 }
0x1151   :  { %v8296_v11 = vmul.f32 %v12326_v17, %v8291_v53  ;;  %v17167_v53 = vld [vmem:[#allocation106_spill] sm:$0xff]  ;;  %v17168_v17 = vld [vmem:[#allocation107_spill] sm:$0xff] }
0x1152   :  { %v8295_v13 = vmul.f32 %v8292_v37, %v17161_v15  ;;  %v300_v9 = vadd.f32 %v17167_v53, %v215_v20  ;;  %v453_v55 = vmul.f32 %v17168_v17, %v367_v34  ;;  %v582_v37 = vpop.permute.xlu1 %581  ;;  %v514_v15 = vadd.f32 %v450_v49, %v299_v35 }
0x1153   :  { %v666_v19 = vmul.f32 %v17085_v26, %v582_v37  ;;  %v668_v29 = vmul.f32 %v17086_v23, %v582_v37  ;;  %v8293_v43 = vadd.f32 0.5, %v8289_v28  ;;  %v301_v26 = vadd.f32 %v13450_v21, %v216_v50 }
0x1154   :  { %v15454_v59 = vadd.f32 %v8296_v11, %v8295_v13  ;;  %v665_v11 = vmul.f32 %v17084_v33, %v582_v37  ;;  %v515_v13 = vadd.f32 %v451_v41, %v300_v9  ;;  %v517_v42 = vadd.f32 %v453_v55, %v302_v24 }
0x1155   :  { %v452_v33 = vmul.f32 %v13447_v60, %v367_v34  ;;  %v667_v58 = vmul.f32 %v13457_v47, %v582_v37 }
0x1156   :  { %17163 = vst [vmem:[#allocation81_spill] sm:$0xff] %v15454_v59  ;;  %12329 = vtanh.f32 %v15454_v59  ;;  %v729_v59 = vadd.f32 %v665_v11, %v514_v15  ;;  %v730_v17 = vadd.f32 %v666_v19, %v515_v13  ;;  %v732_v46 = vadd.f32 %v668_v29, %v517_v42 }
0x1157   :  { %v516_v41 = vadd.f32 %v452_v33, %v301_v26 }
0x1159   :  { %v731_v60 = vadd.f32 %v667_v58, %v516_v41  ;;  %v8837_v58 = vld [vmem:[%s15572_s8 + $0x5] ss:$0 sm:$0xff] }
0x115d   :  { %v17176_v37 = vld [vmem:[#allocation81_spill] sm:$0xff] }
0x115f   :  { %v8383_v20 = vpop.f32.mrb[60].mxu0  ;;  %v8454_v53 = vpop.f32.mrb[60].mxu1 }
0x1160   :  { %v8459_v52 = vadd.f32 %v8383_v20, %v729_v59  ;;  %v8385_v4 = vpop.f32.mrb[61].mxu0  ;;  %v8456_v49 = vpop.f32.mrb[61].mxu1  ;;  %v8461_v21 = vadd.f32 %v8454_v53, %v731_v60  ;;  %v8833_v53 = vld [vmem:[%s15572_s8 + $0x1] ss:$0 sm:$0xff] }
0x1161   :  { %v12330_v35 = vpop.eup %12329  ;;  %v8460_v63 = vadd.f32 %v8385_v4, %v730_v17  ;;  %v8462_v24 = vadd.f32 %v8456_v49, %v732_v46  ;;  %v1512_v20 = vpop.xlane.xlu0 %1511  ;;  %v8832_v4 = vld [vmem:[%s15572_s8] ss:$0 sm:$0xff]  ;;  %v8834_v49 = vld [vmem:[%s15572_s8 + $0x2] ss:$0 sm:$0xff] }
0x1162   :  { %12331 = vtanh.f32 %v8459_v52  ;;  %v8299_v23 = vmul.f32 %v12330_v35, %v8293_v43  ;;  %v1997_v17 = vpop.xlane.xlu1 %1996  ;;  %v1518_v26 = vmul.f32 %v8832_v4, %v1512_v20 }
0x1163   :  { %12333 = vtanh.f32 %v8460_v63  ;;  %v2003_v35 = vmul.f32 %v8833_v53, %v1997_v17 }
0x1164   :  { %8545 = vmatmul.mubr.f32.vlgmr.msra.gmra.mrb[62].mxu0 %v8299_v23  ;;  %8616 = vmatmul.mubr.f32.vlgmr.msra.gmra.mrb[62].mxu1 %v8299_v23  ;;  %v8300_v56 = vmul.f32 %v15206_v16, %v8299_v23  ;;  %12335 = vtanh.f32 %v8462_v24  ;;  %v8836_v24 = vld [vmem:[%s15572_s8 + $0x4] ss:$0 sm:$0xff] }
0x1165   :  { %11861 = vmatpush1.bf16.msra.mxu0 %v16012_v48  ;;  %11893 = vmatpush1.bf16.msra.mxu1 %v16013_v30  ;;  %12337 = vtanh.f32 %v8461_v21  ;;  %v2482_v52 = vpop.xlane.xlu0 %2481 }
0x1166   :  { %8301 = vadd.xlane.f32.xlu1 %v8300_v56  ;;  %11863 = vmatprep.subr.bf16.mxu0 %v16014_v0  ;;  %v2488_v63 = vmul.f32 %v8834_v49, %v2482_v52  ;;  %v3452_v23 = vpop.xlane.xlu1 %3451  ;;  %v2004_v56 = vadd.f32 %v2003_v35, %v1518_v26 }
0x1167   :  { %11895 = vmatprep.subr.bf16.mxu1 %v16015_v36  ;;  %8686 = vmatprep.mubr.f32.mxu0 %v15908_v57 }
0x1168   :  { %8757 = vmatprep.mubr.f32.mxu1 %v15908_v57  ;;  %v2489_v21 = vadd.f32 %v2488_v63, %v2004_v56 }
0x1169   :  { %11865 = vmatpush1.bf16.msra.mxu0 %v16016_v62  ;;  %11897 = vmatpush1.bf16.msra.mxu1 %v16017_v8  ;;  %v2967_v33 = vpop.xlane.xlu0 %2966 }
0x116a   :  { %11867 = vmatprep.subr.bf16.mxu0 %v16018_v14  ;;  %11899 = vmatprep.subr.bf16.mxu1 %v16019_v51 }
0x116c   :  { %v12332_v47 = vpop.eup %12331 }
0x116d   :  { %v8467_v48 = vmul.f32 0.5, %v12332_v47  ;;  %11869 = vmatpush1.bf16.msra.mxu0 %v16020_v38  ;;  %11901 = vmatpush1.bf16.msra.mxu1 %v16095_v22  ;;  %v12334_v30 = vpop.eup %12333  ;;  %v17170_v22 = vld [vmem:[#allocation97_spill] sm:$0xff]  ;;  %v3937_v60 = vpop.xlane.xlu0 %3936  ;;  %v3458_v47 = vmul.f32 %v8836_v24, %v3452_v23 }
0x116e   :  { %11871 = vmatprep.subr.bf16.mxu0 %v16096_v40  ;;  %11903 = vmatprep.subr.bf16.mxu1 %v16023_v12  ;;  %v8468_v0 = vmul.f32 0.5, %v12334_v30  ;;  %v12336_v36 = vpop.eup %12335  ;;  %v17171_v40 = vld [vmem:[#allocation98_spill] sm:$0xff]  ;;  %v4422_v30 = vpop.xlane.xlu1 %4421 }
0x116f   :  { %v8471_v57 = vadd.f32 0.5, %v8467_v48  ;;  %v12338_v38 = vpop.eup %12337  ;;  %v8838_v48 = vld [vmem:[%s15572_s8 + $0x6] ss:$0 sm:$0xff] }
0x1170   :  { %v8472_v62 = vadd.f32 0.5, %v8468_v0  ;;  %v8469_v12 = vmul.f32 0.5, %v12338_v38  ;;  %v3943_v0 = vmul.f32 %v8837_v58, %v3937_v60 }
0x1171   :  { %v8476_v8 = vmul.f32 %v12336_v36, %v8471_v57  ;;  %11873 = vmatpush1.bf16.msra.mxu0 %v16024_v10  ;;  %11905 = vmatpush1.bf16.msra.mxu1 %v16025_v61  ;;  %v8839_v36 = vld [vmem:[%s15572_s8 + $0x7] ss:$0 sm:$0xff] }
0x1172   :  { %11875 = vmatprep.subr.bf16.mxu0 %v16097_v44  ;;  %11907 = vmatprep.subr.bf16.mxu1 %v16098_v54  ;;  %v8475_v14 = vmul.f32 %v8472_v62, %v15359_v3  ;;  %v8473_v10 = vadd.f32 0.5, %v8469_v12  ;;  %v4907_v62 = vpop.xlane.xlu0 %4906  ;;  %v5392_v38 = vpop.xlane.xlu1 %5391 }
0x1174   :  { %v8477_v51 = vadd.f32 %v8476_v8, %v8475_v14  ;;  %v4428_v14 = vmul.f32 %v8838_v48, %v4422_v30 }
0x1175   :  { %11877 = vmatpush1.bf16.msra.mxu0 %v16100_v31  ;;  %11909 = vmatpush1.bf16.msra.mxu1 %v16101_v2  ;;  %v17172_v31 = vld [vmem:[#allocation99_spill] sm:$0xff] }
0x1176   :  { %11879 = vmatprep.subr.bf16.mxu0 %v16102_v1  ;;  %11911 = vmatprep.subr.bf16.mxu1 %v16103_v32  ;;  %12339 = vtanh.f32 %v8477_v51  ;;  %v8840_v51 = vld [vmem:[%s15572_s8 + $0x8] ss:$0 sm:$0xff] }
0x1179   :  { %11881 = vmatpush1.bf16.msra.mxu0 %v16104_v25  ;;  %11913 = vmatpush1.bf16.msra.mxu1 %v16105_v5  ;;  %v17175_v25 = vld [vmem:[#allocation115_spill] sm:$0xff] }
0x117a   :  { %11883 = vmatprep.subr.bf16.mxu0 %v16106_v39  ;;  %11915 = vmatprep.subr.bf16.mxu1 %v16036_v7 }
0x117d   :  { %11885 = vmatpush1.bf16.msra.mxu0 %v16037_v6  ;;  %11917 = vmatpush1.bf16.msra.mxu1 %v16038_v27  ;;  %v17173_v27 = vld [vmem:[#allocation113_spill] sm:$0xff] }
0x117e   :  { %11887 = vmatprep.subr.bf16.mxu0 %v16039_v45  ;;  %11919 = vmatprep.subr.bf16.mxu1 %v16040_v18  ;;  %v17174_v45 = vld [vmem:[#allocation114_spill] sm:$0xff] }
0x1180   :  { %v12340_v61 = vpop.eup %12339 }
0x1181   :  { %11889 = vmatpush1.bf16.msra.mxu0 %v17170_v22  ;;  %11921 = vmatpush1.bf16.msra.mxu1 %v17171_v40  ;;  %v8479_v44 = vmul.f32 %v12340_v61, %v8473_v10  ;;  %v4913_v10 = vmul.f32 %v8839_v36, %v4907_v62  ;;  %v8841_v61 = vld [vmem:[%s15572_s8 + $0x9] ss:$0 sm:$0xff]  ;;  %v5877_v22 = vpop.xlane.xlu0 %5876 }
0x1184   :  { %8687 = vmatmul.mubr.f32.vlgmr.msra.gmra.mrb[62].mxu0 %v8479_v44  ;;  %8758 = vmatmul.mubr.f32.vlgmr.msra.gmra.mrb[62].mxu1 %v8479_v44  ;;  %v5398_v44 = vmul.f32 %v8840_v51, %v5392_v38 }
0x1257   :  { %v8688_v54 = vpop.f32.mrb[62].mxu0  ;;  %v8759_v7 = vpop.f32.mrb[62].mxu1 }
0x1258   :  { %v8764_v2 = vadd.f32 %v8688_v54, %v17172_v31  ;;  %v8690_v6 = vpop.f32.mrb[63].mxu0  ;;  %v8761_v1 = vpop.f32.mrb[63].mxu1  ;;  %v8766_v5 = vadd.f32 %v8759_v7, %v17175_v25  ;;  %v8842_v54 = vld [vmem:[%s15572_s8 + $0xa] ss:$0 sm:$0xff] }
0x1259   :  { %v8765_v32 = vadd.f32 %v8690_v6, %v17173_v27  ;;  %v8767_v18 = vadd.f32 %v8761_v1, %v17174_v45  ;;  %v6362_v7 = vpop.xlane.xlu1 %6361  ;;  %v8843_v6 = vld [vmem:[%s15572_s8 + $0xb] ss:$0 sm:$0xff]  ;;  %v6847_v1 = vpop.xlane.xlu0 %6846  ;;  %v8844_v45 = vld [vmem:[%s15572_s8 + $0xc] ss:$0 sm:$0xff] }
0x125a   :  { %12341 = vtanh.f32 %v8764_v2  ;;  %v5883_v2 = vmul.f32 %v8841_v61, %v5877_v22 }
0x125b   :  { %12343 = vtanh.f32 %v8765_v32  ;;  %v6368_v32 = vmul.f32 %v8842_v54, %v6362_v7 }
0x125c   :  { %12345 = vtanh.f32 %v8767_v18 }
0x125d   :  { %12347 = vtanh.f32 %v8766_v5  ;;  %v7332_v18 = vpop.xlane.xlu1 %7331  ;;  %v6853_v5 = vmul.f32 %v8843_v6, %v6847_v1 }
0x1264   :  { %v12342_v39 = vpop.eup %12341 }
0x1265   :  { %v8772_v3 = vmul.f32 0.5, %v12342_v39  ;;  %v12344_v46 = vpop.eup %12343  ;;  %v8845_v39 = vld [vmem:[%s15572_s8 + $0xd] ss:$0 sm:$0xff] }
0x1266   :  { %v8773_v34 = vmul.f32 0.5, %v12344_v46  ;;  %v12346_v59 = vpop.eup %12345 }
0x1267   :  { %v8776_v43 = vadd.f32 0.5, %v8772_v3  ;;  %v12348_v13 = vpop.eup %12347  ;;  %v7817_v3 = vpop.xlane.xlu0 %7816 }
0x1268   :  { %v8777_v9 = vadd.f32 0.5, %v8773_v34  ;;  %v8774_v19 = vmul.f32 0.5, %v12348_v13  ;;  %v8846_v34 = vld [vmem:[%s15572_s8 + $0xe] ss:$0 sm:$0xff] }
0x1269   :  { %v8781_v55 = vmul.f32 %v12346_v59, %v8776_v43  ;;  %v7338_v43 = vmul.f32 %v8844_v45, %v7332_v18  ;;  %v8302_v59 = vpop.xlane.xlu1 %8301 }
0x126a   :  { %v8780_v15 = vmul.f32 %v8777_v9, %v17176_v37  ;;  %v8778_v28 = vadd.f32 0.5, %v8774_v19 }
0x126c   :  { %v8782_v11 = vadd.f32 %v8781_v55, %v8780_v15  ;;  %v7823_v55 = vmul.f32 %v8845_v39, %v7817_v3  ;;  %v8308_v15 = vmul.f32 %v8846_v34, %v8302_v59 }
0x126e   :  { %12349 = vtanh.f32 %v8782_v11  ;;  %v8847_v11 = vld [vmem:[%s15572_s8 + $0xf] ss:$0 sm:$0xff] }
0x1278   :  { %v12350_v42 = vpop.eup %12349 }
0x1279   :  { %v8784_v29 = vmul.f32 %v12350_v42, %v8778_v28 }
0x127b   :  { %v8785_v50 = vmul.f32 %v15206_v16, %v8784_v29  ;;  %v8835_v16 = vld [vmem:[%s15572_s8 + $0x3] ss:$0 sm:$0xff]  ;;  %v8848_v29 = vld [vmem:[%s15573_s9] ss:$0 sm:$0xff] }
0x127c   :  { %v2973_v41 = vmul.f32 %v8835_v16, %v2967_v33 }
0x127d   :  { %8786 = vadd.xlane.f32.xlu0 %v8785_v50 }
0x127e   :  { %v2974_v57 = vadd.f32 %v2973_v41, %v2489_v21 }
0x1280   :  { %v3459_v8 = vadd.f32 %v3458_v47, %v2974_v57 }
0x1282   :  { %v3944_v12 = vadd.f32 %v3943_v0, %v3459_v8 }
0x1284   :  { %v4429_v40 = vadd.f32 %v4428_v14, %v3944_v12 }
0x1286   :  { %v4914_v31 = vadd.f32 %v4913_v10, %v4429_v40 }
0x1288   :  { %v5399_v27 = vadd.f32 %v5398_v44, %v4914_v31 }
0x128a   :  { %v5884_v25 = vadd.f32 %v5883_v2, %v5399_v27 }
0x128c   :  { %v6369_v46 = vadd.f32 %v6368_v32, %v5884_v25 }
0x128e   :  { %v6854_v9 = vadd.f32 %v6853_v5, %v6369_v46 }
0x1290   :  { %v7339_v37 = vadd.f32 %v7338_v43, %v6854_v9 }
0x1292   :  { %v7824_v13 = vadd.f32 %v7823_v55, %v7339_v37 }
0x1294   :  { %v8309_v28 = vadd.f32 %v8308_v15, %v7824_v13 }
0x130a   :  { %v8787_v19 = vpop.xlane.xlu0 %8786 }
0x130b   :  { %v8793_v42 = vmul.f32 %v8847_v11, %v8787_v19 }
0x130d   :  { %v8794_v50 = vadd.f32 %v8793_v42, %v8309_v28 }
0x130f   :  { %v8802_v20 = vadd.f32 %v8848_v29, %v8794_v50 }
0x1311   :  { %v8849_v53 = vmul.f32 -1.442695, %v8802_v20 }
0x1313   :  { %12351 = vpow2.f32 %v8849_v53 }
0x131d   :  { %v12352_v17 = vpop.eup %12351 }
0x131e   :  { %v8806_v52 = vadd.f32 1.0, %v12352_v17 }
0x1320   :  { %12353 = vrcp.f32 %v8806_v52 }
0x132a   :  { %v12354_v4 = vpop.eup %12353 }
0x132b   :  { %8809 = vst [vmem:[%s15574_s10] sm:$0xff] %v12354_v4 }

</bundles_post_ra>
